<compile_context>
chip_gen: v7x
topology: tpu7x:2x2x1
jax: 0.10.0
libtpu: 0.0.40
codegen_flags: <defaults>
</compile_context>

<pallas_src>
import functools

import jax
import jax.numpy as jnp
from jax.experimental import pallas as pl
from jax.experimental.pallas import tpu as pltpu

EMBED = 768
HEADS = 3
HEAD_DIM = EMBED // HEADS
MLP_RATIO = 1
LN_EPS = 1e-5

_VMEM = pltpu.MemorySpace.VMEM


def _is_v7_chip():
    try:
        kind = jax.devices()[0].device_kind.lower()
    except Exception:
        return False
    return ("v7" in kind) or ("tpu7" in kind)


# --------------------------------------------------------------------------
# Arcface linear:  out = x @ W + b   with K = 25088 reduced over fat K tiles
# --------------------------------------------------------------------------
def _arcface_kernel(x_ref, w_ref, b_ref, o_ref, acc_ref):
    k = pl.program_id(1)

    @pl.when(k == 0)
    def _():
        acc_ref[...] = jnp.zeros_like(acc_ref)

    w = w_ref[...]
    acc_ref[...] += jnp.dot(x_ref[...].astype(w.dtype), w,
                            preferred_element_type=jnp.float32)

    @pl.when(k == pl.num_programs(1) - 1)
    def _():
        o_ref[...] = (acc_ref[...] + b_ref[...]).astype(o_ref.dtype)


def arcface_linear(x, w, b):
    """x: (M, 25088) f32, w: (25088, 768) bf16, b: (1, 768) f32 -> (M, 768)."""
    M, K = x.shape
    Kw, N = w.shape
    assert K == Kw
    b2 = b.reshape(1, N)

    if _is_v7_chip():
        # One 384-wide output tile per TensorCore, 2 fat K steps each.
        nn, tk, vmem_budget = 2, 12544, 40 * 1024 * 1024
    else:
        # Single TensorCore: no point splitting N; 4 fat K steps of 768-wide.
        nn, tk, vmem_budget = 1, 6272, 32 * 1024 * 1024
    # Fallback for shapes where the tuned tiles don't divide cleanly.
    if K % tk != 0 or N % nn != 0 or (N // nn) % 128 != 0:
        nn, tk = 1, K
    nk = K // tk
    tn = N // nn

    return pl.pallas_call(
        _arcface_kernel,
        out_shape=jax.ShapeDtypeStruct((M, N), jnp.float32),
        grid_spec=pltpu.PrefetchScalarGridSpec(
            num_scalar_prefetch=0,
            grid=(nn, nk),
            in_specs=[
                pl.BlockSpec((M, tk), lambda n, k: (0, k)),
                pl.BlockSpec((tk, tn), lambda n, k: (k, n)),
                pl.BlockSpec((1, tn), lambda n, k: (0, n)),
            ],
            out_specs=pl.BlockSpec((M, tn), lambda n, k: (0, n)),
            scratch_shapes=[pltpu.VMEM((M, tn), jnp.float32)],
        ),
        compiler_params=pltpu.CompilerParams(
            dimension_semantics=("parallel", "arbitrary"),
            vmem_limit_bytes=vmem_budget),
    )(x, w, b2)


# --------------------------------------------------------------------------
# Fused kernel: clip projection + six tiny token projections + sequence
# assembly + mapper (1 pre-LN transformer block) + final LayerNorm
# --------------------------------------------------------------------------
def _ln(x, w, b):
    mu = jnp.mean(x, axis=-1, keepdims=True)
    var = jnp.mean(jnp.square(x - mu), axis=-1, keepdims=True)
    return (x - mu) * jax.lax.rsqrt(var + LN_EPS) * w + b


def _fused_assemble_mapper_kernel(
        n_valid, n_clip,
        arc_ref,
        gaze_ref, exp_ref, tex_ref, gamma_ref, ang_ref, trans_ref,
        gz_w, gz_b, ex_w, ex_b, tx_w, tx_b, gm_w, gm_b, an_w, an_b,
        tr_w, tr_b,
        obj_ref, clip_w, clip_b,
        ln1w, ln1b, wq, bq, wk, bk, wv, bv, wo, bo,
        ln2w, ln2b, w1, b1, w2, b2, lnfw, lnfb,
        o_ref):
    B = arc_ref.shape[0]
    D = EMBED
    S = ((n_valid + 7) // 8) * 8      # sublane-aligned padded sequence length

    def proj(x2d, w_ref, b_ref):
        w = w_ref[...]
        return jnp.dot(x2d.astype(w.dtype), w,
                       preferred_element_type=jnp.float32) + b_ref[...]

    # ---- build the token sequence in VMEM (replaces wrapper cat/pad) ----
    # order: [arcface, gaze, exp, tex, gamma, angles, translation, clip...]
    toks = [arc_ref[...][:, None, :]]
    for x_ref, w_ref, b_ref in ((gaze_ref, gz_w, gz_b),
                                (exp_ref, ex_w, ex_b),
                                (tex_ref, tx_w, tx_b),
                                (gamma_ref, gm_w, gm_b),
                                (ang_ref, an_w, an_b),
                                (trans_ref, tr_w, tr_b)):
        toks.append(proj(x_ref[...], w_ref, b_ref)[:, None, :])
    toks.append(proj(obj_ref[...], clip_w, clip_b).reshape(B, n_clip, D))
    if S > n_valid:
        toks.append(jnp.zeros((B, S - n_valid, D), jnp.float32))
    x = jnp.concatenate(toks, axis=1)                             # (B, S, D)

    # ---- self-attention (pre-LN) ----
    h = _ln(x, ln1w[...], ln1b[...]).reshape(B * S, D)
    q2d = proj(h, wq, bq)
    k2d = proj(h, wk, bk)
    v2d = proj(h, wv, bv)

    scale = HEAD_DIM ** -0.5
    wo_v = wo[...]
    key_ok = None
    if n_valid < S:                   # mask padded keys
        kidx = jax.lax.broadcasted_iota(jnp.int32, (B, S, S), 2)
        key_ok = kidx < n_valid

    y = jnp.zeros((B * S, D), jnp.float32)
    for hh in range(HEADS):
        lo = hh * HEAD_DIM
        qh = q2d[:, lo:lo + HEAD_DIM].reshape(B, S, HEAD_DIM)
        kh = k2d[:, lo:lo + HEAD_DIM].reshape(B, S, HEAD_DIM)
        vh = v2d[:, lo:lo + HEAD_DIM].reshape(B, S, HEAD_DIM)
        s = jnp.einsum('bqd,bkd->bqk', qh, kh,
                       preferred_element_type=jnp.float32) * scale
        if key_ok is not None:
            s = jnp.where(key_ok, s, -1e30)
        s = s - jnp.max(s, axis=-1, keepdims=True)
        pa = jnp.exp(s)
        pa = pa * pl.reciprocal(jnp.sum(pa, axis=-1, keepdims=True),
                                approx=True)
        ctx = jnp.einsum('bqk,bkd->bqd', pa, vh,
                         preferred_element_type=jnp.float32)
        # sum over heads of ctx_h @ W_o[row block h]  ==  concat(heads) @ W_o
        y = y + jnp.dot(ctx.reshape(B * S, HEAD_DIM).astype(wo_v.dtype),
                        wo_v[lo:lo + HEAD_DIM, :],
                        preferred_element_type=jnp.float32)
    x = x + (y + bo[...]).reshape(B, S, D)

    # ---- MLP (pre-LN) ----
    h2 = _ln(x, ln2w[...], ln2b[...]).reshape(B * S, D)
    m = proj(h2, w1, b1)
    m = jax.nn.gelu(m, approximate=True)
    m = proj(m, w2, b2).reshape(B, S, D)
    x = x + m

    # ---- module's final nn.LayerNorm(768); drop the padded rows ----
    o_ref[...] = _ln(x, lnfw[...], lnfb[...])[:, :n_valid, :].astype(
        o_ref.dtype)


def fused_assemble_and_map(p, arc_out, gaze, exp, tex, gamma, ang, trans,
                           obj2d, n_clip):
    B = arc_out.shape[0]
    n_valid = 7 + n_clip
    kernel = functools.partial(_fused_assemble_mapper_kernel, n_valid, n_clip)
    ins = (arc_out, gaze, exp, tex, gamma, ang, trans,
           p['gaze_w'], p['gaze_b'], p['exp_w'], p['exp_b'],
           p['tex_w'], p['tex_b'], p['gamma_w'], p['gamma_b'],
           p['ang_w'], p['ang_b'], p['trans_w'], p['trans_b'],
           obj2d, p['clip_w'], p['clip_b'],
           p['ln1_w'], p['ln1_b'],
           p['wq'], p['bq'], p['wk'], p['bk'], p['wv'], p['bv'],
           p['wo'], p['bo'], p['ln2_w'], p['ln2_b'],
           p['w1'], p['b1'], p['w2'], p['b2'],
           p['lnf_w'], p['lnf_b'])
    return pl.pallas_call(
        kernel,
        out_shape=jax.ShapeDtypeStruct((B, n_valid, EMBED), jnp.float32),
        in_specs=[pl.BlockSpec(memory_space=_VMEM)] * len(ins),
        out_specs=pl.BlockSpec(memory_space=_VMEM),
        # ~8.5 MiB of bf16 weights + small activations; 40 MiB is safe on all
        # generations (v7x physical VMEM per TC is 64 MiB).
        compiler_params=pltpu.CompilerParams(
            vmem_limit_bytes=40 * 1024 * 1024),
    )(*ins)


# --------------------------------------------------------------------------
# Parameter construction (deterministic, synthetic) and forward glue
# --------------------------------------------------------------------------
def init_params(key):
    def lin(k, fan_in, fan_out, dtype=jnp.float32):
        kw, kb = jax.random.split(k)
        w = (jax.random.normal(kw, (fan_in, fan_out), jnp.float32) * 0.02
             ).astype(dtype)
        b = jax.random.normal(kb, (1, fan_out), jnp.float32) * 0.02
        return w, b

    keys = jax.random.split(key, 16)
    p = {}
    # bf16 storage for all projection weights (f32 accumulation on the MXU).
    p['clip_w'], p['clip_b'] = lin(keys[0], 1024, EMBED, jnp.bfloat16)
    p['arc_w'], p['arc_b'] = lin(keys[1], 25088, EMBED, jnp.bfloat16)
    p['gaze_w'], p['gaze_b'] = lin(keys[2], 4, EMBED, jnp.bfloat16)
    p['exp_w'], p['exp_b'] = lin(keys[3], 64, EMBED, jnp.bfloat16)
    p['tex_w'], p['tex_b'] = lin(keys[4], 80, EMBED, jnp.bfloat16)
    p['gamma_w'], p['gamma_b'] = lin(keys[5], 27, EMBED, jnp.bfloat16)
    p['ang_w'], p['ang_b'] = lin(keys[6], 3, EMBED, jnp.bfloat16)
    p['trans_w'], p['trans_b'] = lin(keys[7], 3, EMBED, jnp.bfloat16)
    # mapper = Transformer(1, 768, 3, 1): 1 pre-LN block, 3 heads, mlp_ratio 1
    p['wq'], p['bq'] = lin(keys[8], EMBED, EMBED, jnp.bfloat16)
    p['wk'], p['bk'] = lin(keys[9], EMBED, EMBED, jnp.bfloat16)
    p['wv'], p['bv'] = lin(keys[10], EMBED, EMBED, jnp.bfloat16)
    p['wo'], p['bo'] = lin(keys[11], EMBED, EMBED, jnp.bfloat16)
    p['w1'], p['b1'] = lin(keys[12], EMBED, EMBED * MLP_RATIO, jnp.bfloat16)
    p['w2'], p['b2'] = lin(keys[13], EMBED * MLP_RATIO, EMBED, jnp.bfloat16)
    ones = jnp.ones((1, EMBED), jnp.float32)
    zeros = jnp.zeros((1, EMBED), jnp.float32)
    p['ln1_w'], p['ln1_b'] = ones, zeros
    p['ln2_w'], p['ln2_b'] = ones, zeros
    p['lnf_w'], p['lnf_b'] = ones, zeros
    return p


def mimaface_postfuse_forward(p, object_embeds, arcface_embeds, gaze_embeds,
                              exp_embeds, tex_embeds, gamma_embeds,
                              angles_embeds, translation_embeds):
    obj = jnp.squeeze(object_embeds, axis=0)                 # (B, N, 1024)
    B, N, Kclip = obj.shape

    arc = arcface_linear(arcface_embeds, p['arc_w'], p['arc_b'])   # (B, 768)

    # Clip projection, six tiny projections, sequence assembly, mapper and
    # final LayerNorm all happen inside one fused kernel.
    return fused_assemble_and_map(p, arc, gaze_embeds, exp_embeds, tex_embeds,
                                  gamma_embeds, angles_embeds,
                                  translation_embeds,
                                  obj.reshape(B * N, Kclip), N)


if __name__ == "__main__":
    key = jax.random.PRNGKey(0)
    kp, *kin = jax.random.split(key, 10)
    params = init_params(kp)

    B, N = 2, 8
    object_embeds = jax.random.normal(kin[0], (1, B, N, 1024), jnp.float32)
    arcface_embeds = jax.random.normal(kin[1], (B, 25088), jnp.float32)
    gaze_embeds = jax.random.normal(kin[2], (B, 4), jnp.float32)
    exp_embeds = jax.random.normal(kin[3], (B, 64), jnp.float32)
    tex_embeds = jax.random.normal(kin[4], (B, 80), jnp.float32)
    gamma_embeds = jax.random.normal(kin[5], (B, 27), jnp.float32)
    angles_embeds = jax.random.normal(kin[6], (B, 3), jnp.float32)
    translation_embeds = jax.random.normal(kin[7], (B, 3), jnp.float32)

    out = mimaface_postfuse_forward(params, object_embeds, arcface_embeds,
                                    gaze_embeds, exp_embeds, tex_embeds,
                                    gamma_embeds, angles_embeds,
                                    translation_embeds)
    out = jax.block_until_ready(out)
    assert out.shape == (B, N + 7, EMBED), out.shape
    assert bool(jnp.all(jnp.isfinite(out))), "non-finite output"
    print("KERNEL_OK")
</pallas_src>

<mosaic_0001>
module attributes {stable_mosaic.version = 11 : i64} {
  func.func @_arcface_kernel(%arg0: i32, %arg1: i32, %arg2: memref<2x6272xf32, #tpu.memory_space<vmem>>, %arg3: memref<6272x768xbf16, #tpu.memory_space<vmem>>, %arg4: memref<1x768xf32, #tpu.memory_space<vmem>>, %arg5: memref<2x768xf32, #tpu.memory_space<vmem>>, %arg6: memref<2x768xf32, #tpu.memory_space<vmem>>) attributes {dimension_semantics = [#tpu.dimension_semantics<parallel>, #tpu.dimension_semantics<arbitrary>], iteration_bounds = array<i64: 1, 4>, scalar_prefetch = 0 : i64, scratch_operands = 1 : i64, tpu.core_type = #tpu.core_type<tc>, window_params = [{transform_indices = @transform_0, window_bounds = array<i64: 2, 6272>}, {transform_indices = @transform_1, window_bounds = array<i64: 6272, 768>}, {transform_indices = @transform_2, window_bounds = array<i64: 1, 768>}, {transform_indices = @transform_3, window_bounds = array<i64: 2, 768>}]} {
    %c0_i32 = arith.constant 0 : i32
    %0 = arith.cmpi eq, %arg1, %c0_i32 : i32
    %1 = arith.extui %0 : i1 to i32
    %c0_i32_0 = arith.constant 0 : i32
    %2 = arith.cmpi ne, %1, %c0_i32_0 : i32
    scf.if %2 {
      %cst_9 = arith.constant 0.000000e+00 : f32
      %13 = vector.broadcast %cst_9 : f32 to vector<2x768xf32>
      %c0_10 = arith.constant 0 : index
      %c0_11 = arith.constant 0 : index
      %14 = vector.load %arg6[%c0_10, %c0_11] : memref<2x768xf32, #tpu.memory_space<vmem>>, vector<2x768xf32>
      tpu.vector_store %arg6[%c0_10, %c0_11], %13 {strides = array<i32>} : memref<2x768xf32, #tpu.memory_space<vmem>>, vector<2x768xf32>,
    } else {
    }
    %c0 = arith.constant 0 : index
    %c0_1 = arith.constant 0 : index
    %3 = vector.load %arg3[%c0, %c0_1] : memref<6272x768xbf16, #tpu.memory_space<vmem>>, vector<6272x768xbf16>
    %c0_2 = arith.constant 0 : index
    %c0_3 = arith.constant 0 : index
    %4 = vector.load %arg6[%c0_2, %c0_3] : memref<2x768xf32, #tpu.memory_space<vmem>>, vector<2x768xf32>
    %c0_4 = arith.constant 0 : index
    %c0_5 = arith.constant 0 : index
    %5 = vector.load %arg2[%c0_4, %c0_5] : memref<2x6272xf32, #tpu.memory_space<vmem>>, vector<2x6272xf32>
    %6 = arith.truncf %5 : vector<2x6272xf32> to vector<2x6272xbf16>
    %cst = arith.constant dense<0.000000e+00> : vector<2x768xf32>
    %7 = tpu.matmul %6, %3, %cst {dimension_numbers = #tpu.dot_dimension_numbers<[1], [0], [0], [1], [0, 0, 1, 1], [], []>} : vector<2x6272xbf16>, vector<6272x768xbf16>, vector<2x768xf32> -> vector<2x768xf32>
    %8 = arith.addf %4, %7 : vector<2x768xf32>
    %c0_6 = arith.constant 0 : index
    %c0_7 = arith.constant 0 : index
    %9 = vector.load %arg6[%c0_6, %c0_7] : memref<2x768xf32, #tpu.memory_space<vmem>>, vector<2x768xf32>
    tpu.vector_store %arg6[%c0_6, %c0_7], %8 {strides = array<i32>} : memref<2x768xf32, #tpu.memory_space<vmem>>, vector<2x768xf32>,
    %c3_i32 = arith.constant 3 : i32
    %10 = arith.cmpi eq, %arg1, %c3_i32 : i32
    %11 = arith.extui %10 : i1 to i32
    %c0_i32_8 = arith.constant 0 : i32
    %12 = arith.cmpi ne, %11, %c0_i32_8 : i32
    scf.if %12 {
      %c0_9 = arith.constant 0 : index
      %c0_10 = arith.constant 0 : index
      %13 = vector.load %arg6[%c0_9, %c0_10] : memref<2x768xf32, #tpu.memory_space<vmem>>, vector<2x768xf32>
      %c0_11 = arith.constant 0 : index
      %c0_12 = arith.constant 0 : index
      %14 = vector.load %arg4[%c0_11, %c0_12] : memref<1x768xf32, #tpu.memory_space<vmem>>, vector<1x768xf32>
      %15 = vector.broadcast %14 : vector<1x768xf32> to vector<2x768xf32>
      %16 = arith.addf %13, %15 : vector<2x768xf32>
      %c0_13 = arith.constant 0 : index
      %c0_14 = arith.constant 0 : index
      %17 = vector.load %arg5[%c0_13, %c0_14] : memref<2x768xf32, #tpu.memory_space<vmem>>, vector<2x768xf32>
      tpu.vector_store %arg5[%c0_13, %c0_14], %16 {strides = array<i32>} : memref<2x768xf32, #tpu.memory_space<vmem>>, vector<2x768xf32>,
    } else {
    }
    return
  }
  func.func @transform_0(%arg0: i32, %arg1: i32) -> (i32, i32) {
    %c0_i32 = arith.constant 0 : i32
    %c0_i32_0 = arith.constant 0 : i32
    return %c0_i32, %arg1 : i32, i32
  }
  func.func @transform_1(%arg0: i32, %arg1: i32) -> (i32, i32) {
    %c0_i32 = arith.constant 0 : i32
    return %arg1, %arg0 : i32, i32
  }
  func.func @transform_2(%arg0: i32, %arg1: i32) -> (i32, i32) {
    %c0_i32 = arith.constant 0 : i32
    %c0_i32_0 = arith.constant 0 : i32
    return %c0_i32, %arg0 : i32, i32
  }
  func.func @transform_3(%arg0: i32, %arg1: i32) -> (i32, i32) {
    %c0_i32 = arith.constant 0 : i32
    %c0_i32_0 = arith.constant 0 : i32
    return %c0_i32, %arg0 : i32, i32
  }
}

</mosaic_0001>

<bundles_post_ra>
// kernel: tpu_custom_call.1
= control target key start
LH: loop header
LB: loop body
LE: loop exit
PB: predicated region body
PF: predicated region fallthrough
CT: control target
= control target key end

     0   :  { %8 = vsyncpa [#allocation4], 0  ;;  %s27586_s0 = inlined_call_operand.hbm [shape: f32[2,25088], index: 0, kind: input, shape index: {}]   ;;  %s27587_s1 = inlined_call_operand.hbm [shape: bf16[25088,768], index: 1, kind: input, shape index: {}]   ;;  %s27588_s2 = inlined_call_operand.hbm [shape: f32[1,768], index: 2, kind: input, shape index: {}]   ;;  %s27589_s3 = inlined_call_operand.hbm [shape: f32[2,768], index: 3, kind: output, shape index: {}]  }
   0x1   :  { %10 = vsyncpa [#allocation4 + $0x1], 0 }
   0x2   :  { %11 = vsyncpa [#allocation7], 0 }
   0x3   :  { %13 = vsyncpa [#allocation7 + $0x1], 0 }
   0x4   :  { %14 = vsyncpa [#allocation5], 0  ;;  %s24491_s12 = smov 0   ;;  %s24493_s13 = smov 0  }
   0x5   :  { %s24495_s14 = smov 0   ;;  %s24497_s15 = smov 0  }
   0x6   :  { %s24499_s16 = smov 0   ;;  %s24501_s17 = smov 0  }
   0x7 LB: > { %s24520_s18 = sadd.s32 4294967295, %s24460_s17   ;;  %s39_s19 = sadd.s32 1, %s24448_s14  ;;  %s24460_s17 = sphi %s24501_s17, %s20_s17   ;;  %s24456_s16 = sphi %s24499_s16, %s27610_s16   ;;  %s24452_s15 = sphi %s24497_s15, %s27609_s15   ;;  %s24448_s14 = sphi %s24495_s14, %s27608_s14   ;;  %s24444_s13 = sphi %s24493_s13, %s27607_s13   ;;  %s24440_s12 = sphi %s24491_s12, %s27606_s12  }
   0x8   : > { %p46_p0 = scmp.ne.s32.totalorder %s24448_s14, %s24444_s13  ;;  %p52_p1 = scmp.ne.s32.totalorder %s24444_s13, %s24440_s12 }
   0x9   : > { %p27590_p2 = scmp.eq.s32.totalorder %s24520_s18, 0  ;;  %p18002_p3 = scmp.ge.s32.totalorder %s24460_s17, 1 }
   0xa   : > { %p143_p4 = scmp.lt.s32.totalorder %s24460_s17, 5  ;;  %s24462_s22 = smov [#allocation8]  }
   0xb   : > { %p24531_p5 = por %p27590_p2, %p52_p1  ;;  %s159_s23 = sshll.u32 %s24462_s22, 4  ;;  %s160_s23 = int_to_ptr.vmem [resolvable:$true] %s159_s23 }
   0xc   : > { %p24535_p6 = pnand %p18002_p3, %p143_p4  ;;  %p47_p8 = scmp.eq.s32.totalorder %s24460_s17, 0 }
   0xd   : > { %s27593_s20 = scalar_select %p24531_p5, 1, 0 }
   0xe   : > { %s27594_s21 = scalar_select %p24535_p6, 1, 0 }
   0xf   : > { %p20672_p7 = pneg %p24535_p6  ;;  %s29_s25 = sadd.s32 1, %s24456_s16 }
  0x10   : > { %p24549_p10 = scmp.ge.s32.totalorder %s29_s25, 4  ;;  %p24556_p11 = por %p47_p8, %p46_p0 }
  0x11   : > { %p24544_p9 = pnand %p20672_p7, %p27590_p2  ;;  %s24284_s30 = scalar_lea.hbm %s27588_s2, 96 }
  0x12   : > { %s27596_s26 = scalar_select %p24549_p10, 1, 0 }
  0x13   : > { %s27597_s27 = scalar_select %p24556_p11, 1, 0 }
  0x14   : > { %p24285_p13 = scmp.ne.s32.totalorder %s27588_s2, %s24284_s30  ;;  %p24286_p1 = pneg %p24544_p9 }
  0x15   : > { %p24291_p0 = scmp.lt.u32.totalorder %s24284_s30, %s27588_s2 }
  0x16   : > { %p24287_p3 = pnand %p24286_p1, %p24285_p13 }
  0x18   : > { %p24288_p4 = pneg %p24287_p3 }
  0x1a   : > { %p24293_p7 = pnand %p24291_p0, %p24288_p4 }
  0x1c   : > { %24296 = shalt.err (!%p24293_p7)
}
  0x1d   : > { %s24297_s8 = scalar_lea.vmem %s160_s23, 96  ;;  %p24305_p5 = scmp.lt.s32.totalorder %s160_s23, %s160_s23 }
  0x1e   : > { %p24298_p8 = scmp.ne.s32.totalorder %s160_s23, %s24297_s8  ;;  %p24306_p6 = scmp.lt.s32.totalorder %s24297_s8, %s24297_s8 }
  0x20   : > { %p24300_p2 = pnand %p24298_p8, %p24286_p1  ;;  %p24307_p11 = por %p24306_p6, %p24305_p5 }
  0x22   : > { %p24301_p12 = pneg %p24300_p2 }
  0x24   : > { %p24308_p10 = pnand %p24307_p11, %p24301_p12 }
  0x26   : > { %24311 = shalt.err (!%p24308_p10)
}
  0x27   : > { %20675 = dma.hbm_to_vmem [thread:$0]  (!%p24544_p9), %s27588_s2, 96, %s160_s23, [#allocation7]  }
  0x28   : > { %p27598_p2 = scmp.ne.s32.totalorder %s27596_s26, 0  ;;  %s24582_s11 = sand.u32 1, %s24448_s14  }
  0x29   : > { %s20368_s12 = smul.u32 1568, %s24456_s16  ;;  %p27599_p6 = scmp.ne.s32.totalorder %s27597_s27, 0 }
  0x2a   : > { %s27612_s25 = smov (%p27598_p2, %s29_s25), 0  ;;  %s20655_s24 = smul.u32 98, %s24582_s11 }
  0x2b   : > { %s36_s22 = ssub.s32 %s24456_s16, %s27612_s25  ;;  %s24591_s30 = scalar_lea.hbm %s27586_s0, %s20368_s12 }
  0x2c   : > { %p37_p5 = scmp.eq.s32.totalorder %s36_s22, 0  ;;  %p27600_p9 = scmp.lt.s32.totalorder %s24460_s17, 4 }
  0x2d   : > { %s174_s4 = scalar_lea.vmem [#allocation3], %s20655_s24  ;;  %s20656_s6 = smul.u32 18816, %s24582_s11 }
  0x2e   : > { %p24597_p10 = pnand %p27600_p9, %p27599_p6  ;;  %s182_s5 = sshll.u32 %s174_s4, 4  ;;  %s24607_s5 = int_to_ptr.vmem [resolvable:$true] %s182_s5 }
  0x2f   : > { %s24604_s26 = scalar_select %p37_p5, %s24448_s14, %s39_s19  }
  0x30   : > { %s171_s27 = scalar_lea.sflag [#allocation4], %s24582_s11  ;;  %s24312_s7 = scalar_lea.hbm %s24591_s30, 1568 }
  0x31   : > { %p24313_p11 = scmp.ne.s32.totalorder %s24591_s30, %s24312_s7  ;;  %p24314_p12 = pneg %p24597_p10 }
  0x32   : > { %s24317_s10 = scalar_lea.hbm %s27586_s0, 6272  ;;  %p24318_p3 = scmp.lt.u32.totalorder %s24591_s30, %s27586_s0 }
  0x33   : > { %p24315_p13 = pnand %p24314_p12, %p24313_p11  ;;  %p24319_p4 = scmp.lt.u32.totalorder %s24317_s10, %s24312_s7 }
  0x34   : > { %p24321_p7 = scmp.lt.u32.totalorder %s24312_s7, %s24591_s30 }
  0x35   : > { %p24316_p1 = pneg %p24315_p13  ;;  %p24320_p0 = por %p24319_p4, %p24318_p3 }
  0x37   : > { %p24322_p8 = por %p24321_p7, %p24320_p0 }
  0x39   : > { %p24323_p2 = pnand %p24322_p8, %p24316_p1 }
  0x3b   : > { %24326 = shalt.err (!%p24323_p2)
}
  0x3c   : > { %s24327_s22 = scalar_lea.vmem %s24607_s5, 1568  ;;  %s24463_s24 = smov [#allocation3]  }
  0x3d   : > { %p24328_p5 = scmp.ne.s32.totalorder %s24607_s5, %s24327_s22  ;;  %s24332_s28 = sshll.u32 %s24463_s24, 4  ;;  %s24333_s28 = int_to_ptr.vmem [resolvable:$false] %s24332_s28 }
  0x3e   : > { %s24334_s29 = scalar_lea.vmem %s24333_s28, 3136  ;;  %p24335_p11 = scmp.lt.s32.totalorder %s24607_s5, %s24333_s28 }
  0x3f   : > { %p24330_p6 = pnand %p24328_p5, %p24314_p12  ;;  %p24336_p13 = scmp.lt.s32.totalorder %s24334_s29, %s24327_s22 }
  0x41   : > { %p24331_p9 = pneg %p24330_p6  ;;  %p24337_p3 = por %p24336_p13, %p24335_p11 }
  0x43   : > { %p24338_p4 = pnand %p24337_p3, %p24331_p9 }
  0x45   : > { %24341 = shalt.err (!%p24338_p4)
}
  0x46   : > { %20679 = dma.hbm_to_vmem [thread:$0]  (!%p24597_p10), %s24591_s30, 1568, %s24607_s5, %s171_s27  }
  0x47   : > { %s189_s4 = sand.u32 1, %s24460_s17   ;;  %s193_s7 = scalar_lea.vmem [#allocation6], %s20656_s6 }
  0x48   : > { %s203_s8 = sshll.u32 %s193_s7, 4  ;;  %s20685_s9 = smul.u32 301056, %s24456_s16  ;;  %s24638_s8 = int_to_ptr.vmem [resolvable:$true] %s203_s8 }
  0x49   : > { %s24646_s22 = scalar_lea.sflag [#allocation7], %s189_s4  ;;  %s24347_s5 = scalar_lea.hbm %s27587_s1, 1204224 }
  0x4a   : > { %s24644_s12 = scalar_lea.hbm %s27587_s1, %s20685_s9 }
  0x4b   : > { %s24342_s24 = scalar_lea.hbm %s24644_s12, 301056  ;;  %p24348_p8 = scmp.lt.u32.totalorder %s24644_s12, %s27587_s1 }
  0x4c   : > { %p24343_p1 = scmp.ne.s32.totalorder %s24644_s12, %s24342_s24  ;;  %p24349_p2 = scmp.lt.u32.totalorder %s24347_s5, %s24342_s24 }
  0x4d   : > { %p24351_p6 = scmp.lt.u32.totalorder %s24342_s24, %s24644_s12 }
  0x4e   : > { %p24345_p0 = pnand %p24343_p1, %p24314_p12  ;;  %p24350_p5 = por %p24349_p2, %p24348_p8 }
  0x50   : > { %p24346_p7 = pneg %p24345_p0  ;;  %p24352_p9 = por %p24351_p6, %p24350_p5 }
  0x52   : > { %p24353_p11 = pnand %p24352_p9, %p24346_p7 }
  0x54   : > { %24356 = shalt.err (!%p24353_p11)
}
  0x55   : > { %s24357_s28 = scalar_lea.vmem %s24638_s8, 301056  ;;  %s24464_s29 = smov [#allocation6]  }
  0x56   : > { %p24358_p13 = scmp.ne.s32.totalorder %s24638_s8, %s24357_s28  ;;  %s24362_s4 = sshll.u32 %s24464_s29, 4  ;;  %s24363_s4 = int_to_ptr.vmem [resolvable:$false] %s24362_s4 }
  0x57   : > { %s24364_s7 = scalar_lea.vmem %s24363_s4, 602112  ;;  %p24365_p1 = scmp.lt.s32.totalorder %s24638_s8, %s24363_s4 }
  0x58   : > { %p24360_p3 = pnand %p24358_p13, %p24314_p12  ;;  %p24366_p0 = scmp.lt.s32.totalorder %s24364_s7, %s24357_s28 }
  0x5a   : > { %p24361_p4 = pneg %p24360_p3  ;;  %p24367_p8 = por %p24366_p0, %p24365_p1 }
  0x5c   : > { %p24368_p2 = pnand %p24367_p8, %p24361_p4 }
  0x5e   : > { %24371 = shalt.err (!%p24368_p2)
}
  0x5f   : > { %s24465_s9 = smov 384   ;;  %s24466_s10 = smov 24  }
  0x60   : > { %20682 = dma.hbm_to_vmem [thread:$0]  (!%p24597_p10), %s24644_s12, 301056, %s24638_s8, %s24646_s22, %s24465_s9, %s24465_s9, %s24466_s10  }
  0x61   : > { %p27602_p12 = scmp.ne.s32.totalorder %s27594_s21, 0 }
  0x62   : > { %s217_s19 = sand.u32 (!%p27602_p12), 1, %s24444_s13   ;;  %p27603_p7 = scmp.ne.s32.totalorder (!%p27602_p12), %s27593_s20, 0 }
  0x63   : > { %215 = sbr.rel (%p27602_p12) target bundleno = 2748 (0xabc), region = 32  ;;  %s218_s11 = scalar_lea.sflag (!%p27602_p12), [#allocation4], %s217_s19 }
  0x64   : > { %s20658_s24 = smul.u32 (!%p27602_p12), 98, %s217_s19 }
  0x66   : > { %s24675_s30 = scalar_lea.vmem (!%p27602_p12), [#allocation3], %s20658_s24 }
  0x6a   : > { %24423 = dma.done.wait (%p27603_p7), %s218_s11, 1568  }
  0x6b   : > { %24425 = vsyncadd (%p27603_p7), %s218_s11, 4294965728  ;;  %s226_s5 = sand.u32 1, %s24520_s18   ;;  %s20659_s23 = smul.u32 18816, %s217_s19 }
  0x6c   : > { %s227_s8 = scalar_lea.sflag [#allocation7], %s226_s5 }
  0x6d   : > { %s24682_s12 = scalar_lea.vmem [#allocation6], %s20659_s23 }
  0x6e   : > { %24427 = dma.done.wait (%p27603_p7), %s227_s8, 301056  }
  0x6f   : > { %24429 = vsyncadd (%p27603_p7), %s227_s8, 4294666240  ;;  %p27604_p10 = scmp.eq.s32.totalorder %s24520_s18, 0 }
  0x71   : > { %24431 = dma.done.wait (%p27604_p10), [#allocation7], 96   ;;  %p27605_p5 = pmov %p27604_p10 }
  0x72   : > { %p18009_p6 = scmp.ne.s32.totalorder %s24452_s15, 0 }
  0x73   : > { %24433 = vsyncadd (%p27605_p5), [#allocation7], 4294967200  ;;  %v24467_v0 = vmov (!%p18009_p6), 0.0  }
  0x74   : > { %266 = sbr.rel (%p18009_p6) target bundleno = 123 (0x7b), region = 48  ;;  %267 = vst [vmem:[#allocation2] sm:$0xff] (!%p18009_p6), %v24467_v0  ;;  %268 = vst [vmem:[#allocation2 + $0x8] sm:$0xf] (!%p18009_p6), %v24467_v0 }
  0x7b PF: > { %v20744_v1 = vld [vmem:[%s24682_s12 + $0x4] ss:$24 sps:$4 sm:$0xff]   ;;  %v20748_v3 = vld [vmem:[%s24682_s12] ss:$24 sps:$4 sm:$0xff]   ;;  %v20750_v5 = vld [vmem:[%s24682_s12 + $0x34] ss:$24 sps:$4 sm:$0xff]   ;;  %v2653_v39 = vlaneseq }
  0x7c   : > { %v20746_v2 = vld [vmem:[%s24682_s12 + $0x2404] ss:$24 sps:$4 sm:$0xff]   ;;  %14718 = vmatprep.subr.bf16.mxu1 %v20744_v1  ;;  %v20749_v4 = vld [vmem:[%s24682_s12 + $0x2400] ss:$24 sps:$4 sm:$0xff]   ;;  %v20752_v6 = vld [vmem:[%s24682_s12 + $0x2434] ss:$24 sps:$4 sm:$0xff]  }
  0x7d   : > { %15210 = vmatprep.subr.bf16.mxu0 %v20746_v2  ;;  %14719 = vmatpush1.bf16.msra.mxu1 %v20748_v3  ;;  %v20754_v7 = vld [vmem:[%s24682_s12 + $0x30] ss:$24 sps:$4 sm:$0xff]   ;;  %v20756_v9 = vld [vmem:[%s24682_s12 + $0x64] ss:$24 sps:$4 sm:$0xff]   ;;  %v20760_v11 = vld [vmem:[%s24682_s12 + $0x60] ss:$24 sps:$4 sm:$0xff]  }
  0x7e   : > { %15211 = vmatpush1.bf16.msra.mxu0 %v20749_v4  ;;  %14720 = vmatprep.subr.bf16.mxu1 %v20750_v5  ;;  %v20755_v8 = vld [vmem:[%s24682_s12 + $0x2430] ss:$24 sps:$4 sm:$0xff]   ;;  %v20758_v10 = vld [vmem:[%s24682_s12 + $0x2464] ss:$24 sps:$4 sm:$0xff]   ;;  %v20761_v12 = vld [vmem:[%s24682_s12 + $0x2460] ss:$24 sps:$4 sm:$0xff]  }
  0x7f   : > { %15212 = vmatprep.subr.bf16.mxu0 %v20752_v6  ;;  %v20762_v13 = vld [vmem:[%s24682_s12 + $0x94] ss:$24 sps:$4 sm:$0xff]   ;;  %v20766_v15 = vld [vmem:[%s24682_s12 + $0x90] ss:$24 sps:$4 sm:$0xff]   ;;  %v20768_v17 = vld [vmem:[%s24682_s12 + $0xc4] ss:$24 sps:$4 sm:$0xff]  }
  0x80   : > { %v20764_v14 = vld [vmem:[%s24682_s12 + $0x2494] ss:$24 sps:$4 sm:$0xff]   ;;  %v20767_v16 = vld [vmem:[%s24682_s12 + $0x2490] ss:$24 sps:$4 sm:$0xff]   ;;  %v20770_v18 = vld [vmem:[%s24682_s12 + $0x24c4] ss:$24 sps:$4 sm:$0xff]  }
  0x81   : > { %14721 = vmatpush1.bf16.msra.mxu1 %v20754_v7  ;;  %v20772_v19 = vld [vmem:[%s24682_s12 + $0xc0] ss:$24 sps:$4 sm:$0xff]   ;;  %v20774_v21 = vld [vmem:[%s24682_s12 + $0xf4] ss:$24 sps:$4 sm:$0xff]   ;;  %v20778_v23 = vld [vmem:[%s24682_s12 + $0xf0] ss:$24 sps:$4 sm:$0xff]  }
  0x82   : > { %15213 = vmatpush1.bf16.msra.mxu0 %v20755_v8  ;;  %14722 = vmatprep.subr.bf16.mxu1 %v20756_v9  ;;  %v20773_v20 = vld [vmem:[%s24682_s12 + $0x24c0] ss:$24 sps:$4 sm:$0xff]   ;;  %v20776_v22 = vld [vmem:[%s24682_s12 + $0x24f4] ss:$24 sps:$4 sm:$0xff]   ;;  %v20779_v24 = vld [vmem:[%s24682_s12 + $0x24f0] ss:$24 sps:$4 sm:$0xff]  }
  0x83   : > { %15214 = vmatprep.subr.bf16.mxu0 %v20758_v10  ;;  %v20780_v25 = vld [vmem:[%s24682_s12 + $0x124] ss:$24 sps:$4 sm:$0xff]   ;;  %v20784_v27 = vld [vmem:[%s24682_s12 + $0x120] ss:$24 sps:$4 sm:$0xff]   ;;  %v20786_v29 = vld [vmem:[%s24682_s12 + $0x154] ss:$24 sps:$4 sm:$0xff]  }
  0x84   : > { %v20782_v26 = vld [vmem:[%s24682_s12 + $0x2524] ss:$24 sps:$4 sm:$0xff]   ;;  %v20785_v28 = vld [vmem:[%s24682_s12 + $0x2520] ss:$24 sps:$4 sm:$0xff]   ;;  %v20788_v30 = vld [vmem:[%s24682_s12 + $0x2554] ss:$24 sps:$4 sm:$0xff]  }
  0x85   : > { %14723 = vmatpush1.bf16.msra.mxu1 %v20760_v11  ;;  %v20790_v31 = vld [vmem:[%s24682_s12 + $0x150] ss:$24 sps:$4 sm:$0xff]   ;;  %v20792_v33 = vld [vmem:[%s24682_s12 + $0x184] ss:$24 sps:$4 sm:$0xff]   ;;  %v20796_v35 = vld [vmem:[%s24682_s12 + $0x180] ss:$24 sps:$4 sm:$0xff]  }
  0x86   : > { %15215 = vmatpush1.bf16.msra.mxu0 %v20761_v12  ;;  %14724 = vmatprep.subr.bf16.mxu1 %v20762_v13  ;;  %v20791_v32 = vld [vmem:[%s24682_s12 + $0x2550] ss:$24 sps:$4 sm:$0xff]   ;;  %v20794_v34 = vld [vmem:[%s24682_s12 + $0x2584] ss:$24 sps:$4 sm:$0xff]   ;;  %v20797_v36 = vld [vmem:[%s24682_s12 + $0x2580] ss:$24 sps:$4 sm:$0xff]  }
  0x87   : > { %15216 = vmatprep.subr.bf16.mxu0 %v20764_v14  ;;  %v24468_v37 = vmov 1983009808   ;;  %v20798_v40 = vld [vmem:[%s24682_s12 + $0x1b4] ss:$24 sps:$4 sm:$0xff]   ;;  %v20802_v42 = vld [vmem:[%s24682_s12 + $0x1b0] ss:$24 sps:$4 sm:$0xff]  }
  0x88   : > { %v2651_v38 = vunpack.c.l.s4 %v24468_v37  ;;  %v20800_v41 = vld [vmem:[%s24682_s12 + $0x25b4] ss:$24 sps:$4 sm:$0xff]   ;;  %v24732_v44 = vshrl.u32 %v2653_v39, 7  ;;  %v20803_v45 = vld [vmem:[%s24682_s12 + $0x25b0] ss:$24 sps:$4 sm:$0xff]   ;;  %v2623_v53 = vld [vmem:[%s24675_s30] sm:$0xff] }
  0x89   : > { %14725 = vmatpush1.bf16.msra.mxu1 %v20766_v15  ;;  %v20804_v46 = vld [vmem:[%s24682_s12 + $0x1e4] ss:$24 sps:$4 sm:$0xff]   ;;  %v20808_v48 = vld [vmem:[%s24682_s12 + $0x1e0] ss:$24 sps:$4 sm:$0xff]   ;;  %v20810_v51 = vld [vmem:[%s24682_s12 + $0x214] ss:$24 sps:$4 sm:$0xff]   ;;  %v2649_v9 = vcombine.high %v2623_v53, %v2623_v53 }
  0x8a   : > { %15217 = vmatpush1.bf16.msra.mxu0 %v20767_v16  ;;  %14726 = vmatprep.subr.bf16.mxu1 %v20768_v17  ;;  %v2652_v43 = vunpack.c.0.s8 %v2651_v38  ;;  %v20806_v47 = vld [vmem:[%s24682_s12 + $0x25e4] ss:$24 sps:$4 sm:$0xff]   ;;  %v20809_v49 = vld [vmem:[%s24682_s12 + $0x25e0] ss:$24 sps:$4 sm:$0xff]   ;;  %v20812_v52 = vld [vmem:[%s24682_s12 + $0x2614] ss:$24 sps:$4 sm:$0xff]  }
  0x8b   : > { %15218 = vmatprep.subr.bf16.mxu0 %v20770_v18  ;;  %v20814_v54 = vld [vmem:[%s24682_s12 + $0x210] ss:$24 sps:$4 sm:$0xff]   ;;  %v20816_v58 = vld [vmem:[%s24682_s12 + $0x244] ss:$24 sps:$4 sm:$0xff]   ;;  %v20820_v0 = vld [vmem:[%s24682_s12 + $0x240] ss:$24 sps:$4 sm:$0xff]  }
  0x8c   : > { %v24740_v50 = vsub.s32 %v2652_v43, %v24732_v44  ;;  %v20815_v56 = vld [vmem:[%s24682_s12 + $0x2610] ss:$24 sps:$4 sm:$0xff]   ;;  %v20818_v59 = vld [vmem:[%s24682_s12 + $0x2644] ss:$24 sps:$4 sm:$0xff]   ;;  %v20821_v1 = vld [vmem:[%s24682_s12 + $0x2640] ss:$24 sps:$4 sm:$0xff]  }
  0x8d   : > { %14727 = vmatpush1.bf16.msra.mxu1 %v20772_v19  ;;  %v2629_v57 = vld [vmem:[%s24675_s30 + $0x30] sm:$0xff]  ;;  %v20828_v7 = vld [vmem:[%s24682_s12 + $0x2a4] ss:$24 sps:$4 sm:$0xff]   ;;  %v20832_v11 = vld [vmem:[%s24682_s12 + $0x2a0] ss:$24 sps:$4 sm:$0xff]   ;;  %p20363_p9 = scmp.ne.s32.totalorder %s24452_s15, 3 }
  0x8e   : > { %15219 = vmatpush1.bf16.msra.mxu0 %v20773_v20  ;;  %14728 = vmatprep.subr.bf16.mxu1 %v20774_v21  ;;  %v2656_v55 = vrot.slane %v2623_v53, %v24740_v50  ;;  %v2758_v61 = vrot.slane %v2629_v57, %v24740_v50  ;;  %v20822_v2 = vld [vmem:[%s24682_s12 + $0x274] ss:$24 sps:$4 sm:$0xff]   ;;  %v20826_v5 = vld [vmem:[%s24682_s12 + $0x270] ss:$24 sps:$4 sm:$0xff]   ;;  %v20830_v8 = vld [vmem:[%s24682_s12 + $0x26a4] ss:$24 sps:$4 sm:$0xff]   ;;  %v2751_v10 = vcombine.high %v2629_v57, %v2629_v57 }
  0x8f   : > { %15220 = vmatprep.subr.bf16.mxu0 %v20776_v22  ;;  %v20824_v3 = vld [vmem:[%s24682_s12 + $0x2674] ss:$24 sps:$4 sm:$0xff]   ;;  %v20827_v6 = vld [vmem:[%s24682_s12 + $0x2670] ss:$24 sps:$4 sm:$0xff]   ;;  %v20833_v12 = vld [vmem:[%s24682_s12 + $0x26a0] ss:$24 sps:$4 sm:$0xff]   ;;  %v24771_v15 = vrot.slane %v2649_v9, %v24740_v50 }
  0x90   : > { %v2664_v60 = vcombine.high %v2656_v55, %v2656_v55  ;;  %v2766_v63 = vcombine.high %v2758_v61, %v2758_v61  ;;  %v20834_v13 = vld [vmem:[%s24682_s12 + $0x2d4] ss:$24 sps:$4 sm:$0xff]   ;;  %v24774_v16 = vrot.slane %v2751_v10, %v24740_v50  ;;  %v20838_v17 = vld [vmem:[%s24682_s12 + $0x2d0] ss:$24 sps:$4 sm:$0xff]   ;;  %v20842_v19 = vld [vmem:[%s24682_s12 + $0x304] ss:$24 sps:$4 sm:$0xff]  }
  0x91   : > { %14729 = vmatpush1.bf16.msra.mxu1 %v20778_v23  ;;  %v20836_v14 = vld [vmem:[%s24682_s12 + $0x26d4] ss:$24 sps:$4 sm:$0xff]   ;;  %v20839_v18 = vld [vmem:[%s24682_s12 + $0x26d0] ss:$24 sps:$4 sm:$0xff]   ;;  %v20845_v20 = vld [vmem:[%s24682_s12 + $0x2704] ss:$24 sps:$4 sm:$0xff]   ;;  %v2665_v21 = vcombine.high %v24771_v15, %v24771_v15  ;;  %v24784_v23 = vpack.c.bf16 %v2656_v55, %v2656_v55 }
  0x92   : > { %15221 = vmatpush1.bf16.msra.mxu0 %v20779_v24  ;;  %14730 = vmatprep.subr.bf16.mxu1 %v20780_v25  ;;  %v24752_v62 = vpack.c.bf16 %v2664_v60, %v2664_v60  ;;  %v24758_v4 = vpack.c.bf16 %v2766_v63, %v2766_v63  ;;  %v2767_v22 = vcombine.high %v24774_v16, %v24774_v16  ;;  %v20840_v25 = vld [vmem:[%s24682_s12 + $0x300] ss:$24 sps:$4 sm:$0xff]   ;;  %v20860_v37 = vld [vmem:[%s24682_s12 + $0x394] ss:$24 sps:$4 sm:$0xff]   ;;  %v20858_v39 = vld [vmem:[%s24682_s12 + $0x390] ss:$24 sps:$4 sm:$0xff]  }
  0x93   : > { %15222 = vmatprep.subr.bf16.mxu0 %v20782_v26  ;;  %v24786_v24 = vpack.c.bf16 %v2758_v61, %v2758_v61  ;;  %v20843_v26 = vld [vmem:[%s24682_s12 + $0x2700] ss:$24 sps:$4 sm:$0xff]   ;;  %v20863_v38 = vld [vmem:[%s24682_s12 + $0x2794] ss:$24 sps:$4 sm:$0xff]   ;;  %v20882_v57 = vld [vmem:[%s24682_s12 + $0x450] ss:$24 sps:$4 sm:$0xff]  }
  0x94   : > { %14750 = vmatprep.mubr.bf16.mxu1 %v24752_v62  ;;  %15242 = vmatprep.mubr.bf16.mxu0 %v24758_v4  ;;  %v20864_v43 = vld [vmem:[%s24682_s12 + $0x3c0] ss:$24 sps:$4 sm:$0xff]   ;;  %v20884_v55 = vld [vmem:[%s24682_s12 + $0x454] ss:$24 sps:$4 sm:$0xff]   ;;  %v20893_v60 = vld [vmem:[%s24682_s12 + $0x2884] ss:$24 sps:$4 sm:$0xff]  }
  0x95   : > { %14731 = vmatpush1.bf16.msra.mxu1 %v20784_v27  ;;  %v20848_v27 = vld [vmem:[%s24682_s12 + $0x334] ss:$24 sps:$4 sm:$0xff]   ;;  %v20876_v53 = vld [vmem:[%s24682_s12 + $0x420] ss:$24 sps:$4 sm:$0xff]  }
  0x96   : > { %15223 = vmatpush1.bf16.msra.mxu0 %v20785_v28  ;;  %14732 = vmatprep.subr.bf16.mxu1 %v20786_v29  ;;  %v20851_v28 = vld [vmem:[%s24682_s12 + $0x2734] ss:$24 sps:$4 sm:$0xff]   ;;  %v24792_v29 = vpack.c.bf16 %v2665_v21, %v2665_v21  ;;  %v20888_v61 = vld [vmem:[%s24682_s12 + $0x480] ss:$24 sps:$4 sm:$0xff]   ;;  %v20918_v21 = vld [vmem:[%s24682_s12 + $0x570] ss:$24 sps:$4 sm:$0xff]  }
  0x97   : > { %15224 = vmatprep.subr.bf16.mxu0 %v20788_v30  ;;  %v24794_v30 = vpack.c.bf16 %v2767_v22, %v2767_v22  ;;  %v20891_v63 = vld [vmem:[%s24682_s12 + $0x2880] ss:$24 sps:$4 sm:$0xff]   ;;  %v20908_v9 = vld [vmem:[%s24682_s12 + $0x514] ss:$24 sps:$4 sm:$0xff]   ;;  %v20921_v22 = vld [vmem:[%s24682_s12 + $0x2970] ss:$24 sps:$4 sm:$0xff]  }
  0x98   : > { %v20911_v10 = vld [vmem:[%s24682_s12 + $0x2914] ss:$24 sps:$4 sm:$0xff]  }
  0x99   : > { %14733 = vmatpush1.bf16.msra.mxu1 %v20790_v31  ;;  %v20846_v31 = vld [vmem:[%s24682_s12 + $0x330] ss:$24 sps:$4 sm:$0xff]  }
  0x9a   : > { %15225 = vmatpush1.bf16.msra.mxu0 %v20791_v32  ;;  %14734 = vmatprep.subr.bf16.mxu1 %v20792_v33  ;;  %v20849_v32 = vld [vmem:[%s24682_s12 + $0x2730] ss:$24 sps:$4 sm:$0xff]   ;;  %v20854_v33 = vld [vmem:[%s24682_s12 + $0x364] ss:$24 sps:$4 sm:$0xff]  }
  0x9b   : > { %15226 = vmatprep.subr.bf16.mxu0 %v20794_v34  ;;  %v20857_v34 = vld [vmem:[%s24682_s12 + $0x2764] ss:$24 sps:$4 sm:$0xff]  }
  0x9d   : > { %14735 = vmatpush1.bf16.msra.mxu1 %v20796_v35  ;;  %v20852_v35 = vld [vmem:[%s24682_s12 + $0x360] ss:$24 sps:$4 sm:$0xff]  }
  0x9e   : > { %15227 = vmatpush1.bf16.msra.mxu0 %v20797_v36  ;;  %14736 = vmatprep.subr.bf16.mxu1 %v20798_v40  ;;  %v20855_v36 = vld [vmem:[%s24682_s12 + $0x2760] ss:$24 sps:$4 sm:$0xff]   ;;  %v20861_v40 = vld [vmem:[%s24682_s12 + $0x2790] ss:$24 sps:$4 sm:$0xff]  }
  0x9f   : > { %15228 = vmatprep.subr.bf16.mxu0 %v20800_v41  ;;  %v20866_v41 = vld [vmem:[%s24682_s12 + $0x3c4] ss:$24 sps:$4 sm:$0xff]  }
  0xa1   : > { %14737 = vmatpush1.bf16.msra.mxu1 %v20802_v42  ;;  %v20869_v42 = vld [vmem:[%s24682_s12 + $0x27c4] ss:$24 sps:$4 sm:$0xff]  }
  0xa2   : > { %15229 = vmatpush1.bf16.msra.mxu0 %v20803_v45  ;;  %14738 = vmatprep.subr.bf16.mxu1 %v20804_v46  ;;  %v20867_v45 = vld [vmem:[%s24682_s12 + $0x27c0] ss:$24 sps:$4 sm:$0xff]   ;;  %v20872_v46 = vld [vmem:[%s24682_s12 + $0x3f4] ss:$24 sps:$4 sm:$0xff]  }
  0xa3   : > { %15230 = vmatprep.subr.bf16.mxu0 %v20806_v47  ;;  %v20875_v47 = vld [vmem:[%s24682_s12 + $0x27f4] ss:$24 sps:$4 sm:$0xff]  }
  0xa5   : > { %14739 = vmatpush1.bf16.msra.mxu1 %v20808_v48  ;;  %v20870_v48 = vld [vmem:[%s24682_s12 + $0x3f0] ss:$24 sps:$4 sm:$0xff]  }
  0xa6   : > { %15231 = vmatpush1.bf16.msra.mxu0 %v20809_v49  ;;  %14740 = vmatprep.subr.bf16.mxu1 %v20810_v51  ;;  %v20873_v49 = vld [vmem:[%s24682_s12 + $0x27f0] ss:$24 sps:$4 sm:$0xff]   ;;  %v20878_v51 = vld [vmem:[%s24682_s12 + $0x424] ss:$24 sps:$4 sm:$0xff]  }
  0xa7   : > { %15232 = vmatprep.subr.bf16.mxu0 %v20812_v52  ;;  %v20881_v52 = vld [vmem:[%s24682_s12 + $0x2824] ss:$24 sps:$4 sm:$0xff]  }
  0xa9   : > { %14741 = vmatpush1.bf16.msra.mxu1 %v20814_v54  ;;  %v20879_v54 = vld [vmem:[%s24682_s12 + $0x2820] ss:$24 sps:$4 sm:$0xff]  }
  0xaa   : > { %15233 = vmatpush1.bf16.msra.mxu0 %v20815_v56  ;;  %14742 = vmatprep.subr.bf16.mxu1 %v20816_v58  ;;  %v20887_v56 = vld [vmem:[%s24682_s12 + $0x2854] ss:$24 sps:$4 sm:$0xff]   ;;  %v20885_v58 = vld [vmem:[%s24682_s12 + $0x2850] ss:$24 sps:$4 sm:$0xff]  }
  0xab   : > { %15234 = vmatprep.subr.bf16.mxu0 %v20818_v59  ;;  %v20890_v59 = vld [vmem:[%s24682_s12 + $0x484] ss:$24 sps:$4 sm:$0xff]  }
  0xad   : > { %14743 = vmatpush1.bf16.msra.mxu1 %v20820_v0  ;;  %v20896_v0 = vld [vmem:[%s24682_s12 + $0x4b4] ss:$24 sps:$4 sm:$0xff]  }
  0xae   : > { %15235 = vmatpush1.bf16.msra.mxu0 %v20821_v1  ;;  %14744 = vmatprep.subr.bf16.mxu1 %v20822_v2  ;;  %v20899_v1 = vld [vmem:[%s24682_s12 + $0x28b4] ss:$24 sps:$4 sm:$0xff]   ;;  %v20894_v2 = vld [vmem:[%s24682_s12 + $0x4b0] ss:$24 sps:$4 sm:$0xff]  }
  0xaf   : > { %15236 = vmatprep.subr.bf16.mxu0 %v20824_v3  ;;  %v20897_v3 = vld [vmem:[%s24682_s12 + $0x28b0] ss:$24 sps:$4 sm:$0xff]  }
  0xb1   : > { %14745 = vmatpush1.bf16.msra.mxu1 %v20826_v5  ;;  %v20902_v5 = vld [vmem:[%s24682_s12 + $0x4e4] ss:$24 sps:$4 sm:$0xff]  }
  0xb2   : > { %15237 = vmatpush1.bf16.msra.mxu0 %v20827_v6  ;;  %14746 = vmatprep.subr.bf16.mxu1 %v20828_v7  ;;  %v20905_v6 = vld [vmem:[%s24682_s12 + $0x28e4] ss:$24 sps:$4 sm:$0xff]   ;;  %v20900_v7 = vld [vmem:[%s24682_s12 + $0x4e0] ss:$24 sps:$4 sm:$0xff]  }
  0xb3   : > { %15238 = vmatprep.subr.bf16.mxu0 %v20830_v8  ;;  %v20903_v8 = vld [vmem:[%s24682_s12 + $0x28e0] ss:$24 sps:$4 sm:$0xff]  }
  0xb5   : > { %14747 = vmatpush1.bf16.msra.mxu1 %v20832_v11  ;;  %v20906_v11 = vld [vmem:[%s24682_s12 + $0x510] ss:$24 sps:$4 sm:$0xff]  }
  0xb6   : > { %15239 = vmatpush1.bf16.msra.mxu0 %v20833_v12  ;;  %14748 = vmatprep.subr.bf16.mxu1 %v20834_v13  ;;  %v20909_v12 = vld [vmem:[%s24682_s12 + $0x2910] ss:$24 sps:$4 sm:$0xff]   ;;  %v20914_v13 = vld [vmem:[%s24682_s12 + $0x544] ss:$24 sps:$4 sm:$0xff]  }
  0xb7   : > { %15240 = vmatprep.subr.bf16.mxu0 %v20836_v14  ;;  %v20917_v14 = vld [vmem:[%s24682_s12 + $0x2944] ss:$24 sps:$4 sm:$0xff]  }
  0xb9   : > { %14749 = vmatpush1.bf16.msra.mxu1 %v20838_v17  ;;  %v20912_v17 = vld [vmem:[%s24682_s12 + $0x540] ss:$24 sps:$4 sm:$0xff]  }
  0xba   : > { %15241 = vmatpush1.bf16.msra.mxu0 %v20839_v18  ;;  %14759 = vmatprep.subr.bf16.mxu1 %v20842_v19  ;;  %v20915_v18 = vld [vmem:[%s24682_s12 + $0x2940] ss:$24 sps:$4 sm:$0xff]   ;;  %v20920_v19 = vld [vmem:[%s24682_s12 + $0x574] ss:$24 sps:$4 sm:$0xff]  }
  0xbb   : > { %15251 = vmatprep.subr.bf16.mxu0 %v20845_v20  ;;  %v20923_v20 = vld [vmem:[%s24682_s12 + $0x2974] ss:$24 sps:$4 sm:$0xff]  }
  0xbc   : > { %14751 = vmatmul.mubr.bf16.vlgmr.msra.gmra.mrb[0].mxu1 %v24784_v23 }
  0xbd   : > { %15243 = vmatmul.mubr.bf16.vlgmr.msra.gmra.mrb[0].mxu0 %v24786_v24  ;;  %14760 = vmatpush1.bf16.msra.mxu1 %v20840_v25  ;;  %v20926_v25 = vld [vmem:[%s24682_s12 + $0x5a4] ss:$24 sps:$4 sm:$0xff]  }
  0xbe   : > { %15252 = vmatpush1.bf16.msra.mxu0 %v20843_v26  ;;  %14761 = vmatprep.subr.bf16.mxu1 %v20848_v27  ;;  %v20929_v26 = vld [vmem:[%s24682_s12 + $0x29a4] ss:$24 sps:$4 sm:$0xff]   ;;  %v20924_v27 = vld [vmem:[%s24682_s12 + $0x5a0] ss:$24 sps:$4 sm:$0xff]  }
  0xbf   : > { %15253 = vmatprep.subr.bf16.mxu0 %v20851_v28  ;;  %14791 = vmatprep.mubr.bf16.mxu1 %v24792_v29  ;;  %v20927_v28 = vld [vmem:[%s24682_s12 + $0x29a0] ss:$24 sps:$4 sm:$0xff]  }
  0xc0   : > { %15283 = vmatprep.mubr.bf16.mxu0 %v24794_v30 }
  0xc1   : > { %14762 = vmatpush1.bf16.msra.mxu1 %v20846_v31  ;;  %v20932_v31 = vld [vmem:[%s24682_s12 + $0x5d4] ss:$24 sps:$4 sm:$0xff]  }
  0xc2   : > { %15254 = vmatpush1.bf16.msra.mxu0 %v20849_v32  ;;  %14763 = vmatprep.subr.bf16.mxu1 %v20854_v33  ;;  %v20935_v32 = vld [vmem:[%s24682_s12 + $0x29d4] ss:$24 sps:$4 sm:$0xff]   ;;  %v20930_v33 = vld [vmem:[%s24682_s12 + $0x5d0] ss:$24 sps:$4 sm:$0xff]  }
  0xc3   : > { %15255 = vmatprep.subr.bf16.mxu0 %v20857_v34  ;;  %v20933_v34 = vld [vmem:[%s24682_s12 + $0x29d0] ss:$24 sps:$4 sm:$0xff]  }
  0xc5   : > { %14764 = vmatpush1.bf16.msra.mxu1 %v20852_v35  ;;  %v20939_v35 = vld [vmem:[%s24682_s12 + $0x604] ss:$24 sps:$4 sm:$0xff]  }
  0xc6   : > { %15256 = vmatpush1.bf16.msra.mxu0 %v20855_v36  ;;  %14765 = vmatprep.subr.bf16.mxu1 %v20860_v37  ;;  %v20943_v36 = vld [vmem:[%s24682_s12 + $0x2a04] ss:$24 sps:$4 sm:$0xff]   ;;  %v20937_v37 = vld [vmem:[%s24682_s12 + $0x600] ss:$24 sps:$4 sm:$0xff]  }
  0xc7   : > { %15257 = vmatprep.subr.bf16.mxu0 %v20863_v38  ;;  %v24863_v38 = vpack.c.bf16 %v24771_v15, %v24771_v15  ;;  %v24880_v15 = vld [vmem:[%s24675_s30 + $0x38] sm:$0xff] }
  0xc9   : > { %14766 = vmatpush1.bf16.msra.mxu1 %v20858_v39  ;;  %v24867_v39 = vpack.c.bf16 %v24774_v16, %v24774_v16  ;;  %v20944_v16 = vld [vmem:[%s24682_s12 + $0x630] ss:$24 sps:$4 sm:$0xff]  }
  0xca   : > { %15258 = vmatpush1.bf16.msra.mxu0 %v20861_v40  ;;  %14767 = vmatprep.subr.bf16.mxu1 %v20866_v41  ;;  %v20941_v40 = vld [vmem:[%s24682_s12 + $0x2a00] ss:$24 sps:$4 sm:$0xff]   ;;  %v20946_v41 = vld [vmem:[%s24682_s12 + $0x634] ss:$24 sps:$4 sm:$0xff]  }
  0xcb   : > { %15259 = vmatprep.subr.bf16.mxu0 %v20869_v42  ;;  %v24872_v42 = vld [vmem:[%s24675_s30 + $0x8] sm:$0xff] }
  0xcd   : > { %14768 = vmatpush1.bf16.msra.mxu1 %v20864_v43  ;;  %v20949_v43 = vld [vmem:[%s24682_s12 + $0x2a34] ss:$24 sps:$4 sm:$0xff]  }
  0xce   : > { %15260 = vmatpush1.bf16.msra.mxu0 %v20867_v45  ;;  %14769 = vmatprep.subr.bf16.mxu1 %v20872_v46  ;;  %v24877_v45 = vrot.slane %v24872_v42, %v24740_v50  ;;  %v20947_v46 = vld [vmem:[%s24682_s12 + $0x2a30] ss:$24 sps:$4 sm:$0xff]  }
  0xcf   : > { %15261 = vmatprep.subr.bf16.mxu0 %v20875_v47 }
  0xd0   : > { %v2681_v47 = vcombine.high %v24877_v45, %v24877_v45 }
  0xd1   : > { %14770 = vmatpush1.bf16.msra.mxu1 %v20870_v48  ;;  %v24890_v48 = vrot.slane %v24880_v15, %v24740_v50 }
  0xd2   : > { %15262 = vmatpush1.bf16.msra.mxu0 %v20873_v49  ;;  %14771 = vmatprep.subr.bf16.mxu1 %v20878_v51  ;;  %v20952_v49 = vld [vmem:[%s24682_s12 + $0x664] ss:$24 sps:$4 sm:$0xff]  }
  0xd3   : > { %15263 = vmatprep.subr.bf16.mxu0 %v20881_v52  ;;  %v20955_v51 = vld [vmem:[%s24682_s12 + $0x2a64] ss:$24 sps:$4 sm:$0xff]   ;;  %v24894_v52 = vpack.c.bf16 %v2681_v47, %v2681_v47  ;;  %v21016_v47 = vld [vmem:[%s24682_s12 + $0x870] ss:$24 sps:$4 sm:$0xff]  }
  0xd5   : > { %14772 = vmatpush1.bf16.msra.mxu1 %v20876_v53  ;;  %v2783_v53 = vcombine.high %v24890_v48, %v24890_v48 }
  0xd6   : > { %15264 = vmatpush1.bf16.msra.mxu0 %v20879_v54  ;;  %14773 = vmatprep.subr.bf16.mxu1 %v20884_v55  ;;  %v20950_v54 = vld [vmem:[%s24682_s12 + $0x660] ss:$24 sps:$4 sm:$0xff]  }
  0xd7   : > { %15265 = vmatprep.subr.bf16.mxu0 %v20887_v56  ;;  %v20953_v55 = vld [vmem:[%s24682_s12 + $0x2a60] ss:$24 sps:$4 sm:$0xff]   ;;  %v24901_v56 = vpack.c.bf16 %v2783_v53, %v2783_v53  ;;  %v21027_v53 = vld [vmem:[%s24682_s12 + $0x2ca4] ss:$24 sps:$4 sm:$0xff]  }
  0xd9   : > { %14774 = vmatpush1.bf16.msra.mxu1 %v20882_v57  ;;  %v20958_v57 = vld [vmem:[%s24682_s12 + $0x694] ss:$24 sps:$4 sm:$0xff]  }
  0xda   : > { %15266 = vmatpush1.bf16.msra.mxu0 %v20885_v58  ;;  %14775 = vmatprep.subr.bf16.mxu1 %v20890_v59  ;;  %v20961_v58 = vld [vmem:[%s24682_s12 + $0x2a94] ss:$24 sps:$4 sm:$0xff]   ;;  %v20956_v59 = vld [vmem:[%s24682_s12 + $0x690] ss:$24 sps:$4 sm:$0xff]  }
  0xdb   : > { %15267 = vmatprep.subr.bf16.mxu0 %v20893_v60  ;;  %v20959_v60 = vld [vmem:[%s24682_s12 + $0x2a90] ss:$24 sps:$4 sm:$0xff]  }
  0xdd   : > { %14776 = vmatpush1.bf16.msra.mxu1 %v20888_v61  ;;  %v20964_v61 = vld [vmem:[%s24682_s12 + $0x6c4] ss:$24 sps:$4 sm:$0xff]  }
  0xde   : > { %15268 = vmatpush1.bf16.msra.mxu0 %v20891_v63  ;;  %14777 = vmatprep.subr.bf16.mxu1 %v20896_v0  ;;  %v20967_v63 = vld [vmem:[%s24682_s12 + $0x2ac4] ss:$24 sps:$4 sm:$0xff]   ;;  %v20962_v0 = vld [vmem:[%s24682_s12 + $0x6c0] ss:$24 sps:$4 sm:$0xff]  }
  0xdf   : > { %15269 = vmatprep.subr.bf16.mxu0 %v20899_v1  ;;  %v20965_v1 = vld [vmem:[%s24682_s12 + $0x2ac0] ss:$24 sps:$4 sm:$0xff]  }
  0xe1   : > { %14778 = vmatpush1.bf16.msra.mxu1 %v20894_v2  ;;  %v20970_v2 = vld [vmem:[%s24682_s12 + $0x6f4] ss:$24 sps:$4 sm:$0xff]  }
  0xe2   : > { %15270 = vmatpush1.bf16.msra.mxu0 %v20897_v3  ;;  %14779 = vmatprep.subr.bf16.mxu1 %v20902_v5  ;;  %v20973_v3 = vld [vmem:[%s24682_s12 + $0x2af4] ss:$24 sps:$4 sm:$0xff]   ;;  %v20968_v5 = vld [vmem:[%s24682_s12 + $0x6f0] ss:$24 sps:$4 sm:$0xff]  }
  0xe3   : > { %15271 = vmatprep.subr.bf16.mxu0 %v20905_v6  ;;  %v20971_v6 = vld [vmem:[%s24682_s12 + $0x2af0] ss:$24 sps:$4 sm:$0xff]  }
  0xe5   : > { %14780 = vmatpush1.bf16.msra.mxu1 %v20900_v7  ;;  %v20976_v7 = vld [vmem:[%s24682_s12 + $0x724] ss:$24 sps:$4 sm:$0xff]  }
  0xe6   : > { %15272 = vmatpush1.bf16.msra.mxu0 %v20903_v8  ;;  %14781 = vmatprep.subr.bf16.mxu1 %v20908_v9  ;;  %v20979_v8 = vld [vmem:[%s24682_s12 + $0x2b24] ss:$24 sps:$4 sm:$0xff]   ;;  %v20974_v9 = vld [vmem:[%s24682_s12 + $0x720] ss:$24 sps:$4 sm:$0xff]  }
  0xe7   : > { %15273 = vmatprep.subr.bf16.mxu0 %v20911_v10  ;;  %v20977_v10 = vld [vmem:[%s24682_s12 + $0x2b20] ss:$24 sps:$4 sm:$0xff]  }
  0xe9   : > { %14782 = vmatpush1.bf16.msra.mxu1 %v20906_v11  ;;  %v20982_v11 = vld [vmem:[%s24682_s12 + $0x754] ss:$24 sps:$4 sm:$0xff]  }
  0xea   : > { %15274 = vmatpush1.bf16.msra.mxu0 %v20909_v12  ;;  %14783 = vmatprep.subr.bf16.mxu1 %v20914_v13  ;;  %v20985_v12 = vld [vmem:[%s24682_s12 + $0x2b54] ss:$24 sps:$4 sm:$0xff]   ;;  %v20980_v13 = vld [vmem:[%s24682_s12 + $0x750] ss:$24 sps:$4 sm:$0xff]  }
  0xeb   : > { %15275 = vmatprep.subr.bf16.mxu0 %v20917_v14  ;;  %v20983_v14 = vld [vmem:[%s24682_s12 + $0x2b50] ss:$24 sps:$4 sm:$0xff]  }
  0xed   : > { %14784 = vmatpush1.bf16.msra.mxu1 %v20912_v17  ;;  %v20988_v17 = vld [vmem:[%s24682_s12 + $0x784] ss:$24 sps:$4 sm:$0xff]  }
  0xee   : > { %15276 = vmatpush1.bf16.msra.mxu0 %v20915_v18  ;;  %14785 = vmatprep.subr.bf16.mxu1 %v20920_v19  ;;  %v20991_v18 = vld [vmem:[%s24682_s12 + $0x2b84] ss:$24 sps:$4 sm:$0xff]   ;;  %v20986_v19 = vld [vmem:[%s24682_s12 + $0x780] ss:$24 sps:$4 sm:$0xff]  }
  0xef   : > { %15277 = vmatprep.subr.bf16.mxu0 %v20923_v20  ;;  %v20989_v20 = vld [vmem:[%s24682_s12 + $0x2b80] ss:$24 sps:$4 sm:$0xff]  }
  0xf1   : > { %14786 = vmatpush1.bf16.msra.mxu1 %v20918_v21  ;;  %v20994_v21 = vld [vmem:[%s24682_s12 + $0x7b4] ss:$24 sps:$4 sm:$0xff]  }
  0xf2   : > { %15278 = vmatpush1.bf16.msra.mxu0 %v20921_v22  ;;  %14787 = vmatprep.subr.bf16.mxu1 %v20926_v25  ;;  %v20997_v22 = vld [vmem:[%s24682_s12 + $0x2bb4] ss:$24 sps:$4 sm:$0xff]   ;;  %v20992_v25 = vld [vmem:[%s24682_s12 + $0x7b0] ss:$24 sps:$4 sm:$0xff]  }
  0xf3   : > { %15279 = vmatprep.subr.bf16.mxu0 %v20929_v26  ;;  %v20995_v26 = vld [vmem:[%s24682_s12 + $0x2bb0] ss:$24 sps:$4 sm:$0xff]  }
  0xf5   : > { %14788 = vmatpush1.bf16.msra.mxu1 %v20924_v27  ;;  %v21000_v27 = vld [vmem:[%s24682_s12 + $0x7e4] ss:$24 sps:$4 sm:$0xff]  }
  0xf6   : > { %15280 = vmatpush1.bf16.msra.mxu0 %v20927_v28  ;;  %14789 = vmatprep.subr.bf16.mxu1 %v20932_v31  ;;  %v21003_v28 = vld [vmem:[%s24682_s12 + $0x2be4] ss:$24 sps:$4 sm:$0xff]   ;;  %v20998_v31 = vld [vmem:[%s24682_s12 + $0x7e0] ss:$24 sps:$4 sm:$0xff]  }
  0xf7   : > { %15281 = vmatprep.subr.bf16.mxu0 %v20935_v32  ;;  %v21001_v32 = vld [vmem:[%s24682_s12 + $0x2be0] ss:$24 sps:$4 sm:$0xff]  }
  0xf9   : > { %14790 = vmatpush1.bf16.msra.mxu1 %v20930_v33  ;;  %v21006_v33 = vld [vmem:[%s24682_s12 + $0x814] ss:$24 sps:$4 sm:$0xff]  }
  0xfa   : > { %15282 = vmatpush1.bf16.msra.mxu0 %v20933_v34  ;;  %14800 = vmatprep.subr.bf16.mxu1 %v20939_v35  ;;  %v21009_v34 = vld [vmem:[%s24682_s12 + $0x2c14] ss:$24 sps:$4 sm:$0xff]   ;;  %v21004_v35 = vld [vmem:[%s24682_s12 + $0x810] ss:$24 sps:$4 sm:$0xff]  }
  0xfb   : > { %15292 = vmatprep.subr.bf16.mxu0 %v20943_v36  ;;  %v21007_v36 = vld [vmem:[%s24682_s12 + $0x2c10] ss:$24 sps:$4 sm:$0xff]  }
  0xfc   : > { %14792 = vmatmul.mubr.bf16.vlgmr.msra.gmra.mrb[0].mxu1 %v24863_v38 }
  0xfd   : > { %15284 = vmatmul.mubr.bf16.vlgmr.msra.gmra.mrb[0].mxu0 %v24867_v39  ;;  %14801 = vmatpush1.bf16.msra.mxu1 %v20937_v37  ;;  %v21012_v37 = vld [vmem:[%s24682_s12 + $0x844] ss:$24 sps:$4 sm:$0xff]  }
  0xfe   : > { %15293 = vmatpush1.bf16.msra.mxu0 %v20941_v40  ;;  %14802 = vmatprep.subr.bf16.mxu1 %v20946_v41  ;;  %v21015_v40 = vld [vmem:[%s24682_s12 + $0x2c44] ss:$24 sps:$4 sm:$0xff]   ;;  %v21010_v41 = vld [vmem:[%s24682_s12 + $0x840] ss:$24 sps:$4 sm:$0xff]  }
  0xff   : > { %15294 = vmatprep.subr.bf16.mxu0 %v20949_v43  ;;  %14832 = vmatprep.mubr.bf16.mxu1 %v24894_v52  ;;  %v21013_v43 = vld [vmem:[%s24682_s12 + $0x2c40] ss:$24 sps:$4 sm:$0xff]  }
 0x100   : > { %15324 = vmatprep.mubr.bf16.mxu0 %v24901_v56 }
 0x101   : > { %14803 = vmatpush1.bf16.msra.mxu1 %v20944_v16  ;;  %v21018_v16 = vld [vmem:[%s24682_s12 + $0x874] ss:$24 sps:$4 sm:$0xff]  }
 0x102   : > { %15295 = vmatpush1.bf16.msra.mxu0 %v20947_v46  ;;  %14804 = vmatprep.subr.bf16.mxu1 %v20952_v49  ;;  %v21021_v46 = vld [vmem:[%s24682_s12 + $0x2c74] ss:$24 sps:$4 sm:$0xff]   ;;  %v21019_v49 = vld [vmem:[%s24682_s12 + $0x2c70] ss:$24 sps:$4 sm:$0xff]  }
 0x103   : > { %15296 = vmatprep.subr.bf16.mxu0 %v20955_v51  ;;  %v21024_v51 = vld [vmem:[%s24682_s12 + $0x8a4] ss:$24 sps:$4 sm:$0xff]  }
 0x105   : > { %14805 = vmatpush1.bf16.msra.mxu1 %v20950_v54  ;;  %v2666_v54 = vcombine.high %v24872_v42, %v24872_v42 }
 0x106   : > { %15297 = vmatpush1.bf16.msra.mxu0 %v20953_v55  ;;  %14806 = vmatprep.subr.bf16.mxu1 %v20958_v57  ;;  %v2768_v55 = vcombine.high %v24880_v15, %v24880_v15  ;;  %v21022_v57 = vld [vmem:[%s24682_s12 + $0x8a0] ss:$24 sps:$4 sm:$0xff]   ;;  %v21031_v15 = vld [vmem:[%s24682_s12 + $0x2cd0] ss:$24 sps:$4 sm:$0xff]  }
 0x107   : > { %15298 = vmatprep.subr.bf16.mxu0 %v20961_v58  ;;  %v21025_v58 = vld [vmem:[%s24682_s12 + $0x2ca0] ss:$24 sps:$4 sm:$0xff]  }
 0x108   : > { %v24962_v42 = vrot.slane %v2768_v55, %v24740_v50  ;;  %v21093_v55 = vld [vmem:[%s24682_s12 + $0x2eb4] ss:$24 sps:$4 sm:$0xff]  }
 0x109   : > { %14807 = vmatpush1.bf16.msra.mxu1 %v20956_v59  ;;  %v21030_v59 = vld [vmem:[%s24682_s12 + $0x8d4] ss:$24 sps:$4 sm:$0xff]  }
 0x10a   : > { %15299 = vmatpush1.bf16.msra.mxu0 %v20959_v60  ;;  %14808 = vmatprep.subr.bf16.mxu1 %v20964_v61  ;;  %v21033_v60 = vld [vmem:[%s24682_s12 + $0x2cd4] ss:$24 sps:$4 sm:$0xff]   ;;  %v24959_v61 = vrot.slane %v2666_v54, %v24740_v50 }
 0x10b   : > { %15300 = vmatprep.subr.bf16.mxu0 %v20967_v63  ;;  %v21028_v63 = vld [vmem:[%s24682_s12 + $0x8d0] ss:$24 sps:$4 sm:$0xff]   ;;  %v21090_v54 = vld [vmem:[%s24682_s12 + $0xab4] ss:$24 sps:$4 sm:$0xff]  }
 0x10d   : > { %14809 = vmatpush1.bf16.msra.mxu1 %v20962_v0  ;;  %v21036_v0 = vld [vmem:[%s24682_s12 + $0x904] ss:$24 sps:$4 sm:$0xff]  }
 0x10e   : > { %15301 = vmatpush1.bf16.msra.mxu0 %v20965_v1  ;;  %14810 = vmatprep.subr.bf16.mxu1 %v20970_v2  ;;  %v21039_v1 = vld [vmem:[%s24682_s12 + $0x2d04] ss:$24 sps:$4 sm:$0xff]   ;;  %v2682_v2 = vcombine.high %v24959_v61, %v24959_v61 }
 0x10f   : > { %15302 = vmatprep.subr.bf16.mxu0 %v20973_v3  ;;  %v2784_v3 = vcombine.high %v24962_v42, %v24962_v42 }
 0x111   : > { %14811 = vmatpush1.bf16.msra.mxu1 %v20968_v5  ;;  %v21034_v5 = vld [vmem:[%s24682_s12 + $0x900] ss:$24 sps:$4 sm:$0xff]  }
 0x112   : > { %15303 = vmatpush1.bf16.msra.mxu0 %v20971_v6  ;;  %14812 = vmatprep.subr.bf16.mxu1 %v20976_v7  ;;  %v21037_v6 = vld [vmem:[%s24682_s12 + $0x2d00] ss:$24 sps:$4 sm:$0xff]   ;;  %v24976_v7 = vpack.c.bf16 %v24877_v45, %v24877_v45  ;;  %v21040_v45 = vld [vmem:[%s24682_s12 + $0x930] ss:$24 sps:$4 sm:$0xff]  }
 0x113   : > { %15304 = vmatprep.subr.bf16.mxu0 %v20979_v8  ;;  %v24980_v8 = vpack.c.bf16 %v24890_v48, %v24890_v48  ;;  %v21043_v48 = vld [vmem:[%s24682_s12 + $0x2d30] ss:$24 sps:$4 sm:$0xff]  }
 0x115   : > { %14813 = vmatpush1.bf16.msra.mxu1 %v20974_v9  ;;  %v21042_v9 = vld [vmem:[%s24682_s12 + $0x934] ss:$24 sps:$4 sm:$0xff]  }
 0x116   : > { %15305 = vmatpush1.bf16.msra.mxu0 %v20977_v10  ;;  %14814 = vmatprep.subr.bf16.mxu1 %v20982_v11  ;;  %v21045_v10 = vld [vmem:[%s24682_s12 + $0x2d34] ss:$24 sps:$4 sm:$0xff]   ;;  %v24984_v11 = vpack.c.bf16 %v2682_v2, %v2682_v2  ;;  %v21100_v2 = vld [vmem:[%s24682_s12 + $0xb10] ss:$24 sps:$4 sm:$0xff]  }
 0x117   : > { %15306 = vmatprep.subr.bf16.mxu0 %v20985_v12  ;;  %v24986_v12 = vpack.c.bf16 %v2784_v3, %v2784_v3  ;;  %v21103_v3 = vld [vmem:[%s24682_s12 + $0x2f10] ss:$24 sps:$4 sm:$0xff]  }
 0x119   : > { %14815 = vmatpush1.bf16.msra.mxu1 %v20980_v13  ;;  %v21048_v13 = vld [vmem:[%s24682_s12 + $0x964] ss:$24 sps:$4 sm:$0xff]  }
 0x11a   : > { %15307 = vmatpush1.bf16.msra.mxu0 %v20983_v14  ;;  %14816 = vmatprep.subr.bf16.mxu1 %v20988_v17  ;;  %v21051_v14 = vld [vmem:[%s24682_s12 + $0x2d64] ss:$24 sps:$4 sm:$0xff]   ;;  %v21046_v17 = vld [vmem:[%s24682_s12 + $0x960] ss:$24 sps:$4 sm:$0xff]  }
 0x11b   : > { %15308 = vmatprep.subr.bf16.mxu0 %v20991_v18  ;;  %v21049_v18 = vld [vmem:[%s24682_s12 + $0x2d60] ss:$24 sps:$4 sm:$0xff]  }
 0x11d   : > { %14817 = vmatpush1.bf16.msra.mxu1 %v20986_v19  ;;  %v21054_v19 = vld [vmem:[%s24682_s12 + $0x994] ss:$24 sps:$4 sm:$0xff]  }
 0x11e   : > { %15309 = vmatpush1.bf16.msra.mxu0 %v20989_v20  ;;  %14818 = vmatprep.subr.bf16.mxu1 %v20994_v21  ;;  %v21057_v20 = vld [vmem:[%s24682_s12 + $0x2d94] ss:$24 sps:$4 sm:$0xff]   ;;  %v21052_v21 = vld [vmem:[%s24682_s12 + $0x990] ss:$24 sps:$4 sm:$0xff]  }
 0x11f   : > { %15310 = vmatprep.subr.bf16.mxu0 %v20997_v22  ;;  %v21055_v22 = vld [vmem:[%s24682_s12 + $0x2d90] ss:$24 sps:$4 sm:$0xff]  }
 0x121   : > { %14819 = vmatpush1.bf16.msra.mxu1 %v20992_v25  ;;  %v21060_v25 = vld [vmem:[%s24682_s12 + $0x9c4] ss:$24 sps:$4 sm:$0xff]  }
 0x122   : > { %15311 = vmatpush1.bf16.msra.mxu0 %v20995_v26  ;;  %14820 = vmatprep.subr.bf16.mxu1 %v21000_v27  ;;  %v21063_v26 = vld [vmem:[%s24682_s12 + $0x2dc4] ss:$24 sps:$4 sm:$0xff]   ;;  %v21058_v27 = vld [vmem:[%s24682_s12 + $0x9c0] ss:$24 sps:$4 sm:$0xff]  }
 0x123   : > { %15312 = vmatprep.subr.bf16.mxu0 %v21003_v28  ;;  %v21061_v28 = vld [vmem:[%s24682_s12 + $0x2dc0] ss:$24 sps:$4 sm:$0xff]  }
 0x125   : > { %14821 = vmatpush1.bf16.msra.mxu1 %v20998_v31  ;;  %v21066_v31 = vld [vmem:[%s24682_s12 + $0x9f4] ss:$24 sps:$4 sm:$0xff]  }
 0x126   : > { %15313 = vmatpush1.bf16.msra.mxu0 %v21001_v32  ;;  %14822 = vmatprep.subr.bf16.mxu1 %v21006_v33  ;;  %v21069_v32 = vld [vmem:[%s24682_s12 + $0x2df4] ss:$24 sps:$4 sm:$0xff]   ;;  %v21064_v33 = vld [vmem:[%s24682_s12 + $0x9f0] ss:$24 sps:$4 sm:$0xff]  }
 0x127   : > { %15314 = vmatprep.subr.bf16.mxu0 %v21009_v34  ;;  %v21067_v34 = vld [vmem:[%s24682_s12 + $0x2df0] ss:$24 sps:$4 sm:$0xff]  }
 0x129   : > { %14823 = vmatpush1.bf16.msra.mxu1 %v21004_v35  ;;  %v21072_v35 = vld [vmem:[%s24682_s12 + $0xa24] ss:$24 sps:$4 sm:$0xff]  }
 0x12a   : > { %15315 = vmatpush1.bf16.msra.mxu0 %v21007_v36  ;;  %14824 = vmatprep.subr.bf16.mxu1 %v21012_v37  ;;  %v21075_v36 = vld [vmem:[%s24682_s12 + $0x2e24] ss:$24 sps:$4 sm:$0xff]   ;;  %v21070_v37 = vld [vmem:[%s24682_s12 + $0xa20] ss:$24 sps:$4 sm:$0xff]  }
 0x12b   : > { %15316 = vmatprep.subr.bf16.mxu0 %v21015_v40  ;;  %v21073_v40 = vld [vmem:[%s24682_s12 + $0x2e20] ss:$24 sps:$4 sm:$0xff]  }
 0x12d   : > { %14825 = vmatpush1.bf16.msra.mxu1 %v21010_v41  ;;  %v21078_v41 = vld [vmem:[%s24682_s12 + $0xa54] ss:$24 sps:$4 sm:$0xff]  }
 0x12e   : > { %15317 = vmatpush1.bf16.msra.mxu0 %v21013_v43  ;;  %14826 = vmatprep.subr.bf16.mxu1 %v21018_v16  ;;  %v21081_v43 = vld [vmem:[%s24682_s12 + $0x2e54] ss:$24 sps:$4 sm:$0xff]   ;;  %v21076_v16 = vld [vmem:[%s24682_s12 + $0xa50] ss:$24 sps:$4 sm:$0xff]  }
 0x12f   : > { %15318 = vmatprep.subr.bf16.mxu0 %v21021_v46  ;;  %v21079_v46 = vld [vmem:[%s24682_s12 + $0x2e50] ss:$24 sps:$4 sm:$0xff]  }
 0x131   : > { %14827 = vmatpush1.bf16.msra.mxu1 %v21016_v47  ;;  %v21084_v47 = vld [vmem:[%s24682_s12 + $0xa84] ss:$24 sps:$4 sm:$0xff]  }
 0x132   : > { %15319 = vmatpush1.bf16.msra.mxu0 %v21019_v49  ;;  %14828 = vmatprep.subr.bf16.mxu1 %v21024_v51  ;;  %v21087_v49 = vld [vmem:[%s24682_s12 + $0x2e84] ss:$24 sps:$4 sm:$0xff]   ;;  %v21082_v51 = vld [vmem:[%s24682_s12 + $0xa80] ss:$24 sps:$4 sm:$0xff]  }
 0x133   : > { %15320 = vmatprep.subr.bf16.mxu0 %v21027_v53  ;;  %v21085_v53 = vld [vmem:[%s24682_s12 + $0x2e80] ss:$24 sps:$4 sm:$0xff]  }
 0x135   : > { %14829 = vmatpush1.bf16.msra.mxu1 %v21022_v57  ;;  %v21088_v57 = vld [vmem:[%s24682_s12 + $0xab0] ss:$24 sps:$4 sm:$0xff]  }
 0x136   : > { %15321 = vmatpush1.bf16.msra.mxu0 %v21025_v58  ;;  %14830 = vmatprep.subr.bf16.mxu1 %v21030_v59  ;;  %v21091_v58 = vld [vmem:[%s24682_s12 + $0x2eb0] ss:$24 sps:$4 sm:$0xff]   ;;  %v21096_v59 = vld [vmem:[%s24682_s12 + $0xae4] ss:$24 sps:$4 sm:$0xff]  }
 0x137   : > { %15322 = vmatprep.subr.bf16.mxu0 %v21033_v60  ;;  %v21099_v60 = vld [vmem:[%s24682_s12 + $0x2ee4] ss:$24 sps:$4 sm:$0xff]  }
 0x139   : > { %14831 = vmatpush1.bf16.msra.mxu1 %v21028_v63  ;;  %v21094_v63 = vld [vmem:[%s24682_s12 + $0xae0] ss:$24 sps:$4 sm:$0xff]  }
 0x13a   : > { %15323 = vmatpush1.bf16.msra.mxu0 %v21031_v15  ;;  %14841 = vmatprep.subr.bf16.mxu1 %v21036_v0  ;;  %v21097_v15 = vld [vmem:[%s24682_s12 + $0x2ee0] ss:$24 sps:$4 sm:$0xff]   ;;  %v21102_v0 = vld [vmem:[%s24682_s12 + $0xb14] ss:$24 sps:$4 sm:$0xff]  }
 0x13b   : > { %15333 = vmatprep.subr.bf16.mxu0 %v21039_v1  ;;  %v21105_v1 = vld [vmem:[%s24682_s12 + $0x2f14] ss:$24 sps:$4 sm:$0xff]  }
 0x13c   : > { %14833 = vmatmul.mubr.bf16.vlgmr.msra.gmra.mrb[0].mxu1 %v24976_v7 }
 0x13d   : > { %15325 = vmatmul.mubr.bf16.vlgmr.msra.gmra.mrb[0].mxu0 %v24980_v8  ;;  %14842 = vmatpush1.bf16.msra.mxu1 %v21034_v5  ;;  %v21108_v5 = vld [vmem:[%s24682_s12 + $0xb44] ss:$24 sps:$4 sm:$0xff]  }
 0x13e   : > { %15334 = vmatpush1.bf16.msra.mxu0 %v21037_v6  ;;  %14843 = vmatprep.subr.bf16.mxu1 %v21042_v9  ;;  %v21111_v6 = vld [vmem:[%s24682_s12 + $0x2f44] ss:$24 sps:$4 sm:$0xff]   ;;  %v21106_v9 = vld [vmem:[%s24682_s12 + $0xb40] ss:$24 sps:$4 sm:$0xff]  }
 0x13f   : > { %15335 = vmatprep.subr.bf16.mxu0 %v21045_v10  ;;  %14873 = vmatprep.mubr.bf16.mxu1 %v24984_v11  ;;  %v21109_v10 = vld [vmem:[%s24682_s12 + $0x2f40] ss:$24 sps:$4 sm:$0xff]  }
 0x140   : > { %15365 = vmatprep.mubr.bf16.mxu0 %v24986_v12 }
 0x141   : > { %14844 = vmatpush1.bf16.msra.mxu1 %v21040_v45  ;;  %v21114_v45 = vld [vmem:[%s24682_s12 + $0xb74] ss:$24 sps:$4 sm:$0xff]  }
 0x142   : > { %15336 = vmatpush1.bf16.msra.mxu0 %v21043_v48  ;;  %14845 = vmatprep.subr.bf16.mxu1 %v21048_v13  ;;  %v21117_v48 = vld [vmem:[%s24682_s12 + $0x2f74] ss:$24 sps:$4 sm:$0xff]   ;;  %v21112_v13 = vld [vmem:[%s24682_s12 + $0xb70] ss:$24 sps:$4 sm:$0xff]  }
 0x143   : > { %15337 = vmatprep.subr.bf16.mxu0 %v21051_v14  ;;  %v21115_v14 = vld [vmem:[%s24682_s12 + $0x2f70] ss:$24 sps:$4 sm:$0xff]  }
 0x145   : > { %14846 = vmatpush1.bf16.msra.mxu1 %v21046_v17  ;;  %v21120_v17 = vld [vmem:[%s24682_s12 + $0xba4] ss:$24 sps:$4 sm:$0xff]  }
 0x146   : > { %15338 = vmatpush1.bf16.msra.mxu0 %v21049_v18  ;;  %14847 = vmatprep.subr.bf16.mxu1 %v21054_v19  ;;  %v21123_v18 = vld [vmem:[%s24682_s12 + $0x2fa4] ss:$24 sps:$4 sm:$0xff]   ;;  %v25045_v19 = vld [vmem:[%s24675_s30 + $0x10] sm:$0xff] }
 0x147   : > { %15339 = vmatprep.subr.bf16.mxu0 %v21057_v20  ;;  %v25048_v20 = vld [vmem:[%s24675_s30 + $0x40] sm:$0xff] }
 0x149   : > { %14848 = vmatpush1.bf16.msra.mxu1 %v21052_v21  ;;  %v21118_v21 = vld [vmem:[%s24682_s12 + $0xba0] ss:$24 sps:$4 sm:$0xff]  }
 0x14a   : > { %15340 = vmatpush1.bf16.msra.mxu0 %v21055_v22  ;;  %14849 = vmatprep.subr.bf16.mxu1 %v21060_v25  ;;  %v21121_v22 = vld [vmem:[%s24682_s12 + $0x2fa0] ss:$24 sps:$4 sm:$0xff]   ;;  %v21126_v25 = vld [vmem:[%s24682_s12 + $0xbd4] ss:$24 sps:$4 sm:$0xff]  }
 0x14b   : > { %15341 = vmatprep.subr.bf16.mxu0 %v21063_v26  ;;  %v21129_v26 = vld [vmem:[%s24682_s12 + $0x2fd4] ss:$24 sps:$4 sm:$0xff]  }
 0x14d   : > { %14850 = vmatpush1.bf16.msra.mxu1 %v21058_v27  ;;  %v25056_v27 = vrot.slane %v25045_v19, %v24740_v50 }
 0x14e   : > { %15342 = vmatpush1.bf16.msra.mxu0 %v21061_v28  ;;  %14851 = vmatprep.subr.bf16.mxu1 %v21066_v31  ;;  %v25060_v28 = vrot.slane %v25048_v20, %v24740_v50  ;;  %v21124_v31 = vld [vmem:[%s24682_s12 + $0xbd0] ss:$24 sps:$4 sm:$0xff]  }
 0x14f   : > { %15343 = vmatprep.subr.bf16.mxu0 %v21069_v32  ;;  %v21127_v32 = vld [vmem:[%s24682_s12 + $0x2fd0] ss:$24 sps:$4 sm:$0xff]  }
 0x151   : > { %14852 = vmatpush1.bf16.msra.mxu1 %v21064_v33  ;;  %v21133_v33 = vld [vmem:[%s24682_s12 + $0xc04] ss:$24 sps:$4 sm:$0xff]  }
 0x152   : > { %15344 = vmatpush1.bf16.msra.mxu0 %v21067_v34  ;;  %14853 = vmatprep.subr.bf16.mxu1 %v21072_v35  ;;  %v21137_v34 = vld [vmem:[%s24682_s12 + $0x3004] ss:$24 sps:$4 sm:$0xff]   ;;  %v2698_v35 = vcombine.high %v25056_v27, %v25056_v27 }
 0x153   : > { %15345 = vmatprep.subr.bf16.mxu0 %v21075_v36  ;;  %v2800_v36 = vcombine.high %v25060_v28, %v25060_v28 }
 0x155   : > { %14854 = vmatpush1.bf16.msra.mxu1 %v21070_v37  ;;  %v25072_v37 = vpack.c.bf16 %v24959_v61, %v24959_v61  ;;  %v25084_v61 = vpack.c.bf16 %v2800_v36, %v2800_v36  ;;  %v21197_v36 = vld [vmem:[%s24682_s12 + $0x31e4] ss:$24 sps:$4 sm:$0xff]  }
 0x156   : > { %15346 = vmatpush1.bf16.msra.mxu0 %v21073_v40  ;;  %14855 = vmatprep.subr.bf16.mxu1 %v21078_v41  ;;  %v25076_v40 = vpack.c.bf16 %v24962_v42, %v24962_v42  ;;  %v21131_v41 = vld [vmem:[%s24682_s12 + $0xc00] ss:$24 sps:$4 sm:$0xff]   ;;  %v21138_v42 = vld [vmem:[%s24682_s12 + $0xc30] ss:$24 sps:$4 sm:$0xff]  }
 0x157   : > { %15347 = vmatprep.subr.bf16.mxu0 %v21081_v43  ;;  %v21135_v43 = vld [vmem:[%s24682_s12 + $0x3000] ss:$24 sps:$4 sm:$0xff]  }
 0x159   : > { %14856 = vmatpush1.bf16.msra.mxu1 %v21076_v16  ;;  %v21140_v16 = vld [vmem:[%s24682_s12 + $0xc34] ss:$24 sps:$4 sm:$0xff]  }
 0x15a   : > { %15348 = vmatpush1.bf16.msra.mxu0 %v21079_v46  ;;  %14857 = vmatprep.subr.bf16.mxu1 %v21084_v47  ;;  %v21143_v46 = vld [vmem:[%s24682_s12 + $0x3034] ss:$24 sps:$4 sm:$0xff]   ;;  %v25082_v47 = vpack.c.bf16 %v2698_v35, %v2698_v35  ;;  %v21194_v35 = vld [vmem:[%s24682_s12 + $0xde4] ss:$24 sps:$4 sm:$0xff]  }
 0x15b   : > { %15349 = vmatprep.subr.bf16.mxu0 %v21087_v49  ;;  %v21141_v49 = vld [vmem:[%s24682_s12 + $0x3030] ss:$24 sps:$4 sm:$0xff]  }
 0x15d   : > { %14858 = vmatpush1.bf16.msra.mxu1 %v21082_v51  ;;  %v21146_v51 = vld [vmem:[%s24682_s12 + $0xc64] ss:$24 sps:$4 sm:$0xff]  }
 0x15e   : > { %15350 = vmatpush1.bf16.msra.mxu0 %v21085_v53  ;;  %14859 = vmatprep.subr.bf16.mxu1 %v21090_v54  ;;  %v21149_v53 = vld [vmem:[%s24682_s12 + $0x3064] ss:$24 sps:$4 sm:$0xff]   ;;  %v21144_v54 = vld [vmem:[%s24682_s12 + $0xc60] ss:$24 sps:$4 sm:$0xff]  }
 0x15f   : > { %15351 = vmatprep.subr.bf16.mxu0 %v21093_v55  ;;  %v21147_v55 = vld [vmem:[%s24682_s12 + $0x3060] ss:$24 sps:$4 sm:$0xff]  }
 0x161   : > { %14860 = vmatpush1.bf16.msra.mxu1 %v21088_v57  ;;  %v21152_v57 = vld [vmem:[%s24682_s12 + $0xc94] ss:$24 sps:$4 sm:$0xff]  }
 0x162   : > { %15352 = vmatpush1.bf16.msra.mxu0 %v21091_v58  ;;  %14861 = vmatprep.subr.bf16.mxu1 %v21096_v59  ;;  %v21155_v58 = vld [vmem:[%s24682_s12 + $0x3094] ss:$24 sps:$4 sm:$0xff]   ;;  %v21150_v59 = vld [vmem:[%s24682_s12 + $0xc90] ss:$24 sps:$4 sm:$0xff]  }
 0x163   : > { %15353 = vmatprep.subr.bf16.mxu0 %v21099_v60  ;;  %v21153_v60 = vld [vmem:[%s24682_s12 + $0x3090] ss:$24 sps:$4 sm:$0xff]  }
 0x165   : > { %14862 = vmatpush1.bf16.msra.mxu1 %v21094_v63  ;;  %v21158_v63 = vld [vmem:[%s24682_s12 + $0xcc4] ss:$24 sps:$4 sm:$0xff]  }
 0x166   : > { %15354 = vmatpush1.bf16.msra.mxu0 %v21097_v15  ;;  %14863 = vmatprep.subr.bf16.mxu1 %v21102_v0  ;;  %v21161_v15 = vld [vmem:[%s24682_s12 + $0x30c4] ss:$24 sps:$4 sm:$0xff]   ;;  %v21156_v0 = vld [vmem:[%s24682_s12 + $0xcc0] ss:$24 sps:$4 sm:$0xff]  }
 0x167   : > { %15355 = vmatprep.subr.bf16.mxu0 %v21105_v1  ;;  %v21159_v1 = vld [vmem:[%s24682_s12 + $0x30c0] ss:$24 sps:$4 sm:$0xff]  }
 0x169   : > { %14864 = vmatpush1.bf16.msra.mxu1 %v21100_v2  ;;  %v21164_v2 = vld [vmem:[%s24682_s12 + $0xcf4] ss:$24 sps:$4 sm:$0xff]  }
 0x16a   : > { %15356 = vmatpush1.bf16.msra.mxu0 %v21103_v3  ;;  %14865 = vmatprep.subr.bf16.mxu1 %v21108_v5  ;;  %v21167_v3 = vld [vmem:[%s24682_s12 + $0x30f4] ss:$24 sps:$4 sm:$0xff]   ;;  %v21162_v5 = vld [vmem:[%s24682_s12 + $0xcf0] ss:$24 sps:$4 sm:$0xff]  }
 0x16b   : > { %15357 = vmatprep.subr.bf16.mxu0 %v21111_v6  ;;  %v21165_v6 = vld [vmem:[%s24682_s12 + $0x30f0] ss:$24 sps:$4 sm:$0xff]  }
 0x16d   : > { %14866 = vmatpush1.bf16.msra.mxu1 %v21106_v9  ;;  %v21170_v9 = vld [vmem:[%s24682_s12 + $0xd24] ss:$24 sps:$4 sm:$0xff]  }
 0x16e   : > { %15358 = vmatpush1.bf16.msra.mxu0 %v21109_v10  ;;  %14867 = vmatprep.subr.bf16.mxu1 %v21114_v45  ;;  %v21173_v10 = vld [vmem:[%s24682_s12 + $0x3124] ss:$24 sps:$4 sm:$0xff]   ;;  %v21168_v45 = vld [vmem:[%s24682_s12 + $0xd20] ss:$24 sps:$4 sm:$0xff]  }
 0x16f   : > { %15359 = vmatprep.subr.bf16.mxu0 %v21117_v48  ;;  %v21171_v48 = vld [vmem:[%s24682_s12 + $0x3120] ss:$24 sps:$4 sm:$0xff]  }
 0x171   : > { %14868 = vmatpush1.bf16.msra.mxu1 %v21112_v13  ;;  %v21176_v13 = vld [vmem:[%s24682_s12 + $0xd54] ss:$24 sps:$4 sm:$0xff]  }
 0x172   : > { %15360 = vmatpush1.bf16.msra.mxu0 %v21115_v14  ;;  %14869 = vmatprep.subr.bf16.mxu1 %v21120_v17  ;;  %v21179_v14 = vld [vmem:[%s24682_s12 + $0x3154] ss:$24 sps:$4 sm:$0xff]   ;;  %v21174_v17 = vld [vmem:[%s24682_s12 + $0xd50] ss:$24 sps:$4 sm:$0xff]  }
 0x173   : > { %15361 = vmatprep.subr.bf16.mxu0 %v21123_v18  ;;  %v21177_v18 = vld [vmem:[%s24682_s12 + $0x3150] ss:$24 sps:$4 sm:$0xff]  }
 0x175   : > { %14870 = vmatpush1.bf16.msra.mxu1 %v21118_v21  ;;  %v21182_v21 = vld [vmem:[%s24682_s12 + $0xd84] ss:$24 sps:$4 sm:$0xff]  }
 0x176   : > { %15362 = vmatpush1.bf16.msra.mxu0 %v21121_v22  ;;  %14871 = vmatprep.subr.bf16.mxu1 %v21126_v25  ;;  %v21185_v22 = vld [vmem:[%s24682_s12 + $0x3184] ss:$24 sps:$4 sm:$0xff]   ;;  %v21180_v25 = vld [vmem:[%s24682_s12 + $0xd80] ss:$24 sps:$4 sm:$0xff]  }
 0x177   : > { %15363 = vmatprep.subr.bf16.mxu0 %v21129_v26  ;;  %v21183_v26 = vld [vmem:[%s24682_s12 + $0x3180] ss:$24 sps:$4 sm:$0xff]  }
 0x179   : > { %14872 = vmatpush1.bf16.msra.mxu1 %v21124_v31  ;;  %v21188_v31 = vld [vmem:[%s24682_s12 + $0xdb4] ss:$24 sps:$4 sm:$0xff]  }
 0x17a   : > { %15364 = vmatpush1.bf16.msra.mxu0 %v21127_v32  ;;  %14882 = vmatprep.subr.bf16.mxu1 %v21133_v33  ;;  %v21191_v32 = vld [vmem:[%s24682_s12 + $0x31b4] ss:$24 sps:$4 sm:$0xff]   ;;  %v21186_v33 = vld [vmem:[%s24682_s12 + $0xdb0] ss:$24 sps:$4 sm:$0xff]  }
 0x17b   : > { %15374 = vmatprep.subr.bf16.mxu0 %v21137_v34  ;;  %v21189_v34 = vld [vmem:[%s24682_s12 + $0x31b0] ss:$24 sps:$4 sm:$0xff]  }
 0x17c   : > { %14874 = vmatmul.mubr.bf16.vlgmr.msra.gmra.mrb[0].mxu1 %v25072_v37 }
 0x17d   : > { %15366 = vmatmul.mubr.bf16.vlgmr.msra.gmra.mrb[0].mxu0 %v25076_v40  ;;  %14883 = vmatpush1.bf16.msra.mxu1 %v21131_v41  ;;  %v21192_v41 = vld [vmem:[%s24682_s12 + $0xde0] ss:$24 sps:$4 sm:$0xff]  }
 0x17e   : > { %15375 = vmatpush1.bf16.msra.mxu0 %v21135_v43  ;;  %14884 = vmatprep.subr.bf16.mxu1 %v21140_v16  ;;  %v21195_v43 = vld [vmem:[%s24682_s12 + $0x31e0] ss:$24 sps:$4 sm:$0xff]   ;;  %v21200_v16 = vld [vmem:[%s24682_s12 + $0xe14] ss:$24 sps:$4 sm:$0xff]  }
 0x17f   : > { %15376 = vmatprep.subr.bf16.mxu0 %v21143_v46  ;;  %14914 = vmatprep.mubr.bf16.mxu1 %v25082_v47  ;;  %v21203_v46 = vld [vmem:[%s24682_s12 + $0x3214] ss:$24 sps:$4 sm:$0xff]  }
 0x180   : > { %15406 = vmatprep.mubr.bf16.mxu0 %v25084_v61 }
 0x181   : > { %14885 = vmatpush1.bf16.msra.mxu1 %v21138_v42  ;;  %v21198_v42 = vld [vmem:[%s24682_s12 + $0xe10] ss:$24 sps:$4 sm:$0xff]  }
 0x182   : > { %15377 = vmatpush1.bf16.msra.mxu0 %v21141_v49  ;;  %14886 = vmatprep.subr.bf16.mxu1 %v21146_v51  ;;  %v21201_v49 = vld [vmem:[%s24682_s12 + $0x3210] ss:$24 sps:$4 sm:$0xff]   ;;  %v21206_v51 = vld [vmem:[%s24682_s12 + $0xe44] ss:$24 sps:$4 sm:$0xff]  }
 0x183   : > { %15378 = vmatprep.subr.bf16.mxu0 %v21149_v53  ;;  %v21209_v53 = vld [vmem:[%s24682_s12 + $0x3244] ss:$24 sps:$4 sm:$0xff]  }
 0x185   : > { %14887 = vmatpush1.bf16.msra.mxu1 %v21144_v54  ;;  %v21204_v54 = vld [vmem:[%s24682_s12 + $0xe40] ss:$24 sps:$4 sm:$0xff]  }
 0x186   : > { %15379 = vmatpush1.bf16.msra.mxu0 %v21147_v55  ;;  %14888 = vmatprep.subr.bf16.mxu1 %v21152_v57  ;;  %v21207_v55 = vld [vmem:[%s24682_s12 + $0x3240] ss:$24 sps:$4 sm:$0xff]   ;;  %v21212_v57 = vld [vmem:[%s24682_s12 + $0xe74] ss:$24 sps:$4 sm:$0xff]  }
 0x187   : > { %15380 = vmatprep.subr.bf16.mxu0 %v21155_v58  ;;  %v21215_v58 = vld [vmem:[%s24682_s12 + $0x3274] ss:$24 sps:$4 sm:$0xff]  }
 0x189   : > { %14889 = vmatpush1.bf16.msra.mxu1 %v21150_v59  ;;  %v21210_v59 = vld [vmem:[%s24682_s12 + $0xe70] ss:$24 sps:$4 sm:$0xff]  }
 0x18a   : > { %15381 = vmatpush1.bf16.msra.mxu0 %v21153_v60  ;;  %14890 = vmatprep.subr.bf16.mxu1 %v21158_v63  ;;  %v21213_v60 = vld [vmem:[%s24682_s12 + $0x3270] ss:$24 sps:$4 sm:$0xff]   ;;  %v21218_v63 = vld [vmem:[%s24682_s12 + $0xea4] ss:$24 sps:$4 sm:$0xff]  }
 0x18b   : > { %15382 = vmatprep.subr.bf16.mxu0 %v21161_v15  ;;  %v21221_v15 = vld [vmem:[%s24682_s12 + $0x32a4] ss:$24 sps:$4 sm:$0xff]  }
 0x18d   : > { %14891 = vmatpush1.bf16.msra.mxu1 %v21156_v0  ;;  %v2683_v0 = vcombine.high %v25045_v19, %v25045_v19  ;;  %v21222_v19 = vld [vmem:[%s24682_s12 + $0xed0] ss:$24 sps:$4 sm:$0xff]  }
 0x18e   : > { %15383 = vmatpush1.bf16.msra.mxu0 %v21159_v1  ;;  %14892 = vmatprep.subr.bf16.mxu1 %v21164_v2  ;;  %v2785_v1 = vcombine.high %v25048_v20, %v25048_v20  ;;  %v21216_v2 = vld [vmem:[%s24682_s12 + $0xea0] ss:$24 sps:$4 sm:$0xff]   ;;  %v21225_v20 = vld [vmem:[%s24682_s12 + $0x32d0] ss:$24 sps:$4 sm:$0xff]  }
 0x18f   : > { %15384 = vmatprep.subr.bf16.mxu0 %v21167_v3  ;;  %v21219_v3 = vld [vmem:[%s24682_s12 + $0x32a0] ss:$24 sps:$4 sm:$0xff]  }
 0x191   : > { %14893 = vmatpush1.bf16.msra.mxu1 %v21162_v5  ;;  %v21224_v5 = vld [vmem:[%s24682_s12 + $0xed4] ss:$24 sps:$4 sm:$0xff]  }
 0x192   : > { %15385 = vmatpush1.bf16.msra.mxu0 %v21165_v6  ;;  %14894 = vmatprep.subr.bf16.mxu1 %v21170_v9  ;;  %v21227_v6 = vld [vmem:[%s24682_s12 + $0x32d4] ss:$24 sps:$4 sm:$0xff]   ;;  %v25151_v9 = vrot.slane %v2683_v0, %v24740_v50 }
 0x193   : > { %15386 = vmatprep.subr.bf16.mxu0 %v21173_v10  ;;  %v25154_v10 = vrot.slane %v2785_v1, %v24740_v50  ;;  %v21272_v0 = vld [vmem:[%s24682_s12 + $0x1054] ss:$24 sps:$4 sm:$0xff]  }
 0x194   : > { %v21275_v1 = vld [vmem:[%s24682_s12 + $0x3454] ss:$24 sps:$4 sm:$0xff]  }
 0x195   : > { %14895 = vmatpush1.bf16.msra.mxu1 %v21168_v45  ;;  %v21230_v45 = vld [vmem:[%s24682_s12 + $0xf04] ss:$24 sps:$4 sm:$0xff]  }
 0x196   : > { %15387 = vmatpush1.bf16.msra.mxu0 %v21171_v48  ;;  %14896 = vmatprep.subr.bf16.mxu1 %v21176_v13  ;;  %v21233_v48 = vld [vmem:[%s24682_s12 + $0x3304] ss:$24 sps:$4 sm:$0xff]   ;;  %v2699_v13 = vcombine.high %v25151_v9, %v25151_v9 }
 0x197   : > { %15388 = vmatprep.subr.bf16.mxu0 %v21179_v14  ;;  %v2801_v14 = vcombine.high %v25154_v10, %v25154_v10 }
 0x199   : > { %14897 = vmatpush1.bf16.msra.mxu1 %v21174_v17  ;;  %v25166_v17 = vpack.c.bf16 %v25056_v27, %v25056_v27  ;;  %v25178_v27 = vpack.c.bf16 %v2801_v14, %v2801_v14  ;;  %v21285_v14 = vld [vmem:[%s24682_s12 + $0x34b0] ss:$24 sps:$4 sm:$0xff]  }
 0x19a   : > { %15389 = vmatpush1.bf16.msra.mxu0 %v21177_v18  ;;  %14898 = vmatprep.subr.bf16.mxu1 %v21182_v21  ;;  %v25170_v18 = vpack.c.bf16 %v25060_v28, %v25060_v28  ;;  %v21228_v21 = vld [vmem:[%s24682_s12 + $0xf00] ss:$24 sps:$4 sm:$0xff]   ;;  %v21234_v28 = vld [vmem:[%s24682_s12 + $0xf30] ss:$24 sps:$4 sm:$0xff]  }
 0x19b   : > { %15390 = vmatprep.subr.bf16.mxu0 %v21185_v22  ;;  %v21231_v22 = vld [vmem:[%s24682_s12 + $0x3300] ss:$24 sps:$4 sm:$0xff]  }
 0x19d   : > { %14899 = vmatpush1.bf16.msra.mxu1 %v21180_v25  ;;  %v21236_v25 = vld [vmem:[%s24682_s12 + $0xf34] ss:$24 sps:$4 sm:$0xff]  }
 0x19e   : > { %15391 = vmatpush1.bf16.msra.mxu0 %v21183_v26  ;;  %14900 = vmatprep.subr.bf16.mxu1 %v21188_v31  ;;  %v21239_v26 = vld [vmem:[%s24682_s12 + $0x3334] ss:$24 sps:$4 sm:$0xff]   ;;  %v25176_v31 = vpack.c.bf16 %v2699_v13, %v2699_v13  ;;  %v21282_v13 = vld [vmem:[%s24682_s12 + $0x10b0] ss:$24 sps:$4 sm:$0xff]  }
 0x19f   : > { %15392 = vmatprep.subr.bf16.mxu0 %v21191_v32  ;;  %v21237_v32 = vld [vmem:[%s24682_s12 + $0x3330] ss:$24 sps:$4 sm:$0xff]  }
 0x1a1   : > { %14901 = vmatpush1.bf16.msra.mxu1 %v21186_v33  ;;  %v21242_v33 = vld [vmem:[%s24682_s12 + $0xf64] ss:$24 sps:$4 sm:$0xff]  }
 0x1a2   : > { %15393 = vmatpush1.bf16.msra.mxu0 %v21189_v34  ;;  %14902 = vmatprep.subr.bf16.mxu1 %v21194_v35  ;;  %v21245_v34 = vld [vmem:[%s24682_s12 + $0x3364] ss:$24 sps:$4 sm:$0xff]   ;;  %v21240_v35 = vld [vmem:[%s24682_s12 + $0xf60] ss:$24 sps:$4 sm:$0xff]  }
 0x1a3   : > { %15394 = vmatprep.subr.bf16.mxu0 %v21197_v36  ;;  %v21243_v36 = vld [vmem:[%s24682_s12 + $0x3360] ss:$24 sps:$4 sm:$0xff]  }
 0x1a5   : > { %14903 = vmatpush1.bf16.msra.mxu1 %v21192_v41  ;;  %v21248_v41 = vld [vmem:[%s24682_s12 + $0xf94] ss:$24 sps:$4 sm:$0xff]  }
 0x1a6   : > { %15395 = vmatpush1.bf16.msra.mxu0 %v21195_v43  ;;  %14904 = vmatprep.subr.bf16.mxu1 %v21200_v16  ;;  %v21251_v43 = vld [vmem:[%s24682_s12 + $0x3394] ss:$24 sps:$4 sm:$0xff]   ;;  %v21246_v16 = vld [vmem:[%s24682_s12 + $0xf90] ss:$24 sps:$4 sm:$0xff]  }
 0x1a7   : > { %15396 = vmatprep.subr.bf16.mxu0 %v21203_v46  ;;  %v21249_v46 = vld [vmem:[%s24682_s12 + $0x3390] ss:$24 sps:$4 sm:$0xff]  }
 0x1a9   : > { %14905 = vmatpush1.bf16.msra.mxu1 %v21198_v42  ;;  %v21254_v42 = vld [vmem:[%s24682_s12 + $0xfc4] ss:$24 sps:$4 sm:$0xff]  }
 0x1aa   : > { %15397 = vmatpush1.bf16.msra.mxu0 %v21201_v49  ;;  %14906 = vmatprep.subr.bf16.mxu1 %v21206_v51  ;;  %v21257_v49 = vld [vmem:[%s24682_s12 + $0x33c4] ss:$24 sps:$4 sm:$0xff]   ;;  %v21252_v51 = vld [vmem:[%s24682_s12 + $0xfc0] ss:$24 sps:$4 sm:$0xff]  }
 0x1ab   : > { %15398 = vmatprep.subr.bf16.mxu0 %v21209_v53  ;;  %v21255_v53 = vld [vmem:[%s24682_s12 + $0x33c0] ss:$24 sps:$4 sm:$0xff]  }
 0x1ad   : > { %14907 = vmatpush1.bf16.msra.mxu1 %v21204_v54  ;;  %v21260_v54 = vld [vmem:[%s24682_s12 + $0xff4] ss:$24 sps:$4 sm:$0xff]  }
 0x1ae   : > { %15399 = vmatpush1.bf16.msra.mxu0 %v21207_v55  ;;  %14908 = vmatprep.subr.bf16.mxu1 %v21212_v57  ;;  %v21263_v55 = vld [vmem:[%s24682_s12 + $0x33f4] ss:$24 sps:$4 sm:$0xff]   ;;  %v21258_v57 = vld [vmem:[%s24682_s12 + $0xff0] ss:$24 sps:$4 sm:$0xff]  }
 0x1af   : > { %15400 = vmatprep.subr.bf16.mxu0 %v21215_v58  ;;  %v21261_v58 = vld [vmem:[%s24682_s12 + $0x33f0] ss:$24 sps:$4 sm:$0xff]  }
 0x1b1   : > { %14909 = vmatpush1.bf16.msra.mxu1 %v21210_v59  ;;  %v21266_v59 = vld [vmem:[%s24682_s12 + $0x1024] ss:$24 sps:$4 sm:$0xff]  }
 0x1b2   : > { %15401 = vmatpush1.bf16.msra.mxu0 %v21213_v60  ;;  %14910 = vmatprep.subr.bf16.mxu1 %v21218_v63  ;;  %v21269_v60 = vld [vmem:[%s24682_s12 + $0x3424] ss:$24 sps:$4 sm:$0xff]   ;;  %v21264_v63 = vld [vmem:[%s24682_s12 + $0x1020] ss:$24 sps:$4 sm:$0xff]  }
 0x1b3   : > { %15402 = vmatprep.subr.bf16.mxu0 %v21221_v15  ;;  %v21267_v15 = vld [vmem:[%s24682_s12 + $0x3420] ss:$24 sps:$4 sm:$0xff]  }
 0x1b5   : > { %14911 = vmatpush1.bf16.msra.mxu1 %v21216_v2  ;;  %v21270_v2 = vld [vmem:[%s24682_s12 + $0x1050] ss:$24 sps:$4 sm:$0xff]  }
 0x1b6   : > { %15403 = vmatpush1.bf16.msra.mxu0 %v21219_v3  ;;  %14912 = vmatprep.subr.bf16.mxu1 %v21224_v5  ;;  %v21273_v3 = vld [vmem:[%s24682_s12 + $0x3450] ss:$24 sps:$4 sm:$0xff]   ;;  %v21278_v5 = vld [vmem:[%s24682_s12 + $0x1084] ss:$24 sps:$4 sm:$0xff]  }
 0x1b7   : > { %15404 = vmatprep.subr.bf16.mxu0 %v21227_v6  ;;  %v21281_v6 = vld [vmem:[%s24682_s12 + $0x3484] ss:$24 sps:$4 sm:$0xff]  }
 0x1b9   : > { %14913 = vmatpush1.bf16.msra.mxu1 %v21222_v19  ;;  %v21276_v19 = vld [vmem:[%s24682_s12 + $0x1080] ss:$24 sps:$4 sm:$0xff]  }
 0x1ba   : > { %15405 = vmatpush1.bf16.msra.mxu0 %v21225_v20  ;;  %14923 = vmatprep.subr.bf16.mxu1 %v21230_v45  ;;  %v21279_v20 = vld [vmem:[%s24682_s12 + $0x3480] ss:$24 sps:$4 sm:$0xff]   ;;  %v21284_v45 = vld [vmem:[%s24682_s12 + $0x10b4] ss:$24 sps:$4 sm:$0xff]  }
 0x1bb   : > { %15415 = vmatprep.subr.bf16.mxu0 %v21233_v48  ;;  %v21287_v48 = vld [vmem:[%s24682_s12 + $0x34b4] ss:$24 sps:$4 sm:$0xff]  }
 0x1bc   : > { %14915 = vmatmul.mubr.bf16.vlgmr.msra.gmra.mrb[0].mxu1 %v25166_v17 }
 0x1bd   : > { %15407 = vmatmul.mubr.bf16.vlgmr.msra.gmra.mrb[0].mxu0 %v25170_v18  ;;  %14924 = vmatpush1.bf16.msra.mxu1 %v21228_v21  ;;  %v21290_v21 = vld [vmem:[%s24682_s12 + $0x10e4] ss:$24 sps:$4 sm:$0xff]  }
 0x1be   : > { %15416 = vmatpush1.bf16.msra.mxu0 %v21231_v22  ;;  %14925 = vmatprep.subr.bf16.mxu1 %v21236_v25  ;;  %v21293_v22 = vld [vmem:[%s24682_s12 + $0x34e4] ss:$24 sps:$4 sm:$0xff]   ;;  %v21288_v25 = vld [vmem:[%s24682_s12 + $0x10e0] ss:$24 sps:$4 sm:$0xff]  }
 0x1bf   : > { %15417 = vmatprep.subr.bf16.mxu0 %v21239_v26  ;;  %14955 = vmatprep.mubr.bf16.mxu1 %v25176_v31  ;;  %v21291_v26 = vld [vmem:[%s24682_s12 + $0x34e0] ss:$24 sps:$4 sm:$0xff]  }
 0x1c0   : > { %15447 = vmatprep.mubr.bf16.mxu0 %v25178_v27 }
 0x1c1   : > { %14926 = vmatpush1.bf16.msra.mxu1 %v21234_v28  ;;  %v21296_v28 = vld [vmem:[%s24682_s12 + $0x1114] ss:$24 sps:$4 sm:$0xff]  }
 0x1c2   : > { %15418 = vmatpush1.bf16.msra.mxu0 %v21237_v32  ;;  %14927 = vmatprep.subr.bf16.mxu1 %v21242_v33  ;;  %v21299_v32 = vld [vmem:[%s24682_s12 + $0x3514] ss:$24 sps:$4 sm:$0xff]   ;;  %v21294_v33 = vld [vmem:[%s24682_s12 + $0x1110] ss:$24 sps:$4 sm:$0xff]  }
 0x1c3   : > { %15419 = vmatprep.subr.bf16.mxu0 %v21245_v34  ;;  %v21297_v34 = vld [vmem:[%s24682_s12 + $0x3510] ss:$24 sps:$4 sm:$0xff]  }
 0x1c5   : > { %14928 = vmatpush1.bf16.msra.mxu1 %v21240_v35  ;;  %v21302_v35 = vld [vmem:[%s24682_s12 + $0x1144] ss:$24 sps:$4 sm:$0xff]  }
 0x1c6   : > { %15420 = vmatpush1.bf16.msra.mxu0 %v21243_v36  ;;  %14929 = vmatprep.subr.bf16.mxu1 %v21248_v41  ;;  %v21305_v36 = vld [vmem:[%s24682_s12 + $0x3544] ss:$24 sps:$4 sm:$0xff]   ;;  %v21300_v41 = vld [vmem:[%s24682_s12 + $0x1140] ss:$24 sps:$4 sm:$0xff]  }
 0x1c7   : > { %15421 = vmatprep.subr.bf16.mxu0 %v21251_v43  ;;  %v21303_v43 = vld [vmem:[%s24682_s12 + $0x3540] ss:$24 sps:$4 sm:$0xff]  }
 0x1c9   : > { %14930 = vmatpush1.bf16.msra.mxu1 %v21246_v16  ;;  %v21308_v16 = vld [vmem:[%s24682_s12 + $0x1174] ss:$24 sps:$4 sm:$0xff]  }
 0x1ca   : > { %15422 = vmatpush1.bf16.msra.mxu0 %v21249_v46  ;;  %14931 = vmatprep.subr.bf16.mxu1 %v21254_v42  ;;  %v21311_v46 = vld [vmem:[%s24682_s12 + $0x3574] ss:$24 sps:$4 sm:$0xff]   ;;  %v21306_v42 = vld [vmem:[%s24682_s12 + $0x1170] ss:$24 sps:$4 sm:$0xff]  }
 0x1cb   : > { %15423 = vmatprep.subr.bf16.mxu0 %v21257_v49  ;;  %v21309_v49 = vld [vmem:[%s24682_s12 + $0x3570] ss:$24 sps:$4 sm:$0xff]  }
 0x1cd   : > { %14932 = vmatpush1.bf16.msra.mxu1 %v21252_v51  ;;  %v21314_v51 = vld [vmem:[%s24682_s12 + $0x11a4] ss:$24 sps:$4 sm:$0xff]  }
 0x1ce   : > { %15424 = vmatpush1.bf16.msra.mxu0 %v21255_v53  ;;  %14933 = vmatprep.subr.bf16.mxu1 %v21260_v54  ;;  %v21317_v53 = vld [vmem:[%s24682_s12 + $0x35a4] ss:$24 sps:$4 sm:$0xff]  }
 0x1cf   : > { %15425 = vmatprep.subr.bf16.mxu0 %v21263_v55  ;;  %v25237_v54 = vld [vmem:[%s24675_s30 + $0x18] sm:$0xff]  ;;  %v25240_v55 = vld [vmem:[%s24675_s30 + $0x48] sm:$0xff] }
 0x1d1   : > { %14934 = vmatpush1.bf16.msra.mxu1 %v21258_v57  ;;  %v21312_v57 = vld [vmem:[%s24682_s12 + $0x11a0] ss:$24 sps:$4 sm:$0xff]  }
 0x1d2   : > { %15426 = vmatpush1.bf16.msra.mxu0 %v21261_v58  ;;  %14935 = vmatprep.subr.bf16.mxu1 %v21266_v59  ;;  %v21315_v58 = vld [vmem:[%s24682_s12 + $0x35a0] ss:$24 sps:$4 sm:$0xff]   ;;  %v21320_v59 = vld [vmem:[%s24682_s12 + $0x11d4] ss:$24 sps:$4 sm:$0xff]  }
 0x1d3   : > { %15427 = vmatprep.subr.bf16.mxu0 %v21269_v60  ;;  %v21323_v60 = vld [vmem:[%s24682_s12 + $0x35d4] ss:$24 sps:$4 sm:$0xff]  }
 0x1d5   : > { %14936 = vmatpush1.bf16.msra.mxu1 %v21264_v63  ;;  %v25248_v63 = vrot.slane %v25237_v54, %v24740_v50 }
 0x1d6   : > { %15428 = vmatpush1.bf16.msra.mxu0 %v21267_v15  ;;  %14937 = vmatprep.subr.bf16.mxu1 %v21272_v0  ;;  %v25252_v15 = vrot.slane %v25240_v55, %v24740_v50  ;;  %v21318_v0 = vld [vmem:[%s24682_s12 + $0x11d0] ss:$24 sps:$4 sm:$0xff]  }
 0x1d7   : > { %15429 = vmatprep.subr.bf16.mxu0 %v21275_v1  ;;  %v21321_v1 = vld [vmem:[%s24682_s12 + $0x35d0] ss:$24 sps:$4 sm:$0xff]  }
 0x1d9   : > { %14938 = vmatpush1.bf16.msra.mxu1 %v21270_v2  ;;  %v21327_v2 = vld [vmem:[%s24682_s12 + $0x1204] ss:$24 sps:$4 sm:$0xff]  }
 0x1da   : > { %15430 = vmatpush1.bf16.msra.mxu0 %v21273_v3  ;;  %14939 = vmatprep.subr.bf16.mxu1 %v21278_v5  ;;  %v21331_v3 = vld [vmem:[%s24682_s12 + $0x3604] ss:$24 sps:$4 sm:$0xff]   ;;  %v2715_v5 = vcombine.high %v25248_v63, %v25248_v63 }
 0x1db   : > { %15431 = vmatprep.subr.bf16.mxu0 %v21281_v6  ;;  %v2817_v6 = vcombine.high %v25252_v15, %v25252_v15 }
 0x1dd   : > { %14940 = vmatpush1.bf16.msra.mxu1 %v21276_v19  ;;  %v25264_v19 = vpack.c.bf16 %v25151_v9, %v25151_v9  ;;  %v25276_v9 = vpack.c.bf16 %v2817_v6, %v2817_v6  ;;  %v21379_v6 = vld [vmem:[%s24682_s12 + $0x3784] ss:$24 sps:$4 sm:$0xff]  }
 0x1de   : > { %15432 = vmatpush1.bf16.msra.mxu0 %v21279_v20  ;;  %14941 = vmatprep.subr.bf16.mxu1 %v21284_v45  ;;  %v25268_v20 = vpack.c.bf16 %v25154_v10, %v25154_v10  ;;  %v21325_v45 = vld [vmem:[%s24682_s12 + $0x1200] ss:$24 sps:$4 sm:$0xff]   ;;  %v21332_v10 = vld [vmem:[%s24682_s12 + $0x1230] ss:$24 sps:$4 sm:$0xff]  }
 0x1df   : > { %15433 = vmatprep.subr.bf16.mxu0 %v21287_v48  ;;  %v21329_v48 = vld [vmem:[%s24682_s12 + $0x3600] ss:$24 sps:$4 sm:$0xff]  }
 0x1e1   : > { %14942 = vmatpush1.bf16.msra.mxu1 %v21282_v13  ;;  %v21334_v13 = vld [vmem:[%s24682_s12 + $0x1234] ss:$24 sps:$4 sm:$0xff]  }
 0x1e2   : > { %15434 = vmatpush1.bf16.msra.mxu0 %v21285_v14  ;;  %14943 = vmatprep.subr.bf16.mxu1 %v21290_v21  ;;  %v21337_v14 = vld [vmem:[%s24682_s12 + $0x3634] ss:$24 sps:$4 sm:$0xff]   ;;  %v25274_v21 = vpack.c.bf16 %v2715_v5, %v2715_v5  ;;  %v21376_v5 = vld [vmem:[%s24682_s12 + $0x1384] ss:$24 sps:$4 sm:$0xff]  }
 0x1e3   : > { %15435 = vmatprep.subr.bf16.mxu0 %v21293_v22  ;;  %v21335_v22 = vld [vmem:[%s24682_s12 + $0x3630] ss:$24 sps:$4 sm:$0xff]  }
 0x1e5   : > { %14944 = vmatpush1.bf16.msra.mxu1 %v21288_v25  ;;  %v21340_v25 = vld [vmem:[%s24682_s12 + $0x1264] ss:$24 sps:$4 sm:$0xff]  }
 0x1e6   : > { %15436 = vmatpush1.bf16.msra.mxu0 %v21291_v26  ;;  %14945 = vmatprep.subr.bf16.mxu1 %v21296_v28  ;;  %v21343_v26 = vld [vmem:[%s24682_s12 + $0x3664] ss:$24 sps:$4 sm:$0xff]   ;;  %v21338_v28 = vld [vmem:[%s24682_s12 + $0x1260] ss:$24 sps:$4 sm:$0xff]  }
 0x1e7   : > { %15437 = vmatprep.subr.bf16.mxu0 %v21299_v32  ;;  %v21341_v32 = vld [vmem:[%s24682_s12 + $0x3660] ss:$24 sps:$4 sm:$0xff]  }
 0x1e9   : > { %14946 = vmatpush1.bf16.msra.mxu1 %v21294_v33  ;;  %v21346_v33 = vld [vmem:[%s24682_s12 + $0x1294] ss:$24 sps:$4 sm:$0xff]  }
 0x1ea   : > { %15438 = vmatpush1.bf16.msra.mxu0 %v21297_v34  ;;  %14947 = vmatprep.subr.bf16.mxu1 %v21302_v35  ;;  %v21349_v34 = vld [vmem:[%s24682_s12 + $0x3694] ss:$24 sps:$4 sm:$0xff]   ;;  %v21344_v35 = vld [vmem:[%s24682_s12 + $0x1290] ss:$24 sps:$4 sm:$0xff]  }
 0x1eb   : > { %15439 = vmatprep.subr.bf16.mxu0 %v21305_v36  ;;  %v21347_v36 = vld [vmem:[%s24682_s12 + $0x3690] ss:$24 sps:$4 sm:$0xff]  }
 0x1ed   : > { %14948 = vmatpush1.bf16.msra.mxu1 %v21300_v41  ;;  %v21352_v41 = vld [vmem:[%s24682_s12 + $0x12c4] ss:$24 sps:$4 sm:$0xff]  }
 0x1ee   : > { %15440 = vmatpush1.bf16.msra.mxu0 %v21303_v43  ;;  %14949 = vmatprep.subr.bf16.mxu1 %v21308_v16  ;;  %v21355_v43 = vld [vmem:[%s24682_s12 + $0x36c4] ss:$24 sps:$4 sm:$0xff]   ;;  %v21350_v16 = vld [vmem:[%s24682_s12 + $0x12c0] ss:$24 sps:$4 sm:$0xff]  }
 0x1ef   : > { %15441 = vmatprep.subr.bf16.mxu0 %v21311_v46  ;;  %v21353_v46 = vld [vmem:[%s24682_s12 + $0x36c0] ss:$24 sps:$4 sm:$0xff]  }
 0x1f1   : > { %14950 = vmatpush1.bf16.msra.mxu1 %v21306_v42  ;;  %v21358_v42 = vld [vmem:[%s24682_s12 + $0x12f4] ss:$24 sps:$4 sm:$0xff]  }
 0x1f2   : > { %15442 = vmatpush1.bf16.msra.mxu0 %v21309_v49  ;;  %14951 = vmatprep.subr.bf16.mxu1 %v21314_v51  ;;  %v21361_v49 = vld [vmem:[%s24682_s12 + $0x36f4] ss:$24 sps:$4 sm:$0xff]   ;;  %v21356_v51 = vld [vmem:[%s24682_s12 + $0x12f0] ss:$24 sps:$4 sm:$0xff]  }
 0x1f3   : > { %15443 = vmatprep.subr.bf16.mxu0 %v21317_v53  ;;  %v21359_v53 = vld [vmem:[%s24682_s12 + $0x36f0] ss:$24 sps:$4 sm:$0xff]  }
 0x1f5   : > { %14952 = vmatpush1.bf16.msra.mxu1 %v21312_v57  ;;  %v21364_v57 = vld [vmem:[%s24682_s12 + $0x1324] ss:$24 sps:$4 sm:$0xff]  }
 0x1f6   : > { %15444 = vmatpush1.bf16.msra.mxu0 %v21315_v58  ;;  %14953 = vmatprep.subr.bf16.mxu1 %v21320_v59  ;;  %v21367_v58 = vld [vmem:[%s24682_s12 + $0x3724] ss:$24 sps:$4 sm:$0xff]   ;;  %v21362_v59 = vld [vmem:[%s24682_s12 + $0x1320] ss:$24 sps:$4 sm:$0xff]  }
 0x1f7   : > { %15445 = vmatprep.subr.bf16.mxu0 %v21323_v60  ;;  %v21365_v60 = vld [vmem:[%s24682_s12 + $0x3720] ss:$24 sps:$4 sm:$0xff]  }
 0x1f9   : > { %14954 = vmatpush1.bf16.msra.mxu1 %v21318_v0  ;;  %v21370_v0 = vld [vmem:[%s24682_s12 + $0x1354] ss:$24 sps:$4 sm:$0xff]  }
 0x1fa   : > { %15446 = vmatpush1.bf16.msra.mxu0 %v21321_v1  ;;  %14964 = vmatprep.subr.bf16.mxu1 %v21327_v2  ;;  %v21373_v1 = vld [vmem:[%s24682_s12 + $0x3754] ss:$24 sps:$4 sm:$0xff]   ;;  %v21368_v2 = vld [vmem:[%s24682_s12 + $0x1350] ss:$24 sps:$4 sm:$0xff]  }
 0x1fb   : > { %15456 = vmatprep.subr.bf16.mxu0 %v21331_v3  ;;  %v21371_v3 = vld [vmem:[%s24682_s12 + $0x3750] ss:$24 sps:$4 sm:$0xff]  }
 0x1fc   : > { %14956 = vmatmul.mubr.bf16.vlgmr.msra.gmra.mrb[0].mxu1 %v25264_v19 }
 0x1fd   : > { %15448 = vmatmul.mubr.bf16.vlgmr.msra.gmra.mrb[0].mxu0 %v25268_v20  ;;  %14965 = vmatpush1.bf16.msra.mxu1 %v21325_v45  ;;  %v21374_v45 = vld [vmem:[%s24682_s12 + $0x1380] ss:$24 sps:$4 sm:$0xff]  }
 0x1fe   : > { %15457 = vmatpush1.bf16.msra.mxu0 %v21329_v48  ;;  %14966 = vmatprep.subr.bf16.mxu1 %v21334_v13  ;;  %v21377_v48 = vld [vmem:[%s24682_s12 + $0x3780] ss:$24 sps:$4 sm:$0xff]   ;;  %v21382_v13 = vld [vmem:[%s24682_s12 + $0x13b4] ss:$24 sps:$4 sm:$0xff]  }
 0x1ff   : > { %15458 = vmatprep.subr.bf16.mxu0 %v21337_v14  ;;  %14996 = vmatprep.mubr.bf16.mxu1 %v25274_v21  ;;  %v21385_v14 = vld [vmem:[%s24682_s12 + $0x37b4] ss:$24 sps:$4 sm:$0xff]  }
 0x200   : > { %15488 = vmatprep.mubr.bf16.mxu0 %v25276_v9 }
 0x201   : > { %14967 = vmatpush1.bf16.msra.mxu1 %v21332_v10  ;;  %v21380_v10 = vld [vmem:[%s24682_s12 + $0x13b0] ss:$24 sps:$4 sm:$0xff]  }
 0x202   : > { %15459 = vmatpush1.bf16.msra.mxu0 %v21335_v22  ;;  %14968 = vmatprep.subr.bf16.mxu1 %v21340_v25  ;;  %v21383_v22 = vld [vmem:[%s24682_s12 + $0x37b0] ss:$24 sps:$4 sm:$0xff]   ;;  %v21388_v25 = vld [vmem:[%s24682_s12 + $0x13e4] ss:$24 sps:$4 sm:$0xff]  }
 0x203   : > { %15460 = vmatprep.subr.bf16.mxu0 %v21343_v26  ;;  %v21391_v26 = vld [vmem:[%s24682_s12 + $0x37e4] ss:$24 sps:$4 sm:$0xff]  }
 0x205   : > { %14969 = vmatpush1.bf16.msra.mxu1 %v21338_v28  ;;  %v21386_v28 = vld [vmem:[%s24682_s12 + $0x13e0] ss:$24 sps:$4 sm:$0xff]  }
 0x206   : > { %15461 = vmatpush1.bf16.msra.mxu0 %v21341_v32  ;;  %14970 = vmatprep.subr.bf16.mxu1 %v21346_v33  ;;  %v21389_v32 = vld [vmem:[%s24682_s12 + $0x37e0] ss:$24 sps:$4 sm:$0xff]   ;;  %v21394_v33 = vld [vmem:[%s24682_s12 + $0x1414] ss:$24 sps:$4 sm:$0xff]  }
 0x207   : > { %15462 = vmatprep.subr.bf16.mxu0 %v21349_v34  ;;  %v21397_v34 = vld [vmem:[%s24682_s12 + $0x3814] ss:$24 sps:$4 sm:$0xff]  }
 0x209   : > { %14971 = vmatpush1.bf16.msra.mxu1 %v21344_v35  ;;  %v21392_v35 = vld [vmem:[%s24682_s12 + $0x1410] ss:$24 sps:$4 sm:$0xff]  }
 0x20a   : > { %15463 = vmatpush1.bf16.msra.mxu0 %v21347_v36  ;;  %14972 = vmatprep.subr.bf16.mxu1 %v21352_v41  ;;  %v21395_v36 = vld [vmem:[%s24682_s12 + $0x3810] ss:$24 sps:$4 sm:$0xff]   ;;  %v21400_v41 = vld [vmem:[%s24682_s12 + $0x1444] ss:$24 sps:$4 sm:$0xff]  }
 0x20b   : > { %15464 = vmatprep.subr.bf16.mxu0 %v21355_v43  ;;  %v21403_v43 = vld [vmem:[%s24682_s12 + $0x3844] ss:$24 sps:$4 sm:$0xff]  }
 0x20d   : > { %14973 = vmatpush1.bf16.msra.mxu1 %v21350_v16  ;;  %v21398_v16 = vld [vmem:[%s24682_s12 + $0x1440] ss:$24 sps:$4 sm:$0xff]  }
 0x20e   : > { %15465 = vmatpush1.bf16.msra.mxu0 %v21353_v46  ;;  %14974 = vmatprep.subr.bf16.mxu1 %v21358_v42  ;;  %v21401_v46 = vld [vmem:[%s24682_s12 + $0x3840] ss:$24 sps:$4 sm:$0xff]   ;;  %v21406_v42 = vld [vmem:[%s24682_s12 + $0x1474] ss:$24 sps:$4 sm:$0xff]  }
 0x20f   : > { %15466 = vmatprep.subr.bf16.mxu0 %v21361_v49  ;;  %v21409_v49 = vld [vmem:[%s24682_s12 + $0x3874] ss:$24 sps:$4 sm:$0xff]  }
 0x211   : > { %14975 = vmatpush1.bf16.msra.mxu1 %v21356_v51  ;;  %v21404_v51 = vld [vmem:[%s24682_s12 + $0x1470] ss:$24 sps:$4 sm:$0xff]  }
 0x212   : > { %15467 = vmatpush1.bf16.msra.mxu0 %v21359_v53  ;;  %14976 = vmatprep.subr.bf16.mxu1 %v21364_v57  ;;  %v21407_v53 = vld [vmem:[%s24682_s12 + $0x3870] ss:$24 sps:$4 sm:$0xff]   ;;  %v21412_v57 = vld [vmem:[%s24682_s12 + $0x14a4] ss:$24 sps:$4 sm:$0xff]  }
 0x213   : > { %15468 = vmatprep.subr.bf16.mxu0 %v21367_v58  ;;  %v21415_v58 = vld [vmem:[%s24682_s12 + $0x38a4] ss:$24 sps:$4 sm:$0xff]  }
 0x215   : > { %14977 = vmatpush1.bf16.msra.mxu1 %v21362_v59  ;;  %v2700_v59 = vcombine.high %v25237_v54, %v25237_v54  ;;  %v21416_v54 = vld [vmem:[%s24682_s12 + $0x14d0] ss:$24 sps:$4 sm:$0xff]  }
 0x216   : > { %15469 = vmatpush1.bf16.msra.mxu0 %v21365_v60  ;;  %14978 = vmatprep.subr.bf16.mxu1 %v21370_v0  ;;  %v2802_v60 = vcombine.high %v25240_v55, %v25240_v55  ;;  %v21410_v0 = vld [vmem:[%s24682_s12 + $0x14a0] ss:$24 sps:$4 sm:$0xff]   ;;  %v21419_v55 = vld [vmem:[%s24682_s12 + $0x38d0] ss:$24 sps:$4 sm:$0xff]  }
 0x217   : > { %15470 = vmatprep.subr.bf16.mxu0 %v21373_v1  ;;  %v21413_v1 = vld [vmem:[%s24682_s12 + $0x38a0] ss:$24 sps:$4 sm:$0xff]  }
 0x219   : > { %14979 = vmatpush1.bf16.msra.mxu1 %v21368_v2  ;;  %v21418_v2 = vld [vmem:[%s24682_s12 + $0x14d4] ss:$24 sps:$4 sm:$0xff]  }
 0x21a   : > { %15471 = vmatpush1.bf16.msra.mxu0 %v21371_v3  ;;  %14980 = vmatprep.subr.bf16.mxu1 %v21376_v5  ;;  %v21421_v3 = vld [vmem:[%s24682_s12 + $0x38d4] ss:$24 sps:$4 sm:$0xff]   ;;  %v25343_v5 = vrot.slane %v2700_v59, %v24740_v50 }
 0x21b   : > { %15472 = vmatprep.subr.bf16.mxu0 %v21379_v6  ;;  %v25346_v6 = vrot.slane %v2802_v60, %v24740_v50  ;;  %v21454_v59 = vld [vmem:[%s24682_s12 + $0x15f4] ss:$24 sps:$4 sm:$0xff]  }
 0x21c   : > { %v21457_v60 = vld [vmem:[%s24682_s12 + $0x39f4] ss:$24 sps:$4 sm:$0xff]  }
 0x21d   : > { %14981 = vmatpush1.bf16.msra.mxu1 %v21374_v45  ;;  %v21424_v45 = vld [vmem:[%s24682_s12 + $0x1504] ss:$24 sps:$4 sm:$0xff]  }
 0x21e   : > { %15473 = vmatpush1.bf16.msra.mxu0 %v21377_v48  ;;  %14982 = vmatprep.subr.bf16.mxu1 %v21382_v13  ;;  %v21427_v48 = vld [vmem:[%s24682_s12 + $0x3904] ss:$24 sps:$4 sm:$0xff]   ;;  %v2716_v13 = vcombine.high %v25343_v5, %v25343_v5 }
 0x21f   : > { %15474 = vmatprep.subr.bf16.mxu0 %v21385_v14  ;;  %v2818_v14 = vcombine.high %v25346_v6, %v25346_v6 }
 0x221   : > { %14983 = vmatpush1.bf16.msra.mxu1 %v21380_v10  ;;  %v25358_v10 = vpack.c.bf16 %v25248_v63, %v25248_v63  ;;  %v25370_v63 = vpack.c.bf16 %v2818_v14, %v2818_v14  ;;  %v21467_v14 = vld [vmem:[%s24682_s12 + $0x3a50] ss:$24 sps:$4 sm:$0xff]  }
 0x222   : > { %15475 = vmatpush1.bf16.msra.mxu0 %v21383_v22  ;;  %14984 = vmatprep.subr.bf16.mxu1 %v21388_v25  ;;  %v25362_v22 = vpack.c.bf16 %v25252_v15, %v25252_v15  ;;  %v21422_v25 = vld [vmem:[%s24682_s12 + $0x1500] ss:$24 sps:$4 sm:$0xff]   ;;  %v21428_v15 = vld [vmem:[%s24682_s12 + $0x1530] ss:$24 sps:$4 sm:$0xff]  }
 0x223   : > { %15476 = vmatprep.subr.bf16.mxu0 %v21391_v26  ;;  %v21425_v26 = vld [vmem:[%s24682_s12 + $0x3900] ss:$24 sps:$4 sm:$0xff]  }
 0x225   : > { %14985 = vmatpush1.bf16.msra.mxu1 %v21386_v28  ;;  %v21430_v28 = vld [vmem:[%s24682_s12 + $0x1534] ss:$24 sps:$4 sm:$0xff]  }
 0x226   : > { %15477 = vmatpush1.bf16.msra.mxu0 %v21389_v32  ;;  %14986 = vmatprep.subr.bf16.mxu1 %v21394_v33  ;;  %v21433_v32 = vld [vmem:[%s24682_s12 + $0x3934] ss:$24 sps:$4 sm:$0xff]   ;;  %v25368_v33 = vpack.c.bf16 %v2716_v13, %v2716_v13  ;;  %v21464_v13 = vld [vmem:[%s24682_s12 + $0x1650] ss:$24 sps:$4 sm:$0xff]  }
 0x227   : > { %15478 = vmatprep.subr.bf16.mxu0 %v21397_v34  ;;  %v21431_v34 = vld [vmem:[%s24682_s12 + $0x3930] ss:$24 sps:$4 sm:$0xff]  }
 0x229   : > { %14987 = vmatpush1.bf16.msra.mxu1 %v21392_v35  ;;  %v21436_v35 = vld [vmem:[%s24682_s12 + $0x1564] ss:$24 sps:$4 sm:$0xff]  }
 0x22a   : > { %15479 = vmatpush1.bf16.msra.mxu0 %v21395_v36  ;;  %14988 = vmatprep.subr.bf16.mxu1 %v21400_v41  ;;  %v21439_v36 = vld [vmem:[%s24682_s12 + $0x3964] ss:$24 sps:$4 sm:$0xff]   ;;  %v21434_v41 = vld [vmem:[%s24682_s12 + $0x1560] ss:$24 sps:$4 sm:$0xff]  }
 0x22b   : > { %15480 = vmatprep.subr.bf16.mxu0 %v21403_v43  ;;  %v21437_v43 = vld [vmem:[%s24682_s12 + $0x3960] ss:$24 sps:$4 sm:$0xff]  }
 0x22d   : > { %14989 = vmatpush1.bf16.msra.mxu1 %v21398_v16  ;;  %v21442_v16 = vld [vmem:[%s24682_s12 + $0x1594] ss:$24 sps:$4 sm:$0xff]  }
 0x22e   : > { %15481 = vmatpush1.bf16.msra.mxu0 %v21401_v46  ;;  %14990 = vmatprep.subr.bf16.mxu1 %v21406_v42  ;;  %v21445_v46 = vld [vmem:[%s24682_s12 + $0x3994] ss:$24 sps:$4 sm:$0xff]   ;;  %v21440_v42 = vld [vmem:[%s24682_s12 + $0x1590] ss:$24 sps:$4 sm:$0xff]  }
 0x22f   : > { %15482 = vmatprep.subr.bf16.mxu0 %v21409_v49  ;;  %v21443_v49 = vld [vmem:[%s24682_s12 + $0x3990] ss:$24 sps:$4 sm:$0xff]  }
 0x231   : > { %14991 = vmatpush1.bf16.msra.mxu1 %v21404_v51  ;;  %v21448_v51 = vld [vmem:[%s24682_s12 + $0x15c4] ss:$24 sps:$4 sm:$0xff]  }
 0x232   : > { %15483 = vmatpush1.bf16.msra.mxu0 %v21407_v53  ;;  %14992 = vmatprep.subr.bf16.mxu1 %v21412_v57  ;;  %v21451_v53 = vld [vmem:[%s24682_s12 + $0x39c4] ss:$24 sps:$4 sm:$0xff]   ;;  %v21446_v57 = vld [vmem:[%s24682_s12 + $0x15c0] ss:$24 sps:$4 sm:$0xff]  }
 0x233   : > { %15484 = vmatprep.subr.bf16.mxu0 %v21415_v58  ;;  %v21449_v58 = vld [vmem:[%s24682_s12 + $0x39c0] ss:$24 sps:$4 sm:$0xff]  }
 0x235   : > { %14993 = vmatpush1.bf16.msra.mxu1 %v21410_v0  ;;  %v21452_v0 = vld [vmem:[%s24682_s12 + $0x15f0] ss:$24 sps:$4 sm:$0xff]  }
 0x236   : > { %15485 = vmatpush1.bf16.msra.mxu0 %v21413_v1  ;;  %14994 = vmatprep.subr.bf16.mxu1 %v21418_v2  ;;  %v21455_v1 = vld [vmem:[%s24682_s12 + $0x39f0] ss:$24 sps:$4 sm:$0xff]   ;;  %v21460_v2 = vld [vmem:[%s24682_s12 + $0x1624] ss:$24 sps:$4 sm:$0xff]  }
 0x237   : > { %15486 = vmatprep.subr.bf16.mxu0 %v21421_v3  ;;  %v21463_v3 = vld [vmem:[%s24682_s12 + $0x3a24] ss:$24 sps:$4 sm:$0xff]  }
 0x239   : > { %14995 = vmatpush1.bf16.msra.mxu1 %v21416_v54  ;;  %v21458_v54 = vld [vmem:[%s24682_s12 + $0x1620] ss:$24 sps:$4 sm:$0xff]  }
 0x23a   : > { %15487 = vmatpush1.bf16.msra.mxu0 %v21419_v55  ;;  %15005 = vmatprep.subr.bf16.mxu1 %v21424_v45  ;;  %v21461_v55 = vld [vmem:[%s24682_s12 + $0x3a20] ss:$24 sps:$4 sm:$0xff]   ;;  %v21466_v45 = vld [vmem:[%s24682_s12 + $0x1654] ss:$24 sps:$4 sm:$0xff]  }
 0x23b   : > { %15497 = vmatprep.subr.bf16.mxu0 %v21427_v48  ;;  %v21469_v48 = vld [vmem:[%s24682_s12 + $0x3a54] ss:$24 sps:$4 sm:$0xff]  }
 0x23c   : > { %14997 = vmatmul.mubr.bf16.vlgmr.msra.gmra.mrb[0].mxu1 %v25358_v10 }
 0x23d   : > { %15489 = vmatmul.mubr.bf16.vlgmr.msra.gmra.mrb[0].mxu0 %v25362_v22  ;;  %15006 = vmatpush1.bf16.msra.mxu1 %v21422_v25  ;;  %v21472_v25 = vld [vmem:[%s24682_s12 + $0x1684] ss:$24 sps:$4 sm:$0xff]  }
 0x23e   : > { %15498 = vmatpush1.bf16.msra.mxu0 %v21425_v26  ;;  %15007 = vmatprep.subr.bf16.mxu1 %v21430_v28  ;;  %v21475_v26 = vld [vmem:[%s24682_s12 + $0x3a84] ss:$24 sps:$4 sm:$0xff]   ;;  %v21470_v28 = vld [vmem:[%s24682_s12 + $0x1680] ss:$24 sps:$4 sm:$0xff]  }
 0x23f   : > { %15499 = vmatprep.subr.bf16.mxu0 %v21433_v32  ;;  %15037 = vmatprep.mubr.bf16.mxu1 %v25368_v33  ;;  %v21473_v32 = vld [vmem:[%s24682_s12 + $0x3a80] ss:$24 sps:$4 sm:$0xff]  }
 0x240   : > { %15529 = vmatprep.mubr.bf16.mxu0 %v25370_v63 }
 0x241   : > { %15008 = vmatpush1.bf16.msra.mxu1 %v21428_v15  ;;  %v21478_v15 = vld [vmem:[%s24682_s12 + $0x16b4] ss:$24 sps:$4 sm:$0xff]  }
 0x242   : > { %15500 = vmatpush1.bf16.msra.mxu0 %v21431_v34  ;;  %15009 = vmatprep.subr.bf16.mxu1 %v21436_v35  ;;  %v21481_v34 = vld [vmem:[%s24682_s12 + $0x3ab4] ss:$24 sps:$4 sm:$0xff]   ;;  %v21476_v35 = vld [vmem:[%s24682_s12 + $0x16b0] ss:$24 sps:$4 sm:$0xff]  }
 0x243   : > { %15501 = vmatprep.subr.bf16.mxu0 %v21439_v36  ;;  %v21479_v36 = vld [vmem:[%s24682_s12 + $0x3ab0] ss:$24 sps:$4 sm:$0xff]  }
 0x245   : > { %15010 = vmatpush1.bf16.msra.mxu1 %v21434_v41  ;;  %v21484_v41 = vld [vmem:[%s24682_s12 + $0x16e4] ss:$24 sps:$4 sm:$0xff]  }
 0x246   : > { %15502 = vmatpush1.bf16.msra.mxu0 %v21437_v43  ;;  %15011 = vmatprep.subr.bf16.mxu1 %v21442_v16  ;;  %v21487_v43 = vld [vmem:[%s24682_s12 + $0x3ae4] ss:$24 sps:$4 sm:$0xff]   ;;  %v21482_v16 = vld [vmem:[%s24682_s12 + $0x16e0] ss:$24 sps:$4 sm:$0xff]  }
 0x247   : > { %15503 = vmatprep.subr.bf16.mxu0 %v21445_v46  ;;  %v21485_v46 = vld [vmem:[%s24682_s12 + $0x3ae0] ss:$24 sps:$4 sm:$0xff]  }
 0x249   : > { %15012 = vmatpush1.bf16.msra.mxu1 %v21440_v42  ;;  %v21490_v42 = vld [vmem:[%s24682_s12 + $0x1714] ss:$24 sps:$4 sm:$0xff]  }
 0x24a   : > { %15504 = vmatpush1.bf16.msra.mxu0 %v21443_v49  ;;  %15013 = vmatprep.subr.bf16.mxu1 %v21448_v51  ;;  %v21493_v49 = vld [vmem:[%s24682_s12 + $0x3b14] ss:$24 sps:$4 sm:$0xff]   ;;  %v21488_v51 = vld [vmem:[%s24682_s12 + $0x1710] ss:$24 sps:$4 sm:$0xff]  }
 0x24b   : > { %15505 = vmatprep.subr.bf16.mxu0 %v21451_v53  ;;  %v21491_v53 = vld [vmem:[%s24682_s12 + $0x3b10] ss:$24 sps:$4 sm:$0xff]  }
 0x24d   : > { %15014 = vmatpush1.bf16.msra.mxu1 %v21446_v57  ;;  %v21496_v57 = vld [vmem:[%s24682_s12 + $0x1744] ss:$24 sps:$4 sm:$0xff]  }
 0x24e   : > { %15506 = vmatpush1.bf16.msra.mxu0 %v21449_v58  ;;  %15015 = vmatprep.subr.bf16.mxu1 %v21454_v59  ;;  %v21499_v58 = vld [vmem:[%s24682_s12 + $0x3b44] ss:$24 sps:$4 sm:$0xff]   ;;  %v21494_v59 = vld [vmem:[%s24682_s12 + $0x1740] ss:$24 sps:$4 sm:$0xff]  }
 0x24f   : > { %15507 = vmatprep.subr.bf16.mxu0 %v21457_v60  ;;  %v21497_v60 = vld [vmem:[%s24682_s12 + $0x3b40] ss:$24 sps:$4 sm:$0xff]  }
 0x251   : > { %15016 = vmatpush1.bf16.msra.mxu1 %v21452_v0  ;;  %v21502_v0 = vld [vmem:[%s24682_s12 + $0x1774] ss:$24 sps:$4 sm:$0xff]  }
 0x252   : > { %15508 = vmatpush1.bf16.msra.mxu0 %v21455_v1  ;;  %15017 = vmatprep.subr.bf16.mxu1 %v21460_v2  ;;  %v21505_v1 = vld [vmem:[%s24682_s12 + $0x3b74] ss:$24 sps:$4 sm:$0xff]   ;;  %v21500_v2 = vld [vmem:[%s24682_s12 + $0x1770] ss:$24 sps:$4 sm:$0xff]  }
 0x253   : > { %15509 = vmatprep.subr.bf16.mxu0 %v21463_v3  ;;  %v21503_v3 = vld [vmem:[%s24682_s12 + $0x3b70] ss:$24 sps:$4 sm:$0xff]  }
 0x255   : > { %15018 = vmatpush1.bf16.msra.mxu1 %v21458_v54  ;;  %v21508_v54 = vld [vmem:[%s24682_s12 + $0x17a4] ss:$24 sps:$4 sm:$0xff]  }
 0x256   : > { %15510 = vmatpush1.bf16.msra.mxu0 %v21461_v55  ;;  %15019 = vmatprep.subr.bf16.mxu1 %v21466_v45  ;;  %v21511_v55 = vld [vmem:[%s24682_s12 + $0x3ba4] ss:$24 sps:$4 sm:$0xff]  }
 0x257   : > { %15511 = vmatprep.subr.bf16.mxu0 %v21469_v48  ;;  %v25429_v45 = vld [vmem:[%s24675_s30 + $0x20] sm:$0xff]  ;;  %v25432_v48 = vld [vmem:[%s24675_s30 + $0x50] sm:$0xff] }
 0x259   : > { %15020 = vmatpush1.bf16.msra.mxu1 %v21464_v13  ;;  %v21506_v13 = vld [vmem:[%s24682_s12 + $0x17a0] ss:$24 sps:$4 sm:$0xff]  }
 0x25a   : > { %15512 = vmatpush1.bf16.msra.mxu0 %v21467_v14  ;;  %15021 = vmatprep.subr.bf16.mxu1 %v21472_v25  ;;  %v21509_v14 = vld [vmem:[%s24682_s12 + $0x3ba0] ss:$24 sps:$4 sm:$0xff]   ;;  %v21514_v25 = vld [vmem:[%s24682_s12 + $0x17d4] ss:$24 sps:$4 sm:$0xff]  }
 0x25b   : > { %15513 = vmatprep.subr.bf16.mxu0 %v21475_v26  ;;  %v21517_v26 = vld [vmem:[%s24682_s12 + $0x3bd4] ss:$24 sps:$4 sm:$0xff]  }
 0x25d   : > { %15022 = vmatpush1.bf16.msra.mxu1 %v21470_v28  ;;  %v25440_v28 = vrot.slane %v25429_v45, %v24740_v50 }
 0x25e   : > { %15514 = vmatpush1.bf16.msra.mxu0 %v21473_v32  ;;  %15023 = vmatprep.subr.bf16.mxu1 %v21478_v15  ;;  %v25444_v32 = vrot.slane %v25432_v48, %v24740_v50  ;;  %v21512_v15 = vld [vmem:[%s24682_s12 + $0x17d0] ss:$24 sps:$4 sm:$0xff]  }
 0x25f   : > { %15515 = vmatprep.subr.bf16.mxu0 %v21481_v34  ;;  %v21515_v34 = vld [vmem:[%s24682_s12 + $0x3bd0] ss:$24 sps:$4 sm:$0xff]  }
 0x261   : > { %15024 = vmatpush1.bf16.msra.mxu1 %v21476_v35  ;;  %v21521_v35 = vld [vmem:[%s24682_s12 + $0x1804] ss:$24 sps:$4 sm:$0xff]  }
 0x262   : > { %15516 = vmatpush1.bf16.msra.mxu0 %v21479_v36  ;;  %15025 = vmatprep.subr.bf16.mxu1 %v21484_v41  ;;  %v21525_v36 = vld [vmem:[%s24682_s12 + $0x3c04] ss:$24 sps:$4 sm:$0xff]   ;;  %v2732_v41 = vcombine.high %v25440_v28, %v25440_v28 }
 0x263   : > { %15517 = vmatprep.subr.bf16.mxu0 %v21487_v43  ;;  %v2834_v43 = vcombine.high %v25444_v32, %v25444_v32 }
 0x265   : > { %15026 = vmatpush1.bf16.msra.mxu1 %v21482_v16  ;;  %v25456_v16 = vpack.c.bf16 %v25343_v5, %v25343_v5  ;;  %v25468_v5 = vpack.c.bf16 %v2834_v43, %v2834_v43  ;;  %v21561_v43 = vld [vmem:[%s24682_s12 + $0x3d24] ss:$24 sps:$4 sm:$0xff]  }
 0x266   : > { %15518 = vmatpush1.bf16.msra.mxu0 %v21485_v46  ;;  %15027 = vmatprep.subr.bf16.mxu1 %v21490_v42  ;;  %v25460_v46 = vpack.c.bf16 %v25346_v6, %v25346_v6  ;;  %v21519_v42 = vld [vmem:[%s24682_s12 + $0x1800] ss:$24 sps:$4 sm:$0xff]   ;;  %v21526_v6 = vld [vmem:[%s24682_s12 + $0x1830] ss:$24 sps:$4 sm:$0xff]  }
 0x267   : > { %15519 = vmatprep.subr.bf16.mxu0 %v21493_v49  ;;  %v21523_v49 = vld [vmem:[%s24682_s12 + $0x3c00] ss:$24 sps:$4 sm:$0xff]  }
 0x269   : > { %15028 = vmatpush1.bf16.msra.mxu1 %v21488_v51  ;;  %v21528_v51 = vld [vmem:[%s24682_s12 + $0x1834] ss:$24 sps:$4 sm:$0xff]  }
 0x26a   : > { %15520 = vmatpush1.bf16.msra.mxu0 %v21491_v53  ;;  %15029 = vmatprep.subr.bf16.mxu1 %v21496_v57  ;;  %v21531_v53 = vld [vmem:[%s24682_s12 + $0x3c34] ss:$24 sps:$4 sm:$0xff]   ;;  %v25466_v57 = vpack.c.bf16 %v2732_v41, %v2732_v41  ;;  %v21558_v41 = vld [vmem:[%s24682_s12 + $0x1924] ss:$24 sps:$4 sm:$0xff]  }
 0x26b   : > { %15521 = vmatprep.subr.bf16.mxu0 %v21499_v58  ;;  %v21529_v58 = vld [vmem:[%s24682_s12 + $0x3c30] ss:$24 sps:$4 sm:$0xff]  }
 0x26d   : > { %15030 = vmatpush1.bf16.msra.mxu1 %v21494_v59  ;;  %v21534_v59 = vld [vmem:[%s24682_s12 + $0x1864] ss:$24 sps:$4 sm:$0xff]  }
 0x26e   : > { %15522 = vmatpush1.bf16.msra.mxu0 %v21497_v60  ;;  %15031 = vmatprep.subr.bf16.mxu1 %v21502_v0  ;;  %v21537_v60 = vld [vmem:[%s24682_s12 + $0x3c64] ss:$24 sps:$4 sm:$0xff]   ;;  %v21532_v0 = vld [vmem:[%s24682_s12 + $0x1860] ss:$24 sps:$4 sm:$0xff]  }
 0x26f   : > { %15523 = vmatprep.subr.bf16.mxu0 %v21505_v1  ;;  %v21535_v1 = vld [vmem:[%s24682_s12 + $0x3c60] ss:$24 sps:$4 sm:$0xff]  }
 0x271   : > { %15032 = vmatpush1.bf16.msra.mxu1 %v21500_v2  ;;  %v21540_v2 = vld [vmem:[%s24682_s12 + $0x1894] ss:$24 sps:$4 sm:$0xff]  }
 0x272   : > { %15524 = vmatpush1.bf16.msra.mxu0 %v21503_v3  ;;  %15033 = vmatprep.subr.bf16.mxu1 %v21508_v54  ;;  %v21543_v3 = vld [vmem:[%s24682_s12 + $0x3c94] ss:$24 sps:$4 sm:$0xff]   ;;  %v21538_v54 = vld [vmem:[%s24682_s12 + $0x1890] ss:$24 sps:$4 sm:$0xff]  }
 0x273   : > { %15525 = vmatprep.subr.bf16.mxu0 %v21511_v55  ;;  %v21541_v55 = vld [vmem:[%s24682_s12 + $0x3c90] ss:$24 sps:$4 sm:$0xff]  }
 0x275   : > { %15034 = vmatpush1.bf16.msra.mxu1 %v21506_v13  ;;  %v21546_v13 = vld [vmem:[%s24682_s12 + $0x18c4] ss:$24 sps:$4 sm:$0xff]  }
 0x276   : > { %15526 = vmatpush1.bf16.msra.mxu0 %v21509_v14  ;;  %15035 = vmatprep.subr.bf16.mxu1 %v21514_v25  ;;  %v21549_v14 = vld [vmem:[%s24682_s12 + $0x3cc4] ss:$24 sps:$4 sm:$0xff]   ;;  %v21544_v25 = vld [vmem:[%s24682_s12 + $0x18c0] ss:$24 sps:$4 sm:$0xff]  }
 0x277   : > { %15527 = vmatprep.subr.bf16.mxu0 %v21517_v26  ;;  %v21547_v26 = vld [vmem:[%s24682_s12 + $0x3cc0] ss:$24 sps:$4 sm:$0xff]  }
 0x279   : > { %15036 = vmatpush1.bf16.msra.mxu1 %v21512_v15  ;;  %v21552_v15 = vld [vmem:[%s24682_s12 + $0x18f4] ss:$24 sps:$4 sm:$0xff]  }
 0x27a   : > { %15528 = vmatpush1.bf16.msra.mxu0 %v21515_v34  ;;  %15046 = vmatprep.subr.bf16.mxu1 %v21521_v35  ;;  %v21555_v34 = vld [vmem:[%s24682_s12 + $0x3cf4] ss:$24 sps:$4 sm:$0xff]   ;;  %v21550_v35 = vld [vmem:[%s24682_s12 + $0x18f0] ss:$24 sps:$4 sm:$0xff]  }
 0x27b   : > { %15538 = vmatprep.subr.bf16.mxu0 %v21525_v36  ;;  %v21553_v36 = vld [vmem:[%s24682_s12 + $0x3cf0] ss:$24 sps:$4 sm:$0xff]  }
 0x27c   : > { %15038 = vmatmul.mubr.bf16.vlgmr.msra.gmra.mrb[0].mxu1 %v25456_v16 }
 0x27d   : > { %15530 = vmatmul.mubr.bf16.vlgmr.msra.gmra.mrb[0].mxu0 %v25460_v46  ;;  %15047 = vmatpush1.bf16.msra.mxu1 %v21519_v42  ;;  %v21556_v42 = vld [vmem:[%s24682_s12 + $0x1920] ss:$24 sps:$4 sm:$0xff]  }
 0x27e   : > { %15539 = vmatpush1.bf16.msra.mxu0 %v21523_v49  ;;  %15048 = vmatprep.subr.bf16.mxu1 %v21528_v51  ;;  %v21559_v49 = vld [vmem:[%s24682_s12 + $0x3d20] ss:$24 sps:$4 sm:$0xff]   ;;  %v21564_v51 = vld [vmem:[%s24682_s12 + $0x1954] ss:$24 sps:$4 sm:$0xff]  }
 0x27f   : > { %15540 = vmatprep.subr.bf16.mxu0 %v21531_v53  ;;  %15078 = vmatprep.mubr.bf16.mxu1 %v25466_v57  ;;  %v21567_v53 = vld [vmem:[%s24682_s12 + $0x3d54] ss:$24 sps:$4 sm:$0xff]  }
 0x280   : > { %15570 = vmatprep.mubr.bf16.mxu0 %v25468_v5 }
 0x281   : > { %15049 = vmatpush1.bf16.msra.mxu1 %v21526_v6  ;;  %v21562_v6 = vld [vmem:[%s24682_s12 + $0x1950] ss:$24 sps:$4 sm:$0xff]  }
 0x282   : > { %15541 = vmatpush1.bf16.msra.mxu0 %v21529_v58  ;;  %15050 = vmatprep.subr.bf16.mxu1 %v21534_v59  ;;  %v21565_v58 = vld [vmem:[%s24682_s12 + $0x3d50] ss:$24 sps:$4 sm:$0xff]   ;;  %v21570_v59 = vld [vmem:[%s24682_s12 + $0x1984] ss:$24 sps:$4 sm:$0xff]  }
 0x283   : > { %15542 = vmatprep.subr.bf16.mxu0 %v21537_v60  ;;  %v21573_v60 = vld [vmem:[%s24682_s12 + $0x3d84] ss:$24 sps:$4 sm:$0xff]  }
 0x285   : > { %15051 = vmatpush1.bf16.msra.mxu1 %v21532_v0  ;;  %v21568_v0 = vld [vmem:[%s24682_s12 + $0x1980] ss:$24 sps:$4 sm:$0xff]  }
 0x286   : > { %15543 = vmatpush1.bf16.msra.mxu0 %v21535_v1  ;;  %15052 = vmatprep.subr.bf16.mxu1 %v21540_v2  ;;  %v21571_v1 = vld [vmem:[%s24682_s12 + $0x3d80] ss:$24 sps:$4 sm:$0xff]   ;;  %v21576_v2 = vld [vmem:[%s24682_s12 + $0x19b4] ss:$24 sps:$4 sm:$0xff]  }
 0x287   : > { %15544 = vmatprep.subr.bf16.mxu0 %v21543_v3  ;;  %v21579_v3 = vld [vmem:[%s24682_s12 + $0x3db4] ss:$24 sps:$4 sm:$0xff]  }
 0x289   : > { %15053 = vmatpush1.bf16.msra.mxu1 %v21538_v54  ;;  %v21574_v54 = vld [vmem:[%s24682_s12 + $0x19b0] ss:$24 sps:$4 sm:$0xff]  }
 0x28a   : > { %15545 = vmatpush1.bf16.msra.mxu0 %v21541_v55  ;;  %15054 = vmatprep.subr.bf16.mxu1 %v21546_v13  ;;  %v21577_v55 = vld [vmem:[%s24682_s12 + $0x3db0] ss:$24 sps:$4 sm:$0xff]   ;;  %v21582_v13 = vld [vmem:[%s24682_s12 + $0x19e4] ss:$24 sps:$4 sm:$0xff]  }
 0x28b   : > { %15546 = vmatprep.subr.bf16.mxu0 %v21549_v14  ;;  %v21585_v14 = vld [vmem:[%s24682_s12 + $0x3de4] ss:$24 sps:$4 sm:$0xff]  }
 0x28d   : > { %15055 = vmatpush1.bf16.msra.mxu1 %v21544_v25  ;;  %v21580_v25 = vld [vmem:[%s24682_s12 + $0x19e0] ss:$24 sps:$4 sm:$0xff]  }
 0x28e   : > { %15547 = vmatpush1.bf16.msra.mxu0 %v21547_v26  ;;  %15056 = vmatprep.subr.bf16.mxu1 %v21552_v15  ;;  %v21583_v26 = vld [vmem:[%s24682_s12 + $0x3de0] ss:$24 sps:$4 sm:$0xff]   ;;  %v21588_v15 = vld [vmem:[%s24682_s12 + $0x1a14] ss:$24 sps:$4 sm:$0xff]  }
 0x28f   : > { %15548 = vmatprep.subr.bf16.mxu0 %v21555_v34  ;;  %v21591_v34 = vld [vmem:[%s24682_s12 + $0x3e14] ss:$24 sps:$4 sm:$0xff]  }
 0x291   : > { %15057 = vmatpush1.bf16.msra.mxu1 %v21550_v35  ;;  %v21586_v35 = vld [vmem:[%s24682_s12 + $0x1a10] ss:$24 sps:$4 sm:$0xff]  }
 0x292   : > { %15549 = vmatpush1.bf16.msra.mxu0 %v21553_v36  ;;  %15058 = vmatprep.subr.bf16.mxu1 %v21558_v41  ;;  %v21589_v36 = vld [vmem:[%s24682_s12 + $0x3e10] ss:$24 sps:$4 sm:$0xff]   ;;  %v21594_v41 = vld [vmem:[%s24682_s12 + $0x1a44] ss:$24 sps:$4 sm:$0xff]  }
 0x293   : > { %15550 = vmatprep.subr.bf16.mxu0 %v21561_v43  ;;  %v21597_v43 = vld [vmem:[%s24682_s12 + $0x3e44] ss:$24 sps:$4 sm:$0xff]  }
 0x295   : > { %15059 = vmatpush1.bf16.msra.mxu1 %v21556_v42  ;;  %v21592_v42 = vld [vmem:[%s24682_s12 + $0x1a40] ss:$24 sps:$4 sm:$0xff]  }
 0x296   : > { %15551 = vmatpush1.bf16.msra.mxu0 %v21559_v49  ;;  %15060 = vmatprep.subr.bf16.mxu1 %v21564_v51  ;;  %v21595_v49 = vld [vmem:[%s24682_s12 + $0x3e40] ss:$24 sps:$4 sm:$0xff]   ;;  %v21600_v51 = vld [vmem:[%s24682_s12 + $0x1a74] ss:$24 sps:$4 sm:$0xff]  }
 0x297   : > { %15552 = vmatprep.subr.bf16.mxu0 %v21567_v53  ;;  %v21603_v53 = vld [vmem:[%s24682_s12 + $0x3e74] ss:$24 sps:$4 sm:$0xff]  }
 0x299   : > { %15061 = vmatpush1.bf16.msra.mxu1 %v21562_v6  ;;  %v21598_v6 = vld [vmem:[%s24682_s12 + $0x1a70] ss:$24 sps:$4 sm:$0xff]  }
 0x29a   : > { %15553 = vmatpush1.bf16.msra.mxu0 %v21565_v58  ;;  %15062 = vmatprep.subr.bf16.mxu1 %v21570_v59  ;;  %v21601_v58 = vld [vmem:[%s24682_s12 + $0x3e70] ss:$24 sps:$4 sm:$0xff]   ;;  %v21606_v59 = vld [vmem:[%s24682_s12 + $0x1aa4] ss:$24 sps:$4 sm:$0xff]  }
 0x29b   : > { %15554 = vmatprep.subr.bf16.mxu0 %v21573_v60  ;;  %v21609_v60 = vld [vmem:[%s24682_s12 + $0x3ea4] ss:$24 sps:$4 sm:$0xff]  }
 0x29d   : > { %15063 = vmatpush1.bf16.msra.mxu1 %v21568_v0  ;;  %v2717_v0 = vcombine.high %v25429_v45, %v25429_v45  ;;  %v21610_v45 = vld [vmem:[%s24682_s12 + $0x1ad0] ss:$24 sps:$4 sm:$0xff]  }
 0x29e   : > { %15555 = vmatpush1.bf16.msra.mxu0 %v21571_v1  ;;  %15064 = vmatprep.subr.bf16.mxu1 %v21576_v2  ;;  %v2819_v1 = vcombine.high %v25432_v48, %v25432_v48  ;;  %v21604_v2 = vld [vmem:[%s24682_s12 + $0x1aa0] ss:$24 sps:$4 sm:$0xff]   ;;  %v21613_v48 = vld [vmem:[%s24682_s12 + $0x3ed0] ss:$24 sps:$4 sm:$0xff]  }
 0x29f   : > { %15556 = vmatprep.subr.bf16.mxu0 %v21579_v3  ;;  %v21607_v3 = vld [vmem:[%s24682_s12 + $0x3ea0] ss:$24 sps:$4 sm:$0xff]  }
 0x2a1   : > { %15065 = vmatpush1.bf16.msra.mxu1 %v21574_v54  ;;  %v21612_v54 = vld [vmem:[%s24682_s12 + $0x1ad4] ss:$24 sps:$4 sm:$0xff]  }
 0x2a2   : > { %15557 = vmatpush1.bf16.msra.mxu0 %v21577_v55  ;;  %15066 = vmatprep.subr.bf16.mxu1 %v21582_v13  ;;  %v21615_v55 = vld [vmem:[%s24682_s12 + $0x3ed4] ss:$24 sps:$4 sm:$0xff]   ;;  %v25535_v13 = vrot.slane %v2717_v0, %v24740_v50 }
 0x2a3   : > { %15558 = vmatprep.subr.bf16.mxu0 %v21585_v14  ;;  %v25538_v14 = vrot.slane %v2819_v1, %v24740_v50  ;;  %v21636_v0 = vld [vmem:[%s24682_s12 + $0x1b94] ss:$24 sps:$4 sm:$0xff]  }
 0x2a4   : > { %v21639_v1 = vld [vmem:[%s24682_s12 + $0x3f94] ss:$24 sps:$4 sm:$0xff]  }
 0x2a5   : > { %15067 = vmatpush1.bf16.msra.mxu1 %v21580_v25  ;;  %v21618_v25 = vld [vmem:[%s24682_s12 + $0x1b04] ss:$24 sps:$4 sm:$0xff]  }
 0x2a6   : > { %15559 = vmatpush1.bf16.msra.mxu0 %v21583_v26  ;;  %15068 = vmatprep.subr.bf16.mxu1 %v21588_v15  ;;  %v21621_v26 = vld [vmem:[%s24682_s12 + $0x3f04] ss:$24 sps:$4 sm:$0xff]   ;;  %v2733_v15 = vcombine.high %v25535_v13, %v25535_v13 }
 0x2a7   : > { %15560 = vmatprep.subr.bf16.mxu0 %v21591_v34  ;;  %v2835_v34 = vcombine.high %v25538_v14, %v25538_v14 }
 0x2a9   : > { %15069 = vmatpush1.bf16.msra.mxu1 %v21586_v35  ;;  %v25550_v35 = vpack.c.bf16 %v25440_v28, %v25440_v28  ;;  %v25562_v28 = vpack.c.bf16 %v2835_v34, %v2835_v34  ;;  %v21649_v34 = vld [vmem:[%s24682_s12 + $0x3ff0] ss:$24 sps:$4 sm:$0xff]  }
 0x2aa   : > { %15561 = vmatpush1.bf16.msra.mxu0 %v21589_v36  ;;  %15070 = vmatprep.subr.bf16.mxu1 %v21594_v41  ;;  %v25554_v36 = vpack.c.bf16 %v25444_v32, %v25444_v32  ;;  %v21616_v41 = vld [vmem:[%s24682_s12 + $0x1b00] ss:$24 sps:$4 sm:$0xff]   ;;  %v21622_v32 = vld [vmem:[%s24682_s12 + $0x1b30] ss:$24 sps:$4 sm:$0xff]  }
 0x2ab   : > { %15562 = vmatprep.subr.bf16.mxu0 %v21597_v43  ;;  %v21619_v43 = vld [vmem:[%s24682_s12 + $0x3f00] ss:$24 sps:$4 sm:$0xff]  }
 0x2ad   : > { %15071 = vmatpush1.bf16.msra.mxu1 %v21592_v42  ;;  %v21624_v42 = vld [vmem:[%s24682_s12 + $0x1b34] ss:$24 sps:$4 sm:$0xff]  }
 0x2ae   : > { %15563 = vmatpush1.bf16.msra.mxu0 %v21595_v49  ;;  %15072 = vmatprep.subr.bf16.mxu1 %v21600_v51  ;;  %v21627_v49 = vld [vmem:[%s24682_s12 + $0x3f34] ss:$24 sps:$4 sm:$0xff]   ;;  %v25560_v51 = vpack.c.bf16 %v2733_v15, %v2733_v15  ;;  %v21646_v15 = vld [vmem:[%s24682_s12 + $0x1bf0] ss:$24 sps:$4 sm:$0xff]  }
 0x2af   : > { %15564 = vmatprep.subr.bf16.mxu0 %v21603_v53  ;;  %v21625_v53 = vld [vmem:[%s24682_s12 + $0x3f30] ss:$24 sps:$4 sm:$0xff]  }
 0x2b1   : > { %15073 = vmatpush1.bf16.msra.mxu1 %v21598_v6  ;;  %v21630_v6 = vld [vmem:[%s24682_s12 + $0x1b64] ss:$24 sps:$4 sm:$0xff]  }
 0x2b2   : > { %15565 = vmatpush1.bf16.msra.mxu0 %v21601_v58  ;;  %15074 = vmatprep.subr.bf16.mxu1 %v21606_v59  ;;  %v21633_v58 = vld [vmem:[%s24682_s12 + $0x3f64] ss:$24 sps:$4 sm:$0xff]   ;;  %v21628_v59 = vld [vmem:[%s24682_s12 + $0x1b60] ss:$24 sps:$4 sm:$0xff]  }
 0x2b3   : > { %15566 = vmatprep.subr.bf16.mxu0 %v21609_v60  ;;  %v21631_v60 = vld [vmem:[%s24682_s12 + $0x3f60] ss:$24 sps:$4 sm:$0xff]  }
 0x2b5   : > { %15075 = vmatpush1.bf16.msra.mxu1 %v21604_v2  ;;  %v21634_v2 = vld [vmem:[%s24682_s12 + $0x1b90] ss:$24 sps:$4 sm:$0xff]  }
 0x2b6   : > { %15567 = vmatpush1.bf16.msra.mxu0 %v21607_v3  ;;  %15076 = vmatprep.subr.bf16.mxu1 %v21612_v54  ;;  %v21637_v3 = vld [vmem:[%s24682_s12 + $0x3f90] ss:$24 sps:$4 sm:$0xff]   ;;  %v21642_v54 = vld [vmem:[%s24682_s12 + $0x1bc4] ss:$24 sps:$4 sm:$0xff]  }
 0x2b7   : > { %15568 = vmatprep.subr.bf16.mxu0 %v21615_v55  ;;  %v21645_v55 = vld [vmem:[%s24682_s12 + $0x3fc4] ss:$24 sps:$4 sm:$0xff]  }
 0x2b9   : > { %15077 = vmatpush1.bf16.msra.mxu1 %v21610_v45  ;;  %v21640_v45 = vld [vmem:[%s24682_s12 + $0x1bc0] ss:$24 sps:$4 sm:$0xff]  }
 0x2ba   : > { %15569 = vmatpush1.bf16.msra.mxu0 %v21613_v48  ;;  %15087 = vmatprep.subr.bf16.mxu1 %v21618_v25  ;;  %v21643_v48 = vld [vmem:[%s24682_s12 + $0x3fc0] ss:$24 sps:$4 sm:$0xff]   ;;  %v21648_v25 = vld [vmem:[%s24682_s12 + $0x1bf4] ss:$24 sps:$4 sm:$0xff]  }
 0x2bb   : > { %15579 = vmatprep.subr.bf16.mxu0 %v21621_v26  ;;  %v21651_v26 = vld [vmem:[%s24682_s12 + $0x3ff4] ss:$24 sps:$4 sm:$0xff]  }
 0x2bc   : > { %15079 = vmatmul.mubr.bf16.vlgmr.msra.gmra.mrb[0].mxu1 %v25550_v35 }
 0x2bd   : > { %15571 = vmatmul.mubr.bf16.vlgmr.msra.gmra.mrb[0].mxu0 %v25554_v36  ;;  %15088 = vmatpush1.bf16.msra.mxu1 %v21616_v41  ;;  %v21654_v41 = vld [vmem:[%s24682_s12 + $0x1c24] ss:$24 sps:$4 sm:$0xff]  }
 0x2be   : > { %15580 = vmatpush1.bf16.msra.mxu0 %v21619_v43  ;;  %15089 = vmatprep.subr.bf16.mxu1 %v21624_v42  ;;  %v21657_v43 = vld [vmem:[%s24682_s12 + $0x4024] ss:$24 sps:$4 sm:$0xff]   ;;  %v21652_v42 = vld [vmem:[%s24682_s12 + $0x1c20] ss:$24 sps:$4 sm:$0xff]  }
 0x2bf   : > { %15581 = vmatprep.subr.bf16.mxu0 %v21627_v49  ;;  %15119 = vmatprep.mubr.bf16.mxu1 %v25560_v51  ;;  %v21655_v49 = vld [vmem:[%s24682_s12 + $0x4020] ss:$24 sps:$4 sm:$0xff]  }
 0x2c0   : > { %15611 = vmatprep.mubr.bf16.mxu0 %v25562_v28 }
 0x2c1   : > { %15090 = vmatpush1.bf16.msra.mxu1 %v21622_v32  ;;  %v21660_v32 = vld [vmem:[%s24682_s12 + $0x1c54] ss:$24 sps:$4 sm:$0xff]  }
 0x2c2   : > { %15582 = vmatpush1.bf16.msra.mxu0 %v21625_v53  ;;  %15091 = vmatprep.subr.bf16.mxu1 %v21630_v6  ;;  %v21663_v53 = vld [vmem:[%s24682_s12 + $0x4054] ss:$24 sps:$4 sm:$0xff]   ;;  %v21658_v6 = vld [vmem:[%s24682_s12 + $0x1c50] ss:$24 sps:$4 sm:$0xff]  }
 0x2c3   : > { %15583 = vmatprep.subr.bf16.mxu0 %v21633_v58  ;;  %v21661_v58 = vld [vmem:[%s24682_s12 + $0x4050] ss:$24 sps:$4 sm:$0xff]  }
 0x2c5   : > { %15092 = vmatpush1.bf16.msra.mxu1 %v21628_v59  ;;  %v21666_v59 = vld [vmem:[%s24682_s12 + $0x1c84] ss:$24 sps:$4 sm:$0xff]  }
 0x2c6   : > { %15584 = vmatpush1.bf16.msra.mxu0 %v21631_v60  ;;  %15093 = vmatprep.subr.bf16.mxu1 %v21636_v0  ;;  %v21669_v60 = vld [vmem:[%s24682_s12 + $0x4084] ss:$24 sps:$4 sm:$0xff]   ;;  %v21664_v0 = vld [vmem:[%s24682_s12 + $0x1c80] ss:$24 sps:$4 sm:$0xff]  }
 0x2c7   : > { %15585 = vmatprep.subr.bf16.mxu0 %v21639_v1  ;;  %v21667_v1 = vld [vmem:[%s24682_s12 + $0x4080] ss:$24 sps:$4 sm:$0xff]  }
 0x2c9   : > { %15094 = vmatpush1.bf16.msra.mxu1 %v21634_v2  ;;  %v21672_v2 = vld [vmem:[%s24682_s12 + $0x1cb4] ss:$24 sps:$4 sm:$0xff]  }
 0x2ca   : > { %15586 = vmatpush1.bf16.msra.mxu0 %v21637_v3  ;;  %15095 = vmatprep.subr.bf16.mxu1 %v21642_v54  ;;  %v21675_v3 = vld [vmem:[%s24682_s12 + $0x40b4] ss:$24 sps:$4 sm:$0xff]   ;;  %v21670_v54 = vld [vmem:[%s24682_s12 + $0x1cb0] ss:$24 sps:$4 sm:$0xff]  }
 0x2cb   : > { %15587 = vmatprep.subr.bf16.mxu0 %v21645_v55  ;;  %v21673_v55 = vld [vmem:[%s24682_s12 + $0x40b0] ss:$24 sps:$4 sm:$0xff]  }
 0x2cd   : > { %15096 = vmatpush1.bf16.msra.mxu1 %v21640_v45  ;;  %v21678_v45 = vld [vmem:[%s24682_s12 + $0x1ce4] ss:$24 sps:$4 sm:$0xff]  }
 0x2ce   : > { %15588 = vmatpush1.bf16.msra.mxu0 %v21643_v48  ;;  %15097 = vmatprep.subr.bf16.mxu1 %v21648_v25  ;;  %v21681_v48 = vld [vmem:[%s24682_s12 + $0x40e4] ss:$24 sps:$4 sm:$0xff]   ;;  %v21676_v25 = vld [vmem:[%s24682_s12 + $0x1ce0] ss:$24 sps:$4 sm:$0xff]  }
 0x2cf   : > { %15589 = vmatprep.subr.bf16.mxu0 %v21651_v26  ;;  %v21679_v26 = vld [vmem:[%s24682_s12 + $0x40e0] ss:$24 sps:$4 sm:$0xff]  }
 0x2d1   : > { %15098 = vmatpush1.bf16.msra.mxu1 %v21646_v15  ;;  %v21684_v15 = vld [vmem:[%s24682_s12 + $0x1d14] ss:$24 sps:$4 sm:$0xff]  }
 0x2d2   : > { %15590 = vmatpush1.bf16.msra.mxu0 %v21649_v34  ;;  %15099 = vmatprep.subr.bf16.mxu1 %v21654_v41  ;;  %v21687_v34 = vld [vmem:[%s24682_s12 + $0x4114] ss:$24 sps:$4 sm:$0xff]   ;;  %v21682_v41 = vld [vmem:[%s24682_s12 + $0x1d10] ss:$24 sps:$4 sm:$0xff]  }
 0x2d3   : > { %15591 = vmatprep.subr.bf16.mxu0 %v21657_v43  ;;  %v21685_v43 = vld [vmem:[%s24682_s12 + $0x4110] ss:$24 sps:$4 sm:$0xff]  }
 0x2d5   : > { %15100 = vmatpush1.bf16.msra.mxu1 %v21652_v42  ;;  %v21690_v42 = vld [vmem:[%s24682_s12 + $0x1d44] ss:$24 sps:$4 sm:$0xff]  }
 0x2d6   : > { %15592 = vmatpush1.bf16.msra.mxu0 %v21655_v49  ;;  %15101 = vmatprep.subr.bf16.mxu1 %v21660_v32  ;;  %v21693_v49 = vld [vmem:[%s24682_s12 + $0x4144] ss:$24 sps:$4 sm:$0xff]   ;;  %v21688_v32 = vld [vmem:[%s24682_s12 + $0x1d40] ss:$24 sps:$4 sm:$0xff]  }
 0x2d7   : > { %15593 = vmatprep.subr.bf16.mxu0 %v21663_v53  ;;  %v21691_v53 = vld [vmem:[%s24682_s12 + $0x4140] ss:$24 sps:$4 sm:$0xff]  }
 0x2d9   : > { %15102 = vmatpush1.bf16.msra.mxu1 %v21658_v6  ;;  %v21696_v6 = vld [vmem:[%s24682_s12 + $0x1d74] ss:$24 sps:$4 sm:$0xff]  }
 0x2da   : > { %15594 = vmatpush1.bf16.msra.mxu0 %v21661_v58  ;;  %15103 = vmatprep.subr.bf16.mxu1 %v21666_v59  ;;  %v21699_v58 = vld [vmem:[%s24682_s12 + $0x4174] ss:$24 sps:$4 sm:$0xff]   ;;  %v21694_v59 = vld [vmem:[%s24682_s12 + $0x1d70] ss:$24 sps:$4 sm:$0xff]  }
 0x2db   : > { %15595 = vmatprep.subr.bf16.mxu0 %v21669_v60  ;;  %v21697_v60 = vld [vmem:[%s24682_s12 + $0x4170] ss:$24 sps:$4 sm:$0xff]  }
 0x2dd   : > { %15104 = vmatpush1.bf16.msra.mxu1 %v21664_v0  ;;  %v21702_v0 = vld [vmem:[%s24682_s12 + $0x1da4] ss:$24 sps:$4 sm:$0xff]  }
 0x2de   : > { %15596 = vmatpush1.bf16.msra.mxu0 %v21667_v1  ;;  %15105 = vmatprep.subr.bf16.mxu1 %v21672_v2  ;;  %v21705_v1 = vld [vmem:[%s24682_s12 + $0x41a4] ss:$24 sps:$4 sm:$0xff]  }
 0x2df   : > { %15597 = vmatprep.subr.bf16.mxu0 %v21675_v3  ;;  %v25621_v2 = vld [vmem:[%s24675_s30 + $0x28] sm:$0xff]  ;;  %v25624_v3 = vld [vmem:[%s24675_s30 + $0x58] sm:$0xff] }
 0x2e1   : > { %15106 = vmatpush1.bf16.msra.mxu1 %v21670_v54  ;;  %v21700_v54 = vld [vmem:[%s24682_s12 + $0x1da0] ss:$24 sps:$4 sm:$0xff]  }
 0x2e2   : > { %15598 = vmatpush1.bf16.msra.mxu0 %v21673_v55  ;;  %15107 = vmatprep.subr.bf16.mxu1 %v21678_v45  ;;  %v21703_v55 = vld [vmem:[%s24682_s12 + $0x41a0] ss:$24 sps:$4 sm:$0xff]   ;;  %v21708_v45 = vld [vmem:[%s24682_s12 + $0x1dd4] ss:$24 sps:$4 sm:$0xff]  }
 0x2e3   : > { %15599 = vmatprep.subr.bf16.mxu0 %v21681_v48  ;;  %v21711_v48 = vld [vmem:[%s24682_s12 + $0x41d4] ss:$24 sps:$4 sm:$0xff]  }
 0x2e5   : > { %15108 = vmatpush1.bf16.msra.mxu1 %v21676_v25  ;;  %v25632_v25 = vrot.slane %v25621_v2, %v24740_v50 }
 0x2e6   : > { %15600 = vmatpush1.bf16.msra.mxu0 %v21679_v26  ;;  %15109 = vmatprep.subr.bf16.mxu1 %v21684_v15  ;;  %v25636_v26 = vrot.slane %v25624_v3, %v24740_v50  ;;  %v21706_v15 = vld [vmem:[%s24682_s12 + $0x1dd0] ss:$24 sps:$4 sm:$0xff]  }
 0x2e7   : > { %15601 = vmatprep.subr.bf16.mxu0 %v21687_v34  ;;  %v21709_v34 = vld [vmem:[%s24682_s12 + $0x41d0] ss:$24 sps:$4 sm:$0xff]  }
 0x2e9   : > { %15110 = vmatpush1.bf16.msra.mxu1 %v21682_v41  ;;  %v21715_v41 = vld [vmem:[%s24682_s12 + $0x1e04] ss:$24 sps:$4 sm:$0xff]  }
 0x2ea   : > { %15602 = vmatpush1.bf16.msra.mxu0 %v21685_v43  ;;  %15111 = vmatprep.subr.bf16.mxu1 %v21690_v42  ;;  %v21719_v43 = vld [vmem:[%s24682_s12 + $0x4204] ss:$24 sps:$4 sm:$0xff]   ;;  %v21713_v42 = vld [vmem:[%s24682_s12 + $0x1e00] ss:$24 sps:$4 sm:$0xff]  }
 0x2eb   : > { %15603 = vmatprep.subr.bf16.mxu0 %v21693_v49  ;;  %v21717_v49 = vld [vmem:[%s24682_s12 + $0x4200] ss:$24 sps:$4 sm:$0xff]  }
 0x2ed   : > { %15112 = vmatpush1.bf16.msra.mxu1 %v21688_v32  ;;  %v2749_v32 = vcombine.high %v25632_v25, %v25632_v25 }
 0x2ee   : > { %15604 = vmatpush1.bf16.msra.mxu0 %v21691_v53  ;;  %15113 = vmatprep.subr.bf16.mxu1 %v21696_v6  ;;  %v2851_v53 = vcombine.high %v25636_v26, %v25636_v26  ;;  %v25650_v6 = vpack.c.bf16 %v25535_v13, %v25535_v13  ;;  %v21720_v13 = vld [vmem:[%s24682_s12 + $0x1e30] ss:$24 sps:$4 sm:$0xff]  }
 0x2ef   : > { %15605 = vmatprep.subr.bf16.mxu0 %v21699_v58  ;;  %v25654_v58 = vpack.c.bf16 %v25538_v14, %v25538_v14  ;;  %v21723_v14 = vld [vmem:[%s24682_s12 + $0x4230] ss:$24 sps:$4 sm:$0xff]  }
 0x2f1   : > { %15114 = vmatpush1.bf16.msra.mxu1 %v21694_v59  ;;  %v21722_v59 = vld [vmem:[%s24682_s12 + $0x1e34] ss:$24 sps:$4 sm:$0xff]  }
 0x2f2   : > { %15606 = vmatpush1.bf16.msra.mxu0 %v21697_v60  ;;  %15115 = vmatprep.subr.bf16.mxu1 %v21702_v0  ;;  %v21725_v60 = vld [vmem:[%s24682_s12 + $0x4234] ss:$24 sps:$4 sm:$0xff]   ;;  %v25658_v0 = vpack.c.bf16 %v2749_v32, %v2749_v32  ;;  %v21738_v32 = vld [vmem:[%s24682_s12 + $0x1ec0] ss:$24 sps:$4 sm:$0xff]  }
 0x2f3   : > { %15607 = vmatprep.subr.bf16.mxu0 %v21705_v1  ;;  %v25660_v1 = vpack.c.bf16 %v2851_v53, %v2851_v53  ;;  %v21741_v53 = vld [vmem:[%s24682_s12 + $0x42c0] ss:$24 sps:$4 sm:$0xff]  }
 0x2f5   : > { %15116 = vmatpush1.bf16.msra.mxu1 %v21700_v54  ;;  %v21728_v54 = vld [vmem:[%s24682_s12 + $0x1e64] ss:$24 sps:$4 sm:$0xff]  }
 0x2f6   : > { %15608 = vmatpush1.bf16.msra.mxu0 %v21703_v55  ;;  %15117 = vmatprep.subr.bf16.mxu1 %v21708_v45  ;;  %v21731_v55 = vld [vmem:[%s24682_s12 + $0x4264] ss:$24 sps:$4 sm:$0xff]   ;;  %v21726_v45 = vld [vmem:[%s24682_s12 + $0x1e60] ss:$24 sps:$4 sm:$0xff]  }
 0x2f7   : > { %15609 = vmatprep.subr.bf16.mxu0 %v21711_v48  ;;  %v21729_v48 = vld [vmem:[%s24682_s12 + $0x4260] ss:$24 sps:$4 sm:$0xff]  }
 0x2f9   : > { %15118 = vmatpush1.bf16.msra.mxu1 %v21706_v15  ;;  %v21734_v15 = vld [vmem:[%s24682_s12 + $0x1e94] ss:$24 sps:$4 sm:$0xff]  }
 0x2fa   : > { %15610 = vmatpush1.bf16.msra.mxu0 %v21709_v34  ;;  %15128 = vmatprep.subr.bf16.mxu1 %v21715_v41  ;;  %v21737_v34 = vld [vmem:[%s24682_s12 + $0x4294] ss:$24 sps:$4 sm:$0xff]   ;;  %v21732_v41 = vld [vmem:[%s24682_s12 + $0x1e90] ss:$24 sps:$4 sm:$0xff]  }
 0x2fb   : > { %15620 = vmatprep.subr.bf16.mxu0 %v21719_v43  ;;  %v21735_v43 = vld [vmem:[%s24682_s12 + $0x4290] ss:$24 sps:$4 sm:$0xff]  }
 0x2fc   : > { %15120 = vmatmul.mubr.bf16.vlgmr.msra.gmra.mrb[0].mxu1 %v25650_v6 }
 0x2fd   : > { %15612 = vmatmul.mubr.bf16.vlgmr.msra.gmra.mrb[0].mxu0 %v25654_v58  ;;  %15129 = vmatpush1.bf16.msra.mxu1 %v21713_v42  ;;  %v21740_v42 = vld [vmem:[%s24682_s12 + $0x1ec4] ss:$24 sps:$4 sm:$0xff]  }
 0x2fe   : > { %15621 = vmatpush1.bf16.msra.mxu0 %v21717_v49  ;;  %15130 = vmatprep.subr.bf16.mxu1 %v21722_v59  ;;  %v21743_v49 = vld [vmem:[%s24682_s12 + $0x42c4] ss:$24 sps:$4 sm:$0xff]   ;;  %v21746_v59 = vld [vmem:[%s24682_s12 + $0x1ef4] ss:$24 sps:$4 sm:$0xff]  }
 0x2ff   : > { %15622 = vmatprep.subr.bf16.mxu0 %v21725_v60  ;;  %15160 = vmatprep.mubr.bf16.mxu1 %v25658_v0  ;;  %v21749_v60 = vld [vmem:[%s24682_s12 + $0x42f4] ss:$24 sps:$4 sm:$0xff]  }
 0x300   : > { %15652 = vmatprep.mubr.bf16.mxu0 %v25660_v1 }
 0x301   : > { %15131 = vmatpush1.bf16.msra.mxu1 %v21720_v13  ;;  %v21744_v13 = vld [vmem:[%s24682_s12 + $0x1ef0] ss:$24 sps:$4 sm:$0xff]  }
 0x302   : > { %15623 = vmatpush1.bf16.msra.mxu0 %v21723_v14  ;;  %15132 = vmatprep.subr.bf16.mxu1 %v21728_v54  ;;  %v21747_v14 = vld [vmem:[%s24682_s12 + $0x42f0] ss:$24 sps:$4 sm:$0xff]   ;;  %v21752_v54 = vld [vmem:[%s24682_s12 + $0x1f24] ss:$24 sps:$4 sm:$0xff]  }
 0x303   : > { %15624 = vmatprep.subr.bf16.mxu0 %v21731_v55  ;;  %v21755_v55 = vld [vmem:[%s24682_s12 + $0x4324] ss:$24 sps:$4 sm:$0xff]  }
 0x305   : > { %15133 = vmatpush1.bf16.msra.mxu1 %v21726_v45  ;;  %v21750_v45 = vld [vmem:[%s24682_s12 + $0x1f20] ss:$24 sps:$4 sm:$0xff]  }
 0x306   : > { %15625 = vmatpush1.bf16.msra.mxu0 %v21729_v48  ;;  %15134 = vmatprep.subr.bf16.mxu1 %v21734_v15  ;;  %v21753_v48 = vld [vmem:[%s24682_s12 + $0x4320] ss:$24 sps:$4 sm:$0xff]   ;;  %v21758_v15 = vld [vmem:[%s24682_s12 + $0x1f54] ss:$24 sps:$4 sm:$0xff]  }
 0x307   : > { %15626 = vmatprep.subr.bf16.mxu0 %v21737_v34  ;;  %v21761_v34 = vld [vmem:[%s24682_s12 + $0x4354] ss:$24 sps:$4 sm:$0xff]  }
 0x309   : > { %15135 = vmatpush1.bf16.msra.mxu1 %v21732_v41  ;;  %v21756_v41 = vld [vmem:[%s24682_s12 + $0x1f50] ss:$24 sps:$4 sm:$0xff]  }
 0x30a   : > { %15627 = vmatpush1.bf16.msra.mxu0 %v21735_v43  ;;  %15136 = vmatprep.subr.bf16.mxu1 %v21740_v42  ;;  %v21759_v43 = vld [vmem:[%s24682_s12 + $0x4350] ss:$24 sps:$4 sm:$0xff]   ;;  %v21764_v42 = vld [vmem:[%s24682_s12 + $0x1f84] ss:$24 sps:$4 sm:$0xff]  }
 0x30b   : > { %15628 = vmatprep.subr.bf16.mxu0 %v21743_v49  ;;  %v21767_v49 = vld [vmem:[%s24682_s12 + $0x4384] ss:$24 sps:$4 sm:$0xff]  }
 0x30d   : > { %15137 = vmatpush1.bf16.msra.mxu1 %v21738_v32  ;;  %v21762_v32 = vld [vmem:[%s24682_s12 + $0x1f80] ss:$24 sps:$4 sm:$0xff]  }
 0x30e   : > { %15629 = vmatpush1.bf16.msra.mxu0 %v21741_v53  ;;  %15138 = vmatprep.subr.bf16.mxu1 %v21746_v59  ;;  %v21765_v53 = vld [vmem:[%s24682_s12 + $0x4380] ss:$24 sps:$4 sm:$0xff]   ;;  %v21770_v59 = vld [vmem:[%s24682_s12 + $0x1fb4] ss:$24 sps:$4 sm:$0xff]  }
 0x30f   : > { %15630 = vmatprep.subr.bf16.mxu0 %v21749_v60  ;;  %v21773_v60 = vld [vmem:[%s24682_s12 + $0x43b4] ss:$24 sps:$4 sm:$0xff]  }
 0x311   : > { %15139 = vmatpush1.bf16.msra.mxu1 %v21744_v13  ;;  %v21768_v13 = vld [vmem:[%s24682_s12 + $0x1fb0] ss:$24 sps:$4 sm:$0xff]  }
 0x312   : > { %15631 = vmatpush1.bf16.msra.mxu0 %v21747_v14  ;;  %15140 = vmatprep.subr.bf16.mxu1 %v21752_v54  ;;  %v21771_v14 = vld [vmem:[%s24682_s12 + $0x43b0] ss:$24 sps:$4 sm:$0xff]   ;;  %v21776_v54 = vld [vmem:[%s24682_s12 + $0x1fe4] ss:$24 sps:$4 sm:$0xff]  }
 0x313   : > { %15632 = vmatprep.subr.bf16.mxu0 %v21755_v55  ;;  %v21779_v55 = vld [vmem:[%s24682_s12 + $0x43e4] ss:$24 sps:$4 sm:$0xff]  }
 0x315   : > { %15141 = vmatpush1.bf16.msra.mxu1 %v21750_v45  ;;  %v21774_v45 = vld [vmem:[%s24682_s12 + $0x1fe0] ss:$24 sps:$4 sm:$0xff]  }
 0x316   : > { %15633 = vmatpush1.bf16.msra.mxu0 %v21753_v48  ;;  %15142 = vmatprep.subr.bf16.mxu1 %v21758_v15  ;;  %v21777_v48 = vld [vmem:[%s24682_s12 + $0x43e0] ss:$24 sps:$4 sm:$0xff]   ;;  %v21782_v15 = vld [vmem:[%s24682_s12 + $0x2014] ss:$24 sps:$4 sm:$0xff]  }
 0x317   : > { %15634 = vmatprep.subr.bf16.mxu0 %v21761_v34  ;;  %v21785_v34 = vld [vmem:[%s24682_s12 + $0x4414] ss:$24 sps:$4 sm:$0xff]  }
 0x319   : > { %15143 = vmatpush1.bf16.msra.mxu1 %v21756_v41  ;;  %v21780_v41 = vld [vmem:[%s24682_s12 + $0x2010] ss:$24 sps:$4 sm:$0xff]  }
 0x31a   : > { %15635 = vmatpush1.bf16.msra.mxu0 %v21759_v43  ;;  %15144 = vmatprep.subr.bf16.mxu1 %v21764_v42  ;;  %v21783_v43 = vld [vmem:[%s24682_s12 + $0x4410] ss:$24 sps:$4 sm:$0xff]   ;;  %v21788_v42 = vld [vmem:[%s24682_s12 + $0x2044] ss:$24 sps:$4 sm:$0xff]  }
 0x31b   : > { %15636 = vmatprep.subr.bf16.mxu0 %v21767_v49  ;;  %v21791_v49 = vld [vmem:[%s24682_s12 + $0x4444] ss:$24 sps:$4 sm:$0xff]  }
 0x31d   : > { %15145 = vmatpush1.bf16.msra.mxu1 %v21762_v32  ;;  %v21786_v32 = vld [vmem:[%s24682_s12 + $0x2040] ss:$24 sps:$4 sm:$0xff]  }
 0x31e   : > { %15637 = vmatpush1.bf16.msra.mxu0 %v21765_v53  ;;  %15146 = vmatprep.subr.bf16.mxu1 %v21770_v59  ;;  %v21789_v53 = vld [vmem:[%s24682_s12 + $0x4440] ss:$24 sps:$4 sm:$0xff]   ;;  %v21794_v59 = vld [vmem:[%s24682_s12 + $0x2074] ss:$24 sps:$4 sm:$0xff]  }
 0x31f   : > { %15638 = vmatprep.subr.bf16.mxu0 %v21773_v60  ;;  %v21797_v60 = vld [vmem:[%s24682_s12 + $0x4474] ss:$24 sps:$4 sm:$0xff]  }
 0x321   : > { %15147 = vmatpush1.bf16.msra.mxu1 %v21768_v13  ;;  %v21792_v13 = vld [vmem:[%s24682_s12 + $0x2070] ss:$24 sps:$4 sm:$0xff]  }
 0x322   : > { %15639 = vmatpush1.bf16.msra.mxu0 %v21771_v14  ;;  %15148 = vmatprep.subr.bf16.mxu1 %v21776_v54  ;;  %v21795_v14 = vld [vmem:[%s24682_s12 + $0x4470] ss:$24 sps:$4 sm:$0xff]   ;;  %v21800_v54 = vld [vmem:[%s24682_s12 + $0x20a4] ss:$24 sps:$4 sm:$0xff]  }
 0x323   : > { %15640 = vmatprep.subr.bf16.mxu0 %v21779_v55  ;;  %v21803_v55 = vld [vmem:[%s24682_s12 + $0x44a4] ss:$24 sps:$4 sm:$0xff]  }
 0x325   : > { %15149 = vmatpush1.bf16.msra.mxu1 %v21774_v45  ;;  %v2734_v45 = vcombine.high %v25621_v2, %v25621_v2  ;;  %v21804_v2 = vld [vmem:[%s24682_s12 + $0x20d0] ss:$24 sps:$4 sm:$0xff]  }
 0x326   : > { %15641 = vmatpush1.bf16.msra.mxu0 %v21777_v48  ;;  %15150 = vmatprep.subr.bf16.mxu1 %v21782_v15  ;;  %v2836_v48 = vcombine.high %v25624_v3, %v25624_v3  ;;  %v21798_v15 = vld [vmem:[%s24682_s12 + $0x20a0] ss:$24 sps:$4 sm:$0xff]   ;;  %v21807_v3 = vld [vmem:[%s24682_s12 + $0x44d0] ss:$24 sps:$4 sm:$0xff]  }
 0x327   : > { %15642 = vmatprep.subr.bf16.mxu0 %v21785_v34  ;;  %v21801_v34 = vld [vmem:[%s24682_s12 + $0x44a0] ss:$24 sps:$4 sm:$0xff]  }
 0x329   : > { %15151 = vmatpush1.bf16.msra.mxu1 %v21780_v41  ;;  %v21806_v41 = vld [vmem:[%s24682_s12 + $0x20d4] ss:$24 sps:$4 sm:$0xff]  }
 0x32a   : > { %15643 = vmatpush1.bf16.msra.mxu0 %v21783_v43  ;;  %15152 = vmatprep.subr.bf16.mxu1 %v21788_v42  ;;  %v21809_v43 = vld [vmem:[%s24682_s12 + $0x44d4] ss:$24 sps:$4 sm:$0xff]   ;;  %v25727_v42 = vrot.slane %v2734_v45, %v24740_v50 }
 0x32b   : > { %15644 = vmatprep.subr.bf16.mxu0 %v21791_v49  ;;  %v25730_v49 = vrot.slane %v2836_v48, %v24740_v50  ;;  %v21818_v45 = vld [vmem:[%s24682_s12 + $0x2134] ss:$24 sps:$4 sm:$0xff]  }
 0x32c   : > { %v21821_v48 = vld [vmem:[%s24682_s12 + $0x4534] ss:$24 sps:$4 sm:$0xff]  }
 0x32d   : > { %15153 = vmatpush1.bf16.msra.mxu1 %v21786_v32  ;;  %v21812_v32 = vld [vmem:[%s24682_s12 + $0x2104] ss:$24 sps:$4 sm:$0xff]  }
 0x32e   : > { %15645 = vmatpush1.bf16.msra.mxu0 %v21789_v53  ;;  %15154 = vmatprep.subr.bf16.mxu1 %v21794_v59  ;;  %v21815_v53 = vld [vmem:[%s24682_s12 + $0x4504] ss:$24 sps:$4 sm:$0xff]   ;;  %v2750_v59 = vcombine.high %v25727_v42, %v25727_v42 }
 0x32f   : > { %15646 = vmatprep.subr.bf16.mxu0 %v21797_v60  ;;  %v2852_v60 = vcombine.high %v25730_v49, %v25730_v49 }
 0x331   : > { %15155 = vmatpush1.bf16.msra.mxu1 %v21792_v13  ;;  %v25742_v13 = vpack.c.bf16 %v25632_v25, %v25632_v25  ;;  %v25754_v25 = vpack.c.bf16 %v2852_v60, %v2852_v60  ;;  %v21831_v60 = vld [vmem:[%s24682_s12 + $0x4590] ss:$24 sps:$4 sm:$0xff]  }
 0x332   : > { %15647 = vmatpush1.bf16.msra.mxu0 %v21795_v14  ;;  %15156 = vmatprep.subr.bf16.mxu1 %v21800_v54  ;;  %v25746_v14 = vpack.c.bf16 %v25636_v26, %v25636_v26  ;;  %v21810_v54 = vld [vmem:[%s24682_s12 + $0x2100] ss:$24 sps:$4 sm:$0xff]   ;;  %v21816_v26 = vld [vmem:[%s24682_s12 + $0x2130] ss:$24 sps:$4 sm:$0xff]  }
 0x333   : > { %15648 = vmatprep.subr.bf16.mxu0 %v21803_v55  ;;  %v21813_v55 = vld [vmem:[%s24682_s12 + $0x4500] ss:$24 sps:$4 sm:$0xff]  }
 0x335   : > { %15157 = vmatpush1.bf16.msra.mxu1 %v21798_v15  ;;  %v25752_v15 = vpack.c.bf16 %v2750_v59, %v2750_v59  ;;  %v21828_v59 = vld [vmem:[%s24682_s12 + $0x2190] ss:$24 sps:$4 sm:$0xff]  }
 0x336   : > { %15649 = vmatpush1.bf16.msra.mxu0 %v21801_v34  ;;  %15158 = vmatprep.subr.bf16.mxu1 %v21806_v41  ;;  %v21819_v34 = vld [vmem:[%s24682_s12 + $0x4530] ss:$24 sps:$4 sm:$0xff]   ;;  %v21824_v41 = vld [vmem:[%s24682_s12 + $0x2164] ss:$24 sps:$4 sm:$0xff]  }
 0x337   : > { %15650 = vmatprep.subr.bf16.mxu0 %v21809_v43  ;;  %v21827_v43 = vld [vmem:[%s24682_s12 + $0x4564] ss:$24 sps:$4 sm:$0xff]  }
 0x339   : > { %15159 = vmatpush1.bf16.msra.mxu1 %v21804_v2  ;;  %v21822_v2 = vld [vmem:[%s24682_s12 + $0x2160] ss:$24 sps:$4 sm:$0xff]  }
 0x33a   : > { %15651 = vmatpush1.bf16.msra.mxu0 %v21807_v3  ;;  %15169 = vmatprep.subr.bf16.mxu1 %v21812_v32  ;;  %v21825_v3 = vld [vmem:[%s24682_s12 + $0x4560] ss:$24 sps:$4 sm:$0xff]   ;;  %v21830_v32 = vld [vmem:[%s24682_s12 + $0x2194] ss:$24 sps:$4 sm:$0xff]  }
 0x33b   : > { %15661 = vmatprep.subr.bf16.mxu0 %v21815_v53  ;;  %v21833_v53 = vld [vmem:[%s24682_s12 + $0x4594] ss:$24 sps:$4 sm:$0xff]  }
 0x33c   : > { %15161 = vmatmul.mubr.bf16.vlgmr.msra.gmra.mrb[0].mxu1 %v25742_v13 }
 0x33d   : > { %15653 = vmatmul.mubr.bf16.vlgmr.msra.gmra.mrb[0].mxu0 %v25746_v14  ;;  %15170 = vmatpush1.bf16.msra.mxu1 %v21810_v54  ;;  %v21836_v54 = vld [vmem:[%s24682_s12 + $0x21c4] ss:$24 sps:$4 sm:$0xff]  }
 0x33e   : > { %15662 = vmatpush1.bf16.msra.mxu0 %v21813_v55  ;;  %15171 = vmatprep.subr.bf16.mxu1 %v21818_v45  ;;  %v21839_v55 = vld [vmem:[%s24682_s12 + $0x45c4] ss:$24 sps:$4 sm:$0xff]   ;;  %v21834_v45 = vld [vmem:[%s24682_s12 + $0x21c0] ss:$24 sps:$4 sm:$0xff]  }
 0x33f   : > { %15663 = vmatprep.subr.bf16.mxu0 %v21821_v48  ;;  %15201 = vmatprep.mubr.bf16.mxu1 %v25752_v15  ;;  %v21837_v48 = vld [vmem:[%s24682_s12 + $0x45c0] ss:$24 sps:$4 sm:$0xff]  }
 0x340   : > { %15693 = vmatprep.mubr.bf16.mxu0 %v25754_v25 }
 0x341   : > { %15172 = vmatpush1.bf16.msra.mxu1 %v21816_v26  ;;  %v21842_v26 = vld [vmem:[%s24682_s12 + $0x21f4] ss:$24 sps:$4 sm:$0xff]  }
 0x342   : > { %15664 = vmatpush1.bf16.msra.mxu0 %v21819_v34  ;;  %15173 = vmatprep.subr.bf16.mxu1 %v21824_v41  ;;  %v21845_v34 = vld [vmem:[%s24682_s12 + $0x45f4] ss:$24 sps:$4 sm:$0xff]   ;;  %v21840_v41 = vld [vmem:[%s24682_s12 + $0x21f0] ss:$24 sps:$4 sm:$0xff]  }
 0x343   : > { %15665 = vmatprep.subr.bf16.mxu0 %v21827_v43  ;;  %v21843_v43 = vld [vmem:[%s24682_s12 + $0x45f0] ss:$24 sps:$4 sm:$0xff]  }
 0x345   : > { %15174 = vmatpush1.bf16.msra.mxu1 %v21822_v2  ;;  %v21848_v2 = vld [vmem:[%s24682_s12 + $0x2224] ss:$24 sps:$4 sm:$0xff]  }
 0x346   : > { %15666 = vmatpush1.bf16.msra.mxu0 %v21825_v3  ;;  %15175 = vmatprep.subr.bf16.mxu1 %v21830_v32  ;;  %v21851_v3 = vld [vmem:[%s24682_s12 + $0x4624] ss:$24 sps:$4 sm:$0xff]   ;;  %v21846_v32 = vld [vmem:[%s24682_s12 + $0x2220] ss:$24 sps:$4 sm:$0xff]  }
 0x347   : > { %15667 = vmatprep.subr.bf16.mxu0 %v21833_v53  ;;  %v21849_v53 = vld [vmem:[%s24682_s12 + $0x4620] ss:$24 sps:$4 sm:$0xff]  }
 0x349   : > { %15176 = vmatpush1.bf16.msra.mxu1 %v21828_v59  ;;  %v21854_v59 = vld [vmem:[%s24682_s12 + $0x2254] ss:$24 sps:$4 sm:$0xff]  }
 0x34a   : > { %15668 = vmatpush1.bf16.msra.mxu0 %v21831_v60  ;;  %15177 = vmatprep.subr.bf16.mxu1 %v21836_v54  ;;  %v21857_v60 = vld [vmem:[%s24682_s12 + $0x4654] ss:$24 sps:$4 sm:$0xff]   ;;  %v21852_v54 = vld [vmem:[%s24682_s12 + $0x2250] ss:$24 sps:$4 sm:$0xff]  }
 0x34b   : > { %15669 = vmatprep.subr.bf16.mxu0 %v21839_v55  ;;  %v21855_v55 = vld [vmem:[%s24682_s12 + $0x4650] ss:$24 sps:$4 sm:$0xff]  }
 0x34d   : > { %15178 = vmatpush1.bf16.msra.mxu1 %v21834_v45  ;;  %v21860_v45 = vld [vmem:[%s24682_s12 + $0x2284] ss:$24 sps:$4 sm:$0xff]  }
 0x34e   : > { %15670 = vmatpush1.bf16.msra.mxu0 %v21837_v48  ;;  %15179 = vmatprep.subr.bf16.mxu1 %v21842_v26  ;;  %v21863_v48 = vld [vmem:[%s24682_s12 + $0x4684] ss:$24 sps:$4 sm:$0xff]   ;;  %v21858_v26 = vld [vmem:[%s24682_s12 + $0x2280] ss:$24 sps:$4 sm:$0xff]  }
 0x34f   : > { %15671 = vmatprep.subr.bf16.mxu0 %v21845_v34  ;;  %v21861_v34 = vld [vmem:[%s24682_s12 + $0x4680] ss:$24 sps:$4 sm:$0xff]  }
 0x351   : > { %15180 = vmatpush1.bf16.msra.mxu1 %v21840_v41  ;;  %v21866_v41 = vld [vmem:[%s24682_s12 + $0x22b4] ss:$24 sps:$4 sm:$0xff]  }
 0x352   : > { %15672 = vmatpush1.bf16.msra.mxu0 %v21843_v43  ;;  %15181 = vmatprep.subr.bf16.mxu1 %v21848_v2  ;;  %v21869_v43 = vld [vmem:[%s24682_s12 + $0x46b4] ss:$24 sps:$4 sm:$0xff]   ;;  %v21864_v2 = vld [vmem:[%s24682_s12 + $0x22b0] ss:$24 sps:$4 sm:$0xff]  }
 0x353   : > { %15673 = vmatprep.subr.bf16.mxu0 %v21851_v3  ;;  %v21867_v3 = vld [vmem:[%s24682_s12 + $0x46b0] ss:$24 sps:$4 sm:$0xff]  }
 0x355   : > { %15182 = vmatpush1.bf16.msra.mxu1 %v21846_v32  ;;  %v21872_v32 = vld [vmem:[%s24682_s12 + $0x22e4] ss:$24 sps:$4 sm:$0xff]  }
 0x356   : > { %15674 = vmatpush1.bf16.msra.mxu0 %v21849_v53  ;;  %15183 = vmatprep.subr.bf16.mxu1 %v21854_v59  ;;  %v21875_v53 = vld [vmem:[%s24682_s12 + $0x46e4] ss:$24 sps:$4 sm:$0xff]   ;;  %v21870_v59 = vld [vmem:[%s24682_s12 + $0x22e0] ss:$24 sps:$4 sm:$0xff]  }
 0x357   : > { %15675 = vmatprep.subr.bf16.mxu0 %v21857_v60  ;;  %v21873_v60 = vld [vmem:[%s24682_s12 + $0x46e0] ss:$24 sps:$4 sm:$0xff]  }
 0x359   : > { %15184 = vmatpush1.bf16.msra.mxu1 %v21852_v54  ;;  %v21878_v54 = vld [vmem:[%s24682_s12 + $0x2314] ss:$24 sps:$4 sm:$0xff]  }
 0x35a   : > { %15676 = vmatpush1.bf16.msra.mxu0 %v21855_v55  ;;  %15185 = vmatprep.subr.bf16.mxu1 %v21860_v45  ;;  %v21881_v55 = vld [vmem:[%s24682_s12 + $0x4714] ss:$24 sps:$4 sm:$0xff]   ;;  %v21876_v45 = vld [vmem:[%s24682_s12 + $0x2310] ss:$24 sps:$4 sm:$0xff]  }
 0x35b   : > { %15677 = vmatprep.subr.bf16.mxu0 %v21863_v48  ;;  %v21879_v48 = vld [vmem:[%s24682_s12 + $0x4710] ss:$24 sps:$4 sm:$0xff]  }
 0x35d   : > { %15186 = vmatpush1.bf16.msra.mxu1 %v21858_v26  ;;  %v21884_v26 = vld [vmem:[%s24682_s12 + $0x2344] ss:$24 sps:$4 sm:$0xff]  }
 0x35e   : > { %15678 = vmatpush1.bf16.msra.mxu0 %v21861_v34  ;;  %15187 = vmatprep.subr.bf16.mxu1 %v21866_v41  ;;  %v21887_v34 = vld [vmem:[%s24682_s12 + $0x4744] ss:$24 sps:$4 sm:$0xff]   ;;  %v21882_v41 = vld [vmem:[%s24682_s12 + $0x2340] ss:$24 sps:$4 sm:$0xff]  }
 0x35f   : > { %15679 = vmatprep.subr.bf16.mxu0 %v21869_v43  ;;  %v21885_v43 = vld [vmem:[%s24682_s12 + $0x4740] ss:$24 sps:$4 sm:$0xff]  }
 0x361   : > { %15188 = vmatpush1.bf16.msra.mxu1 %v21864_v2  ;;  %v21890_v2 = vld [vmem:[%s24682_s12 + $0x2374] ss:$24 sps:$4 sm:$0xff]  }
 0x362   : > { %15680 = vmatpush1.bf16.msra.mxu0 %v21867_v3  ;;  %15189 = vmatprep.subr.bf16.mxu1 %v21872_v32  ;;  %v21893_v3 = vld [vmem:[%s24682_s12 + $0x4774] ss:$24 sps:$4 sm:$0xff]   ;;  %v21888_v32 = vld [vmem:[%s24682_s12 + $0x2370] ss:$24 sps:$4 sm:$0xff]  }
 0x363   : > { %15681 = vmatprep.subr.bf16.mxu0 %v21875_v53  ;;  %v21891_v53 = vld [vmem:[%s24682_s12 + $0x4770] ss:$24 sps:$4 sm:$0xff]  }
 0x365   : > { %15190 = vmatpush1.bf16.msra.mxu1 %v21870_v59  ;;  %v21896_v59 = vld [vmem:[%s24682_s12 + $0x23a4] ss:$24 sps:$4 sm:$0xff]  }
 0x366   : > { %15682 = vmatpush1.bf16.msra.mxu0 %v21873_v60  ;;  %15191 = vmatprep.subr.bf16.mxu1 %v21878_v54  ;;  %v21899_v60 = vld [vmem:[%s24682_s12 + $0x47a4] ss:$24 sps:$4 sm:$0xff]   ;;  %v21894_v54 = vld [vmem:[%s24682_s12 + $0x23a0] ss:$24 sps:$4 sm:$0xff]  }
 0x367   : > { %15683 = vmatprep.subr.bf16.mxu0 %v21881_v55  ;;  %v21897_v55 = vld [vmem:[%s24682_s12 + $0x47a0] ss:$24 sps:$4 sm:$0xff]  }
 0x369   : > { %15192 = vmatpush1.bf16.msra.mxu1 %v21876_v45  ;;  %v21902_v45 = vld [vmem:[%s24682_s12 + $0x23d4] ss:$24 sps:$4 sm:$0xff]  }
 0x36a   : > { %15684 = vmatpush1.bf16.msra.mxu0 %v21879_v48  ;;  %15193 = vmatprep.subr.bf16.mxu1 %v21884_v26  ;;  %v21905_v48 = vld [vmem:[%s24682_s12 + $0x47d4] ss:$24 sps:$4 sm:$0xff]   ;;  %v21900_v26 = vld [vmem:[%s24682_s12 + $0x23d0] ss:$24 sps:$4 sm:$0xff]  }
 0x36b   : > { %15685 = vmatprep.subr.bf16.mxu0 %v21887_v34  ;;  %v21903_v34 = vld [vmem:[%s24682_s12 + $0x47d0] ss:$24 sps:$4 sm:$0xff]  }
 0x36d   : > { %15194 = vmatpush1.bf16.msra.mxu1 %v21882_v41  ;;  %v21910_v41 = vld [vmem:[%s24682_s12 + $0x4804] ss:$24 sps:$4 sm:$0xff]  }
 0x36e   : > { %15686 = vmatpush1.bf16.msra.mxu0 %v21885_v43  ;;  %15195 = vmatprep.subr.bf16.mxu1 %v21890_v2  ;;  %v21913_v43 = vld [vmem:[%s24682_s12 + $0xc] ss:$24 sps:$4 sm:$0xff]   ;;  %v25822_v2 = vpack.c.bf16 %v25727_v42, %v25727_v42  ;;  %v21914_v42 = vld [vmem:[%s24682_s12 + $0x4830] ss:$24 sps:$4 sm:$0xff]  }
 0x36f   : > { %15687 = vmatprep.subr.bf16.mxu0 %v21893_v3  ;;  %v25826_v3 = vpack.c.bf16 %v25730_v49, %v25730_v49  ;;  %v21917_v49 = vld [vmem:[%s24682_s12 + $0x38] ss:$24 sps:$4 sm:$0xff]  }
 0x371   : > { %15196 = vmatpush1.bf16.msra.mxu1 %v21888_v32  ;;  %v21908_v32 = vld [vmem:[%s24682_s12 + $0x4800] ss:$24 sps:$4 sm:$0xff]  }
 0x372   : > { %15688 = vmatpush1.bf16.msra.mxu0 %v21891_v53  ;;  %15197 = vmatprep.subr.bf16.mxu1 %v21896_v59  ;;  %v21911_v53 = vld [vmem:[%s24682_s12 + $0x8] ss:$24 sps:$4 sm:$0xff]   ;;  %v21916_v59 = vld [vmem:[%s24682_s12 + $0x4834] ss:$24 sps:$4 sm:$0xff]  }
 0x373   : > { %15689 = vmatprep.subr.bf16.mxu0 %v21899_v60  ;;  %v21919_v60 = vld [vmem:[%s24682_s12 + $0x3c] ss:$24 sps:$4 sm:$0xff]  }
 0x375   : > { %15198 = vmatpush1.bf16.msra.mxu1 %v21894_v54  ;;  %v21922_v54 = vld [vmem:[%s24682_s12 + $0x4864] ss:$24 sps:$4 sm:$0xff]  }
 0x376   : > { %15690 = vmatpush1.bf16.msra.mxu0 %v21897_v55  ;;  %15199 = vmatprep.subr.bf16.mxu1 %v21902_v45  ;;  %v21925_v55 = vld [vmem:[%s24682_s12 + $0x6c] ss:$24 sps:$4 sm:$0xff]   ;;  %v24469_v45 = vmov 0  }
 0x377   : > { %15691 = vmatprep.subr.bf16.mxu0 %v21905_v48  ;;  %v21920_v48 = vld [vmem:[%s24682_s12 + $0x4860] ss:$24 sps:$4 sm:$0xff]  }
 0x379   : > { %15200 = vmatpush1.bf16.msra.mxu1 %v21900_v26  ;;  %v21923_v26 = vld [vmem:[%s24682_s12 + $0x68] ss:$24 sps:$4 sm:$0xff]  }
 0x37a   : > { %15692 = vmatpush1.bf16.msra.mxu0 %v21903_v34  ;;  %15743 = vmatprep.subr.bf16.mxu1 %v21913_v43  ;;  %v21928_v34 = vld [vmem:[%s24682_s12 + $0x4894] ss:$24 sps:$4 sm:$0xff]   ;;  %v21926_v43 = vld [vmem:[%s24682_s12 + $0x4890] ss:$24 sps:$4 sm:$0xff]  }
 0x37b   : > { %15702 = vmatprep.subr.bf16.mxu0 %v21910_v41  ;;  %v21931_v41 = vld [vmem:[%s24682_s12 + $0x9c] ss:$24 sps:$4 sm:$0xff]  }
 0x37c   : > { %15202 = vmatmul.mubr.bf16.vlgmr.msra.gmra.mrb[0].mxu1 %v25822_v2 }
 0x37d   : > { %15694 = vmatmul.mubr.bf16.vlgmr.msra.gmra.mrb[0].mxu0 %v25826_v3  ;;  %15744 = vmatpush1.bf16.msra.mxu1 %v21911_v53  ;;  %v21934_v53 = vld [vmem:[%s24682_s12 + $0x48c4] ss:$24 sps:$4 sm:$0xff]  }
 0x37e   : > { %15703 = vmatpush1.bf16.msra.mxu0 %v21908_v32  ;;  %15745 = vmatprep.subr.bf16.mxu1 %v21919_v60  ;;  %v21929_v32 = vld [vmem:[%s24682_s12 + $0x98] ss:$24 sps:$4 sm:$0xff]  }
 0x37f   : > { %15704 = vmatprep.subr.bf16.mxu0 %v21916_v59  ;;  %15734 = vmatprep.mubr.bf16.mxu0 %v24469_v45  ;;  %v21937_v59 = vld [vmem:[%s24682_s12 + $0xcc] ss:$24 sps:$4 sm:$0xff]   ;;  %v21932_v60 = vld [vmem:[%s24682_s12 + $0x48c0] ss:$24 sps:$4 sm:$0xff]  }
 0x380   : > { %15775 = vmatprep.mubr.bf16.mxu1 %v24752_v62 }
 0x381   : > { %15746 = vmatpush1.bf16.msra.mxu1 %v21917_v49  ;;  %v21940_v49 = vld [vmem:[%s24682_s12 + $0x48f4] ss:$24 sps:$4 sm:$0xff]  }
 0x382   : > { %15705 = vmatpush1.bf16.msra.mxu0 %v21914_v42  ;;  %15747 = vmatprep.subr.bf16.mxu1 %v21925_v55  ;;  %v21935_v42 = vld [vmem:[%s24682_s12 + $0xc8] ss:$24 sps:$4 sm:$0xff]  }
 0x383   : > { %15706 = vmatprep.subr.bf16.mxu0 %v21922_v54  ;;  %v21943_v54 = vld [vmem:[%s24682_s12 + $0xfc] ss:$24 sps:$4 sm:$0xff]   ;;  %v21938_v55 = vld [vmem:[%s24682_s12 + $0x48f0] ss:$24 sps:$4 sm:$0xff]  }
 0x385   : > { %15748 = vmatpush1.bf16.msra.mxu1 %v21923_v26  ;;  %v21946_v26 = vld [vmem:[%s24682_s12 + $0x4924] ss:$24 sps:$4 sm:$0xff]  }
 0x386   : > { %15707 = vmatpush1.bf16.msra.mxu0 %v21920_v48  ;;  %15749 = vmatprep.subr.bf16.mxu1 %v21931_v41  ;;  %v21941_v48 = vld [vmem:[%s24682_s12 + $0xf8] ss:$24 sps:$4 sm:$0xff]  }
 0x387   : > { %15708 = vmatprep.subr.bf16.mxu0 %v21928_v34  ;;  %v21949_v34 = vld [vmem:[%s24682_s12 + $0x12c] ss:$24 sps:$4 sm:$0xff]   ;;  %v21944_v41 = vld [vmem:[%s24682_s12 + $0x4920] ss:$24 sps:$4 sm:$0xff]  }
 0x389   : > { %15750 = vmatpush1.bf16.msra.mxu1 %v21929_v32  ;;  %v21952_v32 = vld [vmem:[%s24682_s12 + $0x4954] ss:$24 sps:$4 sm:$0xff]  }
 0x38a   : > { %15709 = vmatpush1.bf16.msra.mxu0 %v21926_v43  ;;  %15751 = vmatprep.subr.bf16.mxu1 %v21937_v59  ;;  %v21947_v43 = vld [vmem:[%s24682_s12 + $0x128] ss:$24 sps:$4 sm:$0xff]  }
 0x38b   : > { %15710 = vmatprep.subr.bf16.mxu0 %v21934_v53  ;;  %v21955_v53 = vld [vmem:[%s24682_s12 + $0x15c] ss:$24 sps:$4 sm:$0xff]   ;;  %v21950_v59 = vld [vmem:[%s24682_s12 + $0x4950] ss:$24 sps:$4 sm:$0xff]  }
 0x38d   : > { %15752 = vmatpush1.bf16.msra.mxu1 %v21935_v42  ;;  %v18010_v42 = vld.sshfl [vmem:[%s24675_s30 + $0x60] sm:$0x3 pattern:$0x76325410] }
 0x38e   : > { %15711 = vmatpush1.bf16.msra.mxu0 %v21932_v60  ;;  %15753 = vmatprep.subr.bf16.mxu1 %v21943_v54  ;;  %v21953_v60 = vld [vmem:[%s24682_s12 + $0x158] ss:$24 sps:$4 sm:$0xff]   ;;  %v21961_v54 = vld [vmem:[%s24682_s12 + $0x14] ss:$24 sps:$4 sm:$0xff]  }
 0x38f   : > { %15712 = vmatprep.subr.bf16.mxu0 %v21940_v49  ;;  %v21958_v49 = vld [vmem:[%s24682_s12 + $0x18c] ss:$24 sps:$4 sm:$0xff]  }
 0x391   : > { %15754 = vmatpush1.bf16.msra.mxu1 %v21941_v48  ;;  %v21956_v48 = vld [vmem:[%s24682_s12 + $0x188] ss:$24 sps:$4 sm:$0xff]  }
 0x392   : > { %15713 = vmatpush1.bf16.msra.mxu0 %v21938_v55  ;;  %15755 = vmatprep.subr.bf16.mxu1 %v21949_v34  ;;  %v25865_v55 = vpack.c.bf16 %v18010_v42, %v18010_v42  ;;  %v21964_v34 = vld [vmem:[%s24682_s12 + $0x1bc] ss:$24 sps:$4 sm:$0xff]   ;;  %v21971_v42 = vld [vmem:[%s24682_s12 + $0x70] ss:$24 sps:$4 sm:$0xff]  }
 0x393   : > { %15714 = vmatprep.subr.bf16.mxu0 %v21946_v26  ;;  %v21959_v26 = vld [vmem:[%s24682_s12 + $0x10] ss:$24 sps:$4 sm:$0xff]  }
 0x395   : > { %15756 = vmatpush1.bf16.msra.mxu1 %v21947_v43  ;;  %v21962_v43 = vld [vmem:[%s24682_s12 + $0x1b8] ss:$24 sps:$4 sm:$0xff]  }
 0x396   : > { %15715 = vmatpush1.bf16.msra.mxu0 %v21944_v41  ;;  %15757 = vmatprep.subr.bf16.mxu1 %v21955_v53  ;;  %v21967_v41 = vld [vmem:[%s24682_s12 + $0x44] ss:$24 sps:$4 sm:$0xff]  }
 0x397   : > { %15716 = vmatprep.subr.bf16.mxu0 %v21952_v32  ;;  %v21965_v32 = vld [vmem:[%s24682_s12 + $0x40] ss:$24 sps:$4 sm:$0xff]   ;;  %v21970_v53 = vld [vmem:[%s24682_s12 + $0x1ec] ss:$24 sps:$4 sm:$0xff]  }
 0x399   : > { %15758 = vmatpush1.bf16.msra.mxu1 %v21953_v60  ;;  %v21968_v60 = vld [vmem:[%s24682_s12 + $0x1e8] ss:$24 sps:$4 sm:$0xff]  }
 0x39a   : > { %15717 = vmatpush1.bf16.msra.mxu0 %v21950_v59  ;;  %15759 = vmatprep.subr.bf16.mxu1 %v21958_v49  ;;  %v21973_v59 = vld [vmem:[%s24682_s12 + $0x74] ss:$24 sps:$4 sm:$0xff]  }
 0x39b   : > { %16768 = vmatprep.subr.bf16.mxu0 %v21961_v54  ;;  %v21976_v49 = vld [vmem:[%s24682_s12 + $0x21c] ss:$24 sps:$4 sm:$0xff]  }
 0x39c   : > { %v21979_v54 = vld [vmem:[%s24682_s12 + $0xa4] ss:$24 sps:$4 sm:$0xff]  }
 0x39d   : > { %15735 = vmatmul.mubr.bf16.vlgmr.msra.gmra.mrb[0].mxu0 %v25865_v55  ;;  %15760 = vmatpush1.bf16.msra.mxu1 %v21956_v48  ;;  %v21974_v48 = vld [vmem:[%s24682_s12 + $0x218] ss:$24 sps:$4 sm:$0xff]  }
 0x39e   : > { %16769 = vmatpush1.bf16.msra.mxu0 %v21959_v26  ;;  %15761 = vmatprep.subr.bf16.mxu1 %v21964_v34  ;;  %v21977_v26 = vld [vmem:[%s24682_s12 + $0xa0] ss:$24 sps:$4 sm:$0xff]   ;;  %v21985_v34 = vld [vmem:[%s24682_s12 + $0xd4] ss:$24 sps:$4 sm:$0xff]  }
 0x39f   : > { %16770 = vmatprep.subr.bf16.mxu0 %v21967_v41  ;;  %16800 = vmatprep.mubr.bf16.mxu0 %v24752_v62  ;;  %v21982_v62 = vld [vmem:[%s24682_s12 + $0x24c] ss:$24 sps:$4 sm:$0xff]   ;;  %v21980_v41 = vld [vmem:[%s24682_s12 + $0x248] ss:$24 sps:$4 sm:$0xff]  }
 0x3a1   : > { %15762 = vmatpush1.bf16.msra.mxu1 %v21962_v43  ;;  %v21983_v43 = vld [vmem:[%s24682_s12 + $0xd0] ss:$24 sps:$4 sm:$0xff]  }
 0x3a2   : > { %16771 = vmatpush1.bf16.msra.mxu0 %v21965_v32  ;;  %15763 = vmatprep.subr.bf16.mxu1 %v21970_v53  ;;  %v21988_v32 = vld [vmem:[%s24682_s12 + $0x27c] ss:$24 sps:$4 sm:$0xff]  }
 0x3a3   : > { %16772 = vmatprep.subr.bf16.mxu0 %v21973_v59  ;;  %v21991_v53 = vld [vmem:[%s24682_s12 + $0x104] ss:$24 sps:$4 sm:$0xff]   ;;  %v21986_v59 = vld [vmem:[%s24682_s12 + $0x278] ss:$24 sps:$4 sm:$0xff]  }
 0x3a5   : > { %15764 = vmatpush1.bf16.msra.mxu1 %v21968_v60  ;;  %v21989_v60 = vld [vmem:[%s24682_s12 + $0x100] ss:$24 sps:$4 sm:$0xff]  }
 0x3a6   : > { %16773 = vmatpush1.bf16.msra.mxu0 %v21971_v42  ;;  %15765 = vmatprep.subr.bf16.mxu1 %v21976_v49  ;;  %v21994_v42 = vld [vmem:[%s24682_s12 + $0x2ac] ss:$24 sps:$4 sm:$0xff]  }
 0x3a7   : > { %16774 = vmatprep.subr.bf16.mxu0 %v21979_v54  ;;  %v21997_v49 = vld [vmem:[%s24682_s12 + $0x134] ss:$24 sps:$4 sm:$0xff]   ;;  %v21992_v54 = vld [vmem:[%s24682_s12 + $0x2a8] ss:$24 sps:$4 sm:$0xff]  }
 0x3a9   : > { %15766 = vmatpush1.bf16.msra.mxu1 %v21974_v48  ;;  %v21995_v48 = vld [vmem:[%s24682_s12 + $0x130] ss:$24 sps:$4 sm:$0xff]  }
 0x3aa   : > { %16775 = vmatpush1.bf16.msra.mxu0 %v21977_v26  ;;  %15767 = vmatprep.subr.bf16.mxu1 %v21982_v62  ;;  %v22000_v26 = vld [vmem:[%s24682_s12 + $0x2dc] ss:$24 sps:$4 sm:$0xff]  }
 0x3ab   : > { %16776 = vmatprep.subr.bf16.mxu0 %v21985_v34  ;;  %v22003_v62 = vld [vmem:[%s24682_s12 + $0x164] ss:$24 sps:$4 sm:$0xff]   ;;  %v21998_v34 = vld [vmem:[%s24682_s12 + $0x2d8] ss:$24 sps:$4 sm:$0xff]  }
 0x3ad   : > { %15768 = vmatpush1.bf16.msra.mxu1 %v21980_v41  ;;  %v22001_v41 = vld [vmem:[%s24682_s12 + $0x160] ss:$24 sps:$4 sm:$0xff]  }
 0x3ae   : > { %16777 = vmatpush1.bf16.msra.mxu0 %v21983_v43  ;;  %15769 = vmatprep.subr.bf16.mxu1 %v21988_v32  ;;  %v22006_v43 = vld [vmem:[%s24682_s12 + $0x30c] ss:$24 sps:$4 sm:$0xff]  }
 0x3af   : > { %16778 = vmatprep.subr.bf16.mxu0 %v21991_v53  ;;  %v22009_v32 = vld [vmem:[%s24682_s12 + $0x194] ss:$24 sps:$4 sm:$0xff]   ;;  %v22004_v53 = vld [vmem:[%s24682_s12 + $0x308] ss:$24 sps:$4 sm:$0xff]  }
 0x3b1   : > { %15770 = vmatpush1.bf16.msra.mxu1 %v21986_v59  ;;  %v22007_v59 = vld [vmem:[%s24682_s12 + $0x190] ss:$24 sps:$4 sm:$0xff]  }
 0x3b2   : > { %16779 = vmatpush1.bf16.msra.mxu0 %v21989_v60  ;;  %15771 = vmatprep.subr.bf16.mxu1 %v21994_v42  ;;  %v22012_v60 = vld [vmem:[%s24682_s12 + $0x33c] ss:$24 sps:$4 sm:$0xff]  }
 0x3b3   : > { %16780 = vmatprep.subr.bf16.mxu0 %v21997_v49  ;;  %v22015_v42 = vld [vmem:[%s24682_s12 + $0x1c4] ss:$24 sps:$4 sm:$0xff]   ;;  %v22010_v49 = vld [vmem:[%s24682_s12 + $0x338] ss:$24 sps:$4 sm:$0xff]  }
 0x3b5   : > { %15772 = vmatpush1.bf16.msra.mxu1 %v21992_v54  ;;  %v22013_v54 = vld [vmem:[%s24682_s12 + $0x1c0] ss:$24 sps:$4 sm:$0xff]  }
 0x3b6   : > { %16781 = vmatpush1.bf16.msra.mxu0 %v21995_v48  ;;  %15773 = vmatprep.subr.bf16.mxu1 %v22000_v26  ;;  %v22018_v48 = vld [vmem:[%s24682_s12 + $0x36c] ss:$24 sps:$4 sm:$0xff]  }
 0x3b7   : > { %16782 = vmatprep.subr.bf16.mxu0 %v22003_v62  ;;  %v22021_v26 = vld [vmem:[%s24682_s12 + $0x1f4] ss:$24 sps:$4 sm:$0xff]   ;;  %v22016_v62 = vld [vmem:[%s24682_s12 + $0x368] ss:$24 sps:$4 sm:$0xff]  }
 0x3b9   : > { %15774 = vmatpush1.bf16.msra.mxu1 %v21998_v34  ;;  %v22019_v34 = vld [vmem:[%s24682_s12 + $0x1f0] ss:$24 sps:$4 sm:$0xff]  }
 0x3ba   : > { %16783 = vmatpush1.bf16.msra.mxu0 %v22001_v41  ;;  %15784 = vmatprep.subr.bf16.mxu1 %v22006_v43  ;;  %v22024_v41 = vld [vmem:[%s24682_s12 + $0x39c] ss:$24 sps:$4 sm:$0xff]  }
 0x3bb   : > { %16784 = vmatprep.subr.bf16.mxu0 %v22009_v32  ;;  %v22027_v43 = vld [vmem:[%s24682_s12 + $0x224] ss:$24 sps:$4 sm:$0xff]   ;;  %v22022_v32 = vld [vmem:[%s24682_s12 + $0x398] ss:$24 sps:$4 sm:$0xff]  }
 0x3bc   : > { %15776 = vmatmul.mubr.bf16.vlgmr.msra.gmra.mrb[4].mxu1 %v24784_v23 }
 0x3bd   : > { %15785 = vmatpush1.bf16.msra.mxu1 %v22004_v53  ;;  %15816 = vmatprep.mubr.bf16.mxu1 %v24792_v29  ;;  %v22025_v53 = vld [vmem:[%s24682_s12 + $0x220] ss:$24 sps:$4 sm:$0xff]  }
 0x3be   : > { %16785 = vmatpush1.bf16.msra.mxu0 %v22007_v59  ;;  %15786 = vmatprep.subr.bf16.mxu1 %v22012_v60  ;;  %v22030_v59 = vld [vmem:[%s24682_s12 + $0x3cc] ss:$24 sps:$4 sm:$0xff]  }
 0x3bf   : > { %16786 = vmatprep.subr.bf16.mxu0 %v22015_v42  ;;  %v22033_v60 = vld [vmem:[%s24682_s12 + $0x254] ss:$24 sps:$4 sm:$0xff]   ;;  %v22028_v42 = vld [vmem:[%s24682_s12 + $0x3c8] ss:$24 sps:$4 sm:$0xff]  }
 0x3c1   : > { %15787 = vmatpush1.bf16.msra.mxu1 %v22010_v49  ;;  %v22031_v49 = vld [vmem:[%s24682_s12 + $0x250] ss:$24 sps:$4 sm:$0xff]  }
 0x3c2   : > { %16787 = vmatpush1.bf16.msra.mxu0 %v22013_v54  ;;  %15788 = vmatprep.subr.bf16.mxu1 %v22018_v48  ;;  %v22036_v54 = vld [vmem:[%s24682_s12 + $0x3fc] ss:$24 sps:$4 sm:$0xff]  }
 0x3c3   : > { %16788 = vmatprep.subr.bf16.mxu0 %v22021_v26  ;;  %v22039_v48 = vld [vmem:[%s24682_s12 + $0x284] ss:$24 sps:$4 sm:$0xff]   ;;  %v22034_v26 = vld [vmem:[%s24682_s12 + $0x3f8] ss:$24 sps:$4 sm:$0xff]  }
 0x3c5   : > { %15789 = vmatpush1.bf16.msra.mxu1 %v22016_v62  ;;  %v22037_v62 = vld [vmem:[%s24682_s12 + $0x280] ss:$24 sps:$4 sm:$0xff]  }
 0x3c6   : > { %16789 = vmatpush1.bf16.msra.mxu0 %v22019_v34  ;;  %15790 = vmatprep.subr.bf16.mxu1 %v22024_v41  ;;  %v22042_v34 = vld [vmem:[%s24682_s12 + $0x42c] ss:$24 sps:$4 sm:$0xff]  }
 0x3c7   : > { %16790 = vmatprep.subr.bf16.mxu0 %v22027_v43  ;;  %v22045_v41 = vld [vmem:[%s24682_s12 + $0x2b4] ss:$24 sps:$4 sm:$0xff]   ;;  %v22040_v43 = vld [vmem:[%s24682_s12 + $0x428] ss:$24 sps:$4 sm:$0xff]  }
 0x3c9   : > { %15791 = vmatpush1.bf16.msra.mxu1 %v22022_v32  ;;  %v22043_v32 = vld [vmem:[%s24682_s12 + $0x2b0] ss:$24 sps:$4 sm:$0xff]  }
 0x3ca   : > { %16791 = vmatpush1.bf16.msra.mxu0 %v22025_v53  ;;  %15792 = vmatprep.subr.bf16.mxu1 %v22030_v59  ;;  %v22048_v53 = vld [vmem:[%s24682_s12 + $0x45c] ss:$24 sps:$4 sm:$0xff]  }
 0x3cb   : > { %16792 = vmatprep.subr.bf16.mxu0 %v22033_v60  ;;  %v22051_v59 = vld [vmem:[%s24682_s12 + $0x2e4] ss:$24 sps:$4 sm:$0xff]   ;;  %v22046_v60 = vld [vmem:[%s24682_s12 + $0x458] ss:$24 sps:$4 sm:$0xff]  }
 0x3cd   : > { %15793 = vmatpush1.bf16.msra.mxu1 %v22028_v42  ;;  %v22049_v42 = vld [vmem:[%s24682_s12 + $0x2e0] ss:$24 sps:$4 sm:$0xff]  }
 0x3ce   : > { %16793 = vmatpush1.bf16.msra.mxu0 %v22031_v49  ;;  %15794 = vmatprep.subr.bf16.mxu1 %v22036_v54  ;;  %v22054_v49 = vld [vmem:[%s24682_s12 + $0x48c] ss:$24 sps:$4 sm:$0xff]  }
 0x3cf   : > { %16794 = vmatprep.subr.bf16.mxu0 %v22039_v48  ;;  %v22057_v54 = vld [vmem:[%s24682_s12 + $0x314] ss:$24 sps:$4 sm:$0xff]   ;;  %v22052_v48 = vld [vmem:[%s24682_s12 + $0x488] ss:$24 sps:$4 sm:$0xff]  }
 0x3d1   : > { %15795 = vmatpush1.bf16.msra.mxu1 %v22034_v26  ;;  %v22055_v26 = vld [vmem:[%s24682_s12 + $0x310] ss:$24 sps:$4 sm:$0xff]  }
 0x3d2   : > { %16795 = vmatpush1.bf16.msra.mxu0 %v22037_v62  ;;  %15796 = vmatprep.subr.bf16.mxu1 %v22042_v34  ;;  %v22060_v62 = vld [vmem:[%s24682_s12 + $0x4bc] ss:$24 sps:$4 sm:$0xff]  }
 0x3d3   : > { %16796 = vmatprep.subr.bf16.mxu0 %v22045_v41  ;;  %v22063_v34 = vld [vmem:[%s24682_s12 + $0x344] ss:$24 sps:$4 sm:$0xff]   ;;  %v22058_v41 = vld [vmem:[%s24682_s12 + $0x4b8] ss:$24 sps:$4 sm:$0xff]  }
 0x3d5   : > { %15797 = vmatpush1.bf16.msra.mxu1 %v22040_v43  ;;  %v22061_v43 = vld [vmem:[%s24682_s12 + $0x340] ss:$24 sps:$4 sm:$0xff]  }
 0x3d6   : > { %16797 = vmatpush1.bf16.msra.mxu0 %v22043_v32  ;;  %15798 = vmatprep.subr.bf16.mxu1 %v22048_v53  ;;  %v22066_v32 = vld [vmem:[%s24682_s12 + $0x4ec] ss:$24 sps:$4 sm:$0xff]  }
 0x3d7   : > { %16798 = vmatprep.subr.bf16.mxu0 %v22051_v59  ;;  %v22069_v53 = vld [vmem:[%s24682_s12 + $0x374] ss:$24 sps:$4 sm:$0xff]   ;;  %v22064_v59 = vld [vmem:[%s24682_s12 + $0x4e8] ss:$24 sps:$4 sm:$0xff]  }
 0x3d9   : > { %15799 = vmatpush1.bf16.msra.mxu1 %v22046_v60  ;;  %v22072_v60 = vld [vmem:[%s24682_s12 + $0x51c] ss:$24 sps:$4 sm:$0xff]  }
 0x3da   : > { %16799 = vmatpush1.bf16.msra.mxu0 %v22049_v42  ;;  %15800 = vmatprep.subr.bf16.mxu1 %v22054_v49  ;;  %v22075_v42 = vld [vmem:[%s24682_s12 + $0x3a4] ss:$24 sps:$4 sm:$0xff]   ;;  %v22070_v49 = vld [vmem:[%s24682_s12 + $0x518] ss:$24 sps:$4 sm:$0xff]  }
 0x3db   : > { %16809 = vmatprep.subr.bf16.mxu0 %v22057_v54  ;;  %v22073_v54 = vld [vmem:[%s24682_s12 + $0x3a0] ss:$24 sps:$4 sm:$0xff]  }
 0x3dd   : > { %16801 = vmatmul.mubr.bf16.vlgmr.msra.gmra.mrb[4].mxu0 %v24784_v23  ;;  %15801 = vmatpush1.bf16.msra.mxu1 %v22052_v48  ;;  %v22067_v23 = vld [vmem:[%s24682_s12 + $0x370] ss:$24 sps:$4 sm:$0xff]   ;;  %v22081_v48 = vld [vmem:[%s24682_s12 + $0x3d4] ss:$24 sps:$4 sm:$0xff]  }
 0x3de   : > { %16810 = vmatpush1.bf16.msra.mxu0 %v22055_v26  ;;  %15802 = vmatprep.subr.bf16.mxu1 %v22060_v62  ;;  %v22076_v26 = vld [vmem:[%s24682_s12 + $0x548] ss:$24 sps:$4 sm:$0xff]  }
 0x3df   : > { %16811 = vmatprep.subr.bf16.mxu0 %v22063_v34  ;;  %16841 = vmatprep.mubr.bf16.mxu0 %v24792_v29  ;;  %v22078_v29 = vld [vmem:[%s24682_s12 + $0x54c] ss:$24 sps:$4 sm:$0xff]   ;;  %v22079_v62 = vld [vmem:[%s24682_s12 + $0x3d0] ss:$24 sps:$4 sm:$0xff]   ;;  %v22084_v34 = vld [vmem:[%s24682_s12 + $0x57c] ss:$24 sps:$4 sm:$0xff]  }
 0x3e1   : > { %15803 = vmatpush1.bf16.msra.mxu1 %v22058_v41  ;;  %v22087_v41 = vld [vmem:[%s24682_s12 + $0x404] ss:$24 sps:$4 sm:$0xff]  }
 0x3e2   : > { %16812 = vmatpush1.bf16.msra.mxu0 %v22061_v43  ;;  %15804 = vmatprep.subr.bf16.mxu1 %v22066_v32  ;;  %v22082_v43 = vld [vmem:[%s24682_s12 + $0x578] ss:$24 sps:$4 sm:$0xff]  }
 0x3e3   : > { %16813 = vmatprep.subr.bf16.mxu0 %v22069_v53  ;;  %v22085_v32 = vld [vmem:[%s24682_s12 + $0x400] ss:$24 sps:$4 sm:$0xff]   ;;  %v22090_v53 = vld [vmem:[%s24682_s12 + $0x5ac] ss:$24 sps:$4 sm:$0xff]  }
 0x3e5   : > { %15805 = vmatpush1.bf16.msra.mxu1 %v22064_v59  ;;  %v22093_v59 = vld [vmem:[%s24682_s12 + $0x434] ss:$24 sps:$4 sm:$0xff]  }
 0x3e6   : > { %16814 = vmatpush1.bf16.msra.mxu0 %v22067_v23  ;;  %15806 = vmatprep.subr.bf16.mxu1 %v22072_v60  ;;  %v22088_v23 = vld [vmem:[%s24682_s12 + $0x5a8] ss:$24 sps:$4 sm:$0xff]  }
 0x3e7   : > { %16815 = vmatprep.subr.bf16.mxu0 %v22075_v42  ;;  %v22091_v60 = vld [vmem:[%s24682_s12 + $0x430] ss:$24 sps:$4 sm:$0xff]   ;;  %v22096_v42 = vld [vmem:[%s24682_s12 + $0x5dc] ss:$24 sps:$4 sm:$0xff]  }
 0x3e9   : > { %15807 = vmatpush1.bf16.msra.mxu1 %v22070_v49  ;;  %v22099_v49 = vld [vmem:[%s24682_s12 + $0x464] ss:$24 sps:$4 sm:$0xff]  }
 0x3ea   : > { %16816 = vmatpush1.bf16.msra.mxu0 %v22073_v54  ;;  %15808 = vmatprep.subr.bf16.mxu1 %v22078_v29  ;;  %v22094_v54 = vld [vmem:[%s24682_s12 + $0x5d8] ss:$24 sps:$4 sm:$0xff]  }
 0x3eb   : > { %16817 = vmatprep.subr.bf16.mxu0 %v22081_v48  ;;  %v22097_v29 = vld [vmem:[%s24682_s12 + $0x460] ss:$24 sps:$4 sm:$0xff]   ;;  %v22102_v48 = vld [vmem:[%s24682_s12 + $0x60c] ss:$24 sps:$4 sm:$0xff]  }
 0x3ed   : > { %15809 = vmatpush1.bf16.msra.mxu1 %v22076_v26  ;;  %v22105_v26 = vld [vmem:[%s24682_s12 + $0x494] ss:$24 sps:$4 sm:$0xff]  }
 0x3ee   : > { %16818 = vmatpush1.bf16.msra.mxu0 %v22079_v62  ;;  %15810 = vmatprep.subr.bf16.mxu1 %v22084_v34  ;;  %v22100_v62 = vld [vmem:[%s24682_s12 + $0x608] ss:$24 sps:$4 sm:$0xff]  }
 0x3ef   : > { %16819 = vmatprep.subr.bf16.mxu0 %v22087_v41  ;;  %v22103_v34 = vld [vmem:[%s24682_s12 + $0x490] ss:$24 sps:$4 sm:$0xff]   ;;  %v22108_v41 = vld [vmem:[%s24682_s12 + $0x63c] ss:$24 sps:$4 sm:$0xff]  }
 0x3f1   : > { %15811 = vmatpush1.bf16.msra.mxu1 %v22082_v43  ;;  %v22111_v43 = vld [vmem:[%s24682_s12 + $0x4c4] ss:$24 sps:$4 sm:$0xff]  }
 0x3f2   : > { %16820 = vmatpush1.bf16.msra.mxu0 %v22085_v32  ;;  %15812 = vmatprep.subr.bf16.mxu1 %v22090_v53  ;;  %v22106_v32 = vld [vmem:[%s24682_s12 + $0x638] ss:$24 sps:$4 sm:$0xff]  }
 0x3f3   : > { %16821 = vmatprep.subr.bf16.mxu0 %v22093_v59  ;;  %v22109_v53 = vld [vmem:[%s24682_s12 + $0x4c0] ss:$24 sps:$4 sm:$0xff]   ;;  %v22114_v59 = vld [vmem:[%s24682_s12 + $0x66c] ss:$24 sps:$4 sm:$0xff]  }
 0x3f5   : > { %15813 = vmatpush1.bf16.msra.mxu1 %v22088_v23  ;;  %v22117_v23 = vld [vmem:[%s24682_s12 + $0x4f4] ss:$24 sps:$4 sm:$0xff]  }
 0x3f6   : > { %16822 = vmatpush1.bf16.msra.mxu0 %v22091_v60  ;;  %15814 = vmatprep.subr.bf16.mxu1 %v22096_v42  ;;  %v22112_v60 = vld [vmem:[%s24682_s12 + $0x668] ss:$24 sps:$4 sm:$0xff]  }
 0x3f7   : > { %16823 = vmatprep.subr.bf16.mxu0 %v22099_v49  ;;  %v22115_v42 = vld [vmem:[%s24682_s12 + $0x4f0] ss:$24 sps:$4 sm:$0xff]   ;;  %v22120_v49 = vld [vmem:[%s24682_s12 + $0x69c] ss:$24 sps:$4 sm:$0xff]  }
 0x3f9   : > { %15815 = vmatpush1.bf16.msra.mxu1 %v22094_v54  ;;  %v22123_v54 = vld [vmem:[%s24682_s12 + $0x524] ss:$24 sps:$4 sm:$0xff]  }
 0x3fa   : > { %16824 = vmatpush1.bf16.msra.mxu0 %v22097_v29  ;;  %15825 = vmatprep.subr.bf16.mxu1 %v22102_v48  ;;  %v22118_v29 = vld [vmem:[%s24682_s12 + $0x698] ss:$24 sps:$4 sm:$0xff]  }
 0x3fb   : > { %16825 = vmatprep.subr.bf16.mxu0 %v22105_v26  ;;  %v22121_v48 = vld [vmem:[%s24682_s12 + $0x520] ss:$24 sps:$4 sm:$0xff]   ;;  %v22126_v26 = vld [vmem:[%s24682_s12 + $0x6cc] ss:$24 sps:$4 sm:$0xff]  }
 0x3fc   : > { %15817 = vmatmul.mubr.bf16.vlgmr.msra.gmra.mrb[4].mxu1 %v24863_v38 }
 0x3fd   : > { %15826 = vmatpush1.bf16.msra.mxu1 %v22100_v62  ;;  %15857 = vmatprep.mubr.bf16.mxu1 %v24894_v52  ;;  %v22129_v62 = vld [vmem:[%s24682_s12 + $0x554] ss:$24 sps:$4 sm:$0xff]  }
 0x3fe   : > { %16826 = vmatpush1.bf16.msra.mxu0 %v22103_v34  ;;  %15827 = vmatprep.subr.bf16.mxu1 %v22108_v41  ;;  %v22124_v34 = vld [vmem:[%s24682_s12 + $0x6c8] ss:$24 sps:$4 sm:$0xff]  }
 0x3ff   : > { %16827 = vmatprep.subr.bf16.mxu0 %v22111_v43  ;;  %v22127_v41 = vld [vmem:[%s24682_s12 + $0x550] ss:$24 sps:$4 sm:$0xff]   ;;  %v22132_v43 = vld [vmem:[%s24682_s12 + $0x6fc] ss:$24 sps:$4 sm:$0xff]  }
 0x401   : > { %15828 = vmatpush1.bf16.msra.mxu1 %v22106_v32  ;;  %v22135_v32 = vld [vmem:[%s24682_s12 + $0x584] ss:$24 sps:$4 sm:$0xff]  }
 0x402   : > { %16828 = vmatpush1.bf16.msra.mxu0 %v22109_v53  ;;  %15829 = vmatprep.subr.bf16.mxu1 %v22114_v59  ;;  %v22130_v53 = vld [vmem:[%s24682_s12 + $0x6f8] ss:$24 sps:$4 sm:$0xff]  }
 0x403   : > { %16829 = vmatprep.subr.bf16.mxu0 %v22117_v23  ;;  %v22133_v59 = vld [vmem:[%s24682_s12 + $0x580] ss:$24 sps:$4 sm:$0xff]   ;;  %v22138_v23 = vld [vmem:[%s24682_s12 + $0x72c] ss:$24 sps:$4 sm:$0xff]  }
 0x405   : > { %15830 = vmatpush1.bf16.msra.mxu1 %v22112_v60  ;;  %v22141_v60 = vld [vmem:[%s24682_s12 + $0x5b4] ss:$24 sps:$4 sm:$0xff]  }
 0x406   : > { %16830 = vmatpush1.bf16.msra.mxu0 %v22115_v42  ;;  %15831 = vmatprep.subr.bf16.mxu1 %v22120_v49  ;;  %v22136_v42 = vld [vmem:[%s24682_s12 + $0x728] ss:$24 sps:$4 sm:$0xff]  }
 0x407   : > { %16831 = vmatprep.subr.bf16.mxu0 %v22123_v54  ;;  %v22139_v49 = vld [vmem:[%s24682_s12 + $0x5b0] ss:$24 sps:$4 sm:$0xff]   ;;  %v22144_v54 = vld [vmem:[%s24682_s12 + $0x75c] ss:$24 sps:$4 sm:$0xff]  }
 0x409   : > { %15832 = vmatpush1.bf16.msra.mxu1 %v22118_v29  ;;  %v22147_v29 = vld [vmem:[%s24682_s12 + $0x5e4] ss:$24 sps:$4 sm:$0xff]  }
 0x40a   : > { %16832 = vmatpush1.bf16.msra.mxu0 %v22121_v48  ;;  %15833 = vmatprep.subr.bf16.mxu1 %v22126_v26  ;;  %v22142_v48 = vld [vmem:[%s24682_s12 + $0x758] ss:$24 sps:$4 sm:$0xff]  }
 0x40b   : > { %16833 = vmatprep.subr.bf16.mxu0 %v22129_v62  ;;  %v22145_v26 = vld [vmem:[%s24682_s12 + $0x5e0] ss:$24 sps:$4 sm:$0xff]   ;;  %v22150_v62 = vld [vmem:[%s24682_s12 + $0x78c] ss:$24 sps:$4 sm:$0xff]  }
 0x40d   : > { %15834 = vmatpush1.bf16.msra.mxu1 %v22124_v34  ;;  %v22153_v34 = vld [vmem:[%s24682_s12 + $0x614] ss:$24 sps:$4 sm:$0xff]  }
 0x40e   : > { %16834 = vmatpush1.bf16.msra.mxu0 %v22127_v41  ;;  %15835 = vmatprep.subr.bf16.mxu1 %v22132_v43  ;;  %v22148_v41 = vld [vmem:[%s24682_s12 + $0x788] ss:$24 sps:$4 sm:$0xff]  }
 0x40f   : > { %16835 = vmatprep.subr.bf16.mxu0 %v22135_v32  ;;  %v22151_v43 = vld [vmem:[%s24682_s12 + $0x610] ss:$24 sps:$4 sm:$0xff]   ;;  %v22156_v32 = vld [vmem:[%s24682_s12 + $0x7bc] ss:$24 sps:$4 sm:$0xff]  }
 0x411   : > { %15836 = vmatpush1.bf16.msra.mxu1 %v22130_v53  ;;  %v22159_v53 = vld [vmem:[%s24682_s12 + $0x644] ss:$24 sps:$4 sm:$0xff]  }
 0x412   : > { %16836 = vmatpush1.bf16.msra.mxu0 %v22133_v59  ;;  %15837 = vmatprep.subr.bf16.mxu1 %v22138_v23  ;;  %v22154_v59 = vld [vmem:[%s24682_s12 + $0x7b8] ss:$24 sps:$4 sm:$0xff]  }
 0x413   : > { %16837 = vmatprep.subr.bf16.mxu0 %v22141_v60  ;;  %v22157_v23 = vld [vmem:[%s24682_s12 + $0x640] ss:$24 sps:$4 sm:$0xff]   ;;  %v22162_v60 = vld [vmem:[%s24682_s12 + $0x7ec] ss:$24 sps:$4 sm:$0xff]  }
 0x415   : > { %15838 = vmatpush1.bf16.msra.mxu1 %v22136_v42  ;;  %v22165_v42 = vld [vmem:[%s24682_s12 + $0x674] ss:$24 sps:$4 sm:$0xff]  }
 0x416   : > { %16838 = vmatpush1.bf16.msra.mxu0 %v22139_v49  ;;  %15839 = vmatprep.subr.bf16.mxu1 %v22144_v54  ;;  %v22160_v49 = vld [vmem:[%s24682_s12 + $0x7e8] ss:$24 sps:$4 sm:$0xff]   ;;  %v22168_v54 = vld [vmem:[%s24682_s12 + $0x81c] ss:$24 sps:$4 sm:$0xff]  }
 0x417   : > { %16839 = vmatprep.subr.bf16.mxu0 %v22147_v29  ;;  %v22171_v29 = vld [vmem:[%s24682_s12 + $0x6a4] ss:$24 sps:$4 sm:$0xff]  }
 0x419   : > { %15840 = vmatpush1.bf16.msra.mxu1 %v22142_v48  ;;  %v22166_v48 = vld [vmem:[%s24682_s12 + $0x818] ss:$24 sps:$4 sm:$0xff]  }
 0x41a   : > { %16840 = vmatpush1.bf16.msra.mxu0 %v22145_v26  ;;  %15841 = vmatprep.subr.bf16.mxu1 %v22150_v62  ;;  %v22169_v26 = vld [vmem:[%s24682_s12 + $0x6a0] ss:$24 sps:$4 sm:$0xff]   ;;  %v22177_v62 = vld [vmem:[%s24682_s12 + $0x6d4] ss:$24 sps:$4 sm:$0xff]  }
 0x41b   : > { %16850 = vmatprep.subr.bf16.mxu0 %v22153_v34  ;;  %v22172_v34 = vld [vmem:[%s24682_s12 + $0x848] ss:$24 sps:$4 sm:$0xff]  }
 0x41d   : > { %16842 = vmatmul.mubr.bf16.vlgmr.msra.gmra.mrb[4].mxu0 %v24863_v38  ;;  %15842 = vmatpush1.bf16.msra.mxu1 %v22148_v41  ;;  %v22163_v38 = vld [vmem:[%s24682_s12 + $0x670] ss:$24 sps:$4 sm:$0xff]  }
 0x41e   : > { %16851 = vmatpush1.bf16.msra.mxu0 %v22151_v43  ;;  %15843 = vmatprep.subr.bf16.mxu1 %v22156_v32  ;;  %v22175_v41 = vld [vmem:[%s24682_s12 + $0x6d0] ss:$24 sps:$4 sm:$0xff]   ;;  %v22180_v43 = vld [vmem:[%s24682_s12 + $0x87c] ss:$24 sps:$4 sm:$0xff]  }
 0x41f   : > { %16852 = vmatprep.subr.bf16.mxu0 %v22159_v53  ;;  %16882 = vmatprep.mubr.bf16.mxu0 %v24894_v52  ;;  %v22174_v52 = vld [vmem:[%s24682_s12 + $0x84c] ss:$24 sps:$4 sm:$0xff]   ;;  %v22178_v53 = vld [vmem:[%s24682_s12 + $0x878] ss:$24 sps:$4 sm:$0xff]  }
 0x420   : > { %v22183_v32 = vld [vmem:[%s24682_s12 + $0x704] ss:$24 sps:$4 sm:$0xff]  }
 0x421   : > { %15844 = vmatpush1.bf16.msra.mxu1 %v22154_v59  ;;  %v22181_v59 = vld [vmem:[%s24682_s12 + $0x700] ss:$24 sps:$4 sm:$0xff]  }
 0x422   : > { %16853 = vmatpush1.bf16.msra.mxu0 %v22157_v23  ;;  %15845 = vmatprep.subr.bf16.mxu1 %v22162_v60  ;;  %v22186_v23 = vld [vmem:[%s24682_s12 + $0x8ac] ss:$24 sps:$4 sm:$0xff]  }
 0x423   : > { %16854 = vmatprep.subr.bf16.mxu0 %v22165_v42  ;;  %v22189_v60 = vld [vmem:[%s24682_s12 + $0x734] ss:$24 sps:$4 sm:$0xff]   ;;  %v22184_v42 = vld [vmem:[%s24682_s12 + $0x8a8] ss:$24 sps:$4 sm:$0xff]  }
 0x425   : > { %15846 = vmatpush1.bf16.msra.mxu1 %v22160_v49  ;;  %v22187_v49 = vld [vmem:[%s24682_s12 + $0x730] ss:$24 sps:$4 sm:$0xff]  }
 0x426   : > { %16855 = vmatpush1.bf16.msra.mxu0 %v22163_v38  ;;  %15847 = vmatprep.subr.bf16.mxu1 %v22168_v54  ;;  %v22192_v38 = vld [vmem:[%s24682_s12 + $0x8dc] ss:$24 sps:$4 sm:$0xff]  }
 0x427   : > { %16856 = vmatprep.subr.bf16.mxu0 %v22171_v29  ;;  %v22195_v54 = vld [vmem:[%s24682_s12 + $0x764] ss:$24 sps:$4 sm:$0xff]   ;;  %v22190_v29 = vld [vmem:[%s24682_s12 + $0x8d8] ss:$24 sps:$4 sm:$0xff]  }
 0x429   : > { %15848 = vmatpush1.bf16.msra.mxu1 %v22166_v48  ;;  %v22193_v48 = vld [vmem:[%s24682_s12 + $0x760] ss:$24 sps:$4 sm:$0xff]  }
 0x42a   : > { %16857 = vmatpush1.bf16.msra.mxu0 %v22169_v26  ;;  %15849 = vmatprep.subr.bf16.mxu1 %v22174_v52  ;;  %v22198_v26 = vld [vmem:[%s24682_s12 + $0x90c] ss:$24 sps:$4 sm:$0xff]  }
 0x42b   : > { %16858 = vmatprep.subr.bf16.mxu0 %v22177_v62  ;;  %v22201_v52 = vld [vmem:[%s24682_s12 + $0x794] ss:$24 sps:$4 sm:$0xff]   ;;  %v22196_v62 = vld [vmem:[%s24682_s12 + $0x908] ss:$24 sps:$4 sm:$0xff]  }
 0x42d   : > { %15850 = vmatpush1.bf16.msra.mxu1 %v22172_v34  ;;  %v22199_v34 = vld [vmem:[%s24682_s12 + $0x790] ss:$24 sps:$4 sm:$0xff]  }
 0x42e   : > { %16859 = vmatpush1.bf16.msra.mxu0 %v22175_v41  ;;  %15851 = vmatprep.subr.bf16.mxu1 %v22180_v43  ;;  %v22204_v41 = vld [vmem:[%s24682_s12 + $0x93c] ss:$24 sps:$4 sm:$0xff]  }
 0x42f   : > { %16860 = vmatprep.subr.bf16.mxu0 %v22183_v32  ;;  %v22207_v43 = vld [vmem:[%s24682_s12 + $0x7c4] ss:$24 sps:$4 sm:$0xff]   ;;  %v22202_v32 = vld [vmem:[%s24682_s12 + $0x938] ss:$24 sps:$4 sm:$0xff]  }
 0x431   : > { %15852 = vmatpush1.bf16.msra.mxu1 %v22178_v53  ;;  %v22205_v53 = vld [vmem:[%s24682_s12 + $0x7c0] ss:$24 sps:$4 sm:$0xff]  }
 0x432   : > { %16861 = vmatpush1.bf16.msra.mxu0 %v22181_v59  ;;  %15853 = vmatprep.subr.bf16.mxu1 %v22186_v23  ;;  %v22210_v59 = vld [vmem:[%s24682_s12 + $0x96c] ss:$24 sps:$4 sm:$0xff]  }
 0x433   : > { %16862 = vmatprep.subr.bf16.mxu0 %v22189_v60  ;;  %v22213_v23 = vld [vmem:[%s24682_s12 + $0x7f4] ss:$24 sps:$4 sm:$0xff]   ;;  %v22208_v60 = vld [vmem:[%s24682_s12 + $0x968] ss:$24 sps:$4 sm:$0xff]  }
 0x435   : > { %15854 = vmatpush1.bf16.msra.mxu1 %v22184_v42  ;;  %v22211_v42 = vld [vmem:[%s24682_s12 + $0x7f0] ss:$24 sps:$4 sm:$0xff]  }
 0x436   : > { %16863 = vmatpush1.bf16.msra.mxu0 %v22187_v49  ;;  %15855 = vmatprep.subr.bf16.mxu1 %v22192_v38  ;;  %v22216_v49 = vld [vmem:[%s24682_s12 + $0x99c] ss:$24 sps:$4 sm:$0xff]  }
 0x437   : > { %16864 = vmatprep.subr.bf16.mxu0 %v22195_v54  ;;  %v22219_v38 = vld [vmem:[%s24682_s12 + $0x824] ss:$24 sps:$4 sm:$0xff]   ;;  %v22214_v54 = vld [vmem:[%s24682_s12 + $0x998] ss:$24 sps:$4 sm:$0xff]  }
 0x439   : > { %15856 = vmatpush1.bf16.msra.mxu1 %v22190_v29  ;;  %v22217_v29 = vld [vmem:[%s24682_s12 + $0x820] ss:$24 sps:$4 sm:$0xff]  }
 0x43a   : > { %16865 = vmatpush1.bf16.msra.mxu0 %v22193_v48  ;;  %15866 = vmatprep.subr.bf16.mxu1 %v22198_v26  ;;  %v22222_v48 = vld [vmem:[%s24682_s12 + $0x9cc] ss:$24 sps:$4 sm:$0xff]  }
 0x43b   : > { %16866 = vmatprep.subr.bf16.mxu0 %v22201_v52  ;;  %v22225_v26 = vld [vmem:[%s24682_s12 + $0x854] ss:$24 sps:$4 sm:$0xff]   ;;  %v22220_v52 = vld [vmem:[%s24682_s12 + $0x9c8] ss:$24 sps:$4 sm:$0xff]  }
 0x43c   : > { %15858 = vmatmul.mubr.bf16.vlgmr.msra.gmra.mrb[4].mxu1 %v24976_v7 }
 0x43d   : > { %15867 = vmatpush1.bf16.msra.mxu1 %v22196_v62  ;;  %15898 = vmatprep.mubr.bf16.mxu1 %v24984_v11  ;;  %v22223_v62 = vld [vmem:[%s24682_s12 + $0x850] ss:$24 sps:$4 sm:$0xff]  }
 0x43e   : > { %16867 = vmatpush1.bf16.msra.mxu0 %v22199_v34  ;;  %15868 = vmatprep.subr.bf16.mxu1 %v22204_v41  ;;  %v22228_v34 = vld [vmem:[%s24682_s12 + $0x9fc] ss:$24 sps:$4 sm:$0xff]  }
 0x43f   : > { %16868 = vmatprep.subr.bf16.mxu0 %v22207_v43  ;;  %v22231_v41 = vld [vmem:[%s24682_s12 + $0x884] ss:$24 sps:$4 sm:$0xff]   ;;  %v22226_v43 = vld [vmem:[%s24682_s12 + $0x9f8] ss:$24 sps:$4 sm:$0xff]  }
 0x441   : > { %15869 = vmatpush1.bf16.msra.mxu1 %v22202_v32  ;;  %v22229_v32 = vld [vmem:[%s24682_s12 + $0x880] ss:$24 sps:$4 sm:$0xff]  }
 0x442   : > { %16869 = vmatpush1.bf16.msra.mxu0 %v22205_v53  ;;  %15870 = vmatprep.subr.bf16.mxu1 %v22210_v59  ;;  %v22234_v53 = vld [vmem:[%s24682_s12 + $0xa2c] ss:$24 sps:$4 sm:$0xff]  }
 0x443   : > { %16870 = vmatprep.subr.bf16.mxu0 %v22213_v23  ;;  %v22237_v59 = vld [vmem:[%s24682_s12 + $0x8b4] ss:$24 sps:$4 sm:$0xff]  }
 0x445   : > { %15871 = vmatpush1.bf16.msra.mxu1 %v22208_v60 }
 0x446   : > { %16871 = vmatpush1.bf16.msra.mxu0 %v22211_v42  ;;  %15872 = vmatprep.subr.bf16.mxu1 %v22216_v49  ;;  %v22232_v49 = vld [vmem:[%s24682_s12 + $0xa28] ss:$24 sps:$4 sm:$0xff]  }
 0x447   : > { %16872 = vmatprep.subr.bf16.mxu0 %v22219_v38  ;;  %v22235_v38 = vld [vmem:[%s24682_s12 + $0x8b0] ss:$24 sps:$4 sm:$0xff]  }
 0x449   : > { %15873 = vmatpush1.bf16.msra.mxu1 %v22214_v54 }
 0x44a   : > { %16873 = vmatpush1.bf16.msra.mxu0 %v22217_v29  ;;  %15874 = vmatprep.subr.bf16.mxu1 %v22222_v48  ;;  %v22240_v29 = vld [vmem:[%s24682_s12 + $0xa5c] ss:$24 sps:$4 sm:$0xff]  }
 0x44b   : > { %16874 = vmatprep.subr.bf16.mxu0 %v22225_v26  ;;  %v22243_v48 = vld [vmem:[%s24682_s12 + $0x8e4] ss:$24 sps:$4 sm:$0xff]   ;;  %v22238_v26 = vld [vmem:[%s24682_s12 + $0xa58] ss:$24 sps:$4 sm:$0xff]  }
 0x44d   : > { %15875 = vmatpush1.bf16.msra.mxu1 %v22220_v52  ;;  %v22241_v52 = vld [vmem:[%s24682_s12 + $0x8e0] ss:$24 sps:$4 sm:$0xff]  }
 0x44e   : > { %16875 = vmatpush1.bf16.msra.mxu0 %v22223_v62  ;;  %15876 = vmatprep.subr.bf16.mxu1 %v22228_v34  ;;  %v22246_v62 = vld [vmem:[%s24682_s12 + $0xa8c] ss:$24 sps:$4 sm:$0xff]  }
 0x44f   : > { %16876 = vmatprep.subr.bf16.mxu0 %v22231_v41  ;;  %v26063_v23 = vpop.f32.mrb[0].mxu1  ;;  %v22249_v34 = vld [vmem:[%s24682_s12 + $0x914] ss:$24 sps:$4 sm:$0xff]   ;;  %v22244_v41 = vld [vmem:[%s24682_s12 + $0xa88] ss:$24 sps:$4 sm:$0xff]  }
 0x450   : > { %v26065_v60 = vpop.f32.mrb[1].mxu1 }
 0x451   : > { %v15207_v42 = vpop.f32.mrb[2].mxu1  ;;  %15877 = vmatpush1.bf16.msra.mxu1 %v22226_v43  ;;  %v22247_v43 = vld [vmem:[%s24682_s12 + $0x910] ss:$24 sps:$4 sm:$0xff]  }
 0x452   : > { %16877 = vmatpush1.bf16.msra.mxu0 %v22229_v32  ;;  %v15208_v54 = vpop.f32.mrb[3].mxu1  ;;  %15878 = vmatprep.subr.bf16.mxu1 %v22234_v53  ;;  %v22252_v32 = vld [vmem:[%s24682_s12 + $0xabc] ss:$24 sps:$4 sm:$0xff]   ;;  %v22253_v42 = vld [vmem:[%s24682_s12 + $0x940] ss:$24 sps:$4 sm:$0xff]  }
 0x453   : > { %16878 = vmatprep.subr.bf16.mxu0 %v22237_v59  ;;  %v22255_v53 = vld [vmem:[%s24682_s12 + $0x944] ss:$24 sps:$4 sm:$0xff]   ;;  %v22250_v59 = vld [vmem:[%s24682_s12 + $0xab8] ss:$24 sps:$4 sm:$0xff]   ;;  %v22256_v54 = vld [vmem:[%s24682_s12 + $0xae8] ss:$24 sps:$4 sm:$0xff]  }
 0x455   : > { %15879 = vmatpush1.bf16.msra.mxu1 %v22232_v49  ;;  %v22258_v49 = vld [vmem:[%s24682_s12 + $0xaec] ss:$24 sps:$4 sm:$0xff]  }
 0x456   : > { %16879 = vmatpush1.bf16.msra.mxu0 %v22235_v38  ;;  %15880 = vmatprep.subr.bf16.mxu1 %v22240_v29  ;;  %v22261_v38 = vld [vmem:[%s24682_s12 + $0x974] ss:$24 sps:$4 sm:$0xff]  }
 0x457   : > { %16880 = vmatprep.subr.bf16.mxu0 %v22243_v48  ;;  %v22264_v29 = vld [vmem:[%s24682_s12 + $0xb1c] ss:$24 sps:$4 sm:$0xff]  }
 0x458   : > { %v22267_v48 = vld [vmem:[%s24682_s12 + $0x9a4] ss:$24 sps:$4 sm:$0xff]  }
 0x459   : > { %15881 = vmatpush1.bf16.msra.mxu1 %v22238_v26  ;;  %v22262_v26 = vld [vmem:[%s24682_s12 + $0xb18] ss:$24 sps:$4 sm:$0xff]  }
 0x45a   : > { %16881 = vmatpush1.bf16.msra.mxu0 %v22241_v52  ;;  %15882 = vmatprep.subr.bf16.mxu1 %v22246_v62  ;;  %v22265_v52 = vld [vmem:[%s24682_s12 + $0x9a0] ss:$24 sps:$4 sm:$0xff]   ;;  %v22273_v62 = vld [vmem:[%s24682_s12 + $0x9d4] ss:$24 sps:$4 sm:$0xff]  }
 0x45b   : > { %16891 = vmatprep.subr.bf16.mxu0 %v22249_v34  ;;  %v22268_v34 = vld [vmem:[%s24682_s12 + $0xb48] ss:$24 sps:$4 sm:$0xff]  }
 0x45d   : > { %16883 = vmatmul.mubr.bf16.vlgmr.msra.gmra.mrb[4].mxu0 %v24976_v7  ;;  %15883 = vmatpush1.bf16.msra.mxu1 %v22244_v41  ;;  %v22259_v7 = vld [vmem:[%s24682_s12 + $0x970] ss:$24 sps:$4 sm:$0xff]  }
 0x45e   : > { %16892 = vmatpush1.bf16.msra.mxu0 %v22247_v43  ;;  %15884 = vmatprep.subr.bf16.mxu1 %v22252_v32  ;;  %v22271_v41 = vld [vmem:[%s24682_s12 + $0x9d0] ss:$24 sps:$4 sm:$0xff]   ;;  %v22276_v43 = vld [vmem:[%s24682_s12 + $0xb7c] ss:$24 sps:$4 sm:$0xff]  }
 0x45f   : > { %16893 = vmatprep.subr.bf16.mxu0 %v22255_v53  ;;  %16923 = vmatprep.mubr.bf16.mxu0 %v24984_v11  ;;  %v22270_v11 = vld [vmem:[%s24682_s12 + $0xb4c] ss:$24 sps:$4 sm:$0xff]   ;;  %v22274_v53 = vld [vmem:[%s24682_s12 + $0xb78] ss:$24 sps:$4 sm:$0xff]  }
 0x460   : > { %v22279_v32 = vld [vmem:[%s24682_s12 + $0xa04] ss:$24 sps:$4 sm:$0xff]  }
 0x461   : > { %15885 = vmatpush1.bf16.msra.mxu1 %v22250_v59  ;;  %v22277_v59 = vld [vmem:[%s24682_s12 + $0xa00] ss:$24 sps:$4 sm:$0xff]  }
 0x462   : > { %16894 = vmatpush1.bf16.msra.mxu0 %v22253_v42  ;;  %15886 = vmatprep.subr.bf16.mxu1 %v22258_v49  ;;  %v22282_v42 = vld [vmem:[%s24682_s12 + $0xbac] ss:$24 sps:$4 sm:$0xff]  }
 0x463   : > { %16895 = vmatprep.subr.bf16.mxu0 %v22261_v38  ;;  %v22285_v49 = vld [vmem:[%s24682_s12 + $0xa34] ss:$24 sps:$4 sm:$0xff]  }
 0x465   : > { %15887 = vmatpush1.bf16.msra.mxu1 %v22256_v54 }
 0x466   : > { %16896 = vmatpush1.bf16.msra.mxu0 %v22259_v7  ;;  %15888 = vmatprep.subr.bf16.mxu1 %v22264_v29 }
 0x467   : > { %16897 = vmatprep.subr.bf16.mxu0 %v22267_v48 }
 0x469   : > { %15889 = vmatpush1.bf16.msra.mxu1 %v22262_v26  ;;  %v22280_v26 = vld [vmem:[%s24682_s12 + $0xba8] ss:$24 sps:$4 sm:$0xff]  }
 0x46a   : > { %16898 = vmatpush1.bf16.msra.mxu0 %v22265_v52  ;;  %15890 = vmatprep.subr.bf16.mxu1 %v22270_v11  ;;  %v22283_v52 = vld [vmem:[%s24682_s12 + $0xa30] ss:$24 sps:$4 sm:$0xff]  }
 0x46b   : > { %16899 = vmatprep.subr.bf16.mxu0 %v22273_v62  ;;  %v22291_v62 = vld [vmem:[%s24682_s12 + $0xa64] ss:$24 sps:$4 sm:$0xff]  }
 0x46d   : > { %15891 = vmatpush1.bf16.msra.mxu1 %v22268_v34 }
 0x46e   : > { %16900 = vmatpush1.bf16.msra.mxu0 %v22271_v41  ;;  %15892 = vmatprep.subr.bf16.mxu1 %v22276_v43  ;;  %v22289_v41 = vld [vmem:[%s24682_s12 + $0xa60] ss:$24 sps:$4 sm:$0xff]   ;;  %v22294_v43 = vld [vmem:[%s24682_s12 + $0xc0c] ss:$24 sps:$4 sm:$0xff]  }
 0x46f   : > { %16901 = vmatprep.subr.bf16.mxu0 %v22279_v32  ;;  %v22297_v32 = vld [vmem:[%s24682_s12 + $0xa94] ss:$24 sps:$4 sm:$0xff]  }
 0x470   : > { %v15736_v38 = vpop.f32.mrb[0].mxu0 }
 0x471   : > { %v26102_v54 = vadd.f32 %v15736_v38, %v26063_v23  ;;  %v15738_v7 = vpop.f32.mrb[1].mxu0  ;;  %15893 = vmatpush1.bf16.msra.mxu1 %v22274_v53  ;;  %v22288_v23 = vld [vmem:[%s24682_s12 + $0xbdc] ss:$24 sps:$4 sm:$0xff]   ;;  %v22292_v53 = vld [vmem:[%s24682_s12 + $0xc08] ss:$24 sps:$4 sm:$0xff]  }
 0x472   : > { %v26105_v29 = vadd.f32 %v15738_v7, %v26065_v60  ;;  %v15740_v48 = vpop.f32.mrb[2].mxu0  ;;  %16902 = vmatpush1.bf16.msra.mxu0 %v22277_v59  ;;  %15894 = vmatprep.subr.bf16.mxu1 %v22282_v42  ;;  %v22286_v60 = vld [vmem:[%s24682_s12 + $0xbd8] ss:$24 sps:$4 sm:$0xff]   ;;  %v22300_v42 = vld [vmem:[%s24682_s12 + $0xc3c] ss:$24 sps:$4 sm:$0xff]  }
 0x473   : > { %v15741_v11 = vpop.f32.mrb[3].mxu0  ;;  %16903 = vmatprep.subr.bf16.mxu0 %v22285_v49  ;;  %v22295_v59 = vld [vmem:[%s24682_s12 + $0xa90] ss:$24 sps:$4 sm:$0xff]   ;;  %v22303_v49 = vld [vmem:[%s24682_s12 + $0xac4] ss:$24 sps:$4 sm:$0xff]  }
 0x474   : > { %v17799_v34 = vcombine.low %v26102_v54, %v26105_v29  ;;  %v22298_v38 = vld [vmem:[%s24682_s12 + $0xc38] ss:$24 sps:$4 sm:$0xff]   ;;  %v22306_v48 = vld [vmem:[%s24682_s12 + $0xc6c] ss:$24 sps:$4 sm:$0xff]   ;;  %v17840_v29 = vsub.s32 (!%p20363_p9), 0, %v24732_v44 }
 0x475   : > { %15895 = vmatpush1.bf16.msra.mxu1 %v22280_v26  ;;  %v22301_v7 = vld [vmem:[%s24682_s12 + $0xac0] ss:$24 sps:$4 sm:$0xff]   ;;  %v22309_v26 = vld [vmem:[%s24682_s12 + $0xaf4] ss:$24 sps:$4 sm:$0xff]   ;;  %v22307_v11 = vld [vmem:[%s24682_s12 + $0xaf0] ss:$24 sps:$4 sm:$0xff]  }
 0x476   : > { %16904 = vmatpush1.bf16.msra.mxu0 %v22283_v52  ;;  %15896 = vmatprep.subr.bf16.mxu1 %v22288_v23  ;;  %v22304_v52 = vld [vmem:[%s24682_s12 + $0xc68] ss:$24 sps:$4 sm:$0xff]   ;;  %v22312_v23 = vld [vmem:[%s24682_s12 + $0xc9c] ss:$24 sps:$4 sm:$0xff]  }
 0x477   : > { %16905 = vmatprep.subr.bf16.mxu0 %v22291_v62  ;;  %v22315_v62 = vld [vmem:[%s24682_s12 + $0xb24] ss:$24 sps:$4 sm:$0xff]  }
 0x478   : > { %v17836_v54 = vld [vmem:[#allocation8] sm:$0x3f] (!%p20363_p9) }
 0x479   : > { %15897 = vmatpush1.bf16.msra.mxu1 %v22286_v60  ;;  %v22310_v60 = vld [vmem:[%s24682_s12 + $0xc98] ss:$24 sps:$4 sm:$0xff]  }
 0x47a   : > { %16906 = vmatpush1.bf16.msra.mxu0 %v22289_v41  ;;  %15907 = vmatprep.subr.bf16.mxu1 %v22294_v43  ;;  %v22313_v41 = vld [vmem:[%s24682_s12 + $0xb20] ss:$24 sps:$4 sm:$0xff]   ;;  %v22318_v43 = vld [vmem:[%s24682_s12 + $0xccc] ss:$24 sps:$4 sm:$0xff]  }
 0x47b   : > { %16907 = vmatprep.subr.bf16.mxu0 %v22297_v32  ;;  %v22321_v32 = vld [vmem:[%s24682_s12 + $0xb54] ss:$24 sps:$4 sm:$0xff]  }
 0x47c   : > { %15899 = vmatmul.mubr.bf16.vlgmr.msra.gmra.mrb[4].mxu1 %v25072_v37 }
 0x47d   : > { %15908 = vmatpush1.bf16.msra.mxu1 %v22292_v53  ;;  %15939 = vmatprep.mubr.bf16.mxu1 %v25082_v47  ;;  %v22316_v53 = vld [vmem:[%s24682_s12 + $0xcc8] ss:$24 sps:$4 sm:$0xff]  }
 0x47e   : > { %16908 = vmatpush1.bf16.msra.mxu0 %v22295_v59  ;;  %15909 = vmatprep.subr.bf16.mxu1 %v22300_v42  ;;  %v22319_v59 = vld [vmem:[%s24682_s12 + $0xb50] ss:$24 sps:$4 sm:$0xff]   ;;  %v22324_v42 = vld [vmem:[%s24682_s12 + $0xcfc] ss:$24 sps:$4 sm:$0xff]  }
 0x47f   : > { %16909 = vmatprep.subr.bf16.mxu0 %v22303_v49  ;;  %v22327_v49 = vld [vmem:[%s24682_s12 + $0xb84] ss:$24 sps:$4 sm:$0xff]  }
 0x481   : > { %15910 = vmatpush1.bf16.msra.mxu1 %v22298_v38  ;;  %v22322_v38 = vld [vmem:[%s24682_s12 + $0xcf8] ss:$24 sps:$4 sm:$0xff]  }
 0x482   : > { %16910 = vmatpush1.bf16.msra.mxu0 %v22301_v7  ;;  %15911 = vmatprep.subr.bf16.mxu1 %v22306_v48  ;;  %v22325_v7 = vld [vmem:[%s24682_s12 + $0xb80] ss:$24 sps:$4 sm:$0xff]   ;;  %v22330_v48 = vld [vmem:[%s24682_s12 + $0xd2c] ss:$24 sps:$4 sm:$0xff]  }
 0x483   : > { %16911 = vmatprep.subr.bf16.mxu0 %v22309_v26  ;;  %v22333_v26 = vld [vmem:[%s24682_s12 + $0xbb4] ss:$24 sps:$4 sm:$0xff]  }
 0x485   : > { %15912 = vmatpush1.bf16.msra.mxu1 %v22304_v52  ;;  %v22328_v52 = vld [vmem:[%s24682_s12 + $0xd28] ss:$24 sps:$4 sm:$0xff]  }
 0x486   : > { %16912 = vmatpush1.bf16.msra.mxu0 %v22307_v11  ;;  %15913 = vmatprep.subr.bf16.mxu1 %v22312_v23  ;;  %v22331_v11 = vld [vmem:[%s24682_s12 + $0xbb0] ss:$24 sps:$4 sm:$0xff]   ;;  %v22336_v23 = vld [vmem:[%s24682_s12 + $0xd5c] ss:$24 sps:$4 sm:$0xff]  }
 0x487   : > { %16913 = vmatprep.subr.bf16.mxu0 %v22315_v62  ;;  %v22339_v62 = vld [vmem:[%s24682_s12 + $0xbe4] ss:$24 sps:$4 sm:$0xff]  }
 0x489   : > { %15914 = vmatpush1.bf16.msra.mxu1 %v22310_v60  ;;  %v22334_v60 = vld [vmem:[%s24682_s12 + $0xd58] ss:$24 sps:$4 sm:$0xff]  }
 0x48a   : > { %16914 = vmatpush1.bf16.msra.mxu0 %v22313_v41  ;;  %15915 = vmatprep.subr.bf16.mxu1 %v22318_v43  ;;  %v22337_v41 = vld [vmem:[%s24682_s12 + $0xbe0] ss:$24 sps:$4 sm:$0xff]   ;;  %v22342_v43 = vld [vmem:[%s24682_s12 + $0xd8c] ss:$24 sps:$4 sm:$0xff]  }
 0x48b   : > { %16915 = vmatprep.subr.bf16.mxu0 %v22321_v32  ;;  %v22345_v32 = vld [vmem:[%s24682_s12 + $0xc14] ss:$24 sps:$4 sm:$0xff]  }
 0x48d   : > { %15916 = vmatpush1.bf16.msra.mxu1 %v22316_v53  ;;  %v22340_v53 = vld [vmem:[%s24682_s12 + $0xd88] ss:$24 sps:$4 sm:$0xff]  }
 0x48e   : > { %16916 = vmatpush1.bf16.msra.mxu0 %v22319_v59  ;;  %15917 = vmatprep.subr.bf16.mxu1 %v22324_v42  ;;  %v22343_v59 = vld [vmem:[%s24682_s12 + $0xc10] ss:$24 sps:$4 sm:$0xff]   ;;  %v22348_v42 = vld [vmem:[%s24682_s12 + $0xdbc] ss:$24 sps:$4 sm:$0xff]  }
 0x48f   : > { %16917 = vmatprep.subr.bf16.mxu0 %v22327_v49  ;;  %v22351_v49 = vld [vmem:[%s24682_s12 + $0xc44] ss:$24 sps:$4 sm:$0xff]  }
 0x491   : > { %15918 = vmatpush1.bf16.msra.mxu1 %v22322_v38  ;;  %v22346_v38 = vld [vmem:[%s24682_s12 + $0xdb8] ss:$24 sps:$4 sm:$0xff]  }
 0x492   : > { %16918 = vmatpush1.bf16.msra.mxu0 %v22325_v7  ;;  %15919 = vmatprep.subr.bf16.mxu1 %v22330_v48  ;;  %v22349_v7 = vld [vmem:[%s24682_s12 + $0xc40] ss:$24 sps:$4 sm:$0xff]   ;;  %v22354_v48 = vld [vmem:[%s24682_s12 + $0xdec] ss:$24 sps:$4 sm:$0xff]  }
 0x493   : > { %16919 = vmatprep.subr.bf16.mxu0 %v22333_v26  ;;  %v22357_v26 = vld [vmem:[%s24682_s12 + $0xc74] ss:$24 sps:$4 sm:$0xff]  }
 0x495   : > { %15920 = vmatpush1.bf16.msra.mxu1 %v22328_v52  ;;  %v22352_v52 = vld [vmem:[%s24682_s12 + $0xde8] ss:$24 sps:$4 sm:$0xff]  }
 0x496   : > { %16920 = vmatpush1.bf16.msra.mxu0 %v22331_v11  ;;  %15921 = vmatprep.subr.bf16.mxu1 %v22336_v23  ;;  %v22360_v11 = vld [vmem:[%s24682_s12 + $0xe1c] ss:$24 sps:$4 sm:$0xff]  }
 0x497   : > { %16921 = vmatprep.subr.bf16.mxu0 %v22339_v62  ;;  %v22363_v23 = vld [vmem:[%s24682_s12 + $0xca4] ss:$24 sps:$4 sm:$0xff]   ;;  %v22358_v62 = vld [vmem:[%s24682_s12 + $0xe18] ss:$24 sps:$4 sm:$0xff]  }
 0x499   : > { %15922 = vmatpush1.bf16.msra.mxu1 %v22334_v60  ;;  %v22361_v60 = vld [vmem:[%s24682_s12 + $0xca0] ss:$24 sps:$4 sm:$0xff]  }
 0x49a   : > { %16922 = vmatpush1.bf16.msra.mxu0 %v22337_v41  ;;  %15923 = vmatprep.subr.bf16.mxu1 %v22342_v43  ;;  %v22369_v41 = vld [vmem:[%s24682_s12 + $0xcd4] ss:$24 sps:$4 sm:$0xff]   ;;  %v22364_v43 = vld [vmem:[%s24682_s12 + $0xe48] ss:$24 sps:$4 sm:$0xff]  }
 0x49b   : > { %16932 = vmatprep.subr.bf16.mxu0 %v22345_v32  ;;  %v22367_v32 = vld [vmem:[%s24682_s12 + $0xcd0] ss:$24 sps:$4 sm:$0xff]  }
 0x49d   : > { %16924 = vmatmul.mubr.bf16.vlgmr.msra.gmra.mrb[4].mxu0 %v25072_v37  ;;  %15924 = vmatpush1.bf16.msra.mxu1 %v22340_v53  ;;  %v22355_v37 = vld [vmem:[%s24682_s12 + $0xc70] ss:$24 sps:$4 sm:$0xff]   ;;  %v22372_v53 = vld [vmem:[%s24682_s12 + $0xe7c] ss:$24 sps:$4 sm:$0xff]  }
 0x49e   : > { %16933 = vmatpush1.bf16.msra.mxu0 %v22343_v59  ;;  %15925 = vmatprep.subr.bf16.mxu1 %v22348_v42  ;;  %v22375_v59 = vld [vmem:[%s24682_s12 + $0xd04] ss:$24 sps:$4 sm:$0xff]   ;;  %v22370_v42 = vld [vmem:[%s24682_s12 + $0xe78] ss:$24 sps:$4 sm:$0xff]  }
 0x49f   : > { %16934 = vmatprep.subr.bf16.mxu0 %v22351_v49  ;;  %16964 = vmatprep.mubr.bf16.mxu0 %v25082_v47  ;;  %v22366_v47 = vld [vmem:[%s24682_s12 + $0xe4c] ss:$24 sps:$4 sm:$0xff]   ;;  %v22373_v49 = vld [vmem:[%s24682_s12 + $0xd00] ss:$24 sps:$4 sm:$0xff]  }
 0x4a1   : > { %15926 = vmatpush1.bf16.msra.mxu1 %v22346_v38  ;;  %v22378_v38 = vld [vmem:[%s24682_s12 + $0xeac] ss:$24 sps:$4 sm:$0xff]  }
 0x4a2   : > { %16935 = vmatpush1.bf16.msra.mxu0 %v22349_v7  ;;  %15927 = vmatprep.subr.bf16.mxu1 %v22354_v48  ;;  %v22381_v7 = vld [vmem:[%s24682_s12 + $0xd34] ss:$24 sps:$4 sm:$0xff]   ;;  %v22376_v48 = vld [vmem:[%s24682_s12 + $0xea8] ss:$24 sps:$4 sm:$0xff]  }
 0x4a3   : > { %16936 = vmatprep.subr.bf16.mxu0 %v22357_v26  ;;  %v22379_v26 = vld [vmem:[%s24682_s12 + $0xd30] ss:$24 sps:$4 sm:$0xff]  }
 0x4a5   : > { %15928 = vmatpush1.bf16.msra.mxu1 %v22352_v52  ;;  %v22384_v52 = vld [vmem:[%s24682_s12 + $0xedc] ss:$24 sps:$4 sm:$0xff]  }
 0x4a6   : > { %16937 = vmatpush1.bf16.msra.mxu0 %v22355_v37  ;;  %15929 = vmatprep.subr.bf16.mxu1 %v22360_v11  ;;  %v22387_v37 = vld [vmem:[%s24682_s12 + $0xd64] ss:$24 sps:$4 sm:$0xff]   ;;  %v22382_v11 = vld [vmem:[%s24682_s12 + $0xed8] ss:$24 sps:$4 sm:$0xff]  }
 0x4a7   : > { %16938 = vmatprep.subr.bf16.mxu0 %v22363_v23  ;;  %v22385_v23 = vld [vmem:[%s24682_s12 + $0xd60] ss:$24 sps:$4 sm:$0xff]  }
 0x4a9   : > { %15930 = vmatpush1.bf16.msra.mxu1 %v22358_v62  ;;  %v22390_v62 = vld [vmem:[%s24682_s12 + $0xf0c] ss:$24 sps:$4 sm:$0xff]  }
 0x4aa   : > { %16939 = vmatpush1.bf16.msra.mxu0 %v22361_v60  ;;  %15931 = vmatprep.subr.bf16.mxu1 %v22366_v47  ;;  %v22393_v60 = vld [vmem:[%s24682_s12 + $0xd94] ss:$24 sps:$4 sm:$0xff]   ;;  %v22388_v47 = vld [vmem:[%s24682_s12 + $0xf08] ss:$24 sps:$4 sm:$0xff]  }
 0x4ab   : > { %16940 = vmatprep.subr.bf16.mxu0 %v22369_v41  ;;  %v22391_v41 = vld [vmem:[%s24682_s12 + $0xd90] ss:$24 sps:$4 sm:$0xff]  }
 0x4ad   : > { %15932 = vmatpush1.bf16.msra.mxu1 %v22364_v43  ;;  %v22396_v43 = vld [vmem:[%s24682_s12 + $0xf3c] ss:$24 sps:$4 sm:$0xff]  }
 0x4ae   : > { %16941 = vmatpush1.bf16.msra.mxu0 %v22367_v32  ;;  %15933 = vmatprep.subr.bf16.mxu1 %v22372_v53  ;;  %v22399_v32 = vld [vmem:[%s24682_s12 + $0xdc4] ss:$24 sps:$4 sm:$0xff]   ;;  %v22394_v53 = vld [vmem:[%s24682_s12 + $0xf38] ss:$24 sps:$4 sm:$0xff]  }
 0x4af   : > { %16942 = vmatprep.subr.bf16.mxu0 %v22375_v59  ;;  %v22397_v59 = vld [vmem:[%s24682_s12 + $0xdc0] ss:$24 sps:$4 sm:$0xff]  }
 0x4b1   : > { %15934 = vmatpush1.bf16.msra.mxu1 %v22370_v42  ;;  %v22402_v42 = vld [vmem:[%s24682_s12 + $0xf6c] ss:$24 sps:$4 sm:$0xff]  }
 0x4b2   : > { %16943 = vmatpush1.bf16.msra.mxu0 %v22373_v49  ;;  %15935 = vmatprep.subr.bf16.mxu1 %v22378_v38  ;;  %v22405_v49 = vld [vmem:[%s24682_s12 + $0xdf4] ss:$24 sps:$4 sm:$0xff]   ;;  %v22400_v38 = vld [vmem:[%s24682_s12 + $0xf68] ss:$24 sps:$4 sm:$0xff]  }
 0x4b3   : > { %16944 = vmatprep.subr.bf16.mxu0 %v22381_v7  ;;  %v22403_v7 = vld [vmem:[%s24682_s12 + $0xdf0] ss:$24 sps:$4 sm:$0xff]  }
 0x4b5   : > { %15936 = vmatpush1.bf16.msra.mxu1 %v22376_v48  ;;  %v22408_v48 = vld [vmem:[%s24682_s12 + $0xf9c] ss:$24 sps:$4 sm:$0xff]  }
 0x4b6   : > { %16945 = vmatpush1.bf16.msra.mxu0 %v22379_v26  ;;  %15937 = vmatprep.subr.bf16.mxu1 %v22384_v52  ;;  %v22411_v26 = vld [vmem:[%s24682_s12 + $0xe24] ss:$24 sps:$4 sm:$0xff]   ;;  %v22406_v52 = vld [vmem:[%s24682_s12 + $0xf98] ss:$24 sps:$4 sm:$0xff]  }
 0x4b7   : > { %16946 = vmatprep.subr.bf16.mxu0 %v22387_v37  ;;  %v22409_v37 = vld [vmem:[%s24682_s12 + $0xe20] ss:$24 sps:$4 sm:$0xff]  }
 0x4b9   : > { %15938 = vmatpush1.bf16.msra.mxu1 %v22382_v11  ;;  %v22414_v11 = vld [vmem:[%s24682_s12 + $0xfcc] ss:$24 sps:$4 sm:$0xff]  }
 0x4ba   : > { %16947 = vmatpush1.bf16.msra.mxu0 %v22385_v23  ;;  %15948 = vmatprep.subr.bf16.mxu1 %v22390_v62  ;;  %v22417_v23 = vld [vmem:[%s24682_s12 + $0xe54] ss:$24 sps:$4 sm:$0xff]   ;;  %v22412_v62 = vld [vmem:[%s24682_s12 + $0xfc8] ss:$24 sps:$4 sm:$0xff]  }
 0x4bb   : > { %16948 = vmatprep.subr.bf16.mxu0 %v22393_v60  ;;  %v22415_v60 = vld [vmem:[%s24682_s12 + $0xe50] ss:$24 sps:$4 sm:$0xff]  }
 0x4bc   : > { %15940 = vmatmul.mubr.bf16.vlgmr.msra.gmra.mrb[4].mxu1 %v25166_v17 }
 0x4bd   : > { %15949 = vmatpush1.bf16.msra.mxu1 %v22388_v47  ;;  %15980 = vmatprep.mubr.bf16.mxu1 %v25176_v31  ;;  %v22420_v47 = vld [vmem:[%s24682_s12 + $0xffc] ss:$24 sps:$4 sm:$0xff]  }
 0x4be   : > { %16949 = vmatpush1.bf16.msra.mxu0 %v22391_v41  ;;  %15950 = vmatprep.subr.bf16.mxu1 %v22396_v43  ;;  %v22423_v41 = vld [vmem:[%s24682_s12 + $0xe84] ss:$24 sps:$4 sm:$0xff]   ;;  %v22418_v43 = vld [vmem:[%s24682_s12 + $0xff8] ss:$24 sps:$4 sm:$0xff]  }
 0x4bf   : > { %16950 = vmatprep.subr.bf16.mxu0 %v22399_v32  ;;  %v22421_v32 = vld [vmem:[%s24682_s12 + $0xe80] ss:$24 sps:$4 sm:$0xff]  }
 0x4c1   : > { %15951 = vmatpush1.bf16.msra.mxu1 %v22394_v53  ;;  %v22426_v53 = vld [vmem:[%s24682_s12 + $0x102c] ss:$24 sps:$4 sm:$0xff]  }
 0x4c2   : > { %16951 = vmatpush1.bf16.msra.mxu0 %v22397_v59  ;;  %15952 = vmatprep.subr.bf16.mxu1 %v22402_v42  ;;  %v22429_v59 = vld [vmem:[%s24682_s12 + $0xeb4] ss:$24 sps:$4 sm:$0xff]   ;;  %v22424_v42 = vld [vmem:[%s24682_s12 + $0x1028] ss:$24 sps:$4 sm:$0xff]  }
 0x4c3   : > { %16952 = vmatprep.subr.bf16.mxu0 %v22405_v49  ;;  %v22427_v49 = vld [vmem:[%s24682_s12 + $0xeb0] ss:$24 sps:$4 sm:$0xff]  }
 0x4c5   : > { %15953 = vmatpush1.bf16.msra.mxu1 %v22400_v38  ;;  %v22432_v38 = vld [vmem:[%s24682_s12 + $0x105c] ss:$24 sps:$4 sm:$0xff]  }
 0x4c6   : > { %16953 = vmatpush1.bf16.msra.mxu0 %v22403_v7  ;;  %15954 = vmatprep.subr.bf16.mxu1 %v22408_v48  ;;  %v22435_v7 = vld [vmem:[%s24682_s12 + $0xee4] ss:$24 sps:$4 sm:$0xff]   ;;  %v22430_v48 = vld [vmem:[%s24682_s12 + $0x1058] ss:$24 sps:$4 sm:$0xff]  }
 0x4c7   : > { %16954 = vmatprep.subr.bf16.mxu0 %v22411_v26  ;;  %v22433_v26 = vld [vmem:[%s24682_s12 + $0xee0] ss:$24 sps:$4 sm:$0xff]  }
 0x4c9   : > { %15955 = vmatpush1.bf16.msra.mxu1 %v22406_v52  ;;  %v22438_v52 = vld [vmem:[%s24682_s12 + $0x108c] ss:$24 sps:$4 sm:$0xff]  }
 0x4ca   : > { %16955 = vmatpush1.bf16.msra.mxu0 %v22409_v37  ;;  %15956 = vmatprep.subr.bf16.mxu1 %v22414_v11  ;;  %v22441_v37 = vld [vmem:[%s24682_s12 + $0xf14] ss:$24 sps:$4 sm:$0xff]   ;;  %v22436_v11 = vld [vmem:[%s24682_s12 + $0x1088] ss:$24 sps:$4 sm:$0xff]  }
 0x4cb   : > { %16956 = vmatprep.subr.bf16.mxu0 %v22417_v23  ;;  %v22439_v23 = vld [vmem:[%s24682_s12 + $0xf10] ss:$24 sps:$4 sm:$0xff]  }
 0x4cd   : > { %15957 = vmatpush1.bf16.msra.mxu1 %v22412_v62  ;;  %v22444_v62 = vld [vmem:[%s24682_s12 + $0x10bc] ss:$24 sps:$4 sm:$0xff]  }
 0x4ce   : > { %16957 = vmatpush1.bf16.msra.mxu0 %v22415_v60  ;;  %15958 = vmatprep.subr.bf16.mxu1 %v22420_v47  ;;  %v22447_v60 = vld [vmem:[%s24682_s12 + $0xf44] ss:$24 sps:$4 sm:$0xff]   ;;  %v22442_v47 = vld [vmem:[%s24682_s12 + $0x10b8] ss:$24 sps:$4 sm:$0xff]  }
 0x4cf   : > { %16958 = vmatprep.subr.bf16.mxu0 %v22423_v41  ;;  %v22445_v41 = vld [vmem:[%s24682_s12 + $0xf40] ss:$24 sps:$4 sm:$0xff]  }
 0x4d1   : > { %15959 = vmatpush1.bf16.msra.mxu1 %v22418_v43  ;;  %v22450_v43 = vld [vmem:[%s24682_s12 + $0x10ec] ss:$24 sps:$4 sm:$0xff]  }
 0x4d2   : > { %16959 = vmatpush1.bf16.msra.mxu0 %v22421_v32  ;;  %15960 = vmatprep.subr.bf16.mxu1 %v22426_v53  ;;  %v22453_v32 = vld [vmem:[%s24682_s12 + $0xf74] ss:$24 sps:$4 sm:$0xff]   ;;  %v22448_v53 = vld [vmem:[%s24682_s12 + $0x10e8] ss:$24 sps:$4 sm:$0xff]  }
 0x4d3   : > { %16960 = vmatprep.subr.bf16.mxu0 %v22429_v59  ;;  %v22456_v59 = vld [vmem:[%s24682_s12 + $0x111c] ss:$24 sps:$4 sm:$0xff]  }
 0x4d5   : > { %15961 = vmatpush1.bf16.msra.mxu1 %v22424_v42  ;;  %v22459_v42 = vld [vmem:[%s24682_s12 + $0xfa4] ss:$24 sps:$4 sm:$0xff]  }
 0x4d6   : > { %16961 = vmatpush1.bf16.msra.mxu0 %v22427_v49  ;;  %15962 = vmatprep.subr.bf16.mxu1 %v22432_v38  ;;  %v22454_v49 = vld [vmem:[%s24682_s12 + $0x1118] ss:$24 sps:$4 sm:$0xff]  }
 0x4d7   : > { %16962 = vmatprep.subr.bf16.mxu0 %v22435_v7  ;;  %v22457_v38 = vld [vmem:[%s24682_s12 + $0xfa0] ss:$24 sps:$4 sm:$0xff]   ;;  %v22465_v7 = vld [vmem:[%s24682_s12 + $0xfd4] ss:$24 sps:$4 sm:$0xff]  }
 0x4d9   : > { %15963 = vmatpush1.bf16.msra.mxu1 %v22430_v48  ;;  %v22460_v48 = vld [vmem:[%s24682_s12 + $0x1148] ss:$24 sps:$4 sm:$0xff]  }
 0x4da   : > { %16963 = vmatpush1.bf16.msra.mxu0 %v22433_v26  ;;  %15964 = vmatprep.subr.bf16.mxu1 %v22438_v52  ;;  %v22463_v26 = vld [vmem:[%s24682_s12 + $0xfd0] ss:$24 sps:$4 sm:$0xff]   ;;  %v22468_v52 = vld [vmem:[%s24682_s12 + $0x117c] ss:$24 sps:$4 sm:$0xff]  }
 0x4db   : > { %16973 = vmatprep.subr.bf16.mxu0 %v22441_v37  ;;  %v22471_v37 = vld [vmem:[%s24682_s12 + $0x1004] ss:$24 sps:$4 sm:$0xff]  }
 0x4dd   : > { %16965 = vmatmul.mubr.bf16.vlgmr.msra.gmra.mrb[4].mxu0 %v25166_v17  ;;  %15965 = vmatpush1.bf16.msra.mxu1 %v22436_v11  ;;  %v22451_v17 = vld [vmem:[%s24682_s12 + $0xf70] ss:$24 sps:$4 sm:$0xff]  }
 0x4de   : > { %16974 = vmatpush1.bf16.msra.mxu0 %v22439_v23  ;;  %15966 = vmatprep.subr.bf16.mxu1 %v22444_v62  ;;  %v22466_v11 = vld [vmem:[%s24682_s12 + $0x1178] ss:$24 sps:$4 sm:$0xff]   ;;  %v22474_v62 = vld [vmem:[%s24682_s12 + $0x11ac] ss:$24 sps:$4 sm:$0xff]  }
 0x4df   : > { %16975 = vmatprep.subr.bf16.mxu0 %v22447_v60  ;;  %17005 = vmatprep.mubr.bf16.mxu0 %v25176_v31  ;;  %v22462_v31 = vld [vmem:[%s24682_s12 + $0x114c] ss:$24 sps:$4 sm:$0xff]   ;;  %v22469_v23 = vld [vmem:[%s24682_s12 + $0x1000] ss:$24 sps:$4 sm:$0xff]  }
 0x4e0   : > { %v22477_v60 = vld [vmem:[%s24682_s12 + $0x1034] ss:$24 sps:$4 sm:$0xff]  }
 0x4e1   : > { %15967 = vmatpush1.bf16.msra.mxu1 %v22442_v47  ;;  %v22472_v47 = vld [vmem:[%s24682_s12 + $0x11a8] ss:$24 sps:$4 sm:$0xff]  }
 0x4e2   : > { %16976 = vmatpush1.bf16.msra.mxu0 %v22445_v41  ;;  %15968 = vmatprep.subr.bf16.mxu1 %v22450_v43  ;;  %v22475_v41 = vld [vmem:[%s24682_s12 + $0x1030] ss:$24 sps:$4 sm:$0xff]   ;;  %v22480_v43 = vld [vmem:[%s24682_s12 + $0x11dc] ss:$24 sps:$4 sm:$0xff]  }
 0x4e3   : > { %16977 = vmatprep.subr.bf16.mxu0 %v22453_v32  ;;  %v22483_v32 = vld [vmem:[%s24682_s12 + $0x1064] ss:$24 sps:$4 sm:$0xff]  }
 0x4e5   : > { %15969 = vmatpush1.bf16.msra.mxu1 %v22448_v53  ;;  %v22478_v53 = vld [vmem:[%s24682_s12 + $0x11d8] ss:$24 sps:$4 sm:$0xff]  }
 0x4e6   : > { %16978 = vmatpush1.bf16.msra.mxu0 %v22451_v17  ;;  %15970 = vmatprep.subr.bf16.mxu1 %v22456_v59  ;;  %v22481_v17 = vld [vmem:[%s24682_s12 + $0x1060] ss:$24 sps:$4 sm:$0xff]   ;;  %v22486_v59 = vld [vmem:[%s24682_s12 + $0x120c] ss:$24 sps:$4 sm:$0xff]  }
 0x4e7   : > { %16979 = vmatprep.subr.bf16.mxu0 %v22459_v42  ;;  %v22489_v42 = vld [vmem:[%s24682_s12 + $0x1094] ss:$24 sps:$4 sm:$0xff]  }
 0x4e9   : > { %15971 = vmatpush1.bf16.msra.mxu1 %v22454_v49  ;;  %v22484_v49 = vld [vmem:[%s24682_s12 + $0x1208] ss:$24 sps:$4 sm:$0xff]  }
 0x4ea   : > { %16980 = vmatpush1.bf16.msra.mxu0 %v22457_v38  ;;  %15972 = vmatprep.subr.bf16.mxu1 %v22462_v31  ;;  %v22487_v38 = vld [vmem:[%s24682_s12 + $0x1090] ss:$24 sps:$4 sm:$0xff]   ;;  %v22492_v31 = vld [vmem:[%s24682_s12 + $0x123c] ss:$24 sps:$4 sm:$0xff]  }
 0x4eb   : > { %16981 = vmatprep.subr.bf16.mxu0 %v22465_v7  ;;  %v22495_v7 = vld [vmem:[%s24682_s12 + $0x10c4] ss:$24 sps:$4 sm:$0xff]  }
 0x4ed   : > { %15973 = vmatpush1.bf16.msra.mxu1 %v22460_v48  ;;  %v22490_v48 = vld [vmem:[%s24682_s12 + $0x1238] ss:$24 sps:$4 sm:$0xff]  }
 0x4ee   : > { %16982 = vmatpush1.bf16.msra.mxu0 %v22463_v26  ;;  %15974 = vmatprep.subr.bf16.mxu1 %v22468_v52  ;;  %v22493_v26 = vld [vmem:[%s24682_s12 + $0x10c0] ss:$24 sps:$4 sm:$0xff]   ;;  %v22498_v52 = vld [vmem:[%s24682_s12 + $0x126c] ss:$24 sps:$4 sm:$0xff]  }
 0x4ef   : > { %16983 = vmatprep.subr.bf16.mxu0 %v22471_v37  ;;  %v22501_v37 = vld [vmem:[%s24682_s12 + $0x10f4] ss:$24 sps:$4 sm:$0xff]  }
 0x4f1   : > { %15975 = vmatpush1.bf16.msra.mxu1 %v22466_v11  ;;  %v22496_v11 = vld [vmem:[%s24682_s12 + $0x1268] ss:$24 sps:$4 sm:$0xff]  }
 0x4f2   : > { %16984 = vmatpush1.bf16.msra.mxu0 %v22469_v23  ;;  %15976 = vmatprep.subr.bf16.mxu1 %v22474_v62  ;;  %v22499_v23 = vld [vmem:[%s24682_s12 + $0x10f0] ss:$24 sps:$4 sm:$0xff]   ;;  %v22504_v62 = vld [vmem:[%s24682_s12 + $0x129c] ss:$24 sps:$4 sm:$0xff]  }
 0x4f3   : > { %16985 = vmatprep.subr.bf16.mxu0 %v22477_v60  ;;  %v22507_v60 = vld [vmem:[%s24682_s12 + $0x1124] ss:$24 sps:$4 sm:$0xff]  }
 0x4f5   : > { %15977 = vmatpush1.bf16.msra.mxu1 %v22472_v47  ;;  %v22502_v47 = vld [vmem:[%s24682_s12 + $0x1298] ss:$24 sps:$4 sm:$0xff]  }
 0x4f6   : > { %16986 = vmatpush1.bf16.msra.mxu0 %v22475_v41  ;;  %15978 = vmatprep.subr.bf16.mxu1 %v22480_v43  ;;  %v22505_v41 = vld [vmem:[%s24682_s12 + $0x1120] ss:$24 sps:$4 sm:$0xff]   ;;  %v22510_v43 = vld [vmem:[%s24682_s12 + $0x12cc] ss:$24 sps:$4 sm:$0xff]  }
 0x4f7   : > { %16987 = vmatprep.subr.bf16.mxu0 %v22483_v32  ;;  %v22513_v32 = vld [vmem:[%s24682_s12 + $0x1154] ss:$24 sps:$4 sm:$0xff]  }
 0x4f9   : > { %15979 = vmatpush1.bf16.msra.mxu1 %v22478_v53  ;;  %v22508_v53 = vld [vmem:[%s24682_s12 + $0x12c8] ss:$24 sps:$4 sm:$0xff]  }
 0x4fa   : > { %16988 = vmatpush1.bf16.msra.mxu0 %v22481_v17  ;;  %15989 = vmatprep.subr.bf16.mxu1 %v22486_v59  ;;  %v22511_v17 = vld [vmem:[%s24682_s12 + $0x1150] ss:$24 sps:$4 sm:$0xff]   ;;  %v22516_v59 = vld [vmem:[%s24682_s12 + $0x12fc] ss:$24 sps:$4 sm:$0xff]  }
 0x4fb   : > { %16989 = vmatprep.subr.bf16.mxu0 %v22489_v42  ;;  %v22519_v42 = vld [vmem:[%s24682_s12 + $0x1184] ss:$24 sps:$4 sm:$0xff]  }
 0x4fc   : > { %15981 = vmatmul.mubr.bf16.vlgmr.msra.gmra.mrb[4].mxu1 %v25264_v19 }
 0x4fd   : > { %15990 = vmatpush1.bf16.msra.mxu1 %v22484_v49  ;;  %16021 = vmatprep.mubr.bf16.mxu1 %v25274_v21  ;;  %v22514_v49 = vld [vmem:[%s24682_s12 + $0x12f8] ss:$24 sps:$4 sm:$0xff]  }
 0x4fe   : > { %16990 = vmatpush1.bf16.msra.mxu0 %v22487_v38  ;;  %15991 = vmatprep.subr.bf16.mxu1 %v22492_v31  ;;  %v22517_v38 = vld [vmem:[%s24682_s12 + $0x1180] ss:$24 sps:$4 sm:$0xff]   ;;  %v22522_v31 = vld [vmem:[%s24682_s12 + $0x132c] ss:$24 sps:$4 sm:$0xff]  }
 0x4ff   : > { %16991 = vmatprep.subr.bf16.mxu0 %v22495_v7  ;;  %v22525_v7 = vld [vmem:[%s24682_s12 + $0x11b4] ss:$24 sps:$4 sm:$0xff]  }
 0x501   : > { %15992 = vmatpush1.bf16.msra.mxu1 %v22490_v48  ;;  %v22520_v48 = vld [vmem:[%s24682_s12 + $0x1328] ss:$24 sps:$4 sm:$0xff]  }
 0x502   : > { %16992 = vmatpush1.bf16.msra.mxu0 %v22493_v26  ;;  %15993 = vmatprep.subr.bf16.mxu1 %v22498_v52  ;;  %v22523_v26 = vld [vmem:[%s24682_s12 + $0x11b0] ss:$24 sps:$4 sm:$0xff]   ;;  %v22528_v52 = vld [vmem:[%s24682_s12 + $0x135c] ss:$24 sps:$4 sm:$0xff]  }
 0x503   : > { %16993 = vmatprep.subr.bf16.mxu0 %v22501_v37  ;;  %v22531_v37 = vld [vmem:[%s24682_s12 + $0x11e4] ss:$24 sps:$4 sm:$0xff]  }
 0x505   : > { %15994 = vmatpush1.bf16.msra.mxu1 %v22496_v11  ;;  %v22526_v11 = vld [vmem:[%s24682_s12 + $0x1358] ss:$24 sps:$4 sm:$0xff]  }
 0x506   : > { %16994 = vmatpush1.bf16.msra.mxu0 %v22499_v23  ;;  %15995 = vmatprep.subr.bf16.mxu1 %v22504_v62  ;;  %v22529_v23 = vld [vmem:[%s24682_s12 + $0x11e0] ss:$24 sps:$4 sm:$0xff]   ;;  %v22534_v62 = vld [vmem:[%s24682_s12 + $0x138c] ss:$24 sps:$4 sm:$0xff]  }
 0x507   : > { %16995 = vmatprep.subr.bf16.mxu0 %v22507_v60  ;;  %v22537_v60 = vld [vmem:[%s24682_s12 + $0x1214] ss:$24 sps:$4 sm:$0xff]  }
 0x509   : > { %15996 = vmatpush1.bf16.msra.mxu1 %v22502_v47  ;;  %v22532_v47 = vld [vmem:[%s24682_s12 + $0x1388] ss:$24 sps:$4 sm:$0xff]  }
 0x50a   : > { %16996 = vmatpush1.bf16.msra.mxu0 %v22505_v41  ;;  %15997 = vmatprep.subr.bf16.mxu1 %v22510_v43  ;;  %v22535_v41 = vld [vmem:[%s24682_s12 + $0x1210] ss:$24 sps:$4 sm:$0xff]   ;;  %v22540_v43 = vld [vmem:[%s24682_s12 + $0x13bc] ss:$24 sps:$4 sm:$0xff]  }
 0x50b   : > { %16997 = vmatprep.subr.bf16.mxu0 %v22513_v32  ;;  %v22543_v32 = vld [vmem:[%s24682_s12 + $0x1244] ss:$24 sps:$4 sm:$0xff]  }
 0x50d   : > { %15998 = vmatpush1.bf16.msra.mxu1 %v22508_v53  ;;  %v22538_v53 = vld [vmem:[%s24682_s12 + $0x13b8] ss:$24 sps:$4 sm:$0xff]  }
 0x50e   : > { %16998 = vmatpush1.bf16.msra.mxu0 %v22511_v17  ;;  %15999 = vmatprep.subr.bf16.mxu1 %v22516_v59  ;;  %v22541_v17 = vld [vmem:[%s24682_s12 + $0x1240] ss:$24 sps:$4 sm:$0xff]   ;;  %v22546_v59 = vld [vmem:[%s24682_s12 + $0x13ec] ss:$24 sps:$4 sm:$0xff]  }
 0x50f   : > { %16999 = vmatprep.subr.bf16.mxu0 %v22519_v42  ;;  %v22549_v42 = vld [vmem:[%s24682_s12 + $0x1274] ss:$24 sps:$4 sm:$0xff]  }
 0x511   : > { %16000 = vmatpush1.bf16.msra.mxu1 %v22514_v49  ;;  %v22544_v49 = vld [vmem:[%s24682_s12 + $0x13e8] ss:$24 sps:$4 sm:$0xff]  }
 0x512   : > { %17000 = vmatpush1.bf16.msra.mxu0 %v22517_v38  ;;  %16001 = vmatprep.subr.bf16.mxu1 %v22522_v31  ;;  %v22552_v38 = vld [vmem:[%s24682_s12 + $0x141c] ss:$24 sps:$4 sm:$0xff]  }
 0x513   : > { %17001 = vmatprep.subr.bf16.mxu0 %v22525_v7  ;;  %v22555_v31 = vld [vmem:[%s24682_s12 + $0x12a4] ss:$24 sps:$4 sm:$0xff]   ;;  %v22550_v7 = vld [vmem:[%s24682_s12 + $0x1418] ss:$24 sps:$4 sm:$0xff]  }
 0x515   : > { %16002 = vmatpush1.bf16.msra.mxu1 %v22520_v48  ;;  %v22553_v48 = vld [vmem:[%s24682_s12 + $0x12a0] ss:$24 sps:$4 sm:$0xff]  }
 0x516   : > { %17002 = vmatpush1.bf16.msra.mxu0 %v22523_v26  ;;  %16003 = vmatprep.subr.bf16.mxu1 %v22528_v52  ;;  %v22561_v26 = vld [vmem:[%s24682_s12 + $0x12d4] ss:$24 sps:$4 sm:$0xff]   ;;  %v22556_v52 = vld [vmem:[%s24682_s12 + $0x1448] ss:$24 sps:$4 sm:$0xff]  }
 0x517   : > { %17003 = vmatprep.subr.bf16.mxu0 %v22531_v37  ;;  %v22559_v37 = vld [vmem:[%s24682_s12 + $0x12d0] ss:$24 sps:$4 sm:$0xff]  }
 0x519   : > { %16004 = vmatpush1.bf16.msra.mxu1 %v22526_v11  ;;  %v22564_v11 = vld [vmem:[%s24682_s12 + $0x147c] ss:$24 sps:$4 sm:$0xff]  }
 0x51a   : > { %17004 = vmatpush1.bf16.msra.mxu0 %v22529_v23  ;;  %16005 = vmatprep.subr.bf16.mxu1 %v22534_v62  ;;  %v22567_v23 = vld [vmem:[%s24682_s12 + $0x1304] ss:$24 sps:$4 sm:$0xff]   ;;  %v22562_v62 = vld [vmem:[%s24682_s12 + $0x1478] ss:$24 sps:$4 sm:$0xff]  }
 0x51b   : > { %17014 = vmatprep.subr.bf16.mxu0 %v22537_v60  ;;  %v22565_v60 = vld [vmem:[%s24682_s12 + $0x1300] ss:$24 sps:$4 sm:$0xff]  }
 0x51d   : > { %17006 = vmatmul.mubr.bf16.vlgmr.msra.gmra.mrb[4].mxu0 %v25264_v19  ;;  %16006 = vmatpush1.bf16.msra.mxu1 %v22532_v47  ;;  %v22547_v19 = vld [vmem:[%s24682_s12 + $0x1270] ss:$24 sps:$4 sm:$0xff]   ;;  %v22570_v47 = vld [vmem:[%s24682_s12 + $0x14ac] ss:$24 sps:$4 sm:$0xff]  }
 0x51e   : > { %17015 = vmatpush1.bf16.msra.mxu0 %v22535_v41  ;;  %16007 = vmatprep.subr.bf16.mxu1 %v22540_v43  ;;  %v22573_v41 = vld [vmem:[%s24682_s12 + $0x1334] ss:$24 sps:$4 sm:$0xff]   ;;  %v22568_v43 = vld [vmem:[%s24682_s12 + $0x14a8] ss:$24 sps:$4 sm:$0xff]  }
 0x51f   : > { %17016 = vmatprep.subr.bf16.mxu0 %v22543_v32  ;;  %17046 = vmatprep.mubr.bf16.mxu0 %v25274_v21  ;;  %v22558_v21 = vld [vmem:[%s24682_s12 + $0x144c] ss:$24 sps:$4 sm:$0xff]   ;;  %v22571_v32 = vld [vmem:[%s24682_s12 + $0x1330] ss:$24 sps:$4 sm:$0xff]  }
 0x521   : > { %16008 = vmatpush1.bf16.msra.mxu1 %v22538_v53  ;;  %v22576_v53 = vld [vmem:[%s24682_s12 + $0x14dc] ss:$24 sps:$4 sm:$0xff]  }
 0x522   : > { %17017 = vmatpush1.bf16.msra.mxu0 %v22541_v17  ;;  %16009 = vmatprep.subr.bf16.mxu1 %v22546_v59  ;;  %v22579_v17 = vld [vmem:[%s24682_s12 + $0x1364] ss:$24 sps:$4 sm:$0xff]   ;;  %v22574_v59 = vld [vmem:[%s24682_s12 + $0x14d8] ss:$24 sps:$4 sm:$0xff]  }
 0x523   : > { %17018 = vmatprep.subr.bf16.mxu0 %v22549_v42  ;;  %v22577_v42 = vld [vmem:[%s24682_s12 + $0x1360] ss:$24 sps:$4 sm:$0xff]  }
 0x525   : > { %16010 = vmatpush1.bf16.msra.mxu1 %v22544_v49  ;;  %v22582_v49 = vld [vmem:[%s24682_s12 + $0x150c] ss:$24 sps:$4 sm:$0xff]  }
 0x526   : > { %17019 = vmatpush1.bf16.msra.mxu0 %v22547_v19  ;;  %16011 = vmatprep.subr.bf16.mxu1 %v22552_v38  ;;  %v22585_v19 = vld [vmem:[%s24682_s12 + $0x1394] ss:$24 sps:$4 sm:$0xff]   ;;  %v22580_v38 = vld [vmem:[%s24682_s12 + $0x1508] ss:$24 sps:$4 sm:$0xff]  }
 0x527   : > { %17020 = vmatprep.subr.bf16.mxu0 %v22555_v31  ;;  %v22583_v31 = vld [vmem:[%s24682_s12 + $0x1390] ss:$24 sps:$4 sm:$0xff]  }
 0x529   : > { %16012 = vmatpush1.bf16.msra.mxu1 %v22550_v7  ;;  %v22588_v7 = vld [vmem:[%s24682_s12 + $0x153c] ss:$24 sps:$4 sm:$0xff]  }
 0x52a   : > { %17021 = vmatpush1.bf16.msra.mxu0 %v22553_v48  ;;  %16013 = vmatprep.subr.bf16.mxu1 %v22558_v21  ;;  %v22591_v48 = vld [vmem:[%s24682_s12 + $0x13c4] ss:$24 sps:$4 sm:$0xff]   ;;  %v22586_v21 = vld [vmem:[%s24682_s12 + $0x1538] ss:$24 sps:$4 sm:$0xff]  }
 0x52b   : > { %17022 = vmatprep.subr.bf16.mxu0 %v22561_v26  ;;  %v22589_v26 = vld [vmem:[%s24682_s12 + $0x13c0] ss:$24 sps:$4 sm:$0xff]  }
 0x52d   : > { %16014 = vmatpush1.bf16.msra.mxu1 %v22556_v52  ;;  %v22594_v52 = vld [vmem:[%s24682_s12 + $0x156c] ss:$24 sps:$4 sm:$0xff]  }
 0x52e   : > { %17023 = vmatpush1.bf16.msra.mxu0 %v22559_v37  ;;  %16015 = vmatprep.subr.bf16.mxu1 %v22564_v11  ;;  %v22597_v37 = vld [vmem:[%s24682_s12 + $0x13f4] ss:$24 sps:$4 sm:$0xff]   ;;  %v22592_v11 = vld [vmem:[%s24682_s12 + $0x1568] ss:$24 sps:$4 sm:$0xff]  }
 0x52f   : > { %17024 = vmatprep.subr.bf16.mxu0 %v22567_v23  ;;  %v22595_v23 = vld [vmem:[%s24682_s12 + $0x13f0] ss:$24 sps:$4 sm:$0xff]  }
 0x531   : > { %16016 = vmatpush1.bf16.msra.mxu1 %v22562_v62  ;;  %v22600_v62 = vld [vmem:[%s24682_s12 + $0x159c] ss:$24 sps:$4 sm:$0xff]  }
 0x532   : > { %17025 = vmatpush1.bf16.msra.mxu0 %v22565_v60  ;;  %16017 = vmatprep.subr.bf16.mxu1 %v22570_v47  ;;  %v22603_v60 = vld [vmem:[%s24682_s12 + $0x1424] ss:$24 sps:$4 sm:$0xff]   ;;  %v22598_v47 = vld [vmem:[%s24682_s12 + $0x1598] ss:$24 sps:$4 sm:$0xff]  }
 0x533   : > { %17026 = vmatprep.subr.bf16.mxu0 %v22573_v41  ;;  %v22601_v41 = vld [vmem:[%s24682_s12 + $0x1420] ss:$24 sps:$4 sm:$0xff]  }
 0x535   : > { %16018 = vmatpush1.bf16.msra.mxu1 %v22568_v43  ;;  %v22606_v43 = vld [vmem:[%s24682_s12 + $0x15cc] ss:$24 sps:$4 sm:$0xff]  }
 0x536   : > { %17027 = vmatpush1.bf16.msra.mxu0 %v22571_v32  ;;  %16019 = vmatprep.subr.bf16.mxu1 %v22576_v53  ;;  %v22609_v32 = vld [vmem:[%s24682_s12 + $0x1454] ss:$24 sps:$4 sm:$0xff]   ;;  %v22604_v53 = vld [vmem:[%s24682_s12 + $0x15c8] ss:$24 sps:$4 sm:$0xff]  }
 0x537   : > { %17028 = vmatprep.subr.bf16.mxu0 %v22579_v17  ;;  %v22607_v17 = vld [vmem:[%s24682_s12 + $0x1450] ss:$24 sps:$4 sm:$0xff]  }
 0x539   : > { %16020 = vmatpush1.bf16.msra.mxu1 %v22574_v59  ;;  %v22612_v59 = vld [vmem:[%s24682_s12 + $0x15fc] ss:$24 sps:$4 sm:$0xff]  }
 0x53a   : > { %17029 = vmatpush1.bf16.msra.mxu0 %v22577_v42  ;;  %16030 = vmatprep.subr.bf16.mxu1 %v22582_v49  ;;  %v22615_v42 = vld [vmem:[%s24682_s12 + $0x1484] ss:$24 sps:$4 sm:$0xff]   ;;  %v22610_v49 = vld [vmem:[%s24682_s12 + $0x15f8] ss:$24 sps:$4 sm:$0xff]  }
 0x53b   : > { %17030 = vmatprep.subr.bf16.mxu0 %v22585_v19  ;;  %v22613_v19 = vld [vmem:[%s24682_s12 + $0x1480] ss:$24 sps:$4 sm:$0xff]  }
 0x53c   : > { %16022 = vmatmul.mubr.bf16.vlgmr.msra.gmra.mrb[4].mxu1 %v25358_v10 }
 0x53d   : > { %16031 = vmatpush1.bf16.msra.mxu1 %v22580_v38  ;;  %16062 = vmatprep.mubr.bf16.mxu1 %v25368_v33  ;;  %v22618_v38 = vld [vmem:[%s24682_s12 + $0x162c] ss:$24 sps:$4 sm:$0xff]  }
 0x53e   : > { %17031 = vmatpush1.bf16.msra.mxu0 %v22583_v31  ;;  %16032 = vmatprep.subr.bf16.mxu1 %v22588_v7  ;;  %v22621_v31 = vld [vmem:[%s24682_s12 + $0x14b4] ss:$24 sps:$4 sm:$0xff]   ;;  %v22616_v7 = vld [vmem:[%s24682_s12 + $0x1628] ss:$24 sps:$4 sm:$0xff]  }
 0x53f   : > { %17032 = vmatprep.subr.bf16.mxu0 %v22591_v48  ;;  %v22619_v48 = vld [vmem:[%s24682_s12 + $0x14b0] ss:$24 sps:$4 sm:$0xff]  }
 0x541   : > { %16033 = vmatpush1.bf16.msra.mxu1 %v22586_v21  ;;  %v22624_v21 = vld [vmem:[%s24682_s12 + $0x165c] ss:$24 sps:$4 sm:$0xff]  }
 0x542   : > { %17033 = vmatpush1.bf16.msra.mxu0 %v22589_v26  ;;  %16034 = vmatprep.subr.bf16.mxu1 %v22594_v52  ;;  %v22627_v26 = vld [vmem:[%s24682_s12 + $0x14e4] ss:$24 sps:$4 sm:$0xff]   ;;  %v22622_v52 = vld [vmem:[%s24682_s12 + $0x1658] ss:$24 sps:$4 sm:$0xff]  }
 0x543   : > { %17034 = vmatprep.subr.bf16.mxu0 %v22597_v37  ;;  %v22625_v37 = vld [vmem:[%s24682_s12 + $0x14e0] ss:$24 sps:$4 sm:$0xff]  }
 0x545   : > { %16035 = vmatpush1.bf16.msra.mxu1 %v22592_v11  ;;  %v22630_v11 = vld [vmem:[%s24682_s12 + $0x168c] ss:$24 sps:$4 sm:$0xff]  }
 0x546   : > { %17035 = vmatpush1.bf16.msra.mxu0 %v22595_v23  ;;  %16036 = vmatprep.subr.bf16.mxu1 %v22600_v62  ;;  %v22633_v23 = vld [vmem:[%s24682_s12 + $0x1514] ss:$24 sps:$4 sm:$0xff]   ;;  %v22628_v62 = vld [vmem:[%s24682_s12 + $0x1688] ss:$24 sps:$4 sm:$0xff]  }
 0x547   : > { %17036 = vmatprep.subr.bf16.mxu0 %v22603_v60  ;;  %v22631_v60 = vld [vmem:[%s24682_s12 + $0x1510] ss:$24 sps:$4 sm:$0xff]  }
 0x549   : > { %16037 = vmatpush1.bf16.msra.mxu1 %v22598_v47  ;;  %v22636_v47 = vld [vmem:[%s24682_s12 + $0x16bc] ss:$24 sps:$4 sm:$0xff]  }
 0x54a   : > { %17037 = vmatpush1.bf16.msra.mxu0 %v22601_v41  ;;  %16038 = vmatprep.subr.bf16.mxu1 %v22606_v43  ;;  %v22639_v41 = vld [vmem:[%s24682_s12 + $0x1544] ss:$24 sps:$4 sm:$0xff]   ;;  %v22634_v43 = vld [vmem:[%s24682_s12 + $0x16b8] ss:$24 sps:$4 sm:$0xff]  }
 0x54b   : > { %17038 = vmatprep.subr.bf16.mxu0 %v22609_v32  ;;  %v22637_v32 = vld [vmem:[%s24682_s12 + $0x1540] ss:$24 sps:$4 sm:$0xff]  }
 0x54d   : > { %16039 = vmatpush1.bf16.msra.mxu1 %v22604_v53  ;;  %v22642_v53 = vld [vmem:[%s24682_s12 + $0x16ec] ss:$24 sps:$4 sm:$0xff]  }
 0x54e   : > { %17039 = vmatpush1.bf16.msra.mxu0 %v22607_v17  ;;  %16040 = vmatprep.subr.bf16.mxu1 %v22612_v59  ;;  %v22645_v17 = vld [vmem:[%s24682_s12 + $0x1574] ss:$24 sps:$4 sm:$0xff]   ;;  %v22640_v59 = vld [vmem:[%s24682_s12 + $0x16e8] ss:$24 sps:$4 sm:$0xff]  }
 0x54f   : > { %17040 = vmatprep.subr.bf16.mxu0 %v22615_v42  ;;  %v22648_v42 = vld [vmem:[%s24682_s12 + $0x171c] ss:$24 sps:$4 sm:$0xff]  }
 0x551   : > { %16041 = vmatpush1.bf16.msra.mxu1 %v22610_v49  ;;  %v22651_v49 = vld [vmem:[%s24682_s12 + $0x15a4] ss:$24 sps:$4 sm:$0xff]  }
 0x552   : > { %17041 = vmatpush1.bf16.msra.mxu0 %v22613_v19  ;;  %16042 = vmatprep.subr.bf16.mxu1 %v22618_v38  ;;  %v22646_v19 = vld [vmem:[%s24682_s12 + $0x1718] ss:$24 sps:$4 sm:$0xff]  }
 0x553   : > { %17042 = vmatprep.subr.bf16.mxu0 %v22621_v31  ;;  %v22649_v38 = vld [vmem:[%s24682_s12 + $0x15a0] ss:$24 sps:$4 sm:$0xff]   ;;  %v22657_v31 = vld [vmem:[%s24682_s12 + $0x15d4] ss:$24 sps:$4 sm:$0xff]  }
 0x555   : > { %16043 = vmatpush1.bf16.msra.mxu1 %v22616_v7  ;;  %v22652_v7 = vld [vmem:[%s24682_s12 + $0x1748] ss:$24 sps:$4 sm:$0xff]  }
 0x556   : > { %17043 = vmatpush1.bf16.msra.mxu0 %v22619_v48  ;;  %16044 = vmatprep.subr.bf16.mxu1 %v22624_v21  ;;  %v22655_v48 = vld [vmem:[%s24682_s12 + $0x15d0] ss:$24 sps:$4 sm:$0xff]   ;;  %v22660_v21 = vld [vmem:[%s24682_s12 + $0x177c] ss:$24 sps:$4 sm:$0xff]  }
 0x557   : > { %17044 = vmatprep.subr.bf16.mxu0 %v22627_v26  ;;  %v22663_v26 = vld [vmem:[%s24682_s12 + $0x1604] ss:$24 sps:$4 sm:$0xff]  }
 0x559   : > { %16045 = vmatpush1.bf16.msra.mxu1 %v22622_v52  ;;  %v22658_v52 = vld [vmem:[%s24682_s12 + $0x1778] ss:$24 sps:$4 sm:$0xff]  }
 0x55a   : > { %17045 = vmatpush1.bf16.msra.mxu0 %v22625_v37  ;;  %16046 = vmatprep.subr.bf16.mxu1 %v22630_v11  ;;  %v22661_v37 = vld [vmem:[%s24682_s12 + $0x1600] ss:$24 sps:$4 sm:$0xff]   ;;  %v22666_v11 = vld [vmem:[%s24682_s12 + $0x17ac] ss:$24 sps:$4 sm:$0xff]  }
 0x55b   : > { %17055 = vmatprep.subr.bf16.mxu0 %v22633_v23  ;;  %v22669_v23 = vld [vmem:[%s24682_s12 + $0x1634] ss:$24 sps:$4 sm:$0xff]  }
 0x55d   : > { %17047 = vmatmul.mubr.bf16.vlgmr.msra.gmra.mrb[4].mxu0 %v25358_v10  ;;  %16047 = vmatpush1.bf16.msra.mxu1 %v22628_v62  ;;  %v22643_v10 = vld [vmem:[%s24682_s12 + $0x1570] ss:$24 sps:$4 sm:$0xff]  }
 0x55e   : > { %17056 = vmatpush1.bf16.msra.mxu0 %v22631_v60  ;;  %16048 = vmatprep.subr.bf16.mxu1 %v22636_v47  ;;  %v22664_v62 = vld [vmem:[%s24682_s12 + $0x17a8] ss:$24 sps:$4 sm:$0xff]   ;;  %v22672_v47 = vld [vmem:[%s24682_s12 + $0x17dc] ss:$24 sps:$4 sm:$0xff]  }
 0x55f   : > { %17057 = vmatprep.subr.bf16.mxu0 %v22639_v41  ;;  %17087 = vmatprep.mubr.bf16.mxu0 %v25368_v33  ;;  %v22654_v33 = vld [vmem:[%s24682_s12 + $0x174c] ss:$24 sps:$4 sm:$0xff]   ;;  %v22667_v60 = vld [vmem:[%s24682_s12 + $0x1630] ss:$24 sps:$4 sm:$0xff]  }
 0x560   : > { %v22675_v41 = vld [vmem:[%s24682_s12 + $0x1664] ss:$24 sps:$4 sm:$0xff]  }
 0x561   : > { %16049 = vmatpush1.bf16.msra.mxu1 %v22634_v43  ;;  %v22670_v43 = vld [vmem:[%s24682_s12 + $0x17d8] ss:$24 sps:$4 sm:$0xff]  }
 0x562   : > { %17058 = vmatpush1.bf16.msra.mxu0 %v22637_v32  ;;  %16050 = vmatprep.subr.bf16.mxu1 %v22642_v53  ;;  %v22673_v32 = vld [vmem:[%s24682_s12 + $0x1660] ss:$24 sps:$4 sm:$0xff]   ;;  %v22678_v53 = vld [vmem:[%s24682_s12 + $0x180c] ss:$24 sps:$4 sm:$0xff]  }
 0x563   : > { %17059 = vmatprep.subr.bf16.mxu0 %v22645_v17  ;;  %v22681_v17 = vld [vmem:[%s24682_s12 + $0x1694] ss:$24 sps:$4 sm:$0xff]  }
 0x565   : > { %16051 = vmatpush1.bf16.msra.mxu1 %v22640_v59  ;;  %v22676_v59 = vld [vmem:[%s24682_s12 + $0x1808] ss:$24 sps:$4 sm:$0xff]  }
 0x566   : > { %17060 = vmatpush1.bf16.msra.mxu0 %v22643_v10  ;;  %16052 = vmatprep.subr.bf16.mxu1 %v22648_v42  ;;  %v22679_v10 = vld [vmem:[%s24682_s12 + $0x1690] ss:$24 sps:$4 sm:$0xff]   ;;  %v22684_v42 = vld [vmem:[%s24682_s12 + $0x183c] ss:$24 sps:$4 sm:$0xff]  }
 0x567   : > { %17061 = vmatprep.subr.bf16.mxu0 %v22651_v49  ;;  %v22687_v49 = vld [vmem:[%s24682_s12 + $0x16c4] ss:$24 sps:$4 sm:$0xff]  }
 0x569   : > { %16053 = vmatpush1.bf16.msra.mxu1 %v22646_v19  ;;  %v22682_v19 = vld [vmem:[%s24682_s12 + $0x1838] ss:$24 sps:$4 sm:$0xff]  }
 0x56a   : > { %17062 = vmatpush1.bf16.msra.mxu0 %v22649_v38  ;;  %16054 = vmatprep.subr.bf16.mxu1 %v22654_v33  ;;  %v22685_v38 = vld [vmem:[%s24682_s12 + $0x16c0] ss:$24 sps:$4 sm:$0xff]   ;;  %v22690_v33 = vld [vmem:[%s24682_s12 + $0x186c] ss:$24 sps:$4 sm:$0xff]  }
 0x56b   : > { %17063 = vmatprep.subr.bf16.mxu0 %v22657_v31  ;;  %v22693_v31 = vld [vmem:[%s24682_s12 + $0x16f4] ss:$24 sps:$4 sm:$0xff]  }
 0x56d   : > { %16055 = vmatpush1.bf16.msra.mxu1 %v22652_v7  ;;  %v22688_v7 = vld [vmem:[%s24682_s12 + $0x1868] ss:$24 sps:$4 sm:$0xff]  }
 0x56e   : > { %17064 = vmatpush1.bf16.msra.mxu0 %v22655_v48  ;;  %16056 = vmatprep.subr.bf16.mxu1 %v22660_v21  ;;  %v22691_v48 = vld [vmem:[%s24682_s12 + $0x16f0] ss:$24 sps:$4 sm:$0xff]   ;;  %v22696_v21 = vld [vmem:[%s24682_s12 + $0x189c] ss:$24 sps:$4 sm:$0xff]  }
 0x56f   : > { %17065 = vmatprep.subr.bf16.mxu0 %v22663_v26  ;;  %v22699_v26 = vld [vmem:[%s24682_s12 + $0x1724] ss:$24 sps:$4 sm:$0xff]  }
 0x571   : > { %16057 = vmatpush1.bf16.msra.mxu1 %v22658_v52  ;;  %v22694_v52 = vld [vmem:[%s24682_s12 + $0x1898] ss:$24 sps:$4 sm:$0xff]  }
 0x572   : > { %17066 = vmatpush1.bf16.msra.mxu0 %v22661_v37  ;;  %16058 = vmatprep.subr.bf16.mxu1 %v22666_v11  ;;  %v22697_v37 = vld [vmem:[%s24682_s12 + $0x1720] ss:$24 sps:$4 sm:$0xff]   ;;  %v22702_v11 = vld [vmem:[%s24682_s12 + $0x18cc] ss:$24 sps:$4 sm:$0xff]  }
 0x573   : > { %17067 = vmatprep.subr.bf16.mxu0 %v22669_v23  ;;  %v22705_v23 = vld [vmem:[%s24682_s12 + $0x1754] ss:$24 sps:$4 sm:$0xff]  }
 0x575   : > { %16059 = vmatpush1.bf16.msra.mxu1 %v22664_v62  ;;  %v22700_v62 = vld [vmem:[%s24682_s12 + $0x18c8] ss:$24 sps:$4 sm:$0xff]  }
 0x576   : > { %17068 = vmatpush1.bf16.msra.mxu0 %v22667_v60  ;;  %16060 = vmatprep.subr.bf16.mxu1 %v22672_v47  ;;  %v22703_v60 = vld [vmem:[%s24682_s12 + $0x1750] ss:$24 sps:$4 sm:$0xff]   ;;  %v22708_v47 = vld [vmem:[%s24682_s12 + $0x18fc] ss:$24 sps:$4 sm:$0xff]  }
 0x577   : > { %17069 = vmatprep.subr.bf16.mxu0 %v22675_v41  ;;  %v22711_v41 = vld [vmem:[%s24682_s12 + $0x1784] ss:$24 sps:$4 sm:$0xff]  }
 0x579   : > { %16061 = vmatpush1.bf16.msra.mxu1 %v22670_v43  ;;  %v22706_v43 = vld [vmem:[%s24682_s12 + $0x18f8] ss:$24 sps:$4 sm:$0xff]  }
 0x57a   : > { %17070 = vmatpush1.bf16.msra.mxu0 %v22673_v32  ;;  %16071 = vmatprep.subr.bf16.mxu1 %v22678_v53  ;;  %v22709_v32 = vld [vmem:[%s24682_s12 + $0x1780] ss:$24 sps:$4 sm:$0xff]   ;;  %v22714_v53 = vld [vmem:[%s24682_s12 + $0x192c] ss:$24 sps:$4 sm:$0xff]  }
 0x57b   : > { %17071 = vmatprep.subr.bf16.mxu0 %v22681_v17  ;;  %v22717_v17 = vld [vmem:[%s24682_s12 + $0x17b4] ss:$24 sps:$4 sm:$0xff]  }
 0x57c   : > { %16063 = vmatmul.mubr.bf16.vlgmr.msra.gmra.mrb[4].mxu1 %v25456_v16 }
 0x57d   : > { %16072 = vmatpush1.bf16.msra.mxu1 %v22676_v59  ;;  %16103 = vmatprep.mubr.bf16.mxu1 %v25466_v57  ;;  %v22712_v59 = vld [vmem:[%s24682_s12 + $0x1928] ss:$24 sps:$4 sm:$0xff]  }
 0x57e   : > { %17072 = vmatpush1.bf16.msra.mxu0 %v22679_v10  ;;  %16073 = vmatprep.subr.bf16.mxu1 %v22684_v42  ;;  %v22715_v10 = vld [vmem:[%s24682_s12 + $0x17b0] ss:$24 sps:$4 sm:$0xff]   ;;  %v22720_v42 = vld [vmem:[%s24682_s12 + $0x195c] ss:$24 sps:$4 sm:$0xff]  }
 0x57f   : > { %17073 = vmatprep.subr.bf16.mxu0 %v22687_v49  ;;  %v22723_v49 = vld [vmem:[%s24682_s12 + $0x17e4] ss:$24 sps:$4 sm:$0xff]  }
 0x581   : > { %16074 = vmatpush1.bf16.msra.mxu1 %v22682_v19  ;;  %v22718_v19 = vld [vmem:[%s24682_s12 + $0x1958] ss:$24 sps:$4 sm:$0xff]  }
 0x582   : > { %17074 = vmatpush1.bf16.msra.mxu0 %v22685_v38  ;;  %16075 = vmatprep.subr.bf16.mxu1 %v22690_v33  ;;  %v22721_v38 = vld [vmem:[%s24682_s12 + $0x17e0] ss:$24 sps:$4 sm:$0xff]   ;;  %v22726_v33 = vld [vmem:[%s24682_s12 + $0x198c] ss:$24 sps:$4 sm:$0xff]  }
 0x583   : > { %17075 = vmatprep.subr.bf16.mxu0 %v22693_v31  ;;  %v22729_v31 = vld [vmem:[%s24682_s12 + $0x1814] ss:$24 sps:$4 sm:$0xff]  }
 0x585   : > { %16076 = vmatpush1.bf16.msra.mxu1 %v22688_v7  ;;  %v22724_v7 = vld [vmem:[%s24682_s12 + $0x1988] ss:$24 sps:$4 sm:$0xff]  }
 0x586   : > { %17076 = vmatpush1.bf16.msra.mxu0 %v22691_v48  ;;  %16077 = vmatprep.subr.bf16.mxu1 %v22696_v21  ;;  %v22727_v48 = vld [vmem:[%s24682_s12 + $0x1810] ss:$24 sps:$4 sm:$0xff]   ;;  %v22732_v21 = vld [vmem:[%s24682_s12 + $0x19bc] ss:$24 sps:$4 sm:$0xff]  }
 0x587   : > { %17077 = vmatprep.subr.bf16.mxu0 %v22699_v26  ;;  %v22735_v26 = vld [vmem:[%s24682_s12 + $0x1844] ss:$24 sps:$4 sm:$0xff]  }
 0x589   : > { %16078 = vmatpush1.bf16.msra.mxu1 %v22694_v52  ;;  %v22730_v52 = vld [vmem:[%s24682_s12 + $0x19b8] ss:$24 sps:$4 sm:$0xff]  }
 0x58a   : > { %17078 = vmatpush1.bf16.msra.mxu0 %v22697_v37  ;;  %16079 = vmatprep.subr.bf16.mxu1 %v22702_v11  ;;  %v22733_v37 = vld [vmem:[%s24682_s12 + $0x1840] ss:$24 sps:$4 sm:$0xff]   ;;  %v22738_v11 = vld [vmem:[%s24682_s12 + $0x19ec] ss:$24 sps:$4 sm:$0xff]  }
 0x58b   : > { %17079 = vmatprep.subr.bf16.mxu0 %v22705_v23  ;;  %v22741_v23 = vld [vmem:[%s24682_s12 + $0x1874] ss:$24 sps:$4 sm:$0xff]  }
 0x58d   : > { %16080 = vmatpush1.bf16.msra.mxu1 %v22700_v62  ;;  %v22736_v62 = vld [vmem:[%s24682_s12 + $0x19e8] ss:$24 sps:$4 sm:$0xff]  }
 0x58e   : > { %17080 = vmatpush1.bf16.msra.mxu0 %v22703_v60  ;;  %16081 = vmatprep.subr.bf16.mxu1 %v22708_v47  ;;  %v22744_v60 = vld [vmem:[%s24682_s12 + $0x1a1c] ss:$24 sps:$4 sm:$0xff]  }
 0x58f   : > { %17081 = vmatprep.subr.bf16.mxu0 %v22711_v41  ;;  %v22747_v47 = vld [vmem:[%s24682_s12 + $0x18a4] ss:$24 sps:$4 sm:$0xff]   ;;  %v22742_v41 = vld [vmem:[%s24682_s12 + $0x1a18] ss:$24 sps:$4 sm:$0xff]  }
 0x591   : > { %16082 = vmatpush1.bf16.msra.mxu1 %v22706_v43  ;;  %v22745_v43 = vld [vmem:[%s24682_s12 + $0x18a0] ss:$24 sps:$4 sm:$0xff]  }
 0x592   : > { %17082 = vmatpush1.bf16.msra.mxu0 %v22709_v32  ;;  %16083 = vmatprep.subr.bf16.mxu1 %v22714_v53  ;;  %v22753_v32 = vld [vmem:[%s24682_s12 + $0x18d4] ss:$24 sps:$4 sm:$0xff]   ;;  %v22748_v53 = vld [vmem:[%s24682_s12 + $0x1a48] ss:$24 sps:$4 sm:$0xff]  }
 0x593   : > { %17083 = vmatprep.subr.bf16.mxu0 %v22717_v17  ;;  %v22751_v17 = vld [vmem:[%s24682_s12 + $0x18d0] ss:$24 sps:$4 sm:$0xff]  }
 0x595   : > { %16084 = vmatpush1.bf16.msra.mxu1 %v22712_v59  ;;  %v22756_v59 = vld [vmem:[%s24682_s12 + $0x1a7c] ss:$24 sps:$4 sm:$0xff]  }
 0x596   : > { %17084 = vmatpush1.bf16.msra.mxu0 %v22715_v10  ;;  %16085 = vmatprep.subr.bf16.mxu1 %v22720_v42  ;;  %v22759_v10 = vld [vmem:[%s24682_s12 + $0x1904] ss:$24 sps:$4 sm:$0xff]   ;;  %v22754_v42 = vld [vmem:[%s24682_s12 + $0x1a78] ss:$24 sps:$4 sm:$0xff]  }
 0x597   : > { %17085 = vmatprep.subr.bf16.mxu0 %v22723_v49  ;;  %v22757_v49 = vld [vmem:[%s24682_s12 + $0x1900] ss:$24 sps:$4 sm:$0xff]  }
 0x599   : > { %16086 = vmatpush1.bf16.msra.mxu1 %v22718_v19  ;;  %v22762_v19 = vld [vmem:[%s24682_s12 + $0x1aac] ss:$24 sps:$4 sm:$0xff]  }
 0x59a   : > { %17086 = vmatpush1.bf16.msra.mxu0 %v22721_v38  ;;  %16087 = vmatprep.subr.bf16.mxu1 %v22726_v33  ;;  %v22765_v38 = vld [vmem:[%s24682_s12 + $0x1934] ss:$24 sps:$4 sm:$0xff]   ;;  %v22760_v33 = vld [vmem:[%s24682_s12 + $0x1aa8] ss:$24 sps:$4 sm:$0xff]  }
 0x59b   : > { %17096 = vmatprep.subr.bf16.mxu0 %v22729_v31  ;;  %v22763_v31 = vld [vmem:[%s24682_s12 + $0x1930] ss:$24 sps:$4 sm:$0xff]  }
 0x59d   : > { %17088 = vmatmul.mubr.bf16.vlgmr.msra.gmra.mrb[4].mxu0 %v25456_v16  ;;  %16088 = vmatpush1.bf16.msra.mxu1 %v22724_v7  ;;  %v22739_v16 = vld [vmem:[%s24682_s12 + $0x1870] ss:$24 sps:$4 sm:$0xff]   ;;  %v22768_v7 = vld [vmem:[%s24682_s12 + $0x1adc] ss:$24 sps:$4 sm:$0xff]  }
 0x59e   : > { %17097 = vmatpush1.bf16.msra.mxu0 %v22727_v48  ;;  %16089 = vmatprep.subr.bf16.mxu1 %v22732_v21  ;;  %v22771_v48 = vld [vmem:[%s24682_s12 + $0x1964] ss:$24 sps:$4 sm:$0xff]   ;;  %v22766_v21 = vld [vmem:[%s24682_s12 + $0x1ad8] ss:$24 sps:$4 sm:$0xff]  }
 0x59f   : > { %17098 = vmatprep.subr.bf16.mxu0 %v22735_v26  ;;  %17128 = vmatprep.mubr.bf16.mxu0 %v25466_v57  ;;  %v22750_v57 = vld [vmem:[%s24682_s12 + $0x1a4c] ss:$24 sps:$4 sm:$0xff]   ;;  %v22769_v26 = vld [vmem:[%s24682_s12 + $0x1960] ss:$24 sps:$4 sm:$0xff]  }
 0x5a1   : > { %16090 = vmatpush1.bf16.msra.mxu1 %v22730_v52  ;;  %v22774_v52 = vld [vmem:[%s24682_s12 + $0x1b0c] ss:$24 sps:$4 sm:$0xff]  }
 0x5a2   : > { %17099 = vmatpush1.bf16.msra.mxu0 %v22733_v37  ;;  %16091 = vmatprep.subr.bf16.mxu1 %v22738_v11  ;;  %v22777_v37 = vld [vmem:[%s24682_s12 + $0x1994] ss:$24 sps:$4 sm:$0xff]   ;;  %v22772_v11 = vld [vmem:[%s24682_s12 + $0x1b08] ss:$24 sps:$4 sm:$0xff]  }
 0x5a3   : > { %17100 = vmatprep.subr.bf16.mxu0 %v22741_v23  ;;  %v22775_v23 = vld [vmem:[%s24682_s12 + $0x1990] ss:$24 sps:$4 sm:$0xff]  }
 0x5a5   : > { %16092 = vmatpush1.bf16.msra.mxu1 %v22736_v62  ;;  %v22780_v62 = vld [vmem:[%s24682_s12 + $0x1b3c] ss:$24 sps:$4 sm:$0xff]  }
 0x5a6   : > { %17101 = vmatpush1.bf16.msra.mxu0 %v22739_v16  ;;  %16093 = vmatprep.subr.bf16.mxu1 %v22744_v60  ;;  %v22783_v16 = vld [vmem:[%s24682_s12 + $0x19c4] ss:$24 sps:$4 sm:$0xff]   ;;  %v22778_v60 = vld [vmem:[%s24682_s12 + $0x1b38] ss:$24 sps:$4 sm:$0xff]  }
 0x5a7   : > { %17102 = vmatprep.subr.bf16.mxu0 %v22747_v47  ;;  %v22781_v47 = vld [vmem:[%s24682_s12 + $0x19c0] ss:$24 sps:$4 sm:$0xff]  }
 0x5a9   : > { %16094 = vmatpush1.bf16.msra.mxu1 %v22742_v41  ;;  %v22786_v41 = vld [vmem:[%s24682_s12 + $0x1b6c] ss:$24 sps:$4 sm:$0xff]  }
 0x5aa   : > { %17103 = vmatpush1.bf16.msra.mxu0 %v22745_v43  ;;  %16095 = vmatprep.subr.bf16.mxu1 %v22750_v57  ;;  %v22789_v43 = vld [vmem:[%s24682_s12 + $0x19f4] ss:$24 sps:$4 sm:$0xff]   ;;  %v22784_v57 = vld [vmem:[%s24682_s12 + $0x1b68] ss:$24 sps:$4 sm:$0xff]  }
 0x5ab   : > { %17104 = vmatprep.subr.bf16.mxu0 %v22753_v32  ;;  %v22787_v32 = vld [vmem:[%s24682_s12 + $0x19f0] ss:$24 sps:$4 sm:$0xff]  }
 0x5ad   : > { %16096 = vmatpush1.bf16.msra.mxu1 %v22748_v53  ;;  %v22792_v53 = vld [vmem:[%s24682_s12 + $0x1b9c] ss:$24 sps:$4 sm:$0xff]  }
 0x5ae   : > { %17105 = vmatpush1.bf16.msra.mxu0 %v22751_v17  ;;  %16097 = vmatprep.subr.bf16.mxu1 %v22756_v59  ;;  %v22795_v17 = vld [vmem:[%s24682_s12 + $0x1a24] ss:$24 sps:$4 sm:$0xff]   ;;  %v22790_v59 = vld [vmem:[%s24682_s12 + $0x1b98] ss:$24 sps:$4 sm:$0xff]  }
 0x5af   : > { %17106 = vmatprep.subr.bf16.mxu0 %v22759_v10  ;;  %v22793_v10 = vld [vmem:[%s24682_s12 + $0x1a20] ss:$24 sps:$4 sm:$0xff]  }
 0x5b1   : > { %16098 = vmatpush1.bf16.msra.mxu1 %v22754_v42  ;;  %v22798_v42 = vld [vmem:[%s24682_s12 + $0x1bcc] ss:$24 sps:$4 sm:$0xff]  }
 0x5b2   : > { %17107 = vmatpush1.bf16.msra.mxu0 %v22757_v49  ;;  %16099 = vmatprep.subr.bf16.mxu1 %v22762_v19  ;;  %v22801_v49 = vld [vmem:[%s24682_s12 + $0x1a54] ss:$24 sps:$4 sm:$0xff]   ;;  %v22796_v19 = vld [vmem:[%s24682_s12 + $0x1bc8] ss:$24 sps:$4 sm:$0xff]  }
 0x5b3   : > { %17108 = vmatprep.subr.bf16.mxu0 %v22765_v38  ;;  %v22799_v38 = vld [vmem:[%s24682_s12 + $0x1a50] ss:$24 sps:$4 sm:$0xff]  }
 0x5b5   : > { %16100 = vmatpush1.bf16.msra.mxu1 %v22760_v33  ;;  %v22804_v33 = vld [vmem:[%s24682_s12 + $0x1bfc] ss:$24 sps:$4 sm:$0xff]  }
 0x5b6   : > { %17109 = vmatpush1.bf16.msra.mxu0 %v22763_v31  ;;  %16101 = vmatprep.subr.bf16.mxu1 %v22768_v7  ;;  %v22807_v31 = vld [vmem:[%s24682_s12 + $0x1a84] ss:$24 sps:$4 sm:$0xff]   ;;  %v22802_v7 = vld [vmem:[%s24682_s12 + $0x1bf8] ss:$24 sps:$4 sm:$0xff]  }
 0x5b7   : > { %17110 = vmatprep.subr.bf16.mxu0 %v22771_v48  ;;  %v22805_v48 = vld [vmem:[%s24682_s12 + $0x1a80] ss:$24 sps:$4 sm:$0xff]  }
 0x5b9   : > { %16102 = vmatpush1.bf16.msra.mxu1 %v22766_v21  ;;  %v22810_v21 = vld [vmem:[%s24682_s12 + $0x1c2c] ss:$24 sps:$4 sm:$0xff]  }
 0x5ba   : > { %17111 = vmatpush1.bf16.msra.mxu0 %v22769_v26  ;;  %16112 = vmatprep.subr.bf16.mxu1 %v22774_v52  ;;  %v22813_v26 = vld [vmem:[%s24682_s12 + $0x1ab4] ss:$24 sps:$4 sm:$0xff]   ;;  %v22808_v52 = vld [vmem:[%s24682_s12 + $0x1c28] ss:$24 sps:$4 sm:$0xff]  }
 0x5bb   : > { %17112 = vmatprep.subr.bf16.mxu0 %v22777_v37  ;;  %v22811_v37 = vld [vmem:[%s24682_s12 + $0x1ab0] ss:$24 sps:$4 sm:$0xff]  }
 0x5bc   : > { %16104 = vmatmul.mubr.bf16.vlgmr.msra.gmra.mrb[4].mxu1 %v25550_v35 }
 0x5bd   : > { %16113 = vmatpush1.bf16.msra.mxu1 %v22772_v11  ;;  %16144 = vmatprep.mubr.bf16.mxu1 %v25560_v51  ;;  %v22816_v11 = vld [vmem:[%s24682_s12 + $0x1c5c] ss:$24 sps:$4 sm:$0xff]  }
 0x5be   : > { %17113 = vmatpush1.bf16.msra.mxu0 %v22775_v23  ;;  %16114 = vmatprep.subr.bf16.mxu1 %v22780_v62  ;;  %v22819_v23 = vld [vmem:[%s24682_s12 + $0x1ae4] ss:$24 sps:$4 sm:$0xff]   ;;  %v22814_v62 = vld [vmem:[%s24682_s12 + $0x1c58] ss:$24 sps:$4 sm:$0xff]  }
 0x5bf   : > { %17114 = vmatprep.subr.bf16.mxu0 %v22783_v16  ;;  %v22817_v16 = vld [vmem:[%s24682_s12 + $0x1ae0] ss:$24 sps:$4 sm:$0xff]  }
 0x5c1   : > { %16115 = vmatpush1.bf16.msra.mxu1 %v22778_v60  ;;  %v22822_v60 = vld [vmem:[%s24682_s12 + $0x1c8c] ss:$24 sps:$4 sm:$0xff]  }
 0x5c2   : > { %17115 = vmatpush1.bf16.msra.mxu0 %v22781_v47  ;;  %16116 = vmatprep.subr.bf16.mxu1 %v22786_v41  ;;  %v22825_v47 = vld [vmem:[%s24682_s12 + $0x1b14] ss:$24 sps:$4 sm:$0xff]   ;;  %v22820_v41 = vld [vmem:[%s24682_s12 + $0x1c88] ss:$24 sps:$4 sm:$0xff]  }
 0x5c3   : > { %17116 = vmatprep.subr.bf16.mxu0 %v22789_v43  ;;  %v22823_v43 = vld [vmem:[%s24682_s12 + $0x1b10] ss:$24 sps:$4 sm:$0xff]  }
 0x5c5   : > { %16117 = vmatpush1.bf16.msra.mxu1 %v22784_v57  ;;  %v22828_v57 = vld [vmem:[%s24682_s12 + $0x1cbc] ss:$24 sps:$4 sm:$0xff]  }
 0x5c6   : > { %17117 = vmatpush1.bf16.msra.mxu0 %v22787_v32  ;;  %16118 = vmatprep.subr.bf16.mxu1 %v22792_v53  ;;  %v22831_v32 = vld [vmem:[%s24682_s12 + $0x1b44] ss:$24 sps:$4 sm:$0xff]   ;;  %v22826_v53 = vld [vmem:[%s24682_s12 + $0x1cb8] ss:$24 sps:$4 sm:$0xff]  }
 0x5c7   : > { %17118 = vmatprep.subr.bf16.mxu0 %v22795_v17  ;;  %v22829_v17 = vld [vmem:[%s24682_s12 + $0x1b40] ss:$24 sps:$4 sm:$0xff]  }
 0x5c9   : > { %16119 = vmatpush1.bf16.msra.mxu1 %v22790_v59  ;;  %v22834_v59 = vld [vmem:[%s24682_s12 + $0x1cec] ss:$24 sps:$4 sm:$0xff]  }
 0x5ca   : > { %17119 = vmatpush1.bf16.msra.mxu0 %v22793_v10  ;;  %16120 = vmatprep.subr.bf16.mxu1 %v22798_v42  ;;  %v22837_v10 = vld [vmem:[%s24682_s12 + $0x1b74] ss:$24 sps:$4 sm:$0xff]   ;;  %v22832_v42 = vld [vmem:[%s24682_s12 + $0x1ce8] ss:$24 sps:$4 sm:$0xff]  }
 0x5cb   : > { %17120 = vmatprep.subr.bf16.mxu0 %v22801_v49  ;;  %v22840_v49 = vld [vmem:[%s24682_s12 + $0x1d1c] ss:$24 sps:$4 sm:$0xff]  }
 0x5cd   : > { %16121 = vmatpush1.bf16.msra.mxu1 %v22796_v19  ;;  %v22843_v19 = vld [vmem:[%s24682_s12 + $0x1ba4] ss:$24 sps:$4 sm:$0xff]  }
 0x5ce   : > { %17121 = vmatpush1.bf16.msra.mxu0 %v22799_v38  ;;  %16122 = vmatprep.subr.bf16.mxu1 %v22804_v33  ;;  %v22838_v38 = vld [vmem:[%s24682_s12 + $0x1d18] ss:$24 sps:$4 sm:$0xff]  }
 0x5cf   : > { %17122 = vmatprep.subr.bf16.mxu0 %v22807_v31  ;;  %v22841_v33 = vld [vmem:[%s24682_s12 + $0x1ba0] ss:$24 sps:$4 sm:$0xff]   ;;  %v22849_v31 = vld [vmem:[%s24682_s12 + $0x1bd4] ss:$24 sps:$4 sm:$0xff]  }
 0x5d1   : > { %16123 = vmatpush1.bf16.msra.mxu1 %v22802_v7  ;;  %v22844_v7 = vld [vmem:[%s24682_s12 + $0x1d48] ss:$24 sps:$4 sm:$0xff]  }
 0x5d2   : > { %17123 = vmatpush1.bf16.msra.mxu0 %v22805_v48  ;;  %16124 = vmatprep.subr.bf16.mxu1 %v22810_v21  ;;  %v22847_v48 = vld [vmem:[%s24682_s12 + $0x1bd0] ss:$24 sps:$4 sm:$0xff]   ;;  %v22852_v21 = vld [vmem:[%s24682_s12 + $0x1d7c] ss:$24 sps:$4 sm:$0xff]  }
 0x5d3   : > { %17124 = vmatprep.subr.bf16.mxu0 %v22813_v26  ;;  %v22855_v26 = vld [vmem:[%s24682_s12 + $0x1c04] ss:$24 sps:$4 sm:$0xff]  }
 0x5d5   : > { %16125 = vmatpush1.bf16.msra.mxu1 %v22808_v52  ;;  %v22850_v52 = vld [vmem:[%s24682_s12 + $0x1d78] ss:$24 sps:$4 sm:$0xff]  }
 0x5d6   : > { %17125 = vmatpush1.bf16.msra.mxu0 %v22811_v37  ;;  %16126 = vmatprep.subr.bf16.mxu1 %v22816_v11  ;;  %v22853_v37 = vld [vmem:[%s24682_s12 + $0x1c00] ss:$24 sps:$4 sm:$0xff]   ;;  %v22858_v11 = vld [vmem:[%s24682_s12 + $0x1dac] ss:$24 sps:$4 sm:$0xff]  }
 0x5d7   : > { %17126 = vmatprep.subr.bf16.mxu0 %v22819_v23  ;;  %v22861_v23 = vld [vmem:[%s24682_s12 + $0x1c34] ss:$24 sps:$4 sm:$0xff]  }
 0x5d9   : > { %16127 = vmatpush1.bf16.msra.mxu1 %v22814_v62  ;;  %v22856_v62 = vld [vmem:[%s24682_s12 + $0x1da8] ss:$24 sps:$4 sm:$0xff]  }
 0x5da   : > { %17127 = vmatpush1.bf16.msra.mxu0 %v22817_v16  ;;  %16128 = vmatprep.subr.bf16.mxu1 %v22822_v60  ;;  %v22859_v16 = vld [vmem:[%s24682_s12 + $0x1c30] ss:$24 sps:$4 sm:$0xff]   ;;  %v22864_v60 = vld [vmem:[%s24682_s12 + $0x1ddc] ss:$24 sps:$4 sm:$0xff]  }
 0x5db   : > { %17137 = vmatprep.subr.bf16.mxu0 %v22825_v47  ;;  %v22867_v47 = vld [vmem:[%s24682_s12 + $0x1c64] ss:$24 sps:$4 sm:$0xff]  }
 0x5dd   : > { %17129 = vmatmul.mubr.bf16.vlgmr.msra.gmra.mrb[4].mxu0 %v25550_v35  ;;  %16129 = vmatpush1.bf16.msra.mxu1 %v22820_v41  ;;  %v22835_v35 = vld [vmem:[%s24682_s12 + $0x1b70] ss:$24 sps:$4 sm:$0xff]  }
 0x5de   : > { %17138 = vmatpush1.bf16.msra.mxu0 %v22823_v43  ;;  %16130 = vmatprep.subr.bf16.mxu1 %v22828_v57  ;;  %v22862_v41 = vld [vmem:[%s24682_s12 + $0x1dd8] ss:$24 sps:$4 sm:$0xff]   ;;  %v22870_v57 = vld [vmem:[%s24682_s12 + $0x1e0c] ss:$24 sps:$4 sm:$0xff]  }
 0x5df   : > { %17139 = vmatprep.subr.bf16.mxu0 %v22831_v32  ;;  %17169 = vmatprep.mubr.bf16.mxu0 %v25560_v51  ;;  %v22846_v51 = vld [vmem:[%s24682_s12 + $0x1d4c] ss:$24 sps:$4 sm:$0xff]   ;;  %v22865_v43 = vld [vmem:[%s24682_s12 + $0x1c60] ss:$24 sps:$4 sm:$0xff]  }
 0x5e0   : > { %v22873_v32 = vld [vmem:[%s24682_s12 + $0x1c94] ss:$24 sps:$4 sm:$0xff]  }
 0x5e1   : > { %16131 = vmatpush1.bf16.msra.mxu1 %v22826_v53  ;;  %v22868_v53 = vld [vmem:[%s24682_s12 + $0x1e08] ss:$24 sps:$4 sm:$0xff]  }
 0x5e2   : > { %17140 = vmatpush1.bf16.msra.mxu0 %v22829_v17  ;;  %16132 = vmatprep.subr.bf16.mxu1 %v22834_v59  ;;  %v22871_v17 = vld [vmem:[%s24682_s12 + $0x1c90] ss:$24 sps:$4 sm:$0xff]   ;;  %v22876_v59 = vld [vmem:[%s24682_s12 + $0x1e3c] ss:$24 sps:$4 sm:$0xff]  }
 0x5e3   : > { %17141 = vmatprep.subr.bf16.mxu0 %v22837_v10  ;;  %v22879_v10 = vld [vmem:[%s24682_s12 + $0x1cc4] ss:$24 sps:$4 sm:$0xff]  }
 0x5e5   : > { %16133 = vmatpush1.bf16.msra.mxu1 %v22832_v42  ;;  %v22874_v42 = vld [vmem:[%s24682_s12 + $0x1e38] ss:$24 sps:$4 sm:$0xff]  }
 0x5e6   : > { %17142 = vmatpush1.bf16.msra.mxu0 %v22835_v35  ;;  %16134 = vmatprep.subr.bf16.mxu1 %v22840_v49  ;;  %v22877_v35 = vld [vmem:[%s24682_s12 + $0x1cc0] ss:$24 sps:$4 sm:$0xff]   ;;  %v22882_v49 = vld [vmem:[%s24682_s12 + $0x1e6c] ss:$24 sps:$4 sm:$0xff]  }
 0x5e7   : > { %17143 = vmatprep.subr.bf16.mxu0 %v22843_v19  ;;  %v22885_v19 = vld [vmem:[%s24682_s12 + $0x1cf4] ss:$24 sps:$4 sm:$0xff]  }
 0x5e9   : > { %16135 = vmatpush1.bf16.msra.mxu1 %v22838_v38  ;;  %v22880_v38 = vld [vmem:[%s24682_s12 + $0x1e68] ss:$24 sps:$4 sm:$0xff]  }
 0x5ea   : > { %17144 = vmatpush1.bf16.msra.mxu0 %v22841_v33  ;;  %16136 = vmatprep.subr.bf16.mxu1 %v22846_v51  ;;  %v22883_v33 = vld [vmem:[%s24682_s12 + $0x1cf0] ss:$24 sps:$4 sm:$0xff]   ;;  %v22888_v51 = vld [vmem:[%s24682_s12 + $0x1e9c] ss:$24 sps:$4 sm:$0xff]  }
 0x5eb   : > { %17145 = vmatprep.subr.bf16.mxu0 %v22849_v31  ;;  %v22891_v31 = vld [vmem:[%s24682_s12 + $0x1d24] ss:$24 sps:$4 sm:$0xff]  }
 0x5ed   : > { %16137 = vmatpush1.bf16.msra.mxu1 %v22844_v7  ;;  %v22886_v7 = vld [vmem:[%s24682_s12 + $0x1e98] ss:$24 sps:$4 sm:$0xff]  }
 0x5ee   : > { %17146 = vmatpush1.bf16.msra.mxu0 %v22847_v48  ;;  %16138 = vmatprep.subr.bf16.mxu1 %v22852_v21  ;;  %v22889_v48 = vld [vmem:[%s24682_s12 + $0x1d20] ss:$24 sps:$4 sm:$0xff]   ;;  %v22894_v21 = vld [vmem:[%s24682_s12 + $0x1ecc] ss:$24 sps:$4 sm:$0xff]  }
 0x5ef   : > { %17147 = vmatprep.subr.bf16.mxu0 %v22855_v26  ;;  %v22897_v26 = vld [vmem:[%s24682_s12 + $0x1d54] ss:$24 sps:$4 sm:$0xff]  }
 0x5f1   : > { %16139 = vmatpush1.bf16.msra.mxu1 %v22850_v52  ;;  %v22892_v52 = vld [vmem:[%s24682_s12 + $0x1ec8] ss:$24 sps:$4 sm:$0xff]  }
 0x5f2   : > { %17148 = vmatpush1.bf16.msra.mxu0 %v22853_v37  ;;  %16140 = vmatprep.subr.bf16.mxu1 %v22858_v11  ;;  %v22895_v37 = vld [vmem:[%s24682_s12 + $0x1d50] ss:$24 sps:$4 sm:$0xff]   ;;  %v22900_v11 = vld [vmem:[%s24682_s12 + $0x1efc] ss:$24 sps:$4 sm:$0xff]  }
 0x5f3   : > { %17149 = vmatprep.subr.bf16.mxu0 %v22861_v23  ;;  %v22903_v23 = vld [vmem:[%s24682_s12 + $0x1d84] ss:$24 sps:$4 sm:$0xff]  }
 0x5f5   : > { %16141 = vmatpush1.bf16.msra.mxu1 %v22856_v62  ;;  %v22898_v62 = vld [vmem:[%s24682_s12 + $0x1ef8] ss:$24 sps:$4 sm:$0xff]  }
 0x5f6   : > { %17150 = vmatpush1.bf16.msra.mxu0 %v22859_v16  ;;  %16142 = vmatprep.subr.bf16.mxu1 %v22864_v60  ;;  %v22901_v16 = vld [vmem:[%s24682_s12 + $0x1d80] ss:$24 sps:$4 sm:$0xff]   ;;  %v22906_v60 = vld [vmem:[%s24682_s12 + $0x1f2c] ss:$24 sps:$4 sm:$0xff]  }
 0x5f7   : > { %17151 = vmatprep.subr.bf16.mxu0 %v22867_v47  ;;  %v22909_v47 = vld [vmem:[%s24682_s12 + $0x1db4] ss:$24 sps:$4 sm:$0xff]  }
 0x5f9   : > { %16143 = vmatpush1.bf16.msra.mxu1 %v22862_v41  ;;  %v22904_v41 = vld [vmem:[%s24682_s12 + $0x1f28] ss:$24 sps:$4 sm:$0xff]  }
 0x5fa   : > { %17152 = vmatpush1.bf16.msra.mxu0 %v22865_v43  ;;  %16153 = vmatprep.subr.bf16.mxu1 %v22870_v57  ;;  %v22907_v43 = vld [vmem:[%s24682_s12 + $0x1db0] ss:$24 sps:$4 sm:$0xff]   ;;  %v22912_v57 = vld [vmem:[%s24682_s12 + $0x1f5c] ss:$24 sps:$4 sm:$0xff]  }
 0x5fb   : > { %17153 = vmatprep.subr.bf16.mxu0 %v22873_v32  ;;  %v22915_v32 = vld [vmem:[%s24682_s12 + $0x1de4] ss:$24 sps:$4 sm:$0xff]  }
 0x5fc   : > { %16145 = vmatmul.mubr.bf16.vlgmr.msra.gmra.mrb[4].mxu1 %v25650_v6 }
 0x5fd   : > { %16154 = vmatpush1.bf16.msra.mxu1 %v22868_v53  ;;  %16185 = vmatprep.mubr.bf16.mxu1 %v25658_v0  ;;  %v22910_v53 = vld [vmem:[%s24682_s12 + $0x1f58] ss:$24 sps:$4 sm:$0xff]  }
 0x5fe   : > { %17154 = vmatpush1.bf16.msra.mxu0 %v22871_v17  ;;  %16155 = vmatprep.subr.bf16.mxu1 %v22876_v59  ;;  %v22913_v17 = vld [vmem:[%s24682_s12 + $0x1de0] ss:$24 sps:$4 sm:$0xff]   ;;  %v22918_v59 = vld [vmem:[%s24682_s12 + $0x1f8c] ss:$24 sps:$4 sm:$0xff]  }
 0x5ff   : > { %17155 = vmatprep.subr.bf16.mxu0 %v22879_v10  ;;  %v22921_v10 = vld [vmem:[%s24682_s12 + $0x1e14] ss:$24 sps:$4 sm:$0xff]  }
 0x601   : > { %16156 = vmatpush1.bf16.msra.mxu1 %v22874_v42  ;;  %v22916_v42 = vld [vmem:[%s24682_s12 + $0x1f88] ss:$24 sps:$4 sm:$0xff]  }
 0x602   : > { %17156 = vmatpush1.bf16.msra.mxu0 %v22877_v35  ;;  %16157 = vmatprep.subr.bf16.mxu1 %v22882_v49  ;;  %v22919_v35 = vld [vmem:[%s24682_s12 + $0x1e10] ss:$24 sps:$4 sm:$0xff]   ;;  %v22924_v49 = vld [vmem:[%s24682_s12 + $0x1fbc] ss:$24 sps:$4 sm:$0xff]  }
 0x603   : > { %17157 = vmatprep.subr.bf16.mxu0 %v22885_v19  ;;  %v22927_v19 = vld [vmem:[%s24682_s12 + $0x1e44] ss:$24 sps:$4 sm:$0xff]  }
 0x605   : > { %16158 = vmatpush1.bf16.msra.mxu1 %v22880_v38  ;;  %v22922_v38 = vld [vmem:[%s24682_s12 + $0x1fb8] ss:$24 sps:$4 sm:$0xff]  }
 0x606   : > { %17158 = vmatpush1.bf16.msra.mxu0 %v22883_v33  ;;  %16159 = vmatprep.subr.bf16.mxu1 %v22888_v51  ;;  %v22925_v33 = vld [vmem:[%s24682_s12 + $0x1e40] ss:$24 sps:$4 sm:$0xff]   ;;  %v22930_v51 = vld [vmem:[%s24682_s12 + $0x1fec] ss:$24 sps:$4 sm:$0xff]  }
 0x607   : > { %17159 = vmatprep.subr.bf16.mxu0 %v22891_v31  ;;  %v22933_v31 = vld [vmem:[%s24682_s12 + $0x1e74] ss:$24 sps:$4 sm:$0xff]  }
 0x609   : > { %16160 = vmatpush1.bf16.msra.mxu1 %v22886_v7  ;;  %v22928_v7 = vld [vmem:[%s24682_s12 + $0x1fe8] ss:$24 sps:$4 sm:$0xff]  }
 0x60a   : > { %17160 = vmatpush1.bf16.msra.mxu0 %v22889_v48  ;;  %16161 = vmatprep.subr.bf16.mxu1 %v22894_v21  ;;  %v22936_v48 = vld [vmem:[%s24682_s12 + $0x201c] ss:$24 sps:$4 sm:$0xff]  }
 0x60b   : > { %17161 = vmatprep.subr.bf16.mxu0 %v22897_v26  ;;  %v22939_v21 = vld [vmem:[%s24682_s12 + $0x1ea4] ss:$24 sps:$4 sm:$0xff]   ;;  %v22934_v26 = vld [vmem:[%s24682_s12 + $0x2018] ss:$24 sps:$4 sm:$0xff]  }
 0x60d   : > { %16162 = vmatpush1.bf16.msra.mxu1 %v22892_v52  ;;  %v22937_v52 = vld [vmem:[%s24682_s12 + $0x1ea0] ss:$24 sps:$4 sm:$0xff]  }
 0x60e   : > { %17162 = vmatpush1.bf16.msra.mxu0 %v22895_v37  ;;  %16163 = vmatprep.subr.bf16.mxu1 %v22900_v11  ;;  %v22945_v37 = vld [vmem:[%s24682_s12 + $0x1ed4] ss:$24 sps:$4 sm:$0xff]   ;;  %v22940_v11 = vld [vmem:[%s24682_s12 + $0x2048] ss:$24 sps:$4 sm:$0xff]  }
 0x60f   : > { %17163 = vmatprep.subr.bf16.mxu0 %v22903_v23  ;;  %v22943_v23 = vld [vmem:[%s24682_s12 + $0x1ed0] ss:$24 sps:$4 sm:$0xff]  }
 0x611   : > { %16164 = vmatpush1.bf16.msra.mxu1 %v22898_v62  ;;  %v22948_v62 = vld [vmem:[%s24682_s12 + $0x207c] ss:$24 sps:$4 sm:$0xff]  }
 0x612   : > { %17164 = vmatpush1.bf16.msra.mxu0 %v22901_v16  ;;  %16165 = vmatprep.subr.bf16.mxu1 %v22906_v60  ;;  %v22951_v16 = vld [vmem:[%s24682_s12 + $0x1f04] ss:$24 sps:$4 sm:$0xff]   ;;  %v22946_v60 = vld [vmem:[%s24682_s12 + $0x2078] ss:$24 sps:$4 sm:$0xff]  }
 0x613   : > { %17165 = vmatprep.subr.bf16.mxu0 %v22909_v47  ;;  %v22949_v47 = vld [vmem:[%s24682_s12 + $0x1f00] ss:$24 sps:$4 sm:$0xff]  }
 0x615   : > { %16166 = vmatpush1.bf16.msra.mxu1 %v22904_v41  ;;  %v22954_v41 = vld [vmem:[%s24682_s12 + $0x20ac] ss:$24 sps:$4 sm:$0xff]  }
 0x616   : > { %17166 = vmatpush1.bf16.msra.mxu0 %v22907_v43  ;;  %16167 = vmatprep.subr.bf16.mxu1 %v22912_v57  ;;  %v22957_v43 = vld [vmem:[%s24682_s12 + $0x1f34] ss:$24 sps:$4 sm:$0xff]   ;;  %v22952_v57 = vld [vmem:[%s24682_s12 + $0x20a8] ss:$24 sps:$4 sm:$0xff]  }
 0x617   : > { %17167 = vmatprep.subr.bf16.mxu0 %v22915_v32  ;;  %v22955_v32 = vld [vmem:[%s24682_s12 + $0x1f30] ss:$24 sps:$4 sm:$0xff]  }
 0x619   : > { %16168 = vmatpush1.bf16.msra.mxu1 %v22910_v53  ;;  %v22960_v53 = vld [vmem:[%s24682_s12 + $0x20dc] ss:$24 sps:$4 sm:$0xff]  }
 0x61a   : > { %17168 = vmatpush1.bf16.msra.mxu0 %v22913_v17  ;;  %16169 = vmatprep.subr.bf16.mxu1 %v22918_v59  ;;  %v22963_v17 = vld [vmem:[%s24682_s12 + $0x1f64] ss:$24 sps:$4 sm:$0xff]   ;;  %v22958_v59 = vld [vmem:[%s24682_s12 + $0x20d8] ss:$24 sps:$4 sm:$0xff]  }
 0x61b   : > { %17178 = vmatprep.subr.bf16.mxu0 %v22921_v10  ;;  %v22961_v10 = vld [vmem:[%s24682_s12 + $0x1f60] ss:$24 sps:$4 sm:$0xff]  }
 0x61d   : > { %17170 = vmatmul.mubr.bf16.vlgmr.msra.gmra.mrb[4].mxu0 %v25650_v6  ;;  %16170 = vmatpush1.bf16.msra.mxu1 %v22916_v42  ;;  %v22931_v6 = vld [vmem:[%s24682_s12 + $0x1e70] ss:$24 sps:$4 sm:$0xff]   ;;  %v22966_v42 = vld [vmem:[%s24682_s12 + $0x210c] ss:$24 sps:$4 sm:$0xff]  }
 0x61e   : > { %17179 = vmatpush1.bf16.msra.mxu0 %v22919_v35  ;;  %16171 = vmatprep.subr.bf16.mxu1 %v22924_v49  ;;  %v22969_v35 = vld [vmem:[%s24682_s12 + $0x1f94] ss:$24 sps:$4 sm:$0xff]   ;;  %v22964_v49 = vld [vmem:[%s24682_s12 + $0x2108] ss:$24 sps:$4 sm:$0xff]  }
 0x61f   : > { %17180 = vmatprep.subr.bf16.mxu0 %v22927_v19  ;;  %17210 = vmatprep.mubr.bf16.mxu0 %v25658_v0  ;;  %v22942_v0 = vld [vmem:[%s24682_s12 + $0x204c] ss:$24 sps:$4 sm:$0xff]   ;;  %v22967_v19 = vld [vmem:[%s24682_s12 + $0x1f90] ss:$24 sps:$4 sm:$0xff]  }
 0x621   : > { %16172 = vmatpush1.bf16.msra.mxu1 %v22922_v38  ;;  %v22972_v38 = vld [vmem:[%s24682_s12 + $0x213c] ss:$24 sps:$4 sm:$0xff]  }
 0x622   : > { %17181 = vmatpush1.bf16.msra.mxu0 %v22925_v33  ;;  %16173 = vmatprep.subr.bf16.mxu1 %v22930_v51  ;;  %v22975_v33 = vld [vmem:[%s24682_s12 + $0x1fc4] ss:$24 sps:$4 sm:$0xff]   ;;  %v22970_v51 = vld [vmem:[%s24682_s12 + $0x2138] ss:$24 sps:$4 sm:$0xff]  }
 0x623   : > { %17182 = vmatprep.subr.bf16.mxu0 %v22933_v31  ;;  %v22973_v31 = vld [vmem:[%s24682_s12 + $0x1fc0] ss:$24 sps:$4 sm:$0xff]  }
 0x625   : > { %16174 = vmatpush1.bf16.msra.mxu1 %v22928_v7  ;;  %v22978_v7 = vld [vmem:[%s24682_s12 + $0x216c] ss:$24 sps:$4 sm:$0xff]  }
 0x626   : > { %17183 = vmatpush1.bf16.msra.mxu0 %v22931_v6  ;;  %16175 = vmatprep.subr.bf16.mxu1 %v22936_v48  ;;  %v22981_v6 = vld [vmem:[%s24682_s12 + $0x1ff4] ss:$24 sps:$4 sm:$0xff]   ;;  %v22976_v48 = vld [vmem:[%s24682_s12 + $0x2168] ss:$24 sps:$4 sm:$0xff]  }
 0x627   : > { %17184 = vmatprep.subr.bf16.mxu0 %v22939_v21  ;;  %v22979_v21 = vld [vmem:[%s24682_s12 + $0x1ff0] ss:$24 sps:$4 sm:$0xff]  }
 0x629   : > { %16176 = vmatpush1.bf16.msra.mxu1 %v22934_v26  ;;  %v22984_v26 = vld [vmem:[%s24682_s12 + $0x219c] ss:$24 sps:$4 sm:$0xff]  }
 0x62a   : > { %17185 = vmatpush1.bf16.msra.mxu0 %v22937_v52  ;;  %16177 = vmatprep.subr.bf16.mxu1 %v22942_v0  ;;  %v22987_v52 = vld [vmem:[%s24682_s12 + $0x2024] ss:$24 sps:$4 sm:$0xff]   ;;  %v22982_v0 = vld [vmem:[%s24682_s12 + $0x2198] ss:$24 sps:$4 sm:$0xff]  }
 0x62b   : > { %17186 = vmatprep.subr.bf16.mxu0 %v22945_v37  ;;  %v22985_v37 = vld [vmem:[%s24682_s12 + $0x2020] ss:$24 sps:$4 sm:$0xff]  }
 0x62d   : > { %16178 = vmatpush1.bf16.msra.mxu1 %v22940_v11  ;;  %v22990_v11 = vld [vmem:[%s24682_s12 + $0x21cc] ss:$24 sps:$4 sm:$0xff]  }
 0x62e   : > { %17187 = vmatpush1.bf16.msra.mxu0 %v22943_v23  ;;  %16179 = vmatprep.subr.bf16.mxu1 %v22948_v62  ;;  %v22993_v23 = vld [vmem:[%s24682_s12 + $0x2054] ss:$24 sps:$4 sm:$0xff]   ;;  %v22988_v62 = vld [vmem:[%s24682_s12 + $0x21c8] ss:$24 sps:$4 sm:$0xff]  }
 0x62f   : > { %17188 = vmatprep.subr.bf16.mxu0 %v22951_v16  ;;  %v22991_v16 = vld [vmem:[%s24682_s12 + $0x2050] ss:$24 sps:$4 sm:$0xff]  }
 0x631   : > { %16180 = vmatpush1.bf16.msra.mxu1 %v22946_v60  ;;  %v22996_v60 = vld [vmem:[%s24682_s12 + $0x21fc] ss:$24 sps:$4 sm:$0xff]  }
 0x632   : > { %17189 = vmatpush1.bf16.msra.mxu0 %v22949_v47  ;;  %16181 = vmatprep.subr.bf16.mxu1 %v22954_v41  ;;  %v22999_v47 = vld [vmem:[%s24682_s12 + $0x2084] ss:$24 sps:$4 sm:$0xff]   ;;  %v22994_v41 = vld [vmem:[%s24682_s12 + $0x21f8] ss:$24 sps:$4 sm:$0xff]  }
 0x633   : > { %17190 = vmatprep.subr.bf16.mxu0 %v22957_v43  ;;  %v22997_v43 = vld [vmem:[%s24682_s12 + $0x2080] ss:$24 sps:$4 sm:$0xff]  }
 0x635   : > { %16182 = vmatpush1.bf16.msra.mxu1 %v22952_v57  ;;  %v23002_v57 = vld [vmem:[%s24682_s12 + $0x222c] ss:$24 sps:$4 sm:$0xff]  }
 0x636   : > { %17191 = vmatpush1.bf16.msra.mxu0 %v22955_v32  ;;  %16183 = vmatprep.subr.bf16.mxu1 %v22960_v53  ;;  %v23005_v32 = vld [vmem:[%s24682_s12 + $0x20b4] ss:$24 sps:$4 sm:$0xff]   ;;  %v23000_v53 = vld [vmem:[%s24682_s12 + $0x2228] ss:$24 sps:$4 sm:$0xff]  }
 0x637   : > { %17192 = vmatprep.subr.bf16.mxu0 %v22963_v17  ;;  %v23003_v17 = vld [vmem:[%s24682_s12 + $0x20b0] ss:$24 sps:$4 sm:$0xff]  }
 0x639   : > { %16184 = vmatpush1.bf16.msra.mxu1 %v22958_v59  ;;  %v23008_v59 = vld [vmem:[%s24682_s12 + $0x225c] ss:$24 sps:$4 sm:$0xff]  }
 0x63a   : > { %17193 = vmatpush1.bf16.msra.mxu0 %v22961_v10  ;;  %16194 = vmatprep.subr.bf16.mxu1 %v22966_v42  ;;  %v23011_v10 = vld [vmem:[%s24682_s12 + $0x20e4] ss:$24 sps:$4 sm:$0xff]   ;;  %v23006_v42 = vld [vmem:[%s24682_s12 + $0x2258] ss:$24 sps:$4 sm:$0xff]  }
 0x63b   : > { %17194 = vmatprep.subr.bf16.mxu0 %v22969_v35  ;;  %v23009_v35 = vld [vmem:[%s24682_s12 + $0x20e0] ss:$24 sps:$4 sm:$0xff]  }
 0x63c   : > { %16186 = vmatmul.mubr.bf16.vlgmr.msra.gmra.mrb[4].mxu1 %v25742_v13 }
 0x63d   : > { %16195 = vmatpush1.bf16.msra.mxu1 %v22964_v49  ;;  %16226 = vmatprep.mubr.bf16.mxu1 %v25752_v15  ;;  %v23014_v49 = vld [vmem:[%s24682_s12 + $0x228c] ss:$24 sps:$4 sm:$0xff]  }
 0x63e   : > { %17195 = vmatpush1.bf16.msra.mxu0 %v22967_v19  ;;  %16196 = vmatprep.subr.bf16.mxu1 %v22972_v38  ;;  %v23017_v19 = vld [vmem:[%s24682_s12 + $0x2114] ss:$24 sps:$4 sm:$0xff]   ;;  %v23012_v38 = vld [vmem:[%s24682_s12 + $0x2288] ss:$24 sps:$4 sm:$0xff]  }
 0x63f   : > { %17196 = vmatprep.subr.bf16.mxu0 %v22975_v33  ;;  %v23015_v33 = vld [vmem:[%s24682_s12 + $0x2110] ss:$24 sps:$4 sm:$0xff]  }
 0x641   : > { %16197 = vmatpush1.bf16.msra.mxu1 %v22970_v51  ;;  %v23020_v51 = vld [vmem:[%s24682_s12 + $0x22bc] ss:$24 sps:$4 sm:$0xff]  }
 0x642   : > { %17197 = vmatpush1.bf16.msra.mxu0 %v22973_v31  ;;  %16198 = vmatprep.subr.bf16.mxu1 %v22978_v7  ;;  %v23023_v31 = vld [vmem:[%s24682_s12 + $0x2144] ss:$24 sps:$4 sm:$0xff]   ;;  %v23018_v7 = vld [vmem:[%s24682_s12 + $0x22b8] ss:$24 sps:$4 sm:$0xff]  }
 0x643   : > { %17198 = vmatprep.subr.bf16.mxu0 %v22981_v6  ;;  %v23021_v6 = vld [vmem:[%s24682_s12 + $0x2140] ss:$24 sps:$4 sm:$0xff]  }
 0x645   : > { %16199 = vmatpush1.bf16.msra.mxu1 %v22976_v48  ;;  %v23026_v48 = vld [vmem:[%s24682_s12 + $0x22ec] ss:$24 sps:$4 sm:$0xff]  }
 0x646   : > { %17199 = vmatpush1.bf16.msra.mxu0 %v22979_v21  ;;  %16200 = vmatprep.subr.bf16.mxu1 %v22984_v26  ;;  %v23029_v21 = vld [vmem:[%s24682_s12 + $0x2174] ss:$24 sps:$4 sm:$0xff]   ;;  %v23024_v26 = vld [vmem:[%s24682_s12 + $0x22e8] ss:$24 sps:$4 sm:$0xff]  }
 0x647   : > { %17200 = vmatprep.subr.bf16.mxu0 %v22987_v52  ;;  %v23032_v52 = vld [vmem:[%s24682_s12 + $0x231c] ss:$24 sps:$4 sm:$0xff]  }
 0x649   : > { %16201 = vmatpush1.bf16.msra.mxu1 %v22982_v0  ;;  %v23035_v0 = vld [vmem:[%s24682_s12 + $0x21a4] ss:$24 sps:$4 sm:$0xff]  }
 0x64a   : > { %17201 = vmatpush1.bf16.msra.mxu0 %v22985_v37  ;;  %16202 = vmatprep.subr.bf16.mxu1 %v22990_v11  ;;  %v23030_v37 = vld [vmem:[%s24682_s12 + $0x2318] ss:$24 sps:$4 sm:$0xff]  }
 0x64b   : > { %17202 = vmatprep.subr.bf16.mxu0 %v22993_v23  ;;  %v23033_v11 = vld [vmem:[%s24682_s12 + $0x21a0] ss:$24 sps:$4 sm:$0xff]   ;;  %v23041_v23 = vld [vmem:[%s24682_s12 + $0x21d4] ss:$24 sps:$4 sm:$0xff]  }
 0x64d   : > { %16203 = vmatpush1.bf16.msra.mxu1 %v22988_v62  ;;  %v23036_v62 = vld [vmem:[%s24682_s12 + $0x2348] ss:$24 sps:$4 sm:$0xff]  }
 0x64e   : > { %17203 = vmatpush1.bf16.msra.mxu0 %v22991_v16  ;;  %16204 = vmatprep.subr.bf16.mxu1 %v22996_v60  ;;  %v23039_v16 = vld [vmem:[%s24682_s12 + $0x21d0] ss:$24 sps:$4 sm:$0xff]   ;;  %v23044_v60 = vld [vmem:[%s24682_s12 + $0x237c] ss:$24 sps:$4 sm:$0xff]  }
 0x64f   : > { %17204 = vmatprep.subr.bf16.mxu0 %v22999_v47  ;;  %v23047_v47 = vld [vmem:[%s24682_s12 + $0x2204] ss:$24 sps:$4 sm:$0xff]  }
 0x651   : > { %16205 = vmatpush1.bf16.msra.mxu1 %v22994_v41  ;;  %v23042_v41 = vld [vmem:[%s24682_s12 + $0x2378] ss:$24 sps:$4 sm:$0xff]  }
 0x652   : > { %17205 = vmatpush1.bf16.msra.mxu0 %v22997_v43  ;;  %16206 = vmatprep.subr.bf16.mxu1 %v23002_v57  ;;  %v23045_v43 = vld [vmem:[%s24682_s12 + $0x2200] ss:$24 sps:$4 sm:$0xff]   ;;  %v23050_v57 = vld [vmem:[%s24682_s12 + $0x23ac] ss:$24 sps:$4 sm:$0xff]  }
 0x653   : > { %17206 = vmatprep.subr.bf16.mxu0 %v23005_v32  ;;  %v23053_v32 = vld [vmem:[%s24682_s12 + $0x2234] ss:$24 sps:$4 sm:$0xff]  }
 0x655   : > { %16207 = vmatpush1.bf16.msra.mxu1 %v23000_v53  ;;  %v23048_v53 = vld [vmem:[%s24682_s12 + $0x23a8] ss:$24 sps:$4 sm:$0xff]  }
 0x656   : > { %17207 = vmatpush1.bf16.msra.mxu0 %v23003_v17  ;;  %16208 = vmatprep.subr.bf16.mxu1 %v23008_v59  ;;  %v23051_v17 = vld [vmem:[%s24682_s12 + $0x2230] ss:$24 sps:$4 sm:$0xff]   ;;  %v23056_v59 = vld [vmem:[%s24682_s12 + $0x23dc] ss:$24 sps:$4 sm:$0xff]  }
 0x657   : > { %17208 = vmatprep.subr.bf16.mxu0 %v23011_v10  ;;  %v23059_v10 = vld [vmem:[%s24682_s12 + $0x2264] ss:$24 sps:$4 sm:$0xff]  }
 0x659   : > { %16209 = vmatpush1.bf16.msra.mxu1 %v23006_v42  ;;  %v23054_v42 = vld [vmem:[%s24682_s12 + $0x23d8] ss:$24 sps:$4 sm:$0xff]  }
 0x65a   : > { %17209 = vmatpush1.bf16.msra.mxu0 %v23009_v35  ;;  %16210 = vmatprep.subr.bf16.mxu1 %v23014_v49  ;;  %v23057_v35 = vld [vmem:[%s24682_s12 + $0x2260] ss:$24 sps:$4 sm:$0xff]   ;;  %v23062_v49 = vld [vmem:[%s24682_s12 + $0x240c] ss:$24 sps:$4 sm:$0xff]  }
 0x65b   : > { %17219 = vmatprep.subr.bf16.mxu0 %v23017_v19  ;;  %v23065_v19 = vld [vmem:[%s24682_s12 + $0x2294] ss:$24 sps:$4 sm:$0xff]  }
 0x65d   : > { %17211 = vmatmul.mubr.bf16.vlgmr.msra.gmra.mrb[4].mxu0 %v25742_v13  ;;  %16211 = vmatpush1.bf16.msra.mxu1 %v23012_v38  ;;  %v23027_v13 = vld [vmem:[%s24682_s12 + $0x2170] ss:$24 sps:$4 sm:$0xff]  }
 0x65e   : > { %17220 = vmatpush1.bf16.msra.mxu0 %v23015_v33  ;;  %16212 = vmatprep.subr.bf16.mxu1 %v23020_v51  ;;  %v23060_v38 = vld [vmem:[%s24682_s12 + $0x2408] ss:$24 sps:$4 sm:$0xff]   ;;  %v23068_v51 = vld [vmem:[%s24682_s12 + $0x243c] ss:$24 sps:$4 sm:$0xff]  }
 0x65f   : > { %17221 = vmatprep.subr.bf16.mxu0 %v23023_v31  ;;  %17251 = vmatprep.mubr.bf16.mxu0 %v25752_v15  ;;  %v23038_v15 = vld [vmem:[%s24682_s12 + $0x234c] ss:$24 sps:$4 sm:$0xff]   ;;  %v23063_v33 = vld [vmem:[%s24682_s12 + $0x2290] ss:$24 sps:$4 sm:$0xff]  }
 0x660   : > { %v23071_v31 = vld [vmem:[%s24682_s12 + $0x22c4] ss:$24 sps:$4 sm:$0xff]  }
 0x661   : > { %16213 = vmatpush1.bf16.msra.mxu1 %v23018_v7  ;;  %v23066_v7 = vld [vmem:[%s24682_s12 + $0x2438] ss:$24 sps:$4 sm:$0xff]  }
 0x662   : > { %17222 = vmatpush1.bf16.msra.mxu0 %v23021_v6  ;;  %16214 = vmatprep.subr.bf16.mxu1 %v23026_v48  ;;  %v23069_v6 = vld [vmem:[%s24682_s12 + $0x22c0] ss:$24 sps:$4 sm:$0xff]   ;;  %v23074_v48 = vld [vmem:[%s24682_s12 + $0x246c] ss:$24 sps:$4 sm:$0xff]  }
 0x663   : > { %17223 = vmatprep.subr.bf16.mxu0 %v23029_v21  ;;  %v23077_v21 = vld [vmem:[%s24682_s12 + $0x22f4] ss:$24 sps:$4 sm:$0xff]  }
 0x665   : > { %16215 = vmatpush1.bf16.msra.mxu1 %v23024_v26  ;;  %v23072_v26 = vld [vmem:[%s24682_s12 + $0x2468] ss:$24 sps:$4 sm:$0xff]  }
 0x666   : > { %17224 = vmatpush1.bf16.msra.mxu0 %v23027_v13  ;;  %16216 = vmatprep.subr.bf16.mxu1 %v23032_v52  ;;  %v23075_v13 = vld [vmem:[%s24682_s12 + $0x22f0] ss:$24 sps:$4 sm:$0xff]   ;;  %v23080_v52 = vld [vmem:[%s24682_s12 + $0x249c] ss:$24 sps:$4 sm:$0xff]  }
 0x667   : > { %17225 = vmatprep.subr.bf16.mxu0 %v23035_v0  ;;  %v23083_v0 = vld [vmem:[%s24682_s12 + $0x2324] ss:$24 sps:$4 sm:$0xff]  }
 0x669   : > { %16217 = vmatpush1.bf16.msra.mxu1 %v23030_v37  ;;  %v23078_v37 = vld [vmem:[%s24682_s12 + $0x2498] ss:$24 sps:$4 sm:$0xff]  }
 0x66a   : > { %17226 = vmatpush1.bf16.msra.mxu0 %v23033_v11  ;;  %16218 = vmatprep.subr.bf16.mxu1 %v23038_v15  ;;  %v23081_v11 = vld [vmem:[%s24682_s12 + $0x2320] ss:$24 sps:$4 sm:$0xff]   ;;  %v23086_v15 = vld [vmem:[%s24682_s12 + $0x24cc] ss:$24 sps:$4 sm:$0xff]  }
 0x66b   : > { %17227 = vmatprep.subr.bf16.mxu0 %v23041_v23  ;;  %v23089_v23 = vld [vmem:[%s24682_s12 + $0x2354] ss:$24 sps:$4 sm:$0xff]  }
 0x66d   : > { %16219 = vmatpush1.bf16.msra.mxu1 %v23036_v62  ;;  %v23084_v62 = vld [vmem:[%s24682_s12 + $0x24c8] ss:$24 sps:$4 sm:$0xff]  }
 0x66e   : > { %17228 = vmatpush1.bf16.msra.mxu0 %v23039_v16  ;;  %16220 = vmatprep.subr.bf16.mxu1 %v23044_v60  ;;  %v23087_v16 = vld [vmem:[%s24682_s12 + $0x2350] ss:$24 sps:$4 sm:$0xff]   ;;  %v23092_v60 = vld [vmem:[%s24682_s12 + $0x24fc] ss:$24 sps:$4 sm:$0xff]  }
 0x66f   : > { %17229 = vmatprep.subr.bf16.mxu0 %v23047_v47  ;;  %v23095_v47 = vld [vmem:[%s24682_s12 + $0x2384] ss:$24 sps:$4 sm:$0xff]  }
 0x671   : > { %16221 = vmatpush1.bf16.msra.mxu1 %v23042_v41  ;;  %v23090_v41 = vld [vmem:[%s24682_s12 + $0x24f8] ss:$24 sps:$4 sm:$0xff]  }
 0x672   : > { %17230 = vmatpush1.bf16.msra.mxu0 %v23045_v43  ;;  %16222 = vmatprep.subr.bf16.mxu1 %v23050_v57  ;;  %v23093_v43 = vld [vmem:[%s24682_s12 + $0x2380] ss:$24 sps:$4 sm:$0xff]   ;;  %v23098_v57 = vld [vmem:[%s24682_s12 + $0x252c] ss:$24 sps:$4 sm:$0xff]  }
 0x673   : > { %17231 = vmatprep.subr.bf16.mxu0 %v23053_v32  ;;  %v23101_v32 = vld [vmem:[%s24682_s12 + $0x23b4] ss:$24 sps:$4 sm:$0xff]  }
 0x675   : > { %16223 = vmatpush1.bf16.msra.mxu1 %v23048_v53  ;;  %v23096_v53 = vld [vmem:[%s24682_s12 + $0x2528] ss:$24 sps:$4 sm:$0xff]  }
 0x676   : > { %17232 = vmatpush1.bf16.msra.mxu0 %v23051_v17  ;;  %16224 = vmatprep.subr.bf16.mxu1 %v23056_v59  ;;  %v23099_v17 = vld [vmem:[%s24682_s12 + $0x23b0] ss:$24 sps:$4 sm:$0xff]   ;;  %v23104_v59 = vld [vmem:[%s24682_s12 + $0x255c] ss:$24 sps:$4 sm:$0xff]  }
 0x677   : > { %17233 = vmatprep.subr.bf16.mxu0 %v23059_v10  ;;  %v23107_v10 = vld [vmem:[%s24682_s12 + $0x23e4] ss:$24 sps:$4 sm:$0xff]  }
 0x679   : > { %16225 = vmatpush1.bf16.msra.mxu1 %v23054_v42  ;;  %v23102_v42 = vld [vmem:[%s24682_s12 + $0x2558] ss:$24 sps:$4 sm:$0xff]  }
 0x67a   : > { %17234 = vmatpush1.bf16.msra.mxu0 %v23057_v35  ;;  %16235 = vmatprep.subr.bf16.mxu1 %v23062_v49  ;;  %v23105_v35 = vld [vmem:[%s24682_s12 + $0x23e0] ss:$24 sps:$4 sm:$0xff]   ;;  %v23110_v49 = vld [vmem:[%s24682_s12 + $0x258c] ss:$24 sps:$4 sm:$0xff]  }
 0x67b   : > { %17235 = vmatprep.subr.bf16.mxu0 %v23065_v19  ;;  %v23113_v19 = vld [vmem:[%s24682_s12 + $0x2414] ss:$24 sps:$4 sm:$0xff]  }
 0x67c   : > { %16227 = vmatmul.mubr.bf16.vlgmr.msra.gmra.mrb[4].mxu1 %v25822_v2 }
 0x67d   : > { %16236 = vmatpush1.bf16.msra.mxu1 %v23060_v38  ;;  %16267 = vmatprep.mubr.bf16.mxu1 %v24758_v4  ;;  %v23108_v38 = vld [vmem:[%s24682_s12 + $0x2588] ss:$24 sps:$4 sm:$0xff]  }
 0x67e   : > { %17236 = vmatpush1.bf16.msra.mxu0 %v23063_v33  ;;  %16237 = vmatprep.subr.bf16.mxu1 %v23068_v51  ;;  %v23111_v33 = vld [vmem:[%s24682_s12 + $0x2410] ss:$24 sps:$4 sm:$0xff]   ;;  %v23116_v51 = vld [vmem:[%s24682_s12 + $0x25bc] ss:$24 sps:$4 sm:$0xff]  }
 0x67f   : > { %17237 = vmatprep.subr.bf16.mxu0 %v23071_v31  ;;  %v23119_v31 = vld [vmem:[%s24682_s12 + $0x2444] ss:$24 sps:$4 sm:$0xff]  }
 0x681   : > { %16238 = vmatpush1.bf16.msra.mxu1 %v23066_v7  ;;  %v23114_v7 = vld [vmem:[%s24682_s12 + $0x25b8] ss:$24 sps:$4 sm:$0xff]  }
 0x682   : > { %17238 = vmatpush1.bf16.msra.mxu0 %v23069_v6  ;;  %16239 = vmatprep.subr.bf16.mxu1 %v23074_v48  ;;  %v23117_v6 = vld [vmem:[%s24682_s12 + $0x2440] ss:$24 sps:$4 sm:$0xff]   ;;  %v23122_v48 = vld [vmem:[%s24682_s12 + $0x25ec] ss:$24 sps:$4 sm:$0xff]  }
 0x683   : > { %17239 = vmatprep.subr.bf16.mxu0 %v23077_v21  ;;  %v23125_v21 = vld [vmem:[%s24682_s12 + $0x2474] ss:$24 sps:$4 sm:$0xff]  }
 0x685   : > { %16240 = vmatpush1.bf16.msra.mxu1 %v23072_v26  ;;  %v23120_v26 = vld [vmem:[%s24682_s12 + $0x25e8] ss:$24 sps:$4 sm:$0xff]  }
 0x686   : > { %17240 = vmatpush1.bf16.msra.mxu0 %v23075_v13  ;;  %16241 = vmatprep.subr.bf16.mxu1 %v23080_v52  ;;  %v23128_v13 = vld [vmem:[%s24682_s12 + $0x261c] ss:$24 sps:$4 sm:$0xff]  }
 0x687   : > { %17241 = vmatprep.subr.bf16.mxu0 %v23083_v0  ;;  %v23131_v52 = vld [vmem:[%s24682_s12 + $0x24a4] ss:$24 sps:$4 sm:$0xff]   ;;  %v23126_v0 = vld [vmem:[%s24682_s12 + $0x2618] ss:$24 sps:$4 sm:$0xff]  }
 0x689   : > { %16242 = vmatpush1.bf16.msra.mxu1 %v23078_v37  ;;  %v23129_v37 = vld [vmem:[%s24682_s12 + $0x24a0] ss:$24 sps:$4 sm:$0xff]  }
 0x68a   : > { %17242 = vmatpush1.bf16.msra.mxu0 %v23081_v11  ;;  %16243 = vmatprep.subr.bf16.mxu1 %v23086_v15  ;;  %v23137_v11 = vld [vmem:[%s24682_s12 + $0x24d4] ss:$24 sps:$4 sm:$0xff]   ;;  %v23132_v15 = vld [vmem:[%s24682_s12 + $0x2648] ss:$24 sps:$4 sm:$0xff]  }
 0x68b   : > { %17243 = vmatprep.subr.bf16.mxu0 %v23089_v23  ;;  %v23135_v23 = vld [vmem:[%s24682_s12 + $0x24d0] ss:$24 sps:$4 sm:$0xff]  }
 0x68d   : > { %16244 = vmatpush1.bf16.msra.mxu1 %v23084_v62  ;;  %v23140_v62 = vld [vmem:[%s24682_s12 + $0x267c] ss:$24 sps:$4 sm:$0xff]  }
 0x68e   : > { %17244 = vmatpush1.bf16.msra.mxu0 %v23087_v16  ;;  %16245 = vmatprep.subr.bf16.mxu1 %v23092_v60  ;;  %v23143_v16 = vld [vmem:[%s24682_s12 + $0x2504] ss:$24 sps:$4 sm:$0xff]   ;;  %v23138_v60 = vld [vmem:[%s24682_s12 + $0x2678] ss:$24 sps:$4 sm:$0xff]  }
 0x68f   : > { %17245 = vmatprep.subr.bf16.mxu0 %v23095_v47  ;;  %v23141_v47 = vld [vmem:[%s24682_s12 + $0x2500] ss:$24 sps:$4 sm:$0xff]  }
 0x691   : > { %16246 = vmatpush1.bf16.msra.mxu1 %v23090_v41  ;;  %v23146_v41 = vld [vmem:[%s24682_s12 + $0x26ac] ss:$24 sps:$4 sm:$0xff]  }
 0x692   : > { %17246 = vmatpush1.bf16.msra.mxu0 %v23093_v43  ;;  %16247 = vmatprep.subr.bf16.mxu1 %v23098_v57  ;;  %v23149_v43 = vld [vmem:[%s24682_s12 + $0x2534] ss:$24 sps:$4 sm:$0xff]   ;;  %v23144_v57 = vld [vmem:[%s24682_s12 + $0x26a8] ss:$24 sps:$4 sm:$0xff]  }
 0x693   : > { %17247 = vmatprep.subr.bf16.mxu0 %v23101_v32  ;;  %v23147_v32 = vld [vmem:[%s24682_s12 + $0x2530] ss:$24 sps:$4 sm:$0xff]  }
 0x695   : > { %16248 = vmatpush1.bf16.msra.mxu1 %v23096_v53  ;;  %v23152_v53 = vld [vmem:[%s24682_s12 + $0x26dc] ss:$24 sps:$4 sm:$0xff]  }
 0x696   : > { %17248 = vmatpush1.bf16.msra.mxu0 %v23099_v17  ;;  %16249 = vmatprep.subr.bf16.mxu1 %v23104_v59  ;;  %v23155_v17 = vld [vmem:[%s24682_s12 + $0x2564] ss:$24 sps:$4 sm:$0xff]   ;;  %v23150_v59 = vld [vmem:[%s24682_s12 + $0x26d8] ss:$24 sps:$4 sm:$0xff]  }
 0x697   : > { %17249 = vmatprep.subr.bf16.mxu0 %v23107_v10  ;;  %v23153_v10 = vld [vmem:[%s24682_s12 + $0x2560] ss:$24 sps:$4 sm:$0xff]  }
 0x699   : > { %16250 = vmatpush1.bf16.msra.mxu1 %v23102_v42  ;;  %v23158_v42 = vld [vmem:[%s24682_s12 + $0x270c] ss:$24 sps:$4 sm:$0xff]  }
 0x69a   : > { %17250 = vmatpush1.bf16.msra.mxu0 %v23105_v35  ;;  %16251 = vmatprep.subr.bf16.mxu1 %v23110_v49  ;;  %v23161_v35 = vld [vmem:[%s24682_s12 + $0x2594] ss:$24 sps:$4 sm:$0xff]   ;;  %v23156_v49 = vld [vmem:[%s24682_s12 + $0x2708] ss:$24 sps:$4 sm:$0xff]  }
 0x69b   : > { %17260 = vmatprep.subr.bf16.mxu0 %v23113_v19  ;;  %v23159_v19 = vld [vmem:[%s24682_s12 + $0x2590] ss:$24 sps:$4 sm:$0xff]  }
 0x69d   : > { %17252 = vmatmul.mubr.bf16.vlgmr.msra.gmra.mrb[4].mxu0 %v25822_v2  ;;  %16252 = vmatpush1.bf16.msra.mxu1 %v23108_v38  ;;  %v23123_v2 = vld [vmem:[%s24682_s12 + $0x2470] ss:$24 sps:$4 sm:$0xff]   ;;  %v23164_v38 = vld [vmem:[%s24682_s12 + $0x273c] ss:$24 sps:$4 sm:$0xff]  }
 0x69e   : > { %17261 = vmatpush1.bf16.msra.mxu0 %v23111_v33  ;;  %16253 = vmatprep.subr.bf16.mxu1 %v23116_v51  ;;  %v23167_v33 = vld [vmem:[%s24682_s12 + $0x25c4] ss:$24 sps:$4 sm:$0xff]   ;;  %v23162_v51 = vld [vmem:[%s24682_s12 + $0x2738] ss:$24 sps:$4 sm:$0xff]  }
 0x69f   : > { %17262 = vmatprep.subr.bf16.mxu0 %v23119_v31  ;;  %17292 = vmatprep.mubr.bf16.mxu0 %v24758_v4  ;;  %v23134_v4 = vld [vmem:[%s24682_s12 + $0x264c] ss:$24 sps:$4 sm:$0xff]   ;;  %v23165_v31 = vld [vmem:[%s24682_s12 + $0x25c0] ss:$24 sps:$4 sm:$0xff]  }
 0x6a1   : > { %16254 = vmatpush1.bf16.msra.mxu1 %v23114_v7  ;;  %v23170_v7 = vld [vmem:[%s24682_s12 + $0x276c] ss:$24 sps:$4 sm:$0xff]  }
 0x6a2   : > { %17263 = vmatpush1.bf16.msra.mxu0 %v23117_v6  ;;  %16255 = vmatprep.subr.bf16.mxu1 %v23122_v48  ;;  %v23173_v6 = vld [vmem:[%s24682_s12 + $0x25f4] ss:$24 sps:$4 sm:$0xff]   ;;  %v23168_v48 = vld [vmem:[%s24682_s12 + $0x2768] ss:$24 sps:$4 sm:$0xff]  }
 0x6a3   : > { %17264 = vmatprep.subr.bf16.mxu0 %v23125_v21  ;;  %v23171_v21 = vld [vmem:[%s24682_s12 + $0x25f0] ss:$24 sps:$4 sm:$0xff]  }
 0x6a5   : > { %16256 = vmatpush1.bf16.msra.mxu1 %v23120_v26  ;;  %v23176_v26 = vld [vmem:[%s24682_s12 + $0x279c] ss:$24 sps:$4 sm:$0xff]  }
 0x6a6   : > { %17265 = vmatpush1.bf16.msra.mxu0 %v23123_v2  ;;  %16257 = vmatprep.subr.bf16.mxu1 %v23128_v13  ;;  %v23179_v2 = vld [vmem:[%s24682_s12 + $0x2624] ss:$24 sps:$4 sm:$0xff]   ;;  %v23174_v13 = vld [vmem:[%s24682_s12 + $0x2798] ss:$24 sps:$4 sm:$0xff]  }
 0x6a7   : > { %17266 = vmatprep.subr.bf16.mxu0 %v23131_v52  ;;  %v23177_v52 = vld [vmem:[%s24682_s12 + $0x2620] ss:$24 sps:$4 sm:$0xff]  }
 0x6a9   : > { %16258 = vmatpush1.bf16.msra.mxu1 %v23126_v0  ;;  %v23182_v0 = vld [vmem:[%s24682_s12 + $0x27cc] ss:$24 sps:$4 sm:$0xff]  }
 0x6aa   : > { %17267 = vmatpush1.bf16.msra.mxu0 %v23129_v37  ;;  %16259 = vmatprep.subr.bf16.mxu1 %v23134_v4  ;;  %v23185_v37 = vld [vmem:[%s24682_s12 + $0x2654] ss:$24 sps:$4 sm:$0xff]   ;;  %v23180_v4 = vld [vmem:[%s24682_s12 + $0x27c8] ss:$24 sps:$4 sm:$0xff]  }
 0x6ab   : > { %17268 = vmatprep.subr.bf16.mxu0 %v23137_v11  ;;  %v23183_v11 = vld [vmem:[%s24682_s12 + $0x2650] ss:$24 sps:$4 sm:$0xff]  }
 0x6ad   : > { %16260 = vmatpush1.bf16.msra.mxu1 %v23132_v15  ;;  %v23188_v15 = vld [vmem:[%s24682_s12 + $0x27fc] ss:$24 sps:$4 sm:$0xff]  }
 0x6ae   : > { %17269 = vmatpush1.bf16.msra.mxu0 %v23135_v23  ;;  %16261 = vmatprep.subr.bf16.mxu1 %v23140_v62  ;;  %v23191_v23 = vld [vmem:[%s24682_s12 + $0x2684] ss:$24 sps:$4 sm:$0xff]   ;;  %v23186_v62 = vld [vmem:[%s24682_s12 + $0x27f8] ss:$24 sps:$4 sm:$0xff]  }
 0x6af   : > { %17270 = vmatprep.subr.bf16.mxu0 %v23143_v16  ;;  %v23189_v16 = vld [vmem:[%s24682_s12 + $0x2680] ss:$24 sps:$4 sm:$0xff]  }
 0x6b1   : > { %16262 = vmatpush1.bf16.msra.mxu1 %v23138_v60  ;;  %v23194_v60 = vld [vmem:[%s24682_s12 + $0x282c] ss:$24 sps:$4 sm:$0xff]  }
 0x6b2   : > { %17271 = vmatpush1.bf16.msra.mxu0 %v23141_v47  ;;  %16263 = vmatprep.subr.bf16.mxu1 %v23146_v41  ;;  %v23197_v47 = vld [vmem:[%s24682_s12 + $0x26b4] ss:$24 sps:$4 sm:$0xff]   ;;  %v23192_v41 = vld [vmem:[%s24682_s12 + $0x2828] ss:$24 sps:$4 sm:$0xff]  }
 0x6b3   : > { %17272 = vmatprep.subr.bf16.mxu0 %v23149_v43  ;;  %v23195_v43 = vld [vmem:[%s24682_s12 + $0x26b0] ss:$24 sps:$4 sm:$0xff]  }
 0x6b5   : > { %16264 = vmatpush1.bf16.msra.mxu1 %v23144_v57  ;;  %v23200_v57 = vld [vmem:[%s24682_s12 + $0x285c] ss:$24 sps:$4 sm:$0xff]  }
 0x6b6   : > { %17273 = vmatpush1.bf16.msra.mxu0 %v23147_v32  ;;  %16265 = vmatprep.subr.bf16.mxu1 %v23152_v53  ;;  %v23203_v32 = vld [vmem:[%s24682_s12 + $0x26e4] ss:$24 sps:$4 sm:$0xff]   ;;  %v23198_v53 = vld [vmem:[%s24682_s12 + $0x2858] ss:$24 sps:$4 sm:$0xff]  }
 0x6b7   : > { %17274 = vmatprep.subr.bf16.mxu0 %v23155_v17  ;;  %v23201_v17 = vld [vmem:[%s24682_s12 + $0x26e0] ss:$24 sps:$4 sm:$0xff]  }
 0x6b9   : > { %16266 = vmatpush1.bf16.msra.mxu1 %v23150_v59  ;;  %v23206_v59 = vld [vmem:[%s24682_s12 + $0x288c] ss:$24 sps:$4 sm:$0xff]  }
 0x6ba   : > { %17275 = vmatpush1.bf16.msra.mxu0 %v23153_v10  ;;  %16276 = vmatprep.subr.bf16.mxu1 %v23158_v42  ;;  %v23209_v10 = vld [vmem:[%s24682_s12 + $0x2714] ss:$24 sps:$4 sm:$0xff]   ;;  %v23204_v42 = vld [vmem:[%s24682_s12 + $0x2888] ss:$24 sps:$4 sm:$0xff]  }
 0x6bb   : > { %17276 = vmatprep.subr.bf16.mxu0 %v23161_v35  ;;  %v23207_v35 = vld [vmem:[%s24682_s12 + $0x2710] ss:$24 sps:$4 sm:$0xff]  }
 0x6bc   : > { %16268 = vmatmul.mubr.bf16.vlgmr.msra.gmra.mrb[4].mxu1 %v24786_v24 }
 0x6bd   : > { %16277 = vmatpush1.bf16.msra.mxu1 %v23156_v49  ;;  %16308 = vmatprep.mubr.bf16.mxu1 %v24794_v30  ;;  %v23212_v49 = vld [vmem:[%s24682_s12 + $0x28bc] ss:$24 sps:$4 sm:$0xff]  }
 0x6be   : > { %17277 = vmatpush1.bf16.msra.mxu0 %v23159_v19  ;;  %16278 = vmatprep.subr.bf16.mxu1 %v23164_v38  ;;  %v23215_v19 = vld [vmem:[%s24682_s12 + $0x2744] ss:$24 sps:$4 sm:$0xff]   ;;  %v23210_v38 = vld [vmem:[%s24682_s12 + $0x28b8] ss:$24 sps:$4 sm:$0xff]  }
 0x6bf   : > { %17278 = vmatprep.subr.bf16.mxu0 %v23167_v33  ;;  %v23213_v33 = vld [vmem:[%s24682_s12 + $0x2740] ss:$24 sps:$4 sm:$0xff]  }
 0x6c1   : > { %16279 = vmatpush1.bf16.msra.mxu1 %v23162_v51  ;;  %v23218_v51 = vld [vmem:[%s24682_s12 + $0x28ec] ss:$24 sps:$4 sm:$0xff]  }
 0x6c2   : > { %17279 = vmatpush1.bf16.msra.mxu0 %v23165_v31  ;;  %16280 = vmatprep.subr.bf16.mxu1 %v23170_v7  ;;  %v23221_v31 = vld [vmem:[%s24682_s12 + $0x2774] ss:$24 sps:$4 sm:$0xff]   ;;  %v23216_v7 = vld [vmem:[%s24682_s12 + $0x28e8] ss:$24 sps:$4 sm:$0xff]  }
 0x6c3   : > { %17280 = vmatprep.subr.bf16.mxu0 %v23173_v6  ;;  %v23224_v6 = vld [vmem:[%s24682_s12 + $0x291c] ss:$24 sps:$4 sm:$0xff]  }
 0x6c5   : > { %16281 = vmatpush1.bf16.msra.mxu1 %v23168_v48  ;;  %v23227_v48 = vld [vmem:[%s24682_s12 + $0x27a4] ss:$24 sps:$4 sm:$0xff]  }
 0x6c6   : > { %17281 = vmatpush1.bf16.msra.mxu0 %v23171_v21  ;;  %16282 = vmatprep.subr.bf16.mxu1 %v23176_v26  ;;  %v23222_v21 = vld [vmem:[%s24682_s12 + $0x2918] ss:$24 sps:$4 sm:$0xff]  }
 0x6c7   : > { %17282 = vmatprep.subr.bf16.mxu0 %v23179_v2  ;;  %v23225_v26 = vld [vmem:[%s24682_s12 + $0x27a0] ss:$24 sps:$4 sm:$0xff]   ;;  %v23233_v2 = vld [vmem:[%s24682_s12 + $0x27d4] ss:$24 sps:$4 sm:$0xff]  }
 0x6c9   : > { %16283 = vmatpush1.bf16.msra.mxu1 %v23174_v13  ;;  %v23228_v13 = vld [vmem:[%s24682_s12 + $0x2948] ss:$24 sps:$4 sm:$0xff]  }
 0x6ca   : > { %17283 = vmatpush1.bf16.msra.mxu0 %v23177_v52  ;;  %16284 = vmatprep.subr.bf16.mxu1 %v23182_v0  ;;  %v23231_v52 = vld [vmem:[%s24682_s12 + $0x27d0] ss:$24 sps:$4 sm:$0xff]   ;;  %v23236_v0 = vld [vmem:[%s24682_s12 + $0x297c] ss:$24 sps:$4 sm:$0xff]  }
 0x6cb   : > { %17284 = vmatprep.subr.bf16.mxu0 %v23185_v37  ;;  %v23239_v37 = vld [vmem:[%s24682_s12 + $0x2804] ss:$24 sps:$4 sm:$0xff]  }
 0x6cd   : > { %16285 = vmatpush1.bf16.msra.mxu1 %v23180_v4  ;;  %v23234_v4 = vld [vmem:[%s24682_s12 + $0x2978] ss:$24 sps:$4 sm:$0xff]  }
 0x6ce   : > { %17285 = vmatpush1.bf16.msra.mxu0 %v23183_v11  ;;  %16286 = vmatprep.subr.bf16.mxu1 %v23188_v15  ;;  %v23237_v11 = vld [vmem:[%s24682_s12 + $0x2800] ss:$24 sps:$4 sm:$0xff]   ;;  %v23242_v15 = vld [vmem:[%s24682_s12 + $0x29ac] ss:$24 sps:$4 sm:$0xff]  }
 0x6cf   : > { %17286 = vmatprep.subr.bf16.mxu0 %v23191_v23  ;;  %v23245_v23 = vld [vmem:[%s24682_s12 + $0x2834] ss:$24 sps:$4 sm:$0xff]  }
 0x6d1   : > { %16287 = vmatpush1.bf16.msra.mxu1 %v23186_v62  ;;  %v23240_v62 = vld [vmem:[%s24682_s12 + $0x29a8] ss:$24 sps:$4 sm:$0xff]  }
 0x6d2   : > { %17287 = vmatpush1.bf16.msra.mxu0 %v23189_v16  ;;  %16288 = vmatprep.subr.bf16.mxu1 %v23194_v60  ;;  %v23243_v16 = vld [vmem:[%s24682_s12 + $0x2830] ss:$24 sps:$4 sm:$0xff]   ;;  %v23248_v60 = vld [vmem:[%s24682_s12 + $0x29dc] ss:$24 sps:$4 sm:$0xff]  }
 0x6d3   : > { %17288 = vmatprep.subr.bf16.mxu0 %v23197_v47  ;;  %v23251_v47 = vld [vmem:[%s24682_s12 + $0x2864] ss:$24 sps:$4 sm:$0xff]  }
 0x6d5   : > { %16289 = vmatpush1.bf16.msra.mxu1 %v23192_v41  ;;  %v23246_v41 = vld [vmem:[%s24682_s12 + $0x29d8] ss:$24 sps:$4 sm:$0xff]  }
 0x6d6   : > { %17289 = vmatpush1.bf16.msra.mxu0 %v23195_v43  ;;  %16290 = vmatprep.subr.bf16.mxu1 %v23200_v57  ;;  %v23249_v43 = vld [vmem:[%s24682_s12 + $0x2860] ss:$24 sps:$4 sm:$0xff]   ;;  %v23254_v57 = vld [vmem:[%s24682_s12 + $0x2a0c] ss:$24 sps:$4 sm:$0xff]  }
 0x6d7   : > { %17290 = vmatprep.subr.bf16.mxu0 %v23203_v32  ;;  %v23257_v32 = vld [vmem:[%s24682_s12 + $0x2894] ss:$24 sps:$4 sm:$0xff]  }
 0x6d9   : > { %16291 = vmatpush1.bf16.msra.mxu1 %v23198_v53  ;;  %v23252_v53 = vld [vmem:[%s24682_s12 + $0x2a08] ss:$24 sps:$4 sm:$0xff]  }
 0x6da   : > { %17291 = vmatpush1.bf16.msra.mxu0 %v23201_v17  ;;  %16292 = vmatprep.subr.bf16.mxu1 %v23206_v59  ;;  %v23255_v17 = vld [vmem:[%s24682_s12 + $0x2890] ss:$24 sps:$4 sm:$0xff]   ;;  %v23260_v59 = vld [vmem:[%s24682_s12 + $0x2a3c] ss:$24 sps:$4 sm:$0xff]  }
 0x6db   : > { %17301 = vmatprep.subr.bf16.mxu0 %v23209_v10  ;;  %v23263_v10 = vld [vmem:[%s24682_s12 + $0x28c4] ss:$24 sps:$4 sm:$0xff]  }
 0x6dd   : > { %17293 = vmatmul.mubr.bf16.vlgmr.msra.gmra.mrb[4].mxu0 %v24786_v24  ;;  %16293 = vmatpush1.bf16.msra.mxu1 %v23204_v42  ;;  %v23219_v24 = vld [vmem:[%s24682_s12 + $0x2770] ss:$24 sps:$4 sm:$0xff]  }
 0x6de   : > { %17302 = vmatpush1.bf16.msra.mxu0 %v23207_v35  ;;  %16294 = vmatprep.subr.bf16.mxu1 %v23212_v49  ;;  %v23258_v42 = vld [vmem:[%s24682_s12 + $0x2a38] ss:$24 sps:$4 sm:$0xff]   ;;  %v23266_v49 = vld [vmem:[%s24682_s12 + $0x2a6c] ss:$24 sps:$4 sm:$0xff]  }
 0x6df   : > { %17303 = vmatprep.subr.bf16.mxu0 %v23215_v19  ;;  %17333 = vmatprep.mubr.bf16.mxu0 %v24794_v30  ;;  %v23230_v30 = vld [vmem:[%s24682_s12 + $0x294c] ss:$24 sps:$4 sm:$0xff]   ;;  %v23261_v35 = vld [vmem:[%s24682_s12 + $0x28c0] ss:$24 sps:$4 sm:$0xff]  }
 0x6e0   : > { %v23269_v19 = vld [vmem:[%s24682_s12 + $0x28f4] ss:$24 sps:$4 sm:$0xff]  }
 0x6e1   : > { %16295 = vmatpush1.bf16.msra.mxu1 %v23210_v38  ;;  %v23264_v38 = vld [vmem:[%s24682_s12 + $0x2a68] ss:$24 sps:$4 sm:$0xff]  }
 0x6e2   : > { %17304 = vmatpush1.bf16.msra.mxu0 %v23213_v33  ;;  %16296 = vmatprep.subr.bf16.mxu1 %v23218_v51  ;;  %v23267_v33 = vld [vmem:[%s24682_s12 + $0x28f0] ss:$24 sps:$4 sm:$0xff]   ;;  %v23272_v51 = vld [vmem:[%s24682_s12 + $0x2a9c] ss:$24 sps:$4 sm:$0xff]  }
 0x6e3   : > { %17305 = vmatprep.subr.bf16.mxu0 %v23221_v31  ;;  %v23275_v31 = vld [vmem:[%s24682_s12 + $0x2924] ss:$24 sps:$4 sm:$0xff]  }
 0x6e5   : > { %16297 = vmatpush1.bf16.msra.mxu1 %v23216_v7  ;;  %v23270_v7 = vld [vmem:[%s24682_s12 + $0x2a98] ss:$24 sps:$4 sm:$0xff]  }
 0x6e6   : > { %17306 = vmatpush1.bf16.msra.mxu0 %v23219_v24  ;;  %16298 = vmatprep.subr.bf16.mxu1 %v23224_v6  ;;  %v23273_v24 = vld [vmem:[%s24682_s12 + $0x2920] ss:$24 sps:$4 sm:$0xff]   ;;  %v23278_v6 = vld [vmem:[%s24682_s12 + $0x2acc] ss:$24 sps:$4 sm:$0xff]  }
 0x6e7   : > { %17307 = vmatprep.subr.bf16.mxu0 %v23227_v48  ;;  %v23281_v48 = vld [vmem:[%s24682_s12 + $0x2954] ss:$24 sps:$4 sm:$0xff]  }
 0x6e9   : > { %16299 = vmatpush1.bf16.msra.mxu1 %v23222_v21  ;;  %v23276_v21 = vld [vmem:[%s24682_s12 + $0x2ac8] ss:$24 sps:$4 sm:$0xff]  }
 0x6ea   : > { %17308 = vmatpush1.bf16.msra.mxu0 %v23225_v26  ;;  %16300 = vmatprep.subr.bf16.mxu1 %v23230_v30  ;;  %v23279_v26 = vld [vmem:[%s24682_s12 + $0x2950] ss:$24 sps:$4 sm:$0xff]   ;;  %v23284_v30 = vld [vmem:[%s24682_s12 + $0x2afc] ss:$24 sps:$4 sm:$0xff]  }
 0x6eb   : > { %17309 = vmatprep.subr.bf16.mxu0 %v23233_v2  ;;  %v23287_v2 = vld [vmem:[%s24682_s12 + $0x2984] ss:$24 sps:$4 sm:$0xff]  }
 0x6ed   : > { %16301 = vmatpush1.bf16.msra.mxu1 %v23228_v13  ;;  %v23282_v13 = vld [vmem:[%s24682_s12 + $0x2af8] ss:$24 sps:$4 sm:$0xff]  }
 0x6ee   : > { %17310 = vmatpush1.bf16.msra.mxu0 %v23231_v52  ;;  %16302 = vmatprep.subr.bf16.mxu1 %v23236_v0  ;;  %v23285_v52 = vld [vmem:[%s24682_s12 + $0x2980] ss:$24 sps:$4 sm:$0xff]   ;;  %v23290_v0 = vld [vmem:[%s24682_s12 + $0x2b2c] ss:$24 sps:$4 sm:$0xff]  }
 0x6ef   : > { %17311 = vmatprep.subr.bf16.mxu0 %v23239_v37  ;;  %v23293_v37 = vld [vmem:[%s24682_s12 + $0x29b4] ss:$24 sps:$4 sm:$0xff]  }
 0x6f1   : > { %16303 = vmatpush1.bf16.msra.mxu1 %v23234_v4  ;;  %v23288_v4 = vld [vmem:[%s24682_s12 + $0x2b28] ss:$24 sps:$4 sm:$0xff]  }
 0x6f2   : > { %17312 = vmatpush1.bf16.msra.mxu0 %v23237_v11  ;;  %16304 = vmatprep.subr.bf16.mxu1 %v23242_v15  ;;  %v23291_v11 = vld [vmem:[%s24682_s12 + $0x29b0] ss:$24 sps:$4 sm:$0xff]   ;;  %v23296_v15 = vld [vmem:[%s24682_s12 + $0x2b5c] ss:$24 sps:$4 sm:$0xff]  }
 0x6f3   : > { %17313 = vmatprep.subr.bf16.mxu0 %v23245_v23  ;;  %v23299_v23 = vld [vmem:[%s24682_s12 + $0x29e4] ss:$24 sps:$4 sm:$0xff]  }
 0x6f5   : > { %16305 = vmatpush1.bf16.msra.mxu1 %v23240_v62  ;;  %v23294_v62 = vld [vmem:[%s24682_s12 + $0x2b58] ss:$24 sps:$4 sm:$0xff]  }
 0x6f6   : > { %17314 = vmatpush1.bf16.msra.mxu0 %v23243_v16  ;;  %16306 = vmatprep.subr.bf16.mxu1 %v23248_v60  ;;  %v23297_v16 = vld [vmem:[%s24682_s12 + $0x29e0] ss:$24 sps:$4 sm:$0xff]   ;;  %v23302_v60 = vld [vmem:[%s24682_s12 + $0x2b8c] ss:$24 sps:$4 sm:$0xff]  }
 0x6f7   : > { %17315 = vmatprep.subr.bf16.mxu0 %v23251_v47  ;;  %v23305_v47 = vld [vmem:[%s24682_s12 + $0x2a14] ss:$24 sps:$4 sm:$0xff]  }
 0x6f9   : > { %16307 = vmatpush1.bf16.msra.mxu1 %v23246_v41  ;;  %v23300_v41 = vld [vmem:[%s24682_s12 + $0x2b88] ss:$24 sps:$4 sm:$0xff]  }
 0x6fa   : > { %17316 = vmatpush1.bf16.msra.mxu0 %v23249_v43  ;;  %16317 = vmatprep.subr.bf16.mxu1 %v23254_v57  ;;  %v23303_v43 = vld [vmem:[%s24682_s12 + $0x2a10] ss:$24 sps:$4 sm:$0xff]   ;;  %v23308_v57 = vld [vmem:[%s24682_s12 + $0x2bbc] ss:$24 sps:$4 sm:$0xff]  }
 0x6fb   : > { %17317 = vmatprep.subr.bf16.mxu0 %v23257_v32  ;;  %v23311_v32 = vld [vmem:[%s24682_s12 + $0x2a44] ss:$24 sps:$4 sm:$0xff]  }
 0x6fc   : > { %16309 = vmatmul.mubr.bf16.vlgmr.msra.gmra.mrb[4].mxu1 %v24867_v39 }
 0x6fd   : > { %16318 = vmatpush1.bf16.msra.mxu1 %v23252_v53  ;;  %16349 = vmatprep.mubr.bf16.mxu1 %v24901_v56  ;;  %v23306_v53 = vld [vmem:[%s24682_s12 + $0x2bb8] ss:$24 sps:$4 sm:$0xff]  }
 0x6fe   : > { %17318 = vmatpush1.bf16.msra.mxu0 %v23255_v17  ;;  %16319 = vmatprep.subr.bf16.mxu1 %v23260_v59  ;;  %v23309_v17 = vld [vmem:[%s24682_s12 + $0x2a40] ss:$24 sps:$4 sm:$0xff]   ;;  %v23314_v59 = vld [vmem:[%s24682_s12 + $0x2bec] ss:$24 sps:$4 sm:$0xff]  }
 0x6ff   : > { %17319 = vmatprep.subr.bf16.mxu0 %v23263_v10  ;;  %v23317_v10 = vld [vmem:[%s24682_s12 + $0x2a74] ss:$24 sps:$4 sm:$0xff]  }
 0x701   : > { %16320 = vmatpush1.bf16.msra.mxu1 %v23258_v42  ;;  %v23312_v42 = vld [vmem:[%s24682_s12 + $0x2be8] ss:$24 sps:$4 sm:$0xff]  }
 0x702   : > { %17320 = vmatpush1.bf16.msra.mxu0 %v23261_v35  ;;  %16321 = vmatprep.subr.bf16.mxu1 %v23266_v49  ;;  %v23320_v35 = vld [vmem:[%s24682_s12 + $0x2c1c] ss:$24 sps:$4 sm:$0xff]  }
 0x703   : > { %17321 = vmatprep.subr.bf16.mxu0 %v23269_v19  ;;  %v23323_v49 = vld [vmem:[%s24682_s12 + $0x2aa4] ss:$24 sps:$4 sm:$0xff]   ;;  %v23318_v19 = vld [vmem:[%s24682_s12 + $0x2c18] ss:$24 sps:$4 sm:$0xff]  }
 0x705   : > { %16322 = vmatpush1.bf16.msra.mxu1 %v23264_v38  ;;  %v23321_v38 = vld [vmem:[%s24682_s12 + $0x2aa0] ss:$24 sps:$4 sm:$0xff]  }
 0x706   : > { %17322 = vmatpush1.bf16.msra.mxu0 %v23267_v33  ;;  %16323 = vmatprep.subr.bf16.mxu1 %v23272_v51  ;;  %v23329_v33 = vld [vmem:[%s24682_s12 + $0x2ad4] ss:$24 sps:$4 sm:$0xff]   ;;  %v23324_v51 = vld [vmem:[%s24682_s12 + $0x2c48] ss:$24 sps:$4 sm:$0xff]  }
 0x707   : > { %17323 = vmatprep.subr.bf16.mxu0 %v23275_v31  ;;  %v23327_v31 = vld [vmem:[%s24682_s12 + $0x2ad0] ss:$24 sps:$4 sm:$0xff]  }
 0x709   : > { %16324 = vmatpush1.bf16.msra.mxu1 %v23270_v7  ;;  %v23332_v7 = vld [vmem:[%s24682_s12 + $0x2c7c] ss:$24 sps:$4 sm:$0xff]  }
 0x70a   : > { %17324 = vmatpush1.bf16.msra.mxu0 %v23273_v24  ;;  %16325 = vmatprep.subr.bf16.mxu1 %v23278_v6  ;;  %v23335_v24 = vld [vmem:[%s24682_s12 + $0x2b04] ss:$24 sps:$4 sm:$0xff]   ;;  %v23330_v6 = vld [vmem:[%s24682_s12 + $0x2c78] ss:$24 sps:$4 sm:$0xff]  }
 0x70b   : > { %17325 = vmatprep.subr.bf16.mxu0 %v23281_v48  ;;  %v23333_v48 = vld [vmem:[%s24682_s12 + $0x2b00] ss:$24 sps:$4 sm:$0xff]  }
 0x70d   : > { %16326 = vmatpush1.bf16.msra.mxu1 %v23276_v21  ;;  %v23338_v21 = vld [vmem:[%s24682_s12 + $0x2cac] ss:$24 sps:$4 sm:$0xff]  }
 0x70e   : > { %17326 = vmatpush1.bf16.msra.mxu0 %v23279_v26  ;;  %16327 = vmatprep.subr.bf16.mxu1 %v23284_v30  ;;  %v23341_v26 = vld [vmem:[%s24682_s12 + $0x2b34] ss:$24 sps:$4 sm:$0xff]   ;;  %v23336_v30 = vld [vmem:[%s24682_s12 + $0x2ca8] ss:$24 sps:$4 sm:$0xff]  }
 0x70f   : > { %17327 = vmatprep.subr.bf16.mxu0 %v23287_v2  ;;  %v23339_v2 = vld [vmem:[%s24682_s12 + $0x2b30] ss:$24 sps:$4 sm:$0xff]  }
 0x711   : > { %16328 = vmatpush1.bf16.msra.mxu1 %v23282_v13  ;;  %v23344_v13 = vld [vmem:[%s24682_s12 + $0x2cdc] ss:$24 sps:$4 sm:$0xff]  }
 0x712   : > { %17328 = vmatpush1.bf16.msra.mxu0 %v23285_v52  ;;  %16329 = vmatprep.subr.bf16.mxu1 %v23290_v0  ;;  %v23347_v52 = vld [vmem:[%s24682_s12 + $0x2b64] ss:$24 sps:$4 sm:$0xff]   ;;  %v23342_v0 = vld [vmem:[%s24682_s12 + $0x2cd8] ss:$24 sps:$4 sm:$0xff]  }
 0x713   : > { %17329 = vmatprep.subr.bf16.mxu0 %v23293_v37  ;;  %v23345_v37 = vld [vmem:[%s24682_s12 + $0x2b60] ss:$24 sps:$4 sm:$0xff]  }
 0x715   : > { %16330 = vmatpush1.bf16.msra.mxu1 %v23288_v4  ;;  %v23350_v4 = vld [vmem:[%s24682_s12 + $0x2d0c] ss:$24 sps:$4 sm:$0xff]  }
 0x716   : > { %17330 = vmatpush1.bf16.msra.mxu0 %v23291_v11  ;;  %16331 = vmatprep.subr.bf16.mxu1 %v23296_v15  ;;  %v23353_v11 = vld [vmem:[%s24682_s12 + $0x2b94] ss:$24 sps:$4 sm:$0xff]   ;;  %v23348_v15 = vld [vmem:[%s24682_s12 + $0x2d08] ss:$24 sps:$4 sm:$0xff]  }
 0x717   : > { %17331 = vmatprep.subr.bf16.mxu0 %v23299_v23  ;;  %v23351_v23 = vld [vmem:[%s24682_s12 + $0x2b90] ss:$24 sps:$4 sm:$0xff]  }
 0x719   : > { %16332 = vmatpush1.bf16.msra.mxu1 %v23294_v62  ;;  %v23356_v62 = vld [vmem:[%s24682_s12 + $0x2d3c] ss:$24 sps:$4 sm:$0xff]  }
 0x71a   : > { %17332 = vmatpush1.bf16.msra.mxu0 %v23297_v16  ;;  %16333 = vmatprep.subr.bf16.mxu1 %v23302_v60  ;;  %v23359_v16 = vld [vmem:[%s24682_s12 + $0x2bc4] ss:$24 sps:$4 sm:$0xff]   ;;  %v23354_v60 = vld [vmem:[%s24682_s12 + $0x2d38] ss:$24 sps:$4 sm:$0xff]  }
 0x71b   : > { %17342 = vmatprep.subr.bf16.mxu0 %v23305_v47  ;;  %v23357_v47 = vld [vmem:[%s24682_s12 + $0x2bc0] ss:$24 sps:$4 sm:$0xff]  }
 0x71d   : > { %17334 = vmatmul.mubr.bf16.vlgmr.msra.gmra.mrb[4].mxu0 %v24867_v39  ;;  %16334 = vmatpush1.bf16.msra.mxu1 %v23300_v41  ;;  %v23315_v39 = vld [vmem:[%s24682_s12 + $0x2a70] ss:$24 sps:$4 sm:$0xff]   ;;  %v23362_v41 = vld [vmem:[%s24682_s12 + $0x2d6c] ss:$24 sps:$4 sm:$0xff]  }
 0x71e   : > { %17343 = vmatpush1.bf16.msra.mxu0 %v23303_v43  ;;  %16335 = vmatprep.subr.bf16.mxu1 %v23308_v57  ;;  %v23365_v43 = vld [vmem:[%s24682_s12 + $0x2bf4] ss:$24 sps:$4 sm:$0xff]   ;;  %v23360_v57 = vld [vmem:[%s24682_s12 + $0x2d68] ss:$24 sps:$4 sm:$0xff]  }
 0x71f   : > { %17344 = vmatprep.subr.bf16.mxu0 %v23311_v32  ;;  %17374 = vmatprep.mubr.bf16.mxu0 %v24901_v56  ;;  %v23326_v56 = vld [vmem:[%s24682_s12 + $0x2c4c] ss:$24 sps:$4 sm:$0xff]   ;;  %v23363_v32 = vld [vmem:[%s24682_s12 + $0x2bf0] ss:$24 sps:$4 sm:$0xff]  }
 0x721   : > { %16336 = vmatpush1.bf16.msra.mxu1 %v23306_v53  ;;  %v23368_v53 = vld [vmem:[%s24682_s12 + $0x2d9c] ss:$24 sps:$4 sm:$0xff]  }
 0x722   : > { %17345 = vmatpush1.bf16.msra.mxu0 %v23309_v17  ;;  %16337 = vmatprep.subr.bf16.mxu1 %v23314_v59  ;;  %v23371_v17 = vld [vmem:[%s24682_s12 + $0x2c24] ss:$24 sps:$4 sm:$0xff]   ;;  %v23366_v59 = vld [vmem:[%s24682_s12 + $0x2d98] ss:$24 sps:$4 sm:$0xff]  }
 0x723   : > { %17346 = vmatprep.subr.bf16.mxu0 %v23317_v10  ;;  %v23369_v10 = vld [vmem:[%s24682_s12 + $0x2c20] ss:$24 sps:$4 sm:$0xff]  }
 0x725   : > { %16338 = vmatpush1.bf16.msra.mxu1 %v23312_v42  ;;  %v23374_v42 = vld [vmem:[%s24682_s12 + $0x2dcc] ss:$24 sps:$4 sm:$0xff]  }
 0x726   : > { %17347 = vmatpush1.bf16.msra.mxu0 %v23315_v39  ;;  %16339 = vmatprep.subr.bf16.mxu1 %v23320_v35  ;;  %v23377_v39 = vld [vmem:[%s24682_s12 + $0x2c54] ss:$24 sps:$4 sm:$0xff]   ;;  %v23372_v35 = vld [vmem:[%s24682_s12 + $0x2dc8] ss:$24 sps:$4 sm:$0xff]  }
 0x727   : > { %17348 = vmatprep.subr.bf16.mxu0 %v23323_v49  ;;  %v23375_v49 = vld [vmem:[%s24682_s12 + $0x2c50] ss:$24 sps:$4 sm:$0xff]  }
 0x729   : > { %16340 = vmatpush1.bf16.msra.mxu1 %v23318_v19  ;;  %v23380_v19 = vld [vmem:[%s24682_s12 + $0x2dfc] ss:$24 sps:$4 sm:$0xff]  }
 0x72a   : > { %17349 = vmatpush1.bf16.msra.mxu0 %v23321_v38  ;;  %16341 = vmatprep.subr.bf16.mxu1 %v23326_v56  ;;  %v23383_v38 = vld [vmem:[%s24682_s12 + $0x2c84] ss:$24 sps:$4 sm:$0xff]   ;;  %v23378_v56 = vld [vmem:[%s24682_s12 + $0x2df8] ss:$24 sps:$4 sm:$0xff]  }
 0x72b   : > { %17350 = vmatprep.subr.bf16.mxu0 %v23329_v33  ;;  %v23381_v33 = vld [vmem:[%s24682_s12 + $0x2c80] ss:$24 sps:$4 sm:$0xff]  }
 0x72d   : > { %16342 = vmatpush1.bf16.msra.mxu1 %v23324_v51  ;;  %v23386_v51 = vld [vmem:[%s24682_s12 + $0x2e2c] ss:$24 sps:$4 sm:$0xff]  }
 0x72e   : > { %17351 = vmatpush1.bf16.msra.mxu0 %v23327_v31  ;;  %16343 = vmatprep.subr.bf16.mxu1 %v23332_v7  ;;  %v23389_v31 = vld [vmem:[%s24682_s12 + $0x2cb4] ss:$24 sps:$4 sm:$0xff]   ;;  %v23384_v7 = vld [vmem:[%s24682_s12 + $0x2e28] ss:$24 sps:$4 sm:$0xff]  }
 0x72f   : > { %17352 = vmatprep.subr.bf16.mxu0 %v23335_v24  ;;  %v23387_v24 = vld [vmem:[%s24682_s12 + $0x2cb0] ss:$24 sps:$4 sm:$0xff]  }
 0x731   : > { %16344 = vmatpush1.bf16.msra.mxu1 %v23330_v6  ;;  %v23392_v6 = vld [vmem:[%s24682_s12 + $0x2e5c] ss:$24 sps:$4 sm:$0xff]  }
 0x732   : > { %17353 = vmatpush1.bf16.msra.mxu0 %v23333_v48  ;;  %16345 = vmatprep.subr.bf16.mxu1 %v23338_v21  ;;  %v23395_v48 = vld [vmem:[%s24682_s12 + $0x2ce4] ss:$24 sps:$4 sm:$0xff]   ;;  %v23390_v21 = vld [vmem:[%s24682_s12 + $0x2e58] ss:$24 sps:$4 sm:$0xff]  }
 0x733   : > { %17354 = vmatprep.subr.bf16.mxu0 %v23341_v26  ;;  %v23393_v26 = vld [vmem:[%s24682_s12 + $0x2ce0] ss:$24 sps:$4 sm:$0xff]  }
 0x735   : > { %16346 = vmatpush1.bf16.msra.mxu1 %v23336_v30  ;;  %v23398_v30 = vld [vmem:[%s24682_s12 + $0x2e8c] ss:$24 sps:$4 sm:$0xff]  }
 0x736   : > { %17355 = vmatpush1.bf16.msra.mxu0 %v23339_v2  ;;  %16347 = vmatprep.subr.bf16.mxu1 %v23344_v13  ;;  %v23401_v2 = vld [vmem:[%s24682_s12 + $0x2d14] ss:$24 sps:$4 sm:$0xff]   ;;  %v23396_v13 = vld [vmem:[%s24682_s12 + $0x2e88] ss:$24 sps:$4 sm:$0xff]  }
 0x737   : > { %17356 = vmatprep.subr.bf16.mxu0 %v23347_v52  ;;  %v23399_v52 = vld [vmem:[%s24682_s12 + $0x2d10] ss:$24 sps:$4 sm:$0xff]  }
 0x739   : > { %16348 = vmatpush1.bf16.msra.mxu1 %v23342_v0  ;;  %v23404_v0 = vld [vmem:[%s24682_s12 + $0x2ebc] ss:$24 sps:$4 sm:$0xff]  }
 0x73a   : > { %17357 = vmatpush1.bf16.msra.mxu0 %v23345_v37  ;;  %16358 = vmatprep.subr.bf16.mxu1 %v23350_v4  ;;  %v23407_v37 = vld [vmem:[%s24682_s12 + $0x2d44] ss:$24 sps:$4 sm:$0xff]   ;;  %v23402_v4 = vld [vmem:[%s24682_s12 + $0x2eb8] ss:$24 sps:$4 sm:$0xff]  }
 0x73b   : > { %17358 = vmatprep.subr.bf16.mxu0 %v23353_v11  ;;  %v23405_v11 = vld [vmem:[%s24682_s12 + $0x2d40] ss:$24 sps:$4 sm:$0xff]  }
 0x73c   : > { %16350 = vmatmul.mubr.bf16.vlgmr.msra.gmra.mrb[4].mxu1 %v24980_v8 }
 0x73d   : > { %16359 = vmatpush1.bf16.msra.mxu1 %v23348_v15  ;;  %16390 = vmatprep.mubr.bf16.mxu1 %v24986_v12  ;;  %v23410_v15 = vld [vmem:[%s24682_s12 + $0x2eec] ss:$24 sps:$4 sm:$0xff]  }
 0x73e   : > { %17359 = vmatpush1.bf16.msra.mxu0 %v23351_v23  ;;  %16360 = vmatprep.subr.bf16.mxu1 %v23356_v62  ;;  %v23413_v23 = vld [vmem:[%s24682_s12 + $0x2d74] ss:$24 sps:$4 sm:$0xff]   ;;  %v23408_v62 = vld [vmem:[%s24682_s12 + $0x2ee8] ss:$24 sps:$4 sm:$0xff]  }
 0x73f   : > { %17360 = vmatprep.subr.bf16.mxu0 %v23359_v16  ;;  %v23416_v16 = vld [vmem:[%s24682_s12 + $0x2f1c] ss:$24 sps:$4 sm:$0xff]  }
 0x741   : > { %16361 = vmatpush1.bf16.msra.mxu1 %v23354_v60  ;;  %v23419_v60 = vld [vmem:[%s24682_s12 + $0x2da4] ss:$24 sps:$4 sm:$0xff]  }
 0x742   : > { %17361 = vmatpush1.bf16.msra.mxu0 %v23357_v47  ;;  %16362 = vmatprep.subr.bf16.mxu1 %v23362_v41  ;;  %v23414_v47 = vld [vmem:[%s24682_s12 + $0x2f18] ss:$24 sps:$4 sm:$0xff]  }
 0x743   : > { %17362 = vmatprep.subr.bf16.mxu0 %v23365_v43  ;;  %v23417_v41 = vld [vmem:[%s24682_s12 + $0x2da0] ss:$24 sps:$4 sm:$0xff]   ;;  %v23425_v43 = vld [vmem:[%s24682_s12 + $0x2dd4] ss:$24 sps:$4 sm:$0xff]  }
 0x745   : > { %16363 = vmatpush1.bf16.msra.mxu1 %v23360_v57  ;;  %v23420_v57 = vld [vmem:[%s24682_s12 + $0x2f48] ss:$24 sps:$4 sm:$0xff]  }
 0x746   : > { %17363 = vmatpush1.bf16.msra.mxu0 %v23363_v32  ;;  %16364 = vmatprep.subr.bf16.mxu1 %v23368_v53  ;;  %v23423_v32 = vld [vmem:[%s24682_s12 + $0x2dd0] ss:$24 sps:$4 sm:$0xff]   ;;  %v23428_v53 = vld [vmem:[%s24682_s12 + $0x2f7c] ss:$24 sps:$4 sm:$0xff]  }
 0x747   : > { %17364 = vmatprep.subr.bf16.mxu0 %v23371_v17  ;;  %v23431_v17 = vld [vmem:[%s24682_s12 + $0x2e04] ss:$24 sps:$4 sm:$0xff]  }
 0x749   : > { %16365 = vmatpush1.bf16.msra.mxu1 %v23366_v59  ;;  %v23426_v59 = vld [vmem:[%s24682_s12 + $0x2f78] ss:$24 sps:$4 sm:$0xff]  }
 0x74a   : > { %17365 = vmatpush1.bf16.msra.mxu0 %v23369_v10  ;;  %16366 = vmatprep.subr.bf16.mxu1 %v23374_v42  ;;  %v23429_v10 = vld [vmem:[%s24682_s12 + $0x2e00] ss:$24 sps:$4 sm:$0xff]   ;;  %v23434_v42 = vld [vmem:[%s24682_s12 + $0x2fac] ss:$24 sps:$4 sm:$0xff]  }
 0x74b   : > { %17366 = vmatprep.subr.bf16.mxu0 %v23377_v39  ;;  %v23437_v39 = vld [vmem:[%s24682_s12 + $0x2e34] ss:$24 sps:$4 sm:$0xff]  }
 0x74d   : > { %16367 = vmatpush1.bf16.msra.mxu1 %v23372_v35  ;;  %v23432_v35 = vld [vmem:[%s24682_s12 + $0x2fa8] ss:$24 sps:$4 sm:$0xff]  }
 0x74e   : > { %17367 = vmatpush1.bf16.msra.mxu0 %v23375_v49  ;;  %16368 = vmatprep.subr.bf16.mxu1 %v23380_v19  ;;  %v23435_v49 = vld [vmem:[%s24682_s12 + $0x2e30] ss:$24 sps:$4 sm:$0xff]   ;;  %v23440_v19 = vld [vmem:[%s24682_s12 + $0x2fdc] ss:$24 sps:$4 sm:$0xff]  }
 0x74f   : > { %17368 = vmatprep.subr.bf16.mxu0 %v23383_v38  ;;  %v23443_v38 = vld [vmem:[%s24682_s12 + $0x2e64] ss:$24 sps:$4 sm:$0xff]  }
 0x751   : > { %16369 = vmatpush1.bf16.msra.mxu1 %v23378_v56  ;;  %v23438_v56 = vld [vmem:[%s24682_s12 + $0x2fd8] ss:$24 sps:$4 sm:$0xff]  }
 0x752   : > { %17369 = vmatpush1.bf16.msra.mxu0 %v23381_v33  ;;  %16370 = vmatprep.subr.bf16.mxu1 %v23386_v51  ;;  %v23441_v33 = vld [vmem:[%s24682_s12 + $0x2e60] ss:$24 sps:$4 sm:$0xff]   ;;  %v23446_v51 = vld [vmem:[%s24682_s12 + $0x300c] ss:$24 sps:$4 sm:$0xff]  }
 0x753   : > { %17370 = vmatprep.subr.bf16.mxu0 %v23389_v31  ;;  %v23449_v31 = vld [vmem:[%s24682_s12 + $0x2e94] ss:$24 sps:$4 sm:$0xff]  }
 0x755   : > { %16371 = vmatpush1.bf16.msra.mxu1 %v23384_v7  ;;  %v23444_v7 = vld [vmem:[%s24682_s12 + $0x3008] ss:$24 sps:$4 sm:$0xff]  }
 0x756   : > { %17371 = vmatpush1.bf16.msra.mxu0 %v23387_v24  ;;  %16372 = vmatprep.subr.bf16.mxu1 %v23392_v6  ;;  %v23447_v24 = vld [vmem:[%s24682_s12 + $0x2e90] ss:$24 sps:$4 sm:$0xff]   ;;  %v23452_v6 = vld [vmem:[%s24682_s12 + $0x303c] ss:$24 sps:$4 sm:$0xff]  }
 0x757   : > { %17372 = vmatprep.subr.bf16.mxu0 %v23395_v48  ;;  %v23455_v48 = vld [vmem:[%s24682_s12 + $0x2ec4] ss:$24 sps:$4 sm:$0xff]  }
 0x759   : > { %16373 = vmatpush1.bf16.msra.mxu1 %v23390_v21  ;;  %v23450_v21 = vld [vmem:[%s24682_s12 + $0x3038] ss:$24 sps:$4 sm:$0xff]  }
 0x75a   : > { %17373 = vmatpush1.bf16.msra.mxu0 %v23393_v26  ;;  %16374 = vmatprep.subr.bf16.mxu1 %v23398_v30  ;;  %v23453_v26 = vld [vmem:[%s24682_s12 + $0x2ec0] ss:$24 sps:$4 sm:$0xff]   ;;  %v23458_v30 = vld [vmem:[%s24682_s12 + $0x306c] ss:$24 sps:$4 sm:$0xff]  }
 0x75b   : > { %17383 = vmatprep.subr.bf16.mxu0 %v23401_v2  ;;  %v23461_v2 = vld [vmem:[%s24682_s12 + $0x2ef4] ss:$24 sps:$4 sm:$0xff]  }
 0x75d   : > { %17375 = vmatmul.mubr.bf16.vlgmr.msra.gmra.mrb[4].mxu0 %v24980_v8  ;;  %16375 = vmatpush1.bf16.msra.mxu1 %v23396_v13  ;;  %v23411_v8 = vld [vmem:[%s24682_s12 + $0x2d70] ss:$24 sps:$4 sm:$0xff]  }
 0x75e   : > { %17384 = vmatpush1.bf16.msra.mxu0 %v23399_v52  ;;  %16376 = vmatprep.subr.bf16.mxu1 %v23404_v0  ;;  %v23456_v13 = vld [vmem:[%s24682_s12 + $0x3068] ss:$24 sps:$4 sm:$0xff]   ;;  %v23464_v0 = vld [vmem:[%s24682_s12 + $0x309c] ss:$24 sps:$4 sm:$0xff]  }
 0x75f   : > { %17385 = vmatprep.subr.bf16.mxu0 %v23407_v37  ;;  %17415 = vmatprep.mubr.bf16.mxu0 %v24986_v12  ;;  %v23422_v12 = vld [vmem:[%s24682_s12 + $0x2f4c] ss:$24 sps:$4 sm:$0xff]   ;;  %v23459_v52 = vld [vmem:[%s24682_s12 + $0x2ef0] ss:$24 sps:$4 sm:$0xff]  }
 0x760   : > { %v23467_v37 = vld [vmem:[%s24682_s12 + $0x2f24] ss:$24 sps:$4 sm:$0xff]  }
 0x761   : > { %16377 = vmatpush1.bf16.msra.mxu1 %v23402_v4  ;;  %v23462_v4 = vld [vmem:[%s24682_s12 + $0x3098] ss:$24 sps:$4 sm:$0xff]  }
 0x762   : > { %17386 = vmatpush1.bf16.msra.mxu0 %v23405_v11  ;;  %16378 = vmatprep.subr.bf16.mxu1 %v23410_v15  ;;  %v23465_v11 = vld [vmem:[%s24682_s12 + $0x2f20] ss:$24 sps:$4 sm:$0xff]   ;;  %v23470_v15 = vld [vmem:[%s24682_s12 + $0x30cc] ss:$24 sps:$4 sm:$0xff]  }
 0x763   : > { %17387 = vmatprep.subr.bf16.mxu0 %v23413_v23  ;;  %v23473_v23 = vld [vmem:[%s24682_s12 + $0x2f54] ss:$24 sps:$4 sm:$0xff]  }
 0x765   : > { %16379 = vmatpush1.bf16.msra.mxu1 %v23408_v62  ;;  %v23468_v62 = vld [vmem:[%s24682_s12 + $0x30c8] ss:$24 sps:$4 sm:$0xff]  }
 0x766   : > { %17388 = vmatpush1.bf16.msra.mxu0 %v23411_v8  ;;  %16380 = vmatprep.subr.bf16.mxu1 %v23416_v16  ;;  %v23471_v8 = vld [vmem:[%s24682_s12 + $0x2f50] ss:$24 sps:$4 sm:$0xff]   ;;  %v23476_v16 = vld [vmem:[%s24682_s12 + $0x30fc] ss:$24 sps:$4 sm:$0xff]  }
 0x767   : > { %17389 = vmatprep.subr.bf16.mxu0 %v23419_v60  ;;  %v23479_v60 = vld [vmem:[%s24682_s12 + $0x2f84] ss:$24 sps:$4 sm:$0xff]  }
 0x769   : > { %16381 = vmatpush1.bf16.msra.mxu1 %v23414_v47  ;;  %v23474_v47 = vld [vmem:[%s24682_s12 + $0x30f8] ss:$24 sps:$4 sm:$0xff]  }
 0x76a   : > { %17390 = vmatpush1.bf16.msra.mxu0 %v23417_v41  ;;  %16382 = vmatprep.subr.bf16.mxu1 %v23422_v12  ;;  %v23477_v41 = vld [vmem:[%s24682_s12 + $0x2f80] ss:$24 sps:$4 sm:$0xff]   ;;  %v23482_v12 = vld [vmem:[%s24682_s12 + $0x312c] ss:$24 sps:$4 sm:$0xff]  }
 0x76b   : > { %17391 = vmatprep.subr.bf16.mxu0 %v23425_v43  ;;  %v23485_v43 = vld [vmem:[%s24682_s12 + $0x2fb4] ss:$24 sps:$4 sm:$0xff]  }
 0x76d   : > { %16383 = vmatpush1.bf16.msra.mxu1 %v23420_v57  ;;  %v23480_v57 = vld [vmem:[%s24682_s12 + $0x3128] ss:$24 sps:$4 sm:$0xff]  }
 0x76e   : > { %17392 = vmatpush1.bf16.msra.mxu0 %v23423_v32  ;;  %16384 = vmatprep.subr.bf16.mxu1 %v23428_v53  ;;  %v23483_v32 = vld [vmem:[%s24682_s12 + $0x2fb0] ss:$24 sps:$4 sm:$0xff]   ;;  %v23488_v53 = vld [vmem:[%s24682_s12 + $0x315c] ss:$24 sps:$4 sm:$0xff]  }
 0x76f   : > { %17393 = vmatprep.subr.bf16.mxu0 %v23431_v17  ;;  %v23491_v17 = vld [vmem:[%s24682_s12 + $0x2fe4] ss:$24 sps:$4 sm:$0xff]  }
 0x771   : > { %16385 = vmatpush1.bf16.msra.mxu1 %v23426_v59  ;;  %v23486_v59 = vld [vmem:[%s24682_s12 + $0x3158] ss:$24 sps:$4 sm:$0xff]  }
 0x772   : > { %17394 = vmatpush1.bf16.msra.mxu0 %v23429_v10  ;;  %16386 = vmatprep.subr.bf16.mxu1 %v23434_v42  ;;  %v23489_v10 = vld [vmem:[%s24682_s12 + $0x2fe0] ss:$24 sps:$4 sm:$0xff]   ;;  %v23494_v42 = vld [vmem:[%s24682_s12 + $0x318c] ss:$24 sps:$4 sm:$0xff]  }
 0x773   : > { %17395 = vmatprep.subr.bf16.mxu0 %v23437_v39  ;;  %v23497_v39 = vld [vmem:[%s24682_s12 + $0x3014] ss:$24 sps:$4 sm:$0xff]  }
 0x775   : > { %16387 = vmatpush1.bf16.msra.mxu1 %v23432_v35  ;;  %v23492_v35 = vld [vmem:[%s24682_s12 + $0x3188] ss:$24 sps:$4 sm:$0xff]  }
 0x776   : > { %17396 = vmatpush1.bf16.msra.mxu0 %v23435_v49  ;;  %16388 = vmatprep.subr.bf16.mxu1 %v23440_v19  ;;  %v23495_v49 = vld [vmem:[%s24682_s12 + $0x3010] ss:$24 sps:$4 sm:$0xff]   ;;  %v23500_v19 = vld [vmem:[%s24682_s12 + $0x31bc] ss:$24 sps:$4 sm:$0xff]  }
 0x777   : > { %17397 = vmatprep.subr.bf16.mxu0 %v23443_v38  ;;  %v23503_v38 = vld [vmem:[%s24682_s12 + $0x3044] ss:$24 sps:$4 sm:$0xff]  }
 0x779   : > { %16389 = vmatpush1.bf16.msra.mxu1 %v23438_v56  ;;  %v23498_v56 = vld [vmem:[%s24682_s12 + $0x31b8] ss:$24 sps:$4 sm:$0xff]  }
 0x77a   : > { %17398 = vmatpush1.bf16.msra.mxu0 %v23441_v33  ;;  %16399 = vmatprep.subr.bf16.mxu1 %v23446_v51  ;;  %v23501_v33 = vld [vmem:[%s24682_s12 + $0x3040] ss:$24 sps:$4 sm:$0xff]   ;;  %v23506_v51 = vld [vmem:[%s24682_s12 + $0x31ec] ss:$24 sps:$4 sm:$0xff]  }
 0x77b   : > { %17399 = vmatprep.subr.bf16.mxu0 %v23449_v31  ;;  %v23509_v31 = vld [vmem:[%s24682_s12 + $0x3074] ss:$24 sps:$4 sm:$0xff]  }
 0x77c   : > { %16391 = vmatmul.mubr.bf16.vlgmr.msra.gmra.mrb[4].mxu1 %v25076_v40 }
 0x77d   : > { %16400 = vmatpush1.bf16.msra.mxu1 %v23444_v7  ;;  %16431 = vmatprep.mubr.bf16.mxu1 %v25084_v61  ;;  %v23504_v7 = vld [vmem:[%s24682_s12 + $0x31e8] ss:$24 sps:$4 sm:$0xff]  }
 0x77e   : > { %17400 = vmatpush1.bf16.msra.mxu0 %v23447_v24  ;;  %16401 = vmatprep.subr.bf16.mxu1 %v23452_v6  ;;  %v23512_v24 = vld [vmem:[%s24682_s12 + $0x321c] ss:$24 sps:$4 sm:$0xff]  }
 0x77f   : > { %17401 = vmatprep.subr.bf16.mxu0 %v23455_v48  ;;  %v23515_v6 = vld [vmem:[%s24682_s12 + $0x30a4] ss:$24 sps:$4 sm:$0xff]   ;;  %v23510_v48 = vld [vmem:[%s24682_s12 + $0x3218] ss:$24 sps:$4 sm:$0xff]  }
 0x781   : > { %16402 = vmatpush1.bf16.msra.mxu1 %v23450_v21  ;;  %v23513_v21 = vld [vmem:[%s24682_s12 + $0x30a0] ss:$24 sps:$4 sm:$0xff]  }
 0x782   : > { %17402 = vmatpush1.bf16.msra.mxu0 %v23453_v26  ;;  %16403 = vmatprep.subr.bf16.mxu1 %v23458_v30  ;;  %v23521_v26 = vld [vmem:[%s24682_s12 + $0x30d4] ss:$24 sps:$4 sm:$0xff]   ;;  %v23516_v30 = vld [vmem:[%s24682_s12 + $0x3248] ss:$24 sps:$4 sm:$0xff]  }
 0x783   : > { %17403 = vmatprep.subr.bf16.mxu0 %v23461_v2  ;;  %v23519_v2 = vld [vmem:[%s24682_s12 + $0x30d0] ss:$24 sps:$4 sm:$0xff]  }
 0x785   : > { %16404 = vmatpush1.bf16.msra.mxu1 %v23456_v13  ;;  %v23524_v13 = vld [vmem:[%s24682_s12 + $0x327c] ss:$24 sps:$4 sm:$0xff]  }
 0x786   : > { %17404 = vmatpush1.bf16.msra.mxu0 %v23459_v52  ;;  %16405 = vmatprep.subr.bf16.mxu1 %v23464_v0  ;;  %v23527_v52 = vld [vmem:[%s24682_s12 + $0x3104] ss:$24 sps:$4 sm:$0xff]   ;;  %v23522_v0 = vld [vmem:[%s24682_s12 + $0x3278] ss:$24 sps:$4 sm:$0xff]  }
 0x787   : > { %17405 = vmatprep.subr.bf16.mxu0 %v23467_v37  ;;  %v23525_v37 = vld [vmem:[%s24682_s12 + $0x3100] ss:$24 sps:$4 sm:$0xff]  }
 0x789   : > { %16406 = vmatpush1.bf16.msra.mxu1 %v23462_v4  ;;  %v23530_v4 = vld [vmem:[%s24682_s12 + $0x32ac] ss:$24 sps:$4 sm:$0xff]  }
 0x78a   : > { %17406 = vmatpush1.bf16.msra.mxu0 %v23465_v11  ;;  %16407 = vmatprep.subr.bf16.mxu1 %v23470_v15  ;;  %v23533_v11 = vld [vmem:[%s24682_s12 + $0x3134] ss:$24 sps:$4 sm:$0xff]   ;;  %v23528_v15 = vld [vmem:[%s24682_s12 + $0x32a8] ss:$24 sps:$4 sm:$0xff]  }
 0x78b   : > { %17407 = vmatprep.subr.bf16.mxu0 %v23473_v23  ;;  %v23531_v23 = vld [vmem:[%s24682_s12 + $0x3130] ss:$24 sps:$4 sm:$0xff]  }
 0x78d   : > { %16408 = vmatpush1.bf16.msra.mxu1 %v23468_v62  ;;  %v23536_v62 = vld [vmem:[%s24682_s12 + $0x32dc] ss:$24 sps:$4 sm:$0xff]  }
 0x78e   : > { %17408 = vmatpush1.bf16.msra.mxu0 %v23471_v8  ;;  %16409 = vmatprep.subr.bf16.mxu1 %v23476_v16  ;;  %v23539_v8 = vld [vmem:[%s24682_s12 + $0x3164] ss:$24 sps:$4 sm:$0xff]   ;;  %v23534_v16 = vld [vmem:[%s24682_s12 + $0x32d8] ss:$24 sps:$4 sm:$0xff]  }
 0x78f   : > { %17409 = vmatprep.subr.bf16.mxu0 %v23479_v60  ;;  %v23537_v60 = vld [vmem:[%s24682_s12 + $0x3160] ss:$24 sps:$4 sm:$0xff]  }
 0x791   : > { %16410 = vmatpush1.bf16.msra.mxu1 %v23474_v47  ;;  %v23542_v47 = vld [vmem:[%s24682_s12 + $0x330c] ss:$24 sps:$4 sm:$0xff]  }
 0x792   : > { %17410 = vmatpush1.bf16.msra.mxu0 %v23477_v41  ;;  %16411 = vmatprep.subr.bf16.mxu1 %v23482_v12  ;;  %v23545_v41 = vld [vmem:[%s24682_s12 + $0x3194] ss:$24 sps:$4 sm:$0xff]   ;;  %v23540_v12 = vld [vmem:[%s24682_s12 + $0x3308] ss:$24 sps:$4 sm:$0xff]  }
 0x793   : > { %17411 = vmatprep.subr.bf16.mxu0 %v23485_v43  ;;  %v23543_v43 = vld [vmem:[%s24682_s12 + $0x3190] ss:$24 sps:$4 sm:$0xff]  }
 0x795   : > { %16412 = vmatpush1.bf16.msra.mxu1 %v23480_v57  ;;  %v23548_v57 = vld [vmem:[%s24682_s12 + $0x333c] ss:$24 sps:$4 sm:$0xff]  }
 0x796   : > { %17412 = vmatpush1.bf16.msra.mxu0 %v23483_v32  ;;  %16413 = vmatprep.subr.bf16.mxu1 %v23488_v53  ;;  %v23551_v32 = vld [vmem:[%s24682_s12 + $0x31c4] ss:$24 sps:$4 sm:$0xff]   ;;  %v23546_v53 = vld [vmem:[%s24682_s12 + $0x3338] ss:$24 sps:$4 sm:$0xff]  }
 0x797   : > { %17413 = vmatprep.subr.bf16.mxu0 %v23491_v17  ;;  %v23549_v17 = vld [vmem:[%s24682_s12 + $0x31c0] ss:$24 sps:$4 sm:$0xff]  }
 0x799   : > { %16414 = vmatpush1.bf16.msra.mxu1 %v23486_v59  ;;  %v23554_v59 = vld [vmem:[%s24682_s12 + $0x336c] ss:$24 sps:$4 sm:$0xff]  }
 0x79a   : > { %17414 = vmatpush1.bf16.msra.mxu0 %v23489_v10  ;;  %16415 = vmatprep.subr.bf16.mxu1 %v23494_v42  ;;  %v23557_v10 = vld [vmem:[%s24682_s12 + $0x31f4] ss:$24 sps:$4 sm:$0xff]   ;;  %v23552_v42 = vld [vmem:[%s24682_s12 + $0x3368] ss:$24 sps:$4 sm:$0xff]  }
 0x79b   : > { %17424 = vmatprep.subr.bf16.mxu0 %v23497_v39  ;;  %v23555_v39 = vld [vmem:[%s24682_s12 + $0x31f0] ss:$24 sps:$4 sm:$0xff]  }
 0x79d   : > { %17416 = vmatmul.mubr.bf16.vlgmr.msra.gmra.mrb[4].mxu0 %v25076_v40  ;;  %16416 = vmatpush1.bf16.msra.mxu1 %v23492_v35  ;;  %v23507_v40 = vld [vmem:[%s24682_s12 + $0x3070] ss:$24 sps:$4 sm:$0xff]   ;;  %v23560_v35 = vld [vmem:[%s24682_s12 + $0x339c] ss:$24 sps:$4 sm:$0xff]  }
 0x79e   : > { %17425 = vmatpush1.bf16.msra.mxu0 %v23495_v49  ;;  %16417 = vmatprep.subr.bf16.mxu1 %v23500_v19  ;;  %v23563_v49 = vld [vmem:[%s24682_s12 + $0x3224] ss:$24 sps:$4 sm:$0xff]   ;;  %v23558_v19 = vld [vmem:[%s24682_s12 + $0x3398] ss:$24 sps:$4 sm:$0xff]  }
 0x79f   : > { %17426 = vmatprep.subr.bf16.mxu0 %v23503_v38  ;;  %17456 = vmatprep.mubr.bf16.mxu0 %v25084_v61  ;;  %v23518_v61 = vld [vmem:[%s24682_s12 + $0x324c] ss:$24 sps:$4 sm:$0xff]   ;;  %v23561_v38 = vld [vmem:[%s24682_s12 + $0x3220] ss:$24 sps:$4 sm:$0xff]  }
 0x7a1   : > { %16418 = vmatpush1.bf16.msra.mxu1 %v23498_v56  ;;  %v23566_v56 = vld [vmem:[%s24682_s12 + $0x33cc] ss:$24 sps:$4 sm:$0xff]  }
 0x7a2   : > { %17427 = vmatpush1.bf16.msra.mxu0 %v23501_v33  ;;  %16419 = vmatprep.subr.bf16.mxu1 %v23506_v51  ;;  %v23569_v33 = vld [vmem:[%s24682_s12 + $0x3254] ss:$24 sps:$4 sm:$0xff]   ;;  %v23564_v51 = vld [vmem:[%s24682_s12 + $0x33c8] ss:$24 sps:$4 sm:$0xff]  }
 0x7a3   : > { %17428 = vmatprep.subr.bf16.mxu0 %v23509_v31  ;;  %v23567_v31 = vld [vmem:[%s24682_s12 + $0x3250] ss:$24 sps:$4 sm:$0xff]  }
 0x7a5   : > { %16420 = vmatpush1.bf16.msra.mxu1 %v23504_v7  ;;  %v23572_v7 = vld [vmem:[%s24682_s12 + $0x33fc] ss:$24 sps:$4 sm:$0xff]  }
 0x7a6   : > { %17429 = vmatpush1.bf16.msra.mxu0 %v23507_v40  ;;  %16421 = vmatprep.subr.bf16.mxu1 %v23512_v24  ;;  %v23575_v40 = vld [vmem:[%s24682_s12 + $0x3284] ss:$24 sps:$4 sm:$0xff]   ;;  %v23570_v24 = vld [vmem:[%s24682_s12 + $0x33f8] ss:$24 sps:$4 sm:$0xff]  }
 0x7a7   : > { %17430 = vmatprep.subr.bf16.mxu0 %v23515_v6  ;;  %v23573_v6 = vld [vmem:[%s24682_s12 + $0x3280] ss:$24 sps:$4 sm:$0xff]  }
 0x7a9   : > { %16422 = vmatpush1.bf16.msra.mxu1 %v23510_v48  ;;  %v23578_v48 = vld [vmem:[%s24682_s12 + $0x342c] ss:$24 sps:$4 sm:$0xff]  }
 0x7aa   : > { %17431 = vmatpush1.bf16.msra.mxu0 %v23513_v21  ;;  %16423 = vmatprep.subr.bf16.mxu1 %v23518_v61  ;;  %v23581_v21 = vld [vmem:[%s24682_s12 + $0x32b4] ss:$24 sps:$4 sm:$0xff]   ;;  %v23576_v61 = vld [vmem:[%s24682_s12 + $0x3428] ss:$24 sps:$4 sm:$0xff]  }
 0x7ab   : > { %17432 = vmatprep.subr.bf16.mxu0 %v23521_v26  ;;  %v23579_v26 = vld [vmem:[%s24682_s12 + $0x32b0] ss:$24 sps:$4 sm:$0xff]  }
 0x7ad   : > { %16424 = vmatpush1.bf16.msra.mxu1 %v23516_v30  ;;  %v23584_v30 = vld [vmem:[%s24682_s12 + $0x345c] ss:$24 sps:$4 sm:$0xff]  }
 0x7ae   : > { %17433 = vmatpush1.bf16.msra.mxu0 %v23519_v2  ;;  %16425 = vmatprep.subr.bf16.mxu1 %v23524_v13  ;;  %v23587_v2 = vld [vmem:[%s24682_s12 + $0x32e4] ss:$24 sps:$4 sm:$0xff]   ;;  %v23582_v13 = vld [vmem:[%s24682_s12 + $0x3458] ss:$24 sps:$4 sm:$0xff]  }
 0x7af   : > { %17434 = vmatprep.subr.bf16.mxu0 %v23527_v52  ;;  %v23585_v52 = vld [vmem:[%s24682_s12 + $0x32e0] ss:$24 sps:$4 sm:$0xff]  }
 0x7b1   : > { %16426 = vmatpush1.bf16.msra.mxu1 %v23522_v0  ;;  %v23590_v0 = vld [vmem:[%s24682_s12 + $0x348c] ss:$24 sps:$4 sm:$0xff]  }
 0x7b2   : > { %17435 = vmatpush1.bf16.msra.mxu0 %v23525_v37  ;;  %16427 = vmatprep.subr.bf16.mxu1 %v23530_v4  ;;  %v23593_v37 = vld [vmem:[%s24682_s12 + $0x3314] ss:$24 sps:$4 sm:$0xff]   ;;  %v23588_v4 = vld [vmem:[%s24682_s12 + $0x3488] ss:$24 sps:$4 sm:$0xff]  }
 0x7b3   : > { %17436 = vmatprep.subr.bf16.mxu0 %v23533_v11  ;;  %v23591_v11 = vld [vmem:[%s24682_s12 + $0x3310] ss:$24 sps:$4 sm:$0xff]  }
 0x7b5   : > { %16428 = vmatpush1.bf16.msra.mxu1 %v23528_v15  ;;  %v23596_v15 = vld [vmem:[%s24682_s12 + $0x34bc] ss:$24 sps:$4 sm:$0xff]  }
 0x7b6   : > { %17437 = vmatpush1.bf16.msra.mxu0 %v23531_v23  ;;  %16429 = vmatprep.subr.bf16.mxu1 %v23536_v62  ;;  %v23599_v23 = vld [vmem:[%s24682_s12 + $0x3344] ss:$24 sps:$4 sm:$0xff]   ;;  %v23594_v62 = vld [vmem:[%s24682_s12 + $0x34b8] ss:$24 sps:$4 sm:$0xff]  }
 0x7b7   : > { %17438 = vmatprep.subr.bf16.mxu0 %v23539_v8  ;;  %v23597_v8 = vld [vmem:[%s24682_s12 + $0x3340] ss:$24 sps:$4 sm:$0xff]  }
 0x7b9   : > { %16430 = vmatpush1.bf16.msra.mxu1 %v23534_v16  ;;  %v23602_v16 = vld [vmem:[%s24682_s12 + $0x34ec] ss:$24 sps:$4 sm:$0xff]  }
 0x7ba   : > { %17439 = vmatpush1.bf16.msra.mxu0 %v23537_v60  ;;  %16440 = vmatprep.subr.bf16.mxu1 %v23542_v47  ;;  %v23605_v60 = vld [vmem:[%s24682_s12 + $0x3374] ss:$24 sps:$4 sm:$0xff]   ;;  %v23600_v47 = vld [vmem:[%s24682_s12 + $0x34e8] ss:$24 sps:$4 sm:$0xff]  }
 0x7bb   : > { %17440 = vmatprep.subr.bf16.mxu0 %v23545_v41  ;;  %v23608_v41 = vld [vmem:[%s24682_s12 + $0x351c] ss:$24 sps:$4 sm:$0xff]  }
 0x7bc   : > { %16432 = vmatmul.mubr.bf16.vlgmr.msra.gmra.mrb[4].mxu1 %v25170_v18 }
 0x7bd   : > { %16441 = vmatpush1.bf16.msra.mxu1 %v23540_v12  ;;  %16472 = vmatprep.mubr.bf16.mxu1 %v25178_v27  ;;  %v23611_v12 = vld [vmem:[%s24682_s12 + $0x33a4] ss:$24 sps:$4 sm:$0xff]  }
 0x7be   : > { %17441 = vmatpush1.bf16.msra.mxu0 %v23543_v43  ;;  %16442 = vmatprep.subr.bf16.mxu1 %v23548_v57  ;;  %v23606_v43 = vld [vmem:[%s24682_s12 + $0x3518] ss:$24 sps:$4 sm:$0xff]  }
 0x7bf   : > { %17442 = vmatprep.subr.bf16.mxu0 %v23551_v32  ;;  %v23609_v57 = vld [vmem:[%s24682_s12 + $0x33a0] ss:$24 sps:$4 sm:$0xff]   ;;  %v23617_v32 = vld [vmem:[%s24682_s12 + $0x33d4] ss:$24 sps:$4 sm:$0xff]  }
 0x7c1   : > { %16443 = vmatpush1.bf16.msra.mxu1 %v23546_v53  ;;  %v23612_v53 = vld [vmem:[%s24682_s12 + $0x3548] ss:$24 sps:$4 sm:$0xff]  }
 0x7c2   : > { %17443 = vmatpush1.bf16.msra.mxu0 %v23549_v17  ;;  %16444 = vmatprep.subr.bf16.mxu1 %v23554_v59  ;;  %v23615_v17 = vld [vmem:[%s24682_s12 + $0x33d0] ss:$24 sps:$4 sm:$0xff]   ;;  %v23620_v59 = vld [vmem:[%s24682_s12 + $0x357c] ss:$24 sps:$4 sm:$0xff]  }
 0x7c3   : > { %17444 = vmatprep.subr.bf16.mxu0 %v23557_v10  ;;  %v23623_v10 = vld [vmem:[%s24682_s12 + $0x3404] ss:$24 sps:$4 sm:$0xff]  }
 0x7c5   : > { %16445 = vmatpush1.bf16.msra.mxu1 %v23552_v42  ;;  %v23618_v42 = vld [vmem:[%s24682_s12 + $0x3578] ss:$24 sps:$4 sm:$0xff]  }
 0x7c6   : > { %17445 = vmatpush1.bf16.msra.mxu0 %v23555_v39  ;;  %16446 = vmatprep.subr.bf16.mxu1 %v23560_v35  ;;  %v23621_v39 = vld [vmem:[%s24682_s12 + $0x3400] ss:$24 sps:$4 sm:$0xff]   ;;  %v23626_v35 = vld [vmem:[%s24682_s12 + $0x35ac] ss:$24 sps:$4 sm:$0xff]  }
 0x7c7   : > { %17446 = vmatprep.subr.bf16.mxu0 %v23563_v49  ;;  %v23629_v49 = vld [vmem:[%s24682_s12 + $0x3434] ss:$24 sps:$4 sm:$0xff]  }
 0x7c9   : > { %16447 = vmatpush1.bf16.msra.mxu1 %v23558_v19  ;;  %v23624_v19 = vld [vmem:[%s24682_s12 + $0x35a8] ss:$24 sps:$4 sm:$0xff]  }
 0x7ca   : > { %17447 = vmatpush1.bf16.msra.mxu0 %v23561_v38  ;;  %16448 = vmatprep.subr.bf16.mxu1 %v23566_v56  ;;  %v23627_v38 = vld [vmem:[%s24682_s12 + $0x3430] ss:$24 sps:$4 sm:$0xff]   ;;  %v23632_v56 = vld [vmem:[%s24682_s12 + $0x35dc] ss:$24 sps:$4 sm:$0xff]  }
 0x7cb   : > { %17448 = vmatprep.subr.bf16.mxu0 %v23569_v33  ;;  %v23635_v33 = vld [vmem:[%s24682_s12 + $0x3464] ss:$24 sps:$4 sm:$0xff]  }
 0x7cd   : > { %16449 = vmatpush1.bf16.msra.mxu1 %v23564_v51  ;;  %v23630_v51 = vld [vmem:[%s24682_s12 + $0x35d8] ss:$24 sps:$4 sm:$0xff]  }
 0x7ce   : > { %17449 = vmatpush1.bf16.msra.mxu0 %v23567_v31  ;;  %16450 = vmatprep.subr.bf16.mxu1 %v23572_v7  ;;  %v23633_v31 = vld [vmem:[%s24682_s12 + $0x3460] ss:$24 sps:$4 sm:$0xff]   ;;  %v23638_v7 = vld [vmem:[%s24682_s12 + $0x360c] ss:$24 sps:$4 sm:$0xff]  }
 0x7cf   : > { %17450 = vmatprep.subr.bf16.mxu0 %v23575_v40  ;;  %v23641_v40 = vld [vmem:[%s24682_s12 + $0x3494] ss:$24 sps:$4 sm:$0xff]  }
 0x7d1   : > { %16451 = vmatpush1.bf16.msra.mxu1 %v23570_v24  ;;  %v23636_v24 = vld [vmem:[%s24682_s12 + $0x3608] ss:$24 sps:$4 sm:$0xff]  }
 0x7d2   : > { %17451 = vmatpush1.bf16.msra.mxu0 %v23573_v6  ;;  %16452 = vmatprep.subr.bf16.mxu1 %v23578_v48  ;;  %v23639_v6 = vld [vmem:[%s24682_s12 + $0x3490] ss:$24 sps:$4 sm:$0xff]   ;;  %v23644_v48 = vld [vmem:[%s24682_s12 + $0x363c] ss:$24 sps:$4 sm:$0xff]  }
 0x7d3   : > { %17452 = vmatprep.subr.bf16.mxu0 %v23581_v21  ;;  %v23647_v21 = vld [vmem:[%s24682_s12 + $0x34c4] ss:$24 sps:$4 sm:$0xff]  }
 0x7d5   : > { %16453 = vmatpush1.bf16.msra.mxu1 %v23576_v61  ;;  %v23642_v61 = vld [vmem:[%s24682_s12 + $0x3638] ss:$24 sps:$4 sm:$0xff]  }
 0x7d6   : > { %17453 = vmatpush1.bf16.msra.mxu0 %v23579_v26  ;;  %16454 = vmatprep.subr.bf16.mxu1 %v23584_v30  ;;  %v23645_v26 = vld [vmem:[%s24682_s12 + $0x34c0] ss:$24 sps:$4 sm:$0xff]   ;;  %v23650_v30 = vld [vmem:[%s24682_s12 + $0x366c] ss:$24 sps:$4 sm:$0xff]  }
 0x7d7   : > { %17454 = vmatprep.subr.bf16.mxu0 %v23587_v2  ;;  %v23653_v2 = vld [vmem:[%s24682_s12 + $0x34f4] ss:$24 sps:$4 sm:$0xff]  }
 0x7d9   : > { %16455 = vmatpush1.bf16.msra.mxu1 %v23582_v13  ;;  %v23648_v13 = vld [vmem:[%s24682_s12 + $0x3668] ss:$24 sps:$4 sm:$0xff]  }
 0x7da   : > { %17455 = vmatpush1.bf16.msra.mxu0 %v23585_v52  ;;  %16456 = vmatprep.subr.bf16.mxu1 %v23590_v0  ;;  %v23651_v52 = vld [vmem:[%s24682_s12 + $0x34f0] ss:$24 sps:$4 sm:$0xff]   ;;  %v23656_v0 = vld [vmem:[%s24682_s12 + $0x369c] ss:$24 sps:$4 sm:$0xff]  }
 0x7db   : > { %17465 = vmatprep.subr.bf16.mxu0 %v23593_v37  ;;  %v23659_v37 = vld [vmem:[%s24682_s12 + $0x3524] ss:$24 sps:$4 sm:$0xff]  }
 0x7dd   : > { %17457 = vmatmul.mubr.bf16.vlgmr.msra.gmra.mrb[4].mxu0 %v25170_v18  ;;  %16457 = vmatpush1.bf16.msra.mxu1 %v23588_v4  ;;  %v23603_v18 = vld [vmem:[%s24682_s12 + $0x3370] ss:$24 sps:$4 sm:$0xff]  }
 0x7de   : > { %17466 = vmatpush1.bf16.msra.mxu0 %v23591_v11  ;;  %16458 = vmatprep.subr.bf16.mxu1 %v23596_v15  ;;  %v23654_v4 = vld [vmem:[%s24682_s12 + $0x3698] ss:$24 sps:$4 sm:$0xff]   ;;  %v23662_v15 = vld [vmem:[%s24682_s12 + $0x36cc] ss:$24 sps:$4 sm:$0xff]  }
 0x7df   : > { %17467 = vmatprep.subr.bf16.mxu0 %v23599_v23  ;;  %17497 = vmatprep.mubr.bf16.mxu0 %v25178_v27  ;;  %v23614_v27 = vld [vmem:[%s24682_s12 + $0x354c] ss:$24 sps:$4 sm:$0xff]   ;;  %v23657_v11 = vld [vmem:[%s24682_s12 + $0x3520] ss:$24 sps:$4 sm:$0xff]  }
 0x7e0   : > { %v23665_v23 = vld [vmem:[%s24682_s12 + $0x3554] ss:$24 sps:$4 sm:$0xff]  }
 0x7e1   : > { %16459 = vmatpush1.bf16.msra.mxu1 %v23594_v62  ;;  %v23660_v62 = vld [vmem:[%s24682_s12 + $0x36c8] ss:$24 sps:$4 sm:$0xff]  }
 0x7e2   : > { %17468 = vmatpush1.bf16.msra.mxu0 %v23597_v8  ;;  %16460 = vmatprep.subr.bf16.mxu1 %v23602_v16  ;;  %v23663_v8 = vld [vmem:[%s24682_s12 + $0x3550] ss:$24 sps:$4 sm:$0xff]   ;;  %v23668_v16 = vld [vmem:[%s24682_s12 + $0x36fc] ss:$24 sps:$4 sm:$0xff]  }
 0x7e3   : > { %17469 = vmatprep.subr.bf16.mxu0 %v23605_v60  ;;  %v23671_v60 = vld [vmem:[%s24682_s12 + $0x3584] ss:$24 sps:$4 sm:$0xff]  }
 0x7e5   : > { %16461 = vmatpush1.bf16.msra.mxu1 %v23600_v47  ;;  %v23666_v47 = vld [vmem:[%s24682_s12 + $0x36f8] ss:$24 sps:$4 sm:$0xff]  }
 0x7e6   : > { %17470 = vmatpush1.bf16.msra.mxu0 %v23603_v18  ;;  %16462 = vmatprep.subr.bf16.mxu1 %v23608_v41  ;;  %v23669_v18 = vld [vmem:[%s24682_s12 + $0x3580] ss:$24 sps:$4 sm:$0xff]   ;;  %v23674_v41 = vld [vmem:[%s24682_s12 + $0x372c] ss:$24 sps:$4 sm:$0xff]  }
 0x7e7   : > { %17471 = vmatprep.subr.bf16.mxu0 %v23611_v12  ;;  %v23677_v12 = vld [vmem:[%s24682_s12 + $0x35b4] ss:$24 sps:$4 sm:$0xff]  }
 0x7e9   : > { %16463 = vmatpush1.bf16.msra.mxu1 %v23606_v43  ;;  %v23672_v43 = vld [vmem:[%s24682_s12 + $0x3728] ss:$24 sps:$4 sm:$0xff]  }
 0x7ea   : > { %17472 = vmatpush1.bf16.msra.mxu0 %v23609_v57  ;;  %16464 = vmatprep.subr.bf16.mxu1 %v23614_v27  ;;  %v23675_v57 = vld [vmem:[%s24682_s12 + $0x35b0] ss:$24 sps:$4 sm:$0xff]   ;;  %v23680_v27 = vld [vmem:[%s24682_s12 + $0x375c] ss:$24 sps:$4 sm:$0xff]  }
 0x7eb   : > { %17473 = vmatprep.subr.bf16.mxu0 %v23617_v32  ;;  %v23683_v32 = vld [vmem:[%s24682_s12 + $0x35e4] ss:$24 sps:$4 sm:$0xff]  }
 0x7ed   : > { %16465 = vmatpush1.bf16.msra.mxu1 %v23612_v53  ;;  %v23678_v53 = vld [vmem:[%s24682_s12 + $0x3758] ss:$24 sps:$4 sm:$0xff]  }
 0x7ee   : > { %17474 = vmatpush1.bf16.msra.mxu0 %v23615_v17  ;;  %16466 = vmatprep.subr.bf16.mxu1 %v23620_v59  ;;  %v23681_v17 = vld [vmem:[%s24682_s12 + $0x35e0] ss:$24 sps:$4 sm:$0xff]   ;;  %v23686_v59 = vld [vmem:[%s24682_s12 + $0x378c] ss:$24 sps:$4 sm:$0xff]  }
 0x7ef   : > { %17475 = vmatprep.subr.bf16.mxu0 %v23623_v10  ;;  %v23689_v10 = vld [vmem:[%s24682_s12 + $0x3614] ss:$24 sps:$4 sm:$0xff]  }
 0x7f1   : > { %16467 = vmatpush1.bf16.msra.mxu1 %v23618_v42  ;;  %v23684_v42 = vld [vmem:[%s24682_s12 + $0x3788] ss:$24 sps:$4 sm:$0xff]  }
 0x7f2   : > { %17476 = vmatpush1.bf16.msra.mxu0 %v23621_v39  ;;  %16468 = vmatprep.subr.bf16.mxu1 %v23626_v35  ;;  %v23687_v39 = vld [vmem:[%s24682_s12 + $0x3610] ss:$24 sps:$4 sm:$0xff]   ;;  %v23692_v35 = vld [vmem:[%s24682_s12 + $0x37bc] ss:$24 sps:$4 sm:$0xff]  }
 0x7f3   : > { %17477 = vmatprep.subr.bf16.mxu0 %v23629_v49  ;;  %v23695_v49 = vld [vmem:[%s24682_s12 + $0x3644] ss:$24 sps:$4 sm:$0xff]  }
 0x7f5   : > { %16469 = vmatpush1.bf16.msra.mxu1 %v23624_v19  ;;  %v23690_v19 = vld [vmem:[%s24682_s12 + $0x37b8] ss:$24 sps:$4 sm:$0xff]  }
 0x7f6   : > { %17478 = vmatpush1.bf16.msra.mxu0 %v23627_v38  ;;  %16470 = vmatprep.subr.bf16.mxu1 %v23632_v56  ;;  %v23693_v38 = vld [vmem:[%s24682_s12 + $0x3640] ss:$24 sps:$4 sm:$0xff]   ;;  %v23698_v56 = vld [vmem:[%s24682_s12 + $0x37ec] ss:$24 sps:$4 sm:$0xff]  }
 0x7f7   : > { %17479 = vmatprep.subr.bf16.mxu0 %v23635_v33  ;;  %v23701_v33 = vld [vmem:[%s24682_s12 + $0x3674] ss:$24 sps:$4 sm:$0xff]  }
 0x7f9   : > { %16471 = vmatpush1.bf16.msra.mxu1 %v23630_v51  ;;  %v23696_v51 = vld [vmem:[%s24682_s12 + $0x37e8] ss:$24 sps:$4 sm:$0xff]  }
 0x7fa   : > { %17480 = vmatpush1.bf16.msra.mxu0 %v23633_v31  ;;  %16481 = vmatprep.subr.bf16.mxu1 %v23638_v7  ;;  %v23704_v31 = vld [vmem:[%s24682_s12 + $0x381c] ss:$24 sps:$4 sm:$0xff]  }
 0x7fb   : > { %17481 = vmatprep.subr.bf16.mxu0 %v23641_v40  ;;  %v23707_v7 = vld [vmem:[%s24682_s12 + $0x36a4] ss:$24 sps:$4 sm:$0xff]   ;;  %v23702_v40 = vld [vmem:[%s24682_s12 + $0x3818] ss:$24 sps:$4 sm:$0xff]  }
 0x7fc   : > { %16473 = vmatmul.mubr.bf16.vlgmr.msra.gmra.mrb[4].mxu1 %v25268_v20 }
 0x7fd   : > { %16482 = vmatpush1.bf16.msra.mxu1 %v23636_v24  ;;  %16513 = vmatprep.mubr.bf16.mxu1 %v25276_v9  ;;  %v23705_v24 = vld [vmem:[%s24682_s12 + $0x36a0] ss:$24 sps:$4 sm:$0xff]  }
 0x7fe   : > { %17482 = vmatpush1.bf16.msra.mxu0 %v23639_v6  ;;  %16483 = vmatprep.subr.bf16.mxu1 %v23644_v48  ;;  %v23713_v6 = vld [vmem:[%s24682_s12 + $0x36d4] ss:$24 sps:$4 sm:$0xff]   ;;  %v23708_v48 = vld [vmem:[%s24682_s12 + $0x3848] ss:$24 sps:$4 sm:$0xff]  }
 0x7ff   : > { %17483 = vmatprep.subr.bf16.mxu0 %v23647_v21  ;;  %v23711_v21 = vld [vmem:[%s24682_s12 + $0x36d0] ss:$24 sps:$4 sm:$0xff]  }
 0x801   : > { %16484 = vmatpush1.bf16.msra.mxu1 %v23642_v61  ;;  %v23716_v61 = vld [vmem:[%s24682_s12 + $0x387c] ss:$24 sps:$4 sm:$0xff]  }
 0x802   : > { %17484 = vmatpush1.bf16.msra.mxu0 %v23645_v26  ;;  %16485 = vmatprep.subr.bf16.mxu1 %v23650_v30  ;;  %v23719_v26 = vld [vmem:[%s24682_s12 + $0x3704] ss:$24 sps:$4 sm:$0xff]   ;;  %v23714_v30 = vld [vmem:[%s24682_s12 + $0x3878] ss:$24 sps:$4 sm:$0xff]  }
 0x803   : > { %17485 = vmatprep.subr.bf16.mxu0 %v23653_v2  ;;  %v23717_v2 = vld [vmem:[%s24682_s12 + $0x3700] ss:$24 sps:$4 sm:$0xff]  }
 0x805   : > { %16486 = vmatpush1.bf16.msra.mxu1 %v23648_v13  ;;  %v23722_v13 = vld [vmem:[%s24682_s12 + $0x38ac] ss:$24 sps:$4 sm:$0xff]  }
 0x806   : > { %17486 = vmatpush1.bf16.msra.mxu0 %v23651_v52  ;;  %16487 = vmatprep.subr.bf16.mxu1 %v23656_v0  ;;  %v23725_v52 = vld [vmem:[%s24682_s12 + $0x3734] ss:$24 sps:$4 sm:$0xff]   ;;  %v23720_v0 = vld [vmem:[%s24682_s12 + $0x38a8] ss:$24 sps:$4 sm:$0xff]  }
 0x807   : > { %17487 = vmatprep.subr.bf16.mxu0 %v23659_v37  ;;  %v23723_v37 = vld [vmem:[%s24682_s12 + $0x3730] ss:$24 sps:$4 sm:$0xff]  }
 0x809   : > { %16488 = vmatpush1.bf16.msra.mxu1 %v23654_v4  ;;  %v23728_v4 = vld [vmem:[%s24682_s12 + $0x38dc] ss:$24 sps:$4 sm:$0xff]  }
 0x80a   : > { %17488 = vmatpush1.bf16.msra.mxu0 %v23657_v11  ;;  %16489 = vmatprep.subr.bf16.mxu1 %v23662_v15  ;;  %v23731_v11 = vld [vmem:[%s24682_s12 + $0x3764] ss:$24 sps:$4 sm:$0xff]   ;;  %v23726_v15 = vld [vmem:[%s24682_s12 + $0x38d8] ss:$24 sps:$4 sm:$0xff]  }
 0x80b   : > { %17489 = vmatprep.subr.bf16.mxu0 %v23665_v23  ;;  %v23729_v23 = vld [vmem:[%s24682_s12 + $0x3760] ss:$24 sps:$4 sm:$0xff]  }
 0x80d   : > { %16490 = vmatpush1.bf16.msra.mxu1 %v23660_v62  ;;  %v23734_v62 = vld [vmem:[%s24682_s12 + $0x390c] ss:$24 sps:$4 sm:$0xff]  }
 0x80e   : > { %17490 = vmatpush1.bf16.msra.mxu0 %v23663_v8  ;;  %16491 = vmatprep.subr.bf16.mxu1 %v23668_v16  ;;  %v23737_v8 = vld [vmem:[%s24682_s12 + $0x3794] ss:$24 sps:$4 sm:$0xff]   ;;  %v23732_v16 = vld [vmem:[%s24682_s12 + $0x3908] ss:$24 sps:$4 sm:$0xff]  }
 0x80f   : > { %17491 = vmatprep.subr.bf16.mxu0 %v23671_v60  ;;  %v23735_v60 = vld [vmem:[%s24682_s12 + $0x3790] ss:$24 sps:$4 sm:$0xff]  }
 0x811   : > { %16492 = vmatpush1.bf16.msra.mxu1 %v23666_v47  ;;  %v23740_v47 = vld [vmem:[%s24682_s12 + $0x393c] ss:$24 sps:$4 sm:$0xff]  }
 0x812   : > { %17492 = vmatpush1.bf16.msra.mxu0 %v23669_v18  ;;  %16493 = vmatprep.subr.bf16.mxu1 %v23674_v41  ;;  %v23743_v18 = vld [vmem:[%s24682_s12 + $0x37c4] ss:$24 sps:$4 sm:$0xff]   ;;  %v23738_v41 = vld [vmem:[%s24682_s12 + $0x3938] ss:$24 sps:$4 sm:$0xff]  }
 0x813   : > { %17493 = vmatprep.subr.bf16.mxu0 %v23677_v12  ;;  %v23741_v12 = vld [vmem:[%s24682_s12 + $0x37c0] ss:$24 sps:$4 sm:$0xff]  }
 0x815   : > { %16494 = vmatpush1.bf16.msra.mxu1 %v23672_v43  ;;  %v23746_v43 = vld [vmem:[%s24682_s12 + $0x396c] ss:$24 sps:$4 sm:$0xff]  }
 0x816   : > { %17494 = vmatpush1.bf16.msra.mxu0 %v23675_v57  ;;  %16495 = vmatprep.subr.bf16.mxu1 %v23680_v27  ;;  %v23749_v57 = vld [vmem:[%s24682_s12 + $0x37f4] ss:$24 sps:$4 sm:$0xff]   ;;  %v23744_v27 = vld [vmem:[%s24682_s12 + $0x3968] ss:$24 sps:$4 sm:$0xff]  }
 0x817   : > { %17495 = vmatprep.subr.bf16.mxu0 %v23683_v32  ;;  %v23747_v32 = vld [vmem:[%s24682_s12 + $0x37f0] ss:$24 sps:$4 sm:$0xff]  }
 0x819   : > { %16496 = vmatpush1.bf16.msra.mxu1 %v23678_v53  ;;  %v23752_v53 = vld [vmem:[%s24682_s12 + $0x399c] ss:$24 sps:$4 sm:$0xff]  }
 0x81a   : > { %17496 = vmatpush1.bf16.msra.mxu0 %v23681_v17  ;;  %16497 = vmatprep.subr.bf16.mxu1 %v23686_v59  ;;  %v23755_v17 = vld [vmem:[%s24682_s12 + $0x3824] ss:$24 sps:$4 sm:$0xff]   ;;  %v23750_v59 = vld [vmem:[%s24682_s12 + $0x3998] ss:$24 sps:$4 sm:$0xff]  }
 0x81b   : > { %17506 = vmatprep.subr.bf16.mxu0 %v23689_v10  ;;  %v23753_v10 = vld [vmem:[%s24682_s12 + $0x3820] ss:$24 sps:$4 sm:$0xff]  }
 0x81d   : > { %17498 = vmatmul.mubr.bf16.vlgmr.msra.gmra.mrb[4].mxu0 %v25268_v20  ;;  %16498 = vmatpush1.bf16.msra.mxu1 %v23684_v42  ;;  %v23699_v20 = vld [vmem:[%s24682_s12 + $0x3670] ss:$24 sps:$4 sm:$0xff]   ;;  %v23758_v42 = vld [vmem:[%s24682_s12 + $0x39cc] ss:$24 sps:$4 sm:$0xff]  }
 0x81e   : > { %17507 = vmatpush1.bf16.msra.mxu0 %v23687_v39  ;;  %16499 = vmatprep.subr.bf16.mxu1 %v23692_v35  ;;  %v23761_v39 = vld [vmem:[%s24682_s12 + $0x3854] ss:$24 sps:$4 sm:$0xff]   ;;  %v23756_v35 = vld [vmem:[%s24682_s12 + $0x39c8] ss:$24 sps:$4 sm:$0xff]  }
 0x81f   : > { %17508 = vmatprep.subr.bf16.mxu0 %v23695_v49  ;;  %17538 = vmatprep.mubr.bf16.mxu0 %v25276_v9  ;;  %v23710_v9 = vld [vmem:[%s24682_s12 + $0x384c] ss:$24 sps:$4 sm:$0xff]   ;;  %v23759_v49 = vld [vmem:[%s24682_s12 + $0x3850] ss:$24 sps:$4 sm:$0xff]  }
 0x821   : > { %16500 = vmatpush1.bf16.msra.mxu1 %v23690_v19  ;;  %v23764_v19 = vld [vmem:[%s24682_s12 + $0x39fc] ss:$24 sps:$4 sm:$0xff]  }
 0x822   : > { %17509 = vmatpush1.bf16.msra.mxu0 %v23693_v38  ;;  %16501 = vmatprep.subr.bf16.mxu1 %v23698_v56  ;;  %v23767_v38 = vld [vmem:[%s24682_s12 + $0x3884] ss:$24 sps:$4 sm:$0xff]   ;;  %v23762_v56 = vld [vmem:[%s24682_s12 + $0x39f8] ss:$24 sps:$4 sm:$0xff]  }
 0x823   : > { %17510 = vmatprep.subr.bf16.mxu0 %v23701_v33  ;;  %v23765_v33 = vld [vmem:[%s24682_s12 + $0x3880] ss:$24 sps:$4 sm:$0xff]  }
 0x825   : > { %16502 = vmatpush1.bf16.msra.mxu1 %v23696_v51  ;;  %v23770_v51 = vld [vmem:[%s24682_s12 + $0x3a2c] ss:$24 sps:$4 sm:$0xff]  }
 0x826   : > { %17511 = vmatpush1.bf16.msra.mxu0 %v23699_v20  ;;  %16503 = vmatprep.subr.bf16.mxu1 %v23704_v31  ;;  %v23773_v20 = vld [vmem:[%s24682_s12 + $0x38b4] ss:$24 sps:$4 sm:$0xff]   ;;  %v23768_v31 = vld [vmem:[%s24682_s12 + $0x3a28] ss:$24 sps:$4 sm:$0xff]  }
 0x827   : > { %17512 = vmatprep.subr.bf16.mxu0 %v23707_v7  ;;  %v23771_v7 = vld [vmem:[%s24682_s12 + $0x38b0] ss:$24 sps:$4 sm:$0xff]  }
 0x829   : > { %16504 = vmatpush1.bf16.msra.mxu1 %v23702_v40  ;;  %v23776_v40 = vld [vmem:[%s24682_s12 + $0x3a5c] ss:$24 sps:$4 sm:$0xff]  }
 0x82a   : > { %17513 = vmatpush1.bf16.msra.mxu0 %v23705_v24  ;;  %16505 = vmatprep.subr.bf16.mxu1 %v23710_v9  ;;  %v23779_v24 = vld [vmem:[%s24682_s12 + $0x38e4] ss:$24 sps:$4 sm:$0xff]   ;;  %v23774_v9 = vld [vmem:[%s24682_s12 + $0x3a58] ss:$24 sps:$4 sm:$0xff]  }
 0x82b   : > { %17514 = vmatprep.subr.bf16.mxu0 %v23713_v6  ;;  %v23777_v6 = vld [vmem:[%s24682_s12 + $0x38e0] ss:$24 sps:$4 sm:$0xff]  }
 0x82d   : > { %16506 = vmatpush1.bf16.msra.mxu1 %v23708_v48  ;;  %v23782_v48 = vld [vmem:[%s24682_s12 + $0x3a8c] ss:$24 sps:$4 sm:$0xff]  }
 0x82e   : > { %17515 = vmatpush1.bf16.msra.mxu0 %v23711_v21  ;;  %16507 = vmatprep.subr.bf16.mxu1 %v23716_v61  ;;  %v23785_v21 = vld [vmem:[%s24682_s12 + $0x3914] ss:$24 sps:$4 sm:$0xff]   ;;  %v23780_v61 = vld [vmem:[%s24682_s12 + $0x3a88] ss:$24 sps:$4 sm:$0xff]  }
 0x82f   : > { %17516 = vmatprep.subr.bf16.mxu0 %v23719_v26  ;;  %v23783_v26 = vld [vmem:[%s24682_s12 + $0x3910] ss:$24 sps:$4 sm:$0xff]  }
 0x831   : > { %16508 = vmatpush1.bf16.msra.mxu1 %v23714_v30  ;;  %v23788_v30 = vld [vmem:[%s24682_s12 + $0x3abc] ss:$24 sps:$4 sm:$0xff]  }
 0x832   : > { %17517 = vmatpush1.bf16.msra.mxu0 %v23717_v2  ;;  %16509 = vmatprep.subr.bf16.mxu1 %v23722_v13  ;;  %v23791_v2 = vld [vmem:[%s24682_s12 + $0x3944] ss:$24 sps:$4 sm:$0xff]   ;;  %v23786_v13 = vld [vmem:[%s24682_s12 + $0x3ab8] ss:$24 sps:$4 sm:$0xff]  }
 0x833   : > { %17518 = vmatprep.subr.bf16.mxu0 %v23725_v52  ;;  %v23789_v52 = vld [vmem:[%s24682_s12 + $0x3940] ss:$24 sps:$4 sm:$0xff]  }
 0x835   : > { %16510 = vmatpush1.bf16.msra.mxu1 %v23720_v0  ;;  %v23794_v0 = vld [vmem:[%s24682_s12 + $0x3aec] ss:$24 sps:$4 sm:$0xff]  }
 0x836   : > { %17519 = vmatpush1.bf16.msra.mxu0 %v23723_v37  ;;  %16511 = vmatprep.subr.bf16.mxu1 %v23728_v4  ;;  %v23797_v37 = vld [vmem:[%s24682_s12 + $0x3974] ss:$24 sps:$4 sm:$0xff]   ;;  %v23792_v4 = vld [vmem:[%s24682_s12 + $0x3ae8] ss:$24 sps:$4 sm:$0xff]  }
 0x837   : > { %17520 = vmatprep.subr.bf16.mxu0 %v23731_v11  ;;  %v23800_v11 = vld [vmem:[%s24682_s12 + $0x3b1c] ss:$24 sps:$4 sm:$0xff]  }
 0x839   : > { %16512 = vmatpush1.bf16.msra.mxu1 %v23726_v15  ;;  %v23803_v15 = vld [vmem:[%s24682_s12 + $0x39a4] ss:$24 sps:$4 sm:$0xff]  }
 0x83a   : > { %17521 = vmatpush1.bf16.msra.mxu0 %v23729_v23  ;;  %16522 = vmatprep.subr.bf16.mxu1 %v23734_v62  ;;  %v23798_v23 = vld [vmem:[%s24682_s12 + $0x3b18] ss:$24 sps:$4 sm:$0xff]  }
 0x83b   : > { %17522 = vmatprep.subr.bf16.mxu0 %v23737_v8  ;;  %v23801_v62 = vld [vmem:[%s24682_s12 + $0x39a0] ss:$24 sps:$4 sm:$0xff]   ;;  %v23809_v8 = vld [vmem:[%s24682_s12 + $0x39d4] ss:$24 sps:$4 sm:$0xff]  }
 0x83c   : > { %16514 = vmatmul.mubr.bf16.vlgmr.msra.gmra.mrb[4].mxu1 %v25362_v22 }
 0x83d   : > { %16523 = vmatpush1.bf16.msra.mxu1 %v23732_v16  ;;  %16554 = vmatprep.mubr.bf16.mxu1 %v25370_v63  ;;  %v23804_v16 = vld [vmem:[%s24682_s12 + $0x3b48] ss:$24 sps:$4 sm:$0xff]  }
 0x83e   : > { %17523 = vmatpush1.bf16.msra.mxu0 %v23735_v60  ;;  %16524 = vmatprep.subr.bf16.mxu1 %v23740_v47  ;;  %v23807_v60 = vld [vmem:[%s24682_s12 + $0x39d0] ss:$24 sps:$4 sm:$0xff]   ;;  %v23812_v47 = vld [vmem:[%s24682_s12 + $0x3b7c] ss:$24 sps:$4 sm:$0xff]  }
 0x83f   : > { %17524 = vmatprep.subr.bf16.mxu0 %v23743_v18  ;;  %v23815_v18 = vld [vmem:[%s24682_s12 + $0x3a04] ss:$24 sps:$4 sm:$0xff]  }
 0x841   : > { %16525 = vmatpush1.bf16.msra.mxu1 %v23738_v41  ;;  %v23810_v41 = vld [vmem:[%s24682_s12 + $0x3b78] ss:$24 sps:$4 sm:$0xff]  }
 0x842   : > { %17525 = vmatpush1.bf16.msra.mxu0 %v23741_v12  ;;  %16526 = vmatprep.subr.bf16.mxu1 %v23746_v43  ;;  %v23813_v12 = vld [vmem:[%s24682_s12 + $0x3a00] ss:$24 sps:$4 sm:$0xff]   ;;  %v23818_v43 = vld [vmem:[%s24682_s12 + $0x3bac] ss:$24 sps:$4 sm:$0xff]  }
 0x843   : > { %17526 = vmatprep.subr.bf16.mxu0 %v23749_v57  ;;  %v23821_v57 = vld [vmem:[%s24682_s12 + $0x3a34] ss:$24 sps:$4 sm:$0xff]  }
 0x845   : > { %16527 = vmatpush1.bf16.msra.mxu1 %v23744_v27  ;;  %v23816_v27 = vld [vmem:[%s24682_s12 + $0x3ba8] ss:$24 sps:$4 sm:$0xff]  }
 0x846   : > { %17527 = vmatpush1.bf16.msra.mxu0 %v23747_v32  ;;  %16528 = vmatprep.subr.bf16.mxu1 %v23752_v53  ;;  %v23819_v32 = vld [vmem:[%s24682_s12 + $0x3a30] ss:$24 sps:$4 sm:$0xff]   ;;  %v23824_v53 = vld [vmem:[%s24682_s12 + $0x3bdc] ss:$24 sps:$4 sm:$0xff]  }
 0x847   : > { %17528 = vmatprep.subr.bf16.mxu0 %v23755_v17  ;;  %v23827_v17 = vld [vmem:[%s24682_s12 + $0x3a64] ss:$24 sps:$4 sm:$0xff]  }
 0x849   : > { %16529 = vmatpush1.bf16.msra.mxu1 %v23750_v59  ;;  %v23822_v59 = vld [vmem:[%s24682_s12 + $0x3bd8] ss:$24 sps:$4 sm:$0xff]  }
 0x84a   : > { %17529 = vmatpush1.bf16.msra.mxu0 %v23753_v10  ;;  %16530 = vmatprep.subr.bf16.mxu1 %v23758_v42  ;;  %v23825_v10 = vld [vmem:[%s24682_s12 + $0x3a60] ss:$24 sps:$4 sm:$0xff]   ;;  %v23830_v42 = vld [vmem:[%s24682_s12 + $0x3c0c] ss:$24 sps:$4 sm:$0xff]  }
 0x84b   : > { %17530 = vmatprep.subr.bf16.mxu0 %v23761_v39  ;;  %v23833_v39 = vld [vmem:[%s24682_s12 + $0x3a94] ss:$24 sps:$4 sm:$0xff]  }
 0x84d   : > { %16531 = vmatpush1.bf16.msra.mxu1 %v23756_v35  ;;  %v23828_v35 = vld [vmem:[%s24682_s12 + $0x3c08] ss:$24 sps:$4 sm:$0xff]  }
 0x84e   : > { %17531 = vmatpush1.bf16.msra.mxu0 %v23759_v49  ;;  %16532 = vmatprep.subr.bf16.mxu1 %v23764_v19  ;;  %v23831_v49 = vld [vmem:[%s24682_s12 + $0x3a90] ss:$24 sps:$4 sm:$0xff]   ;;  %v23836_v19 = vld [vmem:[%s24682_s12 + $0x3c3c] ss:$24 sps:$4 sm:$0xff]  }
 0x84f   : > { %17532 = vmatprep.subr.bf16.mxu0 %v23767_v38  ;;  %v23839_v38 = vld [vmem:[%s24682_s12 + $0x3ac4] ss:$24 sps:$4 sm:$0xff]  }
 0x851   : > { %16533 = vmatpush1.bf16.msra.mxu1 %v23762_v56  ;;  %v23834_v56 = vld [vmem:[%s24682_s12 + $0x3c38] ss:$24 sps:$4 sm:$0xff]  }
 0x852   : > { %17533 = vmatpush1.bf16.msra.mxu0 %v23765_v33  ;;  %16534 = vmatprep.subr.bf16.mxu1 %v23770_v51  ;;  %v23837_v33 = vld [vmem:[%s24682_s12 + $0x3ac0] ss:$24 sps:$4 sm:$0xff]   ;;  %v23842_v51 = vld [vmem:[%s24682_s12 + $0x3c6c] ss:$24 sps:$4 sm:$0xff]  }
 0x853   : > { %17534 = vmatprep.subr.bf16.mxu0 %v23773_v20  ;;  %v23845_v20 = vld [vmem:[%s24682_s12 + $0x3af4] ss:$24 sps:$4 sm:$0xff]  }
 0x855   : > { %16535 = vmatpush1.bf16.msra.mxu1 %v23768_v31  ;;  %v23840_v31 = vld [vmem:[%s24682_s12 + $0x3c68] ss:$24 sps:$4 sm:$0xff]  }
 0x856   : > { %17535 = vmatpush1.bf16.msra.mxu0 %v23771_v7  ;;  %16536 = vmatprep.subr.bf16.mxu1 %v23776_v40  ;;  %v23843_v7 = vld [vmem:[%s24682_s12 + $0x3af0] ss:$24 sps:$4 sm:$0xff]   ;;  %v23848_v40 = vld [vmem:[%s24682_s12 + $0x3c9c] ss:$24 sps:$4 sm:$0xff]  }
 0x857   : > { %17536 = vmatprep.subr.bf16.mxu0 %v23779_v24  ;;  %v23851_v24 = vld [vmem:[%s24682_s12 + $0x3b24] ss:$24 sps:$4 sm:$0xff]  }
 0x859   : > { %16537 = vmatpush1.bf16.msra.mxu1 %v23774_v9  ;;  %v23846_v9 = vld [vmem:[%s24682_s12 + $0x3c98] ss:$24 sps:$4 sm:$0xff]  }
 0x85a   : > { %17537 = vmatpush1.bf16.msra.mxu0 %v23777_v6  ;;  %16538 = vmatprep.subr.bf16.mxu1 %v23782_v48  ;;  %v23849_v6 = vld [vmem:[%s24682_s12 + $0x3b20] ss:$24 sps:$4 sm:$0xff]   ;;  %v23854_v48 = vld [vmem:[%s24682_s12 + $0x3ccc] ss:$24 sps:$4 sm:$0xff]  }
 0x85b   : > { %17547 = vmatprep.subr.bf16.mxu0 %v23785_v21  ;;  %v23857_v21 = vld [vmem:[%s24682_s12 + $0x3b54] ss:$24 sps:$4 sm:$0xff]  }
 0x85d   : > { %17539 = vmatmul.mubr.bf16.vlgmr.msra.gmra.mrb[4].mxu0 %v25362_v22  ;;  %16539 = vmatpush1.bf16.msra.mxu1 %v23780_v61  ;;  %v23795_v22 = vld [vmem:[%s24682_s12 + $0x3970] ss:$24 sps:$4 sm:$0xff]  }
 0x85e   : > { %17548 = vmatpush1.bf16.msra.mxu0 %v23783_v26  ;;  %16540 = vmatprep.subr.bf16.mxu1 %v23788_v30  ;;  %v23852_v61 = vld [vmem:[%s24682_s12 + $0x3cc8] ss:$24 sps:$4 sm:$0xff]   ;;  %v23860_v30 = vld [vmem:[%s24682_s12 + $0x3cfc] ss:$24 sps:$4 sm:$0xff]  }
 0x85f   : > { %17549 = vmatprep.subr.bf16.mxu0 %v23791_v2  ;;  %17579 = vmatprep.mubr.bf16.mxu0 %v25370_v63  ;;  %v23806_v63 = vld [vmem:[%s24682_s12 + $0x3b4c] ss:$24 sps:$4 sm:$0xff]   ;;  %v23855_v26 = vld [vmem:[%s24682_s12 + $0x3b50] ss:$24 sps:$4 sm:$0xff]  }
 0x860   : > { %v23863_v2 = vld [vmem:[%s24682_s12 + $0x3b84] ss:$24 sps:$4 sm:$0xff]  }
 0x861   : > { %16541 = vmatpush1.bf16.msra.mxu1 %v23786_v13  ;;  %v23858_v13 = vld [vmem:[%s24682_s12 + $0x3cf8] ss:$24 sps:$4 sm:$0xff]  }
 0x862   : > { %17550 = vmatpush1.bf16.msra.mxu0 %v23789_v52  ;;  %16542 = vmatprep.subr.bf16.mxu1 %v23794_v0  ;;  %v23861_v52 = vld [vmem:[%s24682_s12 + $0x3b80] ss:$24 sps:$4 sm:$0xff]   ;;  %v23866_v0 = vld [vmem:[%s24682_s12 + $0x3d2c] ss:$24 sps:$4 sm:$0xff]  }
 0x863   : > { %17551 = vmatprep.subr.bf16.mxu0 %v23797_v37  ;;  %v23869_v37 = vld [vmem:[%s24682_s12 + $0x3bb4] ss:$24 sps:$4 sm:$0xff]  }
 0x865   : > { %16543 = vmatpush1.bf16.msra.mxu1 %v23792_v4  ;;  %v23864_v4 = vld [vmem:[%s24682_s12 + $0x3d28] ss:$24 sps:$4 sm:$0xff]  }
 0x866   : > { %17552 = vmatpush1.bf16.msra.mxu0 %v23795_v22  ;;  %16544 = vmatprep.subr.bf16.mxu1 %v23800_v11  ;;  %v23867_v22 = vld [vmem:[%s24682_s12 + $0x3bb0] ss:$24 sps:$4 sm:$0xff]   ;;  %v23872_v11 = vld [vmem:[%s24682_s12 + $0x3d5c] ss:$24 sps:$4 sm:$0xff]  }
 0x867   : > { %17553 = vmatprep.subr.bf16.mxu0 %v23803_v15  ;;  %v23875_v15 = vld [vmem:[%s24682_s12 + $0x3be4] ss:$24 sps:$4 sm:$0xff]  }
 0x869   : > { %16545 = vmatpush1.bf16.msra.mxu1 %v23798_v23  ;;  %v23870_v23 = vld [vmem:[%s24682_s12 + $0x3d58] ss:$24 sps:$4 sm:$0xff]  }
 0x86a   : > { %17554 = vmatpush1.bf16.msra.mxu0 %v23801_v62  ;;  %16546 = vmatprep.subr.bf16.mxu1 %v23806_v63  ;;  %v23873_v62 = vld [vmem:[%s24682_s12 + $0x3be0] ss:$24 sps:$4 sm:$0xff]   ;;  %v23878_v63 = vld [vmem:[%s24682_s12 + $0x3d8c] ss:$24 sps:$4 sm:$0xff]  }
 0x86b   : > { %17555 = vmatprep.subr.bf16.mxu0 %v23809_v8  ;;  %v23881_v8 = vld [vmem:[%s24682_s12 + $0x3c14] ss:$24 sps:$4 sm:$0xff]  }
 0x86d   : > { %16547 = vmatpush1.bf16.msra.mxu1 %v23804_v16  ;;  %v23876_v16 = vld [vmem:[%s24682_s12 + $0x3d88] ss:$24 sps:$4 sm:$0xff]  }
 0x86e   : > { %17556 = vmatpush1.bf16.msra.mxu0 %v23807_v60  ;;  %16548 = vmatprep.subr.bf16.mxu1 %v23812_v47  ;;  %v23879_v60 = vld [vmem:[%s24682_s12 + $0x3c10] ss:$24 sps:$4 sm:$0xff]   ;;  %v23884_v47 = vld [vmem:[%s24682_s12 + $0x3dbc] ss:$24 sps:$4 sm:$0xff]  }
 0x86f   : > { %17557 = vmatprep.subr.bf16.mxu0 %v23815_v18  ;;  %v23887_v18 = vld [vmem:[%s24682_s12 + $0x3c44] ss:$24 sps:$4 sm:$0xff]  }
 0x871   : > { %16549 = vmatpush1.bf16.msra.mxu1 %v23810_v41  ;;  %v23882_v41 = vld [vmem:[%s24682_s12 + $0x3db8] ss:$24 sps:$4 sm:$0xff]  }
 0x872   : > { %17558 = vmatpush1.bf16.msra.mxu0 %v23813_v12  ;;  %16550 = vmatprep.subr.bf16.mxu1 %v23818_v43  ;;  %v23885_v12 = vld [vmem:[%s24682_s12 + $0x3c40] ss:$24 sps:$4 sm:$0xff]   ;;  %v23890_v43 = vld [vmem:[%s24682_s12 + $0x3dec] ss:$24 sps:$4 sm:$0xff]  }
 0x873   : > { %17559 = vmatprep.subr.bf16.mxu0 %v23821_v57  ;;  %v23893_v57 = vld [vmem:[%s24682_s12 + $0x3c74] ss:$24 sps:$4 sm:$0xff]  }
 0x875   : > { %16551 = vmatpush1.bf16.msra.mxu1 %v23816_v27  ;;  %v23888_v27 = vld [vmem:[%s24682_s12 + $0x3de8] ss:$24 sps:$4 sm:$0xff]  }
 0x876   : > { %17560 = vmatpush1.bf16.msra.mxu0 %v23819_v32  ;;  %16552 = vmatprep.subr.bf16.mxu1 %v23824_v53  ;;  %v23896_v32 = vld [vmem:[%s24682_s12 + $0x3e1c] ss:$24 sps:$4 sm:$0xff]  }
 0x877   : > { %17561 = vmatprep.subr.bf16.mxu0 %v23827_v17  ;;  %v23899_v53 = vld [vmem:[%s24682_s12 + $0x3ca4] ss:$24 sps:$4 sm:$0xff]   ;;  %v23894_v17 = vld [vmem:[%s24682_s12 + $0x3e18] ss:$24 sps:$4 sm:$0xff]  }
 0x879   : > { %16553 = vmatpush1.bf16.msra.mxu1 %v23822_v59  ;;  %v23897_v59 = vld [vmem:[%s24682_s12 + $0x3ca0] ss:$24 sps:$4 sm:$0xff]  }
 0x87a   : > { %17562 = vmatpush1.bf16.msra.mxu0 %v23825_v10  ;;  %16563 = vmatprep.subr.bf16.mxu1 %v23830_v42  ;;  %v23905_v10 = vld [vmem:[%s24682_s12 + $0x3cd4] ss:$24 sps:$4 sm:$0xff]   ;;  %v23900_v42 = vld [vmem:[%s24682_s12 + $0x3e48] ss:$24 sps:$4 sm:$0xff]  }
 0x87b   : > { %17563 = vmatprep.subr.bf16.mxu0 %v23833_v39  ;;  %v23903_v39 = vld [vmem:[%s24682_s12 + $0x3cd0] ss:$24 sps:$4 sm:$0xff]  }
 0x87c   : > { %16555 = vmatmul.mubr.bf16.vlgmr.msra.gmra.mrb[4].mxu1 %v25460_v46 }
 0x87d   : > { %16564 = vmatpush1.bf16.msra.mxu1 %v23828_v35  ;;  %16595 = vmatprep.mubr.bf16.mxu1 %v25468_v5  ;;  %v23908_v35 = vld [vmem:[%s24682_s12 + $0x3e7c] ss:$24 sps:$4 sm:$0xff]  }
 0x87e   : > { %17564 = vmatpush1.bf16.msra.mxu0 %v23831_v49  ;;  %16565 = vmatprep.subr.bf16.mxu1 %v23836_v19  ;;  %v23911_v49 = vld [vmem:[%s24682_s12 + $0x3d04] ss:$24 sps:$4 sm:$0xff]   ;;  %v23906_v19 = vld [vmem:[%s24682_s12 + $0x3e78] ss:$24 sps:$4 sm:$0xff]  }
 0x87f   : > { %17565 = vmatprep.subr.bf16.mxu0 %v23839_v38  ;;  %v23909_v38 = vld [vmem:[%s24682_s12 + $0x3d00] ss:$24 sps:$4 sm:$0xff]  }
 0x881   : > { %16566 = vmatpush1.bf16.msra.mxu1 %v23834_v56  ;;  %v23914_v56 = vld [vmem:[%s24682_s12 + $0x3eac] ss:$24 sps:$4 sm:$0xff]  }
 0x882   : > { %17566 = vmatpush1.bf16.msra.mxu0 %v23837_v33  ;;  %16567 = vmatprep.subr.bf16.mxu1 %v23842_v51  ;;  %v23917_v33 = vld [vmem:[%s24682_s12 + $0x3d34] ss:$24 sps:$4 sm:$0xff]   ;;  %v23912_v51 = vld [vmem:[%s24682_s12 + $0x3ea8] ss:$24 sps:$4 sm:$0xff]  }
 0x883   : > { %17567 = vmatprep.subr.bf16.mxu0 %v23845_v20  ;;  %v23915_v20 = vld [vmem:[%s24682_s12 + $0x3d30] ss:$24 sps:$4 sm:$0xff]  }
 0x885   : > { %16568 = vmatpush1.bf16.msra.mxu1 %v23840_v31  ;;  %v23920_v31 = vld [vmem:[%s24682_s12 + $0x3edc] ss:$24 sps:$4 sm:$0xff]  }
 0x886   : > { %17568 = vmatpush1.bf16.msra.mxu0 %v23843_v7  ;;  %16569 = vmatprep.subr.bf16.mxu1 %v23848_v40  ;;  %v23923_v7 = vld [vmem:[%s24682_s12 + $0x3d64] ss:$24 sps:$4 sm:$0xff]   ;;  %v23918_v40 = vld [vmem:[%s24682_s12 + $0x3ed8] ss:$24 sps:$4 sm:$0xff]  }
 0x887   : > { %17569 = vmatprep.subr.bf16.mxu0 %v23851_v24  ;;  %v23921_v24 = vld [vmem:[%s24682_s12 + $0x3d60] ss:$24 sps:$4 sm:$0xff]  }
 0x889   : > { %16570 = vmatpush1.bf16.msra.mxu1 %v23846_v9  ;;  %v23926_v9 = vld [vmem:[%s24682_s12 + $0x3f0c] ss:$24 sps:$4 sm:$0xff]  }
 0x88a   : > { %17570 = vmatpush1.bf16.msra.mxu0 %v23849_v6  ;;  %16571 = vmatprep.subr.bf16.mxu1 %v23854_v48  ;;  %v23929_v6 = vld [vmem:[%s24682_s12 + $0x3d94] ss:$24 sps:$4 sm:$0xff]   ;;  %v23924_v48 = vld [vmem:[%s24682_s12 + $0x3f08] ss:$24 sps:$4 sm:$0xff]  }
 0x88b   : > { %17571 = vmatprep.subr.bf16.mxu0 %v23857_v21  ;;  %v23927_v21 = vld [vmem:[%s24682_s12 + $0x3d90] ss:$24 sps:$4 sm:$0xff]  }
 0x88d   : > { %16572 = vmatpush1.bf16.msra.mxu1 %v23852_v61  ;;  %v23932_v61 = vld [vmem:[%s24682_s12 + $0x3f3c] ss:$24 sps:$4 sm:$0xff]  }
 0x88e   : > { %17572 = vmatpush1.bf16.msra.mxu0 %v23855_v26  ;;  %16573 = vmatprep.subr.bf16.mxu1 %v23860_v30  ;;  %v23935_v26 = vld [vmem:[%s24682_s12 + $0x3dc4] ss:$24 sps:$4 sm:$0xff]   ;;  %v23930_v30 = vld [vmem:[%s24682_s12 + $0x3f38] ss:$24 sps:$4 sm:$0xff]  }
 0x88f   : > { %17573 = vmatprep.subr.bf16.mxu0 %v23863_v2  ;;  %v23933_v2 = vld [vmem:[%s24682_s12 + $0x3dc0] ss:$24 sps:$4 sm:$0xff]  }
 0x891   : > { %16574 = vmatpush1.bf16.msra.mxu1 %v23858_v13  ;;  %v23938_v13 = vld [vmem:[%s24682_s12 + $0x3f6c] ss:$24 sps:$4 sm:$0xff]  }
 0x892   : > { %17574 = vmatpush1.bf16.msra.mxu0 %v23861_v52  ;;  %16575 = vmatprep.subr.bf16.mxu1 %v23866_v0  ;;  %v23941_v52 = vld [vmem:[%s24682_s12 + $0x3df4] ss:$24 sps:$4 sm:$0xff]   ;;  %v23936_v0 = vld [vmem:[%s24682_s12 + $0x3f68] ss:$24 sps:$4 sm:$0xff]  }
 0x893   : > { %17575 = vmatprep.subr.bf16.mxu0 %v23869_v37  ;;  %v23939_v37 = vld [vmem:[%s24682_s12 + $0x3df0] ss:$24 sps:$4 sm:$0xff]  }
 0x895   : > { %16576 = vmatpush1.bf16.msra.mxu1 %v23864_v4  ;;  %v23944_v4 = vld [vmem:[%s24682_s12 + $0x3f9c] ss:$24 sps:$4 sm:$0xff]  }
 0x896   : > { %17576 = vmatpush1.bf16.msra.mxu0 %v23867_v22  ;;  %16577 = vmatprep.subr.bf16.mxu1 %v23872_v11  ;;  %v23947_v22 = vld [vmem:[%s24682_s12 + $0x3e24] ss:$24 sps:$4 sm:$0xff]   ;;  %v23942_v11 = vld [vmem:[%s24682_s12 + $0x3f98] ss:$24 sps:$4 sm:$0xff]  }
 0x897   : > { %17577 = vmatprep.subr.bf16.mxu0 %v23875_v15  ;;  %v23945_v15 = vld [vmem:[%s24682_s12 + $0x3e20] ss:$24 sps:$4 sm:$0xff]  }
 0x899   : > { %16578 = vmatpush1.bf16.msra.mxu1 %v23870_v23  ;;  %v23950_v23 = vld [vmem:[%s24682_s12 + $0x3fcc] ss:$24 sps:$4 sm:$0xff]  }
 0x89a   : > { %17578 = vmatpush1.bf16.msra.mxu0 %v23873_v62  ;;  %16579 = vmatprep.subr.bf16.mxu1 %v23878_v63  ;;  %v23953_v62 = vld [vmem:[%s24682_s12 + $0x3e54] ss:$24 sps:$4 sm:$0xff]   ;;  %v23948_v63 = vld [vmem:[%s24682_s12 + $0x3fc8] ss:$24 sps:$4 sm:$0xff]  }
 0x89b   : > { %17588 = vmatprep.subr.bf16.mxu0 %v23881_v8  ;;  %v23951_v8 = vld [vmem:[%s24682_s12 + $0x3e50] ss:$24 sps:$4 sm:$0xff]  }
 0x89d   : > { %17580 = vmatmul.mubr.bf16.vlgmr.msra.gmra.mrb[4].mxu0 %v25460_v46  ;;  %16580 = vmatpush1.bf16.msra.mxu1 %v23876_v16  ;;  %v23891_v46 = vld [vmem:[%s24682_s12 + $0x3c70] ss:$24 sps:$4 sm:$0xff]   ;;  %v23956_v16 = vld [vmem:[%s24682_s12 + $0x3ffc] ss:$24 sps:$4 sm:$0xff]  }
 0x89e   : > { %17589 = vmatpush1.bf16.msra.mxu0 %v23879_v60  ;;  %16581 = vmatprep.subr.bf16.mxu1 %v23884_v47  ;;  %v23959_v60 = vld [vmem:[%s24682_s12 + $0x3e84] ss:$24 sps:$4 sm:$0xff]   ;;  %v23954_v47 = vld [vmem:[%s24682_s12 + $0x3ff8] ss:$24 sps:$4 sm:$0xff]  }
 0x89f   : > { %17590 = vmatprep.subr.bf16.mxu0 %v23887_v18  ;;  %17620 = vmatprep.mubr.bf16.mxu0 %v25468_v5  ;;  %v23902_v5 = vld [vmem:[%s24682_s12 + $0x3e4c] ss:$24 sps:$4 sm:$0xff]   ;;  %v23957_v18 = vld [vmem:[%s24682_s12 + $0x3e80] ss:$24 sps:$4 sm:$0xff]  }
 0x8a1   : > { %16582 = vmatpush1.bf16.msra.mxu1 %v23882_v41  ;;  %v23962_v41 = vld [vmem:[%s24682_s12 + $0x402c] ss:$24 sps:$4 sm:$0xff]  }
 0x8a2   : > { %17591 = vmatpush1.bf16.msra.mxu0 %v23885_v12  ;;  %16583 = vmatprep.subr.bf16.mxu1 %v23890_v43  ;;  %v23965_v12 = vld [vmem:[%s24682_s12 + $0x3eb4] ss:$24 sps:$4 sm:$0xff]   ;;  %v23960_v43 = vld [vmem:[%s24682_s12 + $0x4028] ss:$24 sps:$4 sm:$0xff]  }
 0x8a3   : > { %17592 = vmatprep.subr.bf16.mxu0 %v23893_v57  ;;  %v23963_v57 = vld [vmem:[%s24682_s12 + $0x3eb0] ss:$24 sps:$4 sm:$0xff]  }
 0x8a5   : > { %16584 = vmatpush1.bf16.msra.mxu1 %v23888_v27  ;;  %v23968_v27 = vld [vmem:[%s24682_s12 + $0x405c] ss:$24 sps:$4 sm:$0xff]  }
 0x8a6   : > { %17593 = vmatpush1.bf16.msra.mxu0 %v23891_v46  ;;  %16585 = vmatprep.subr.bf16.mxu1 %v23896_v32  ;;  %v23971_v46 = vld [vmem:[%s24682_s12 + $0x3ee4] ss:$24 sps:$4 sm:$0xff]   ;;  %v23966_v32 = vld [vmem:[%s24682_s12 + $0x4058] ss:$24 sps:$4 sm:$0xff]  }
 0x8a7   : > { %17594 = vmatprep.subr.bf16.mxu0 %v23899_v53  ;;  %v23969_v53 = vld [vmem:[%s24682_s12 + $0x3ee0] ss:$24 sps:$4 sm:$0xff]  }
 0x8a9   : > { %16586 = vmatpush1.bf16.msra.mxu1 %v23894_v17  ;;  %v23974_v17 = vld [vmem:[%s24682_s12 + $0x408c] ss:$24 sps:$4 sm:$0xff]  }
 0x8aa   : > { %17595 = vmatpush1.bf16.msra.mxu0 %v23897_v59  ;;  %16587 = vmatprep.subr.bf16.mxu1 %v23902_v5  ;;  %v23977_v59 = vld [vmem:[%s24682_s12 + $0x3f14] ss:$24 sps:$4 sm:$0xff]   ;;  %v23972_v5 = vld [vmem:[%s24682_s12 + $0x4088] ss:$24 sps:$4 sm:$0xff]  }
 0x8ab   : > { %17596 = vmatprep.subr.bf16.mxu0 %v23905_v10  ;;  %v23975_v10 = vld [vmem:[%s24682_s12 + $0x3f10] ss:$24 sps:$4 sm:$0xff]  }
 0x8ad   : > { %16588 = vmatpush1.bf16.msra.mxu1 %v23900_v42  ;;  %v23980_v42 = vld [vmem:[%s24682_s12 + $0x40bc] ss:$24 sps:$4 sm:$0xff]  }
 0x8ae   : > { %17597 = vmatpush1.bf16.msra.mxu0 %v23903_v39  ;;  %16589 = vmatprep.subr.bf16.mxu1 %v23908_v35  ;;  %v23983_v39 = vld [vmem:[%s24682_s12 + $0x3f44] ss:$24 sps:$4 sm:$0xff]   ;;  %v23978_v35 = vld [vmem:[%s24682_s12 + $0x40b8] ss:$24 sps:$4 sm:$0xff]  }
 0x8af   : > { %17598 = vmatprep.subr.bf16.mxu0 %v23911_v49  ;;  %v23981_v49 = vld [vmem:[%s24682_s12 + $0x3f40] ss:$24 sps:$4 sm:$0xff]  }
 0x8b1   : > { %16590 = vmatpush1.bf16.msra.mxu1 %v23906_v19  ;;  %v23986_v19 = vld [vmem:[%s24682_s12 + $0x40ec] ss:$24 sps:$4 sm:$0xff]  }
 0x8b2   : > { %17599 = vmatpush1.bf16.msra.mxu0 %v23909_v38  ;;  %16591 = vmatprep.subr.bf16.mxu1 %v23914_v56  ;;  %v23989_v38 = vld [vmem:[%s24682_s12 + $0x3f74] ss:$24 sps:$4 sm:$0xff]   ;;  %v23984_v56 = vld [vmem:[%s24682_s12 + $0x40e8] ss:$24 sps:$4 sm:$0xff]  }
 0x8b3   : > { %17600 = vmatprep.subr.bf16.mxu0 %v23917_v33  ;;  %v23992_v33 = vld [vmem:[%s24682_s12 + $0x411c] ss:$24 sps:$4 sm:$0xff]  }
 0x8b5   : > { %16592 = vmatpush1.bf16.msra.mxu1 %v23912_v51  ;;  %v23995_v51 = vld [vmem:[%s24682_s12 + $0x3fa4] ss:$24 sps:$4 sm:$0xff]  }
 0x8b6   : > { %17601 = vmatpush1.bf16.msra.mxu0 %v23915_v20  ;;  %16593 = vmatprep.subr.bf16.mxu1 %v23920_v31  ;;  %v23990_v20 = vld [vmem:[%s24682_s12 + $0x4118] ss:$24 sps:$4 sm:$0xff]  }
 0x8b7   : > { %17602 = vmatprep.subr.bf16.mxu0 %v23923_v7  ;;  %v23993_v31 = vld [vmem:[%s24682_s12 + $0x3fa0] ss:$24 sps:$4 sm:$0xff]   ;;  %v24001_v7 = vld [vmem:[%s24682_s12 + $0x3fd4] ss:$24 sps:$4 sm:$0xff]  }
 0x8b9   : > { %16594 = vmatpush1.bf16.msra.mxu1 %v23918_v40  ;;  %v23996_v40 = vld [vmem:[%s24682_s12 + $0x4148] ss:$24 sps:$4 sm:$0xff]  }
 0x8ba   : > { %17603 = vmatpush1.bf16.msra.mxu0 %v23921_v24  ;;  %16604 = vmatprep.subr.bf16.mxu1 %v23926_v9  ;;  %v23999_v24 = vld [vmem:[%s24682_s12 + $0x3fd0] ss:$24 sps:$4 sm:$0xff]   ;;  %v24004_v9 = vld [vmem:[%s24682_s12 + $0x417c] ss:$24 sps:$4 sm:$0xff]  }
 0x8bb   : > { %17604 = vmatprep.subr.bf16.mxu0 %v23929_v6  ;;  %v24007_v6 = vld [vmem:[%s24682_s12 + $0x4004] ss:$24 sps:$4 sm:$0xff]  }
 0x8bc   : > { %16596 = vmatmul.mubr.bf16.vlgmr.msra.gmra.mrb[4].mxu1 %v25554_v36 }
 0x8bd   : > { %16605 = vmatpush1.bf16.msra.mxu1 %v23924_v48  ;;  %16636 = vmatprep.mubr.bf16.mxu1 %v25562_v28  ;;  %v24002_v48 = vld [vmem:[%s24682_s12 + $0x4178] ss:$24 sps:$4 sm:$0xff]  }
 0x8be   : > { %17605 = vmatpush1.bf16.msra.mxu0 %v23927_v21  ;;  %16606 = vmatprep.subr.bf16.mxu1 %v23932_v61  ;;  %v24005_v21 = vld [vmem:[%s24682_s12 + $0x4000] ss:$24 sps:$4 sm:$0xff]   ;;  %v24010_v61 = vld [vmem:[%s24682_s12 + $0x41ac] ss:$24 sps:$4 sm:$0xff]  }
 0x8bf   : > { %17606 = vmatprep.subr.bf16.mxu0 %v23935_v26  ;;  %v24013_v26 = vld [vmem:[%s24682_s12 + $0x4034] ss:$24 sps:$4 sm:$0xff]  }
 0x8c1   : > { %16607 = vmatpush1.bf16.msra.mxu1 %v23930_v30  ;;  %v24008_v30 = vld [vmem:[%s24682_s12 + $0x41a8] ss:$24 sps:$4 sm:$0xff]  }
 0x8c2   : > { %17607 = vmatpush1.bf16.msra.mxu0 %v23933_v2  ;;  %16608 = vmatprep.subr.bf16.mxu1 %v23938_v13  ;;  %v24011_v2 = vld [vmem:[%s24682_s12 + $0x4030] ss:$24 sps:$4 sm:$0xff]   ;;  %v24016_v13 = vld [vmem:[%s24682_s12 + $0x41dc] ss:$24 sps:$4 sm:$0xff]  }
 0x8c3   : > { %17608 = vmatprep.subr.bf16.mxu0 %v23941_v52  ;;  %v24019_v52 = vld [vmem:[%s24682_s12 + $0x4064] ss:$24 sps:$4 sm:$0xff]  }
 0x8c5   : > { %16609 = vmatpush1.bf16.msra.mxu1 %v23936_v0  ;;  %v24014_v0 = vld [vmem:[%s24682_s12 + $0x41d8] ss:$24 sps:$4 sm:$0xff]  }
 0x8c6   : > { %17609 = vmatpush1.bf16.msra.mxu0 %v23939_v37  ;;  %16610 = vmatprep.subr.bf16.mxu1 %v23944_v4  ;;  %v24017_v37 = vld [vmem:[%s24682_s12 + $0x4060] ss:$24 sps:$4 sm:$0xff]   ;;  %v24022_v4 = vld [vmem:[%s24682_s12 + $0x420c] ss:$24 sps:$4 sm:$0xff]  }
 0x8c7   : > { %17610 = vmatprep.subr.bf16.mxu0 %v23947_v22  ;;  %v24025_v22 = vld [vmem:[%s24682_s12 + $0x4094] ss:$24 sps:$4 sm:$0xff]  }
 0x8c9   : > { %16611 = vmatpush1.bf16.msra.mxu1 %v23942_v11  ;;  %v24020_v11 = vld [vmem:[%s24682_s12 + $0x4208] ss:$24 sps:$4 sm:$0xff]  }
 0x8ca   : > { %17611 = vmatpush1.bf16.msra.mxu0 %v23945_v15  ;;  %16612 = vmatprep.subr.bf16.mxu1 %v23950_v23  ;;  %v24023_v15 = vld [vmem:[%s24682_s12 + $0x4090] ss:$24 sps:$4 sm:$0xff]   ;;  %v24028_v23 = vld [vmem:[%s24682_s12 + $0x423c] ss:$24 sps:$4 sm:$0xff]  }
 0x8cb   : > { %17612 = vmatprep.subr.bf16.mxu0 %v23953_v62  ;;  %v24031_v62 = vld [vmem:[%s24682_s12 + $0x40c4] ss:$24 sps:$4 sm:$0xff]  }
 0x8cd   : > { %16613 = vmatpush1.bf16.msra.mxu1 %v23948_v63  ;;  %v24026_v63 = vld [vmem:[%s24682_s12 + $0x4238] ss:$24 sps:$4 sm:$0xff]  }
 0x8ce   : > { %17613 = vmatpush1.bf16.msra.mxu0 %v23951_v8  ;;  %16614 = vmatprep.subr.bf16.mxu1 %v23956_v16  ;;  %v24029_v8 = vld [vmem:[%s24682_s12 + $0x40c0] ss:$24 sps:$4 sm:$0xff]   ;;  %v24034_v16 = vld [vmem:[%s24682_s12 + $0x426c] ss:$24 sps:$4 sm:$0xff]  }
 0x8cf   : > { %17614 = vmatprep.subr.bf16.mxu0 %v23959_v60  ;;  %v24037_v60 = vld [vmem:[%s24682_s12 + $0x40f4] ss:$24 sps:$4 sm:$0xff]  }
 0x8d1   : > { %16615 = vmatpush1.bf16.msra.mxu1 %v23954_v47  ;;  %v24032_v47 = vld [vmem:[%s24682_s12 + $0x4268] ss:$24 sps:$4 sm:$0xff]  }
 0x8d2   : > { %17615 = vmatpush1.bf16.msra.mxu0 %v23957_v18  ;;  %16616 = vmatprep.subr.bf16.mxu1 %v23962_v41  ;;  %v24035_v18 = vld [vmem:[%s24682_s12 + $0x40f0] ss:$24 sps:$4 sm:$0xff]   ;;  %v24040_v41 = vld [vmem:[%s24682_s12 + $0x429c] ss:$24 sps:$4 sm:$0xff]  }
 0x8d3   : > { %17616 = vmatprep.subr.bf16.mxu0 %v23965_v12  ;;  %v24043_v12 = vld [vmem:[%s24682_s12 + $0x4124] ss:$24 sps:$4 sm:$0xff]  }
 0x8d5   : > { %16617 = vmatpush1.bf16.msra.mxu1 %v23960_v43  ;;  %v24038_v43 = vld [vmem:[%s24682_s12 + $0x4298] ss:$24 sps:$4 sm:$0xff]  }
 0x8d6   : > { %17617 = vmatpush1.bf16.msra.mxu0 %v23963_v57  ;;  %16618 = vmatprep.subr.bf16.mxu1 %v23968_v27  ;;  %v24041_v57 = vld [vmem:[%s24682_s12 + $0x4120] ss:$24 sps:$4 sm:$0xff]   ;;  %v24046_v27 = vld [vmem:[%s24682_s12 + $0x42cc] ss:$24 sps:$4 sm:$0xff]  }
 0x8d7   : > { %17618 = vmatprep.subr.bf16.mxu0 %v23971_v46  ;;  %v24049_v46 = vld [vmem:[%s24682_s12 + $0x4154] ss:$24 sps:$4 sm:$0xff]  }
 0x8d9   : > { %16619 = vmatpush1.bf16.msra.mxu1 %v23966_v32  ;;  %v24044_v32 = vld [vmem:[%s24682_s12 + $0x42c8] ss:$24 sps:$4 sm:$0xff]  }
 0x8da   : > { %17619 = vmatpush1.bf16.msra.mxu0 %v23969_v53  ;;  %16620 = vmatprep.subr.bf16.mxu1 %v23974_v17  ;;  %v24047_v53 = vld [vmem:[%s24682_s12 + $0x4150] ss:$24 sps:$4 sm:$0xff]   ;;  %v24052_v17 = vld [vmem:[%s24682_s12 + $0x42fc] ss:$24 sps:$4 sm:$0xff]  }
 0x8db   : > { %17629 = vmatprep.subr.bf16.mxu0 %v23977_v59  ;;  %v24055_v59 = vld [vmem:[%s24682_s12 + $0x4184] ss:$24 sps:$4 sm:$0xff]  }
 0x8dd   : > { %17621 = vmatmul.mubr.bf16.vlgmr.msra.gmra.mrb[4].mxu0 %v25554_v36  ;;  %16621 = vmatpush1.bf16.msra.mxu1 %v23972_v5  ;;  %v23987_v36 = vld [vmem:[%s24682_s12 + $0x3f70] ss:$24 sps:$4 sm:$0xff]  }
 0x8de   : > { %17630 = vmatpush1.bf16.msra.mxu0 %v23975_v10  ;;  %16622 = vmatprep.subr.bf16.mxu1 %v23980_v42  ;;  %v24050_v5 = vld [vmem:[%s24682_s12 + $0x42f8] ss:$24 sps:$4 sm:$0xff]   ;;  %v24058_v42 = vld [vmem:[%s24682_s12 + $0x432c] ss:$24 sps:$4 sm:$0xff]  }
 0x8df   : > { %17631 = vmatprep.subr.bf16.mxu0 %v23983_v39  ;;  %17661 = vmatprep.mubr.bf16.mxu0 %v25562_v28  ;;  %v23998_v28 = vld [vmem:[%s24682_s12 + $0x414c] ss:$24 sps:$4 sm:$0xff]   ;;  %v24053_v10 = vld [vmem:[%s24682_s12 + $0x4180] ss:$24 sps:$4 sm:$0xff]  }
 0x8e0   : > { %v24061_v39 = vld [vmem:[%s24682_s12 + $0x41b4] ss:$24 sps:$4 sm:$0xff]  }
 0x8e1   : > { %16623 = vmatpush1.bf16.msra.mxu1 %v23978_v35  ;;  %v24056_v35 = vld [vmem:[%s24682_s12 + $0x4328] ss:$24 sps:$4 sm:$0xff]  }
 0x8e2   : > { %17632 = vmatpush1.bf16.msra.mxu0 %v23981_v49  ;;  %16624 = vmatprep.subr.bf16.mxu1 %v23986_v19  ;;  %v24059_v49 = vld [vmem:[%s24682_s12 + $0x41b0] ss:$24 sps:$4 sm:$0xff]   ;;  %v24064_v19 = vld [vmem:[%s24682_s12 + $0x435c] ss:$24 sps:$4 sm:$0xff]  }
 0x8e3   : > { %17633 = vmatprep.subr.bf16.mxu0 %v23989_v38  ;;  %v24067_v38 = vld [vmem:[%s24682_s12 + $0x41e4] ss:$24 sps:$4 sm:$0xff]  }
 0x8e5   : > { %16625 = vmatpush1.bf16.msra.mxu1 %v23984_v56  ;;  %v24062_v56 = vld [vmem:[%s24682_s12 + $0x4358] ss:$24 sps:$4 sm:$0xff]  }
 0x8e6   : > { %17634 = vmatpush1.bf16.msra.mxu0 %v23987_v36  ;;  %16626 = vmatprep.subr.bf16.mxu1 %v23992_v33  ;;  %v24065_v36 = vld [vmem:[%s24682_s12 + $0x41e0] ss:$24 sps:$4 sm:$0xff]   ;;  %v24070_v33 = vld [vmem:[%s24682_s12 + $0x438c] ss:$24 sps:$4 sm:$0xff]  }
 0x8e7   : > { %17635 = vmatprep.subr.bf16.mxu0 %v23995_v51  ;;  %v24073_v51 = vld [vmem:[%s24682_s12 + $0x4214] ss:$24 sps:$4 sm:$0xff]  }
 0x8e9   : > { %16627 = vmatpush1.bf16.msra.mxu1 %v23990_v20  ;;  %v24068_v20 = vld [vmem:[%s24682_s12 + $0x4388] ss:$24 sps:$4 sm:$0xff]  }
 0x8ea   : > { %17636 = vmatpush1.bf16.msra.mxu0 %v23993_v31  ;;  %16628 = vmatprep.subr.bf16.mxu1 %v23998_v28  ;;  %v24071_v31 = vld [vmem:[%s24682_s12 + $0x4210] ss:$24 sps:$4 sm:$0xff]   ;;  %v24076_v28 = vld [vmem:[%s24682_s12 + $0x43bc] ss:$24 sps:$4 sm:$0xff]  }
 0x8eb   : > { %17637 = vmatprep.subr.bf16.mxu0 %v24001_v7  ;;  %v24079_v7 = vld [vmem:[%s24682_s12 + $0x4244] ss:$24 sps:$4 sm:$0xff]  }
 0x8ed   : > { %16629 = vmatpush1.bf16.msra.mxu1 %v23996_v40  ;;  %v24074_v40 = vld [vmem:[%s24682_s12 + $0x43b8] ss:$24 sps:$4 sm:$0xff]  }
 0x8ee   : > { %17638 = vmatpush1.bf16.msra.mxu0 %v23999_v24  ;;  %16630 = vmatprep.subr.bf16.mxu1 %v24004_v9  ;;  %v24077_v24 = vld [vmem:[%s24682_s12 + $0x4240] ss:$24 sps:$4 sm:$0xff]   ;;  %v24082_v9 = vld [vmem:[%s24682_s12 + $0x43ec] ss:$24 sps:$4 sm:$0xff]  }
 0x8ef   : > { %17639 = vmatprep.subr.bf16.mxu0 %v24007_v6  ;;  %v24085_v6 = vld [vmem:[%s24682_s12 + $0x4274] ss:$24 sps:$4 sm:$0xff]  }
 0x8f1   : > { %16631 = vmatpush1.bf16.msra.mxu1 %v24002_v48  ;;  %v24080_v48 = vld [vmem:[%s24682_s12 + $0x43e8] ss:$24 sps:$4 sm:$0xff]  }
 0x8f2   : > { %17640 = vmatpush1.bf16.msra.mxu0 %v24005_v21  ;;  %16632 = vmatprep.subr.bf16.mxu1 %v24010_v61  ;;  %v24088_v21 = vld [vmem:[%s24682_s12 + $0x441c] ss:$24 sps:$4 sm:$0xff]  }
 0x8f3   : > { %17641 = vmatprep.subr.bf16.mxu0 %v24013_v26  ;;  %v24091_v61 = vld [vmem:[%s24682_s12 + $0x42a4] ss:$24 sps:$4 sm:$0xff]   ;;  %v24086_v26 = vld [vmem:[%s24682_s12 + $0x4418] ss:$24 sps:$4 sm:$0xff]  }
 0x8f5   : > { %16633 = vmatpush1.bf16.msra.mxu1 %v24008_v30  ;;  %v24089_v30 = vld [vmem:[%s24682_s12 + $0x42a0] ss:$24 sps:$4 sm:$0xff]  }
 0x8f6   : > { %17642 = vmatpush1.bf16.msra.mxu0 %v24011_v2  ;;  %16634 = vmatprep.subr.bf16.mxu1 %v24016_v13  ;;  %v24097_v2 = vld [vmem:[%s24682_s12 + $0x42d4] ss:$24 sps:$4 sm:$0xff]   ;;  %v24092_v13 = vld [vmem:[%s24682_s12 + $0x4448] ss:$24 sps:$4 sm:$0xff]  }
 0x8f7   : > { %17643 = vmatprep.subr.bf16.mxu0 %v24019_v52  ;;  %v24095_v52 = vld [vmem:[%s24682_s12 + $0x42d0] ss:$24 sps:$4 sm:$0xff]  }
 0x8f9   : > { %16635 = vmatpush1.bf16.msra.mxu1 %v24014_v0  ;;  %v24100_v0 = vld [vmem:[%s24682_s12 + $0x447c] ss:$24 sps:$4 sm:$0xff]  }
 0x8fa   : > { %17644 = vmatpush1.bf16.msra.mxu0 %v24017_v37  ;;  %16645 = vmatprep.subr.bf16.mxu1 %v24022_v4  ;;  %v24103_v37 = vld [vmem:[%s24682_s12 + $0x4304] ss:$24 sps:$4 sm:$0xff]   ;;  %v24098_v4 = vld [vmem:[%s24682_s12 + $0x4478] ss:$24 sps:$4 sm:$0xff]  }
 0x8fb   : > { %17645 = vmatprep.subr.bf16.mxu0 %v24025_v22  ;;  %v24101_v22 = vld [vmem:[%s24682_s12 + $0x4300] ss:$24 sps:$4 sm:$0xff]  }
 0x8fc   : > { %16637 = vmatmul.mubr.bf16.vlgmr.msra.gmra.mrb[4].mxu1 %v25654_v58 }
 0x8fd   : > { %16646 = vmatpush1.bf16.msra.mxu1 %v24020_v11  ;;  %16677 = vmatprep.mubr.bf16.mxu1 %v25660_v1  ;;  %v24106_v11 = vld [vmem:[%s24682_s12 + $0x44ac] ss:$24 sps:$4 sm:$0xff]  }
 0x8fe   : > { %17646 = vmatpush1.bf16.msra.mxu0 %v24023_v15  ;;  %16647 = vmatprep.subr.bf16.mxu1 %v24028_v23  ;;  %v24109_v15 = vld [vmem:[%s24682_s12 + $0x4334] ss:$24 sps:$4 sm:$0xff]   ;;  %v24104_v23 = vld [vmem:[%s24682_s12 + $0x44a8] ss:$24 sps:$4 sm:$0xff]  }
 0x8ff   : > { %17647 = vmatprep.subr.bf16.mxu0 %v24031_v62  ;;  %v24107_v62 = vld [vmem:[%s24682_s12 + $0x4330] ss:$24 sps:$4 sm:$0xff]  }
 0x901   : > { %16648 = vmatpush1.bf16.msra.mxu1 %v24026_v63  ;;  %v24112_v63 = vld [vmem:[%s24682_s12 + $0x44dc] ss:$24 sps:$4 sm:$0xff]  }
 0x902   : > { %17648 = vmatpush1.bf16.msra.mxu0 %v24029_v8  ;;  %16649 = vmatprep.subr.bf16.mxu1 %v24034_v16  ;;  %v24115_v8 = vld [vmem:[%s24682_s12 + $0x4364] ss:$24 sps:$4 sm:$0xff]   ;;  %v24110_v16 = vld [vmem:[%s24682_s12 + $0x44d8] ss:$24 sps:$4 sm:$0xff]  }
 0x903   : > { %17649 = vmatprep.subr.bf16.mxu0 %v24037_v60  ;;  %v24113_v60 = vld [vmem:[%s24682_s12 + $0x4360] ss:$24 sps:$4 sm:$0xff]  }
 0x905   : > { %16650 = vmatpush1.bf16.msra.mxu1 %v24032_v47  ;;  %v24118_v47 = vld [vmem:[%s24682_s12 + $0x450c] ss:$24 sps:$4 sm:$0xff]  }
 0x906   : > { %17650 = vmatpush1.bf16.msra.mxu0 %v24035_v18  ;;  %16651 = vmatprep.subr.bf16.mxu1 %v24040_v41  ;;  %v24121_v18 = vld [vmem:[%s24682_s12 + $0x4394] ss:$24 sps:$4 sm:$0xff]   ;;  %v24116_v41 = vld [vmem:[%s24682_s12 + $0x4508] ss:$24 sps:$4 sm:$0xff]  }
 0x907   : > { %17651 = vmatprep.subr.bf16.mxu0 %v24043_v12  ;;  %v24119_v12 = vld [vmem:[%s24682_s12 + $0x4390] ss:$24 sps:$4 sm:$0xff]  }
 0x909   : > { %16652 = vmatpush1.bf16.msra.mxu1 %v24038_v43  ;;  %v24124_v43 = vld [vmem:[%s24682_s12 + $0x453c] ss:$24 sps:$4 sm:$0xff]  }
 0x90a   : > { %17652 = vmatpush1.bf16.msra.mxu0 %v24041_v57  ;;  %16653 = vmatprep.subr.bf16.mxu1 %v24046_v27  ;;  %v24127_v57 = vld [vmem:[%s24682_s12 + $0x43c4] ss:$24 sps:$4 sm:$0xff]   ;;  %v24122_v27 = vld [vmem:[%s24682_s12 + $0x4538] ss:$24 sps:$4 sm:$0xff]  }
 0x90b   : > { %17653 = vmatprep.subr.bf16.mxu0 %v24049_v46  ;;  %v24125_v46 = vld [vmem:[%s24682_s12 + $0x43c0] ss:$24 sps:$4 sm:$0xff]  }
 0x90d   : > { %16654 = vmatpush1.bf16.msra.mxu1 %v24044_v32  ;;  %v24130_v32 = vld [vmem:[%s24682_s12 + $0x456c] ss:$24 sps:$4 sm:$0xff]  }
 0x90e   : > { %17654 = vmatpush1.bf16.msra.mxu0 %v24047_v53  ;;  %16655 = vmatprep.subr.bf16.mxu1 %v24052_v17  ;;  %v24133_v53 = vld [vmem:[%s24682_s12 + $0x43f4] ss:$24 sps:$4 sm:$0xff]   ;;  %v24128_v17 = vld [vmem:[%s24682_s12 + $0x4568] ss:$24 sps:$4 sm:$0xff]  }
 0x90f   : > { %17655 = vmatprep.subr.bf16.mxu0 %v24055_v59  ;;  %v24131_v59 = vld [vmem:[%s24682_s12 + $0x43f0] ss:$24 sps:$4 sm:$0xff]  }
 0x911   : > { %16656 = vmatpush1.bf16.msra.mxu1 %v24050_v5  ;;  %v24136_v5 = vld [vmem:[%s24682_s12 + $0x459c] ss:$24 sps:$4 sm:$0xff]  }
 0x912   : > { %17656 = vmatpush1.bf16.msra.mxu0 %v24053_v10  ;;  %16657 = vmatprep.subr.bf16.mxu1 %v24058_v42  ;;  %v24139_v10 = vld [vmem:[%s24682_s12 + $0x4424] ss:$24 sps:$4 sm:$0xff]   ;;  %v24134_v42 = vld [vmem:[%s24682_s12 + $0x4598] ss:$24 sps:$4 sm:$0xff]  }
 0x913   : > { %17657 = vmatprep.subr.bf16.mxu0 %v24061_v39  ;;  %v24137_v39 = vld [vmem:[%s24682_s12 + $0x4420] ss:$24 sps:$4 sm:$0xff]  }
 0x915   : > { %16658 = vmatpush1.bf16.msra.mxu1 %v24056_v35  ;;  %v24142_v35 = vld [vmem:[%s24682_s12 + $0x45cc] ss:$24 sps:$4 sm:$0xff]  }
 0x916   : > { %17658 = vmatpush1.bf16.msra.mxu0 %v24059_v49  ;;  %16659 = vmatprep.subr.bf16.mxu1 %v24064_v19  ;;  %v24145_v49 = vld [vmem:[%s24682_s12 + $0x4454] ss:$24 sps:$4 sm:$0xff]   ;;  %v24140_v19 = vld [vmem:[%s24682_s12 + $0x45c8] ss:$24 sps:$4 sm:$0xff]  }
 0x917   : > { %17659 = vmatprep.subr.bf16.mxu0 %v24067_v38  ;;  %v24143_v38 = vld [vmem:[%s24682_s12 + $0x4450] ss:$24 sps:$4 sm:$0xff]  }
 0x919   : > { %16660 = vmatpush1.bf16.msra.mxu1 %v24062_v56  ;;  %v24148_v56 = vld [vmem:[%s24682_s12 + $0x45fc] ss:$24 sps:$4 sm:$0xff]  }
 0x91a   : > { %17660 = vmatpush1.bf16.msra.mxu0 %v24065_v36  ;;  %16661 = vmatprep.subr.bf16.mxu1 %v24070_v33  ;;  %v24151_v36 = vld [vmem:[%s24682_s12 + $0x4484] ss:$24 sps:$4 sm:$0xff]   ;;  %v24146_v33 = vld [vmem:[%s24682_s12 + $0x45f8] ss:$24 sps:$4 sm:$0xff]  }
 0x91b   : > { %17670 = vmatprep.subr.bf16.mxu0 %v24073_v51  ;;  %v24149_v51 = vld [vmem:[%s24682_s12 + $0x4480] ss:$24 sps:$4 sm:$0xff]  }
 0x91d   : > { %17662 = vmatmul.mubr.bf16.vlgmr.msra.gmra.mrb[4].mxu0 %v25654_v58  ;;  %16662 = vmatpush1.bf16.msra.mxu1 %v24068_v20  ;;  %v24083_v58 = vld [vmem:[%s24682_s12 + $0x4270] ss:$24 sps:$4 sm:$0xff]   ;;  %v24154_v20 = vld [vmem:[%s24682_s12 + $0x462c] ss:$24 sps:$4 sm:$0xff]  }
 0x91e   : > { %17671 = vmatpush1.bf16.msra.mxu0 %v24071_v31  ;;  %16663 = vmatprep.subr.bf16.mxu1 %v24076_v28  ;;  %v24157_v31 = vld [vmem:[%s24682_s12 + $0x44b4] ss:$24 sps:$4 sm:$0xff]   ;;  %v24152_v28 = vld [vmem:[%s24682_s12 + $0x4628] ss:$24 sps:$4 sm:$0xff]  }
 0x91f   : > { %17672 = vmatprep.subr.bf16.mxu0 %v24079_v7  ;;  %17702 = vmatprep.mubr.bf16.mxu0 %v25660_v1  ;;  %v24094_v1 = vld [vmem:[%s24682_s12 + $0x444c] ss:$24 sps:$4 sm:$0xff]   ;;  %v24155_v7 = vld [vmem:[%s24682_s12 + $0x44b0] ss:$24 sps:$4 sm:$0xff]  }
 0x921   : > { %16664 = vmatpush1.bf16.msra.mxu1 %v24074_v40  ;;  %v24160_v40 = vld [vmem:[%s24682_s12 + $0x465c] ss:$24 sps:$4 sm:$0xff]  }
 0x922   : > { %17673 = vmatpush1.bf16.msra.mxu0 %v24077_v24  ;;  %16665 = vmatprep.subr.bf16.mxu1 %v24082_v9  ;;  %v24163_v24 = vld [vmem:[%s24682_s12 + $0x44e4] ss:$24 sps:$4 sm:$0xff]   ;;  %v24158_v9 = vld [vmem:[%s24682_s12 + $0x4658] ss:$24 sps:$4 sm:$0xff]  }
 0x923   : > { %17674 = vmatprep.subr.bf16.mxu0 %v24085_v6  ;;  %v24161_v6 = vld [vmem:[%s24682_s12 + $0x44e0] ss:$24 sps:$4 sm:$0xff]  }
 0x925   : > { %16666 = vmatpush1.bf16.msra.mxu1 %v24080_v48  ;;  %v24166_v48 = vld [vmem:[%s24682_s12 + $0x468c] ss:$24 sps:$4 sm:$0xff]  }
 0x926   : > { %17675 = vmatpush1.bf16.msra.mxu0 %v24083_v58  ;;  %16667 = vmatprep.subr.bf16.mxu1 %v24088_v21  ;;  %v24169_v58 = vld [vmem:[%s24682_s12 + $0x4514] ss:$24 sps:$4 sm:$0xff]   ;;  %v24164_v21 = vld [vmem:[%s24682_s12 + $0x4688] ss:$24 sps:$4 sm:$0xff]  }
 0x927   : > { %17676 = vmatprep.subr.bf16.mxu0 %v24091_v61  ;;  %v24167_v61 = vld [vmem:[%s24682_s12 + $0x4510] ss:$24 sps:$4 sm:$0xff]  }
 0x929   : > { %16668 = vmatpush1.bf16.msra.mxu1 %v24086_v26  ;;  %v24172_v26 = vld [vmem:[%s24682_s12 + $0x46bc] ss:$24 sps:$4 sm:$0xff]  }
 0x92a   : > { %17677 = vmatpush1.bf16.msra.mxu0 %v24089_v30  ;;  %16669 = vmatprep.subr.bf16.mxu1 %v24094_v1  ;;  %v24175_v30 = vld [vmem:[%s24682_s12 + $0x4544] ss:$24 sps:$4 sm:$0xff]   ;;  %v24170_v1 = vld [vmem:[%s24682_s12 + $0x46b8] ss:$24 sps:$4 sm:$0xff]  }
 0x92b   : > { %17678 = vmatprep.subr.bf16.mxu0 %v24097_v2  ;;  %v24173_v2 = vld [vmem:[%s24682_s12 + $0x4540] ss:$24 sps:$4 sm:$0xff]  }
 0x92d   : > { %16670 = vmatpush1.bf16.msra.mxu1 %v24092_v13  ;;  %v24178_v13 = vld [vmem:[%s24682_s12 + $0x46ec] ss:$24 sps:$4 sm:$0xff]  }
 0x92e   : > { %17679 = vmatpush1.bf16.msra.mxu0 %v24095_v52  ;;  %16671 = vmatprep.subr.bf16.mxu1 %v24100_v0  ;;  %v24181_v52 = vld [vmem:[%s24682_s12 + $0x4574] ss:$24 sps:$4 sm:$0xff]   ;;  %v24176_v0 = vld [vmem:[%s24682_s12 + $0x46e8] ss:$24 sps:$4 sm:$0xff]  }
 0x92f   : > { %17680 = vmatprep.subr.bf16.mxu0 %v24103_v37  ;;  %v24184_v37 = vld [vmem:[%s24682_s12 + $0x471c] ss:$24 sps:$4 sm:$0xff]  }
 0x931   : > { %16672 = vmatpush1.bf16.msra.mxu1 %v24098_v4  ;;  %v24187_v4 = vld [vmem:[%s24682_s12 + $0x45a4] ss:$24 sps:$4 sm:$0xff]  }
 0x932   : > { %17681 = vmatpush1.bf16.msra.mxu0 %v24101_v22  ;;  %16673 = vmatprep.subr.bf16.mxu1 %v24106_v11  ;;  %v24182_v22 = vld [vmem:[%s24682_s12 + $0x4718] ss:$24 sps:$4 sm:$0xff]  }
 0x933   : > { %17682 = vmatprep.subr.bf16.mxu0 %v24109_v15  ;;  %v24185_v11 = vld [vmem:[%s24682_s12 + $0x45a0] ss:$24 sps:$4 sm:$0xff]   ;;  %v24193_v15 = vld [vmem:[%s24682_s12 + $0x45d4] ss:$24 sps:$4 sm:$0xff]  }
 0x935   : > { %16674 = vmatpush1.bf16.msra.mxu1 %v24104_v23  ;;  %v24188_v23 = vld [vmem:[%s24682_s12 + $0x4748] ss:$24 sps:$4 sm:$0xff]  }
 0x936   : > { %17683 = vmatpush1.bf16.msra.mxu0 %v24107_v62  ;;  %16675 = vmatprep.subr.bf16.mxu1 %v24112_v63  ;;  %v24191_v62 = vld [vmem:[%s24682_s12 + $0x45d0] ss:$24 sps:$4 sm:$0xff]   ;;  %v24196_v63 = vld [vmem:[%s24682_s12 + $0x477c] ss:$24 sps:$4 sm:$0xff]  }
 0x937   : > { %17684 = vmatprep.subr.bf16.mxu0 %v24115_v8  ;;  %v24199_v8 = vld [vmem:[%s24682_s12 + $0x4604] ss:$24 sps:$4 sm:$0xff]  }
 0x939   : > { %16676 = vmatpush1.bf16.msra.mxu1 %v24110_v16  ;;  %v24194_v16 = vld [vmem:[%s24682_s12 + $0x4778] ss:$24 sps:$4 sm:$0xff]  }
 0x93a   : > { %17685 = vmatpush1.bf16.msra.mxu0 %v24113_v60  ;;  %16686 = vmatprep.subr.bf16.mxu1 %v24118_v47  ;;  %v24197_v60 = vld [vmem:[%s24682_s12 + $0x4600] ss:$24 sps:$4 sm:$0xff]   ;;  %v24202_v47 = vld [vmem:[%s24682_s12 + $0x47ac] ss:$24 sps:$4 sm:$0xff]  }
 0x93b   : > { %17686 = vmatprep.subr.bf16.mxu0 %v24121_v18  ;;  %v24205_v18 = vld [vmem:[%s24682_s12 + $0x4634] ss:$24 sps:$4 sm:$0xff]  }
 0x93c   : > { %16678 = vmatmul.mubr.bf16.vlgmr.msra.gmra.mrb[4].mxu1 %v25746_v14 }
 0x93d   : > { %16687 = vmatpush1.bf16.msra.mxu1 %v24116_v41  ;;  %16718 = vmatprep.mubr.bf16.mxu1 %v25754_v25  ;;  %v24200_v41 = vld [vmem:[%s24682_s12 + $0x47a8] ss:$24 sps:$4 sm:$0xff]  }
 0x93e   : > { %17687 = vmatpush1.bf16.msra.mxu0 %v24119_v12  ;;  %16688 = vmatprep.subr.bf16.mxu1 %v24124_v43  ;;  %v24203_v12 = vld [vmem:[%s24682_s12 + $0x4630] ss:$24 sps:$4 sm:$0xff]   ;;  %v24208_v43 = vld [vmem:[%s24682_s12 + $0x47dc] ss:$24 sps:$4 sm:$0xff]  }
 0x93f   : > { %17688 = vmatprep.subr.bf16.mxu0 %v24127_v57  ;;  %v24211_v57 = vld [vmem:[%s24682_s12 + $0x4664] ss:$24 sps:$4 sm:$0xff]  }
 0x941   : > { %16689 = vmatpush1.bf16.msra.mxu1 %v24122_v27  ;;  %v24206_v27 = vld [vmem:[%s24682_s12 + $0x47d8] ss:$24 sps:$4 sm:$0xff]  }
 0x942   : > { %17689 = vmatpush1.bf16.msra.mxu0 %v24125_v46  ;;  %16690 = vmatprep.subr.bf16.mxu1 %v24130_v32  ;;  %v24209_v46 = vld [vmem:[%s24682_s12 + $0x4660] ss:$24 sps:$4 sm:$0xff]   ;;  %v24214_v32 = vld [vmem:[%s24682_s12 + $0x480c] ss:$24 sps:$4 sm:$0xff]  }
 0x943   : > { %17690 = vmatprep.subr.bf16.mxu0 %v24133_v53  ;;  %v24217_v53 = vld [vmem:[%s24682_s12 + $0x4694] ss:$24 sps:$4 sm:$0xff]  }
 0x945   : > { %16691 = vmatpush1.bf16.msra.mxu1 %v24128_v17  ;;  %v24212_v17 = vld [vmem:[%s24682_s12 + $0x4808] ss:$24 sps:$4 sm:$0xff]  }
 0x946   : > { %17691 = vmatpush1.bf16.msra.mxu0 %v24131_v59  ;;  %16692 = vmatprep.subr.bf16.mxu1 %v24136_v5  ;;  %v24215_v59 = vld [vmem:[%s24682_s12 + $0x4690] ss:$24 sps:$4 sm:$0xff]   ;;  %v24220_v5 = vld [vmem:[%s24682_s12 + $0x483c] ss:$24 sps:$4 sm:$0xff]  }
 0x947   : > { %17692 = vmatprep.subr.bf16.mxu0 %v24139_v10  ;;  %v24223_v10 = vld [vmem:[%s24682_s12 + $0x46c4] ss:$24 sps:$4 sm:$0xff]  }
 0x949   : > { %16693 = vmatpush1.bf16.msra.mxu1 %v24134_v42  ;;  %v24218_v42 = vld [vmem:[%s24682_s12 + $0x4838] ss:$24 sps:$4 sm:$0xff]  }
 0x94a   : > { %17693 = vmatpush1.bf16.msra.mxu0 %v24137_v39  ;;  %16694 = vmatprep.subr.bf16.mxu1 %v24142_v35  ;;  %v24221_v39 = vld [vmem:[%s24682_s12 + $0x46c0] ss:$24 sps:$4 sm:$0xff]   ;;  %v24226_v35 = vld [vmem:[%s24682_s12 + $0x486c] ss:$24 sps:$4 sm:$0xff]  }
 0x94b   : > { %17694 = vmatprep.subr.bf16.mxu0 %v24145_v49  ;;  %v24229_v49 = vld [vmem:[%s24682_s12 + $0x46f4] ss:$24 sps:$4 sm:$0xff]  }
 0x94d   : > { %16695 = vmatpush1.bf16.msra.mxu1 %v24140_v19  ;;  %v24224_v19 = vld [vmem:[%s24682_s12 + $0x4868] ss:$24 sps:$4 sm:$0xff]  }
 0x94e   : > { %17695 = vmatpush1.bf16.msra.mxu0 %v24143_v38  ;;  %16696 = vmatprep.subr.bf16.mxu1 %v24148_v56  ;;  %v24227_v38 = vld [vmem:[%s24682_s12 + $0x46f0] ss:$24 sps:$4 sm:$0xff]   ;;  %v24232_v56 = vld [vmem:[%s24682_s12 + $0x489c] ss:$24 sps:$4 sm:$0xff]  }
 0x94f   : > { %17696 = vmatprep.subr.bf16.mxu0 %v24151_v36  ;;  %v24235_v36 = vld [vmem:[%s24682_s12 + $0x4724] ss:$24 sps:$4 sm:$0xff]  }
 0x951   : > { %16697 = vmatpush1.bf16.msra.mxu1 %v24146_v33  ;;  %v24230_v33 = vld [vmem:[%s24682_s12 + $0x4898] ss:$24 sps:$4 sm:$0xff]  }
 0x952   : > { %17697 = vmatpush1.bf16.msra.mxu0 %v24149_v51  ;;  %16698 = vmatprep.subr.bf16.mxu1 %v24154_v20  ;;  %v24233_v51 = vld [vmem:[%s24682_s12 + $0x4720] ss:$24 sps:$4 sm:$0xff]   ;;  %v24238_v20 = vld [vmem:[%s24682_s12 + $0x48cc] ss:$24 sps:$4 sm:$0xff]  }
 0x953   : > { %17698 = vmatprep.subr.bf16.mxu0 %v24157_v31  ;;  %v24241_v31 = vld [vmem:[%s24682_s12 + $0x4754] ss:$24 sps:$4 sm:$0xff]  }
 0x955   : > { %16699 = vmatpush1.bf16.msra.mxu1 %v24152_v28  ;;  %v24236_v28 = vld [vmem:[%s24682_s12 + $0x48c8] ss:$24 sps:$4 sm:$0xff]  }
 0x956   : > { %17699 = vmatpush1.bf16.msra.mxu0 %v24155_v7  ;;  %16700 = vmatprep.subr.bf16.mxu1 %v24160_v40  ;;  %v24239_v7 = vld [vmem:[%s24682_s12 + $0x4750] ss:$24 sps:$4 sm:$0xff]   ;;  %v24244_v40 = vld [vmem:[%s24682_s12 + $0x48fc] ss:$24 sps:$4 sm:$0xff]  }
 0x957   : > { %17700 = vmatprep.subr.bf16.mxu0 %v24163_v24  ;;  %v24247_v24 = vld [vmem:[%s24682_s12 + $0x4784] ss:$24 sps:$4 sm:$0xff]  }
 0x959   : > { %16701 = vmatpush1.bf16.msra.mxu1 %v24158_v9  ;;  %v24242_v9 = vld [vmem:[%s24682_s12 + $0x48f8] ss:$24 sps:$4 sm:$0xff]  }
 0x95a   : > { %17701 = vmatpush1.bf16.msra.mxu0 %v24161_v6  ;;  %16702 = vmatprep.subr.bf16.mxu1 %v24166_v48  ;;  %v24245_v6 = vld [vmem:[%s24682_s12 + $0x4780] ss:$24 sps:$4 sm:$0xff]   ;;  %v24250_v48 = vld [vmem:[%s24682_s12 + $0x492c] ss:$24 sps:$4 sm:$0xff]  }
 0x95b   : > { %17711 = vmatprep.subr.bf16.mxu0 %v24169_v58  ;;  %v24253_v58 = vld [vmem:[%s24682_s12 + $0x47b4] ss:$24 sps:$4 sm:$0xff]  }
 0x95d   : > { %17703 = vmatmul.mubr.bf16.vlgmr.msra.gmra.mrb[4].mxu0 %v25746_v14  ;;  %16703 = vmatpush1.bf16.msra.mxu1 %v24164_v21  ;;  %v24179_v14 = vld [vmem:[%s24682_s12 + $0x4570] ss:$24 sps:$4 sm:$0xff]  }
 0x95e   : > { %17712 = vmatpush1.bf16.msra.mxu0 %v24167_v61  ;;  %16704 = vmatprep.subr.bf16.mxu1 %v24172_v26  ;;  %v24248_v21 = vld [vmem:[%s24682_s12 + $0x4928] ss:$24 sps:$4 sm:$0xff]   ;;  %v24256_v26 = vld [vmem:[%s24682_s12 + $0x495c] ss:$24 sps:$4 sm:$0xff]  }
 0x95f   : > { %17713 = vmatprep.subr.bf16.mxu0 %v24175_v30  ;;  %17743 = vmatprep.mubr.bf16.mxu0 %v25754_v25  ;;  %v24190_v25 = vld [vmem:[%s24682_s12 + $0x474c] ss:$24 sps:$4 sm:$0xff]   ;;  %v24251_v61 = vld [vmem:[%s24682_s12 + $0x47b0] ss:$24 sps:$4 sm:$0xff]  }
 0x960   : > { %v24259_v30 = vld [vmem:[%s24682_s12 + $0x47e4] ss:$24 sps:$4 sm:$0xff]  }
 0x961   : > { %16705 = vmatpush1.bf16.msra.mxu1 %v24170_v1  ;;  %v24254_v1 = vld [vmem:[%s24682_s12 + $0x4958] ss:$24 sps:$4 sm:$0xff]  }
 0x962   : > { %17714 = vmatpush1.bf16.msra.mxu0 %v24173_v2  ;;  %16706 = vmatprep.subr.bf16.mxu1 %v24178_v13  ;;  %v24257_v2 = vld [vmem:[%s24682_s12 + $0x47e0] ss:$24 sps:$4 sm:$0xff]   ;;  %v24262_v13 = vld [vmem:[%s24682_s12 + $0x4814] ss:$24 sps:$4 sm:$0xff]  }
 0x963   : > { %17715 = vmatprep.subr.bf16.mxu0 %v24181_v52  ;;  %v24260_v52 = vld [vmem:[%s24682_s12 + $0x4810] ss:$24 sps:$4 sm:$0xff]  }
 0x965   : > { %16707 = vmatpush1.bf16.msra.mxu1 %v24176_v0  ;;  %v24265_v0 = vld [vmem:[%s24682_s12 + $0x4844] ss:$24 sps:$4 sm:$0xff]  }
 0x966   : > { %17716 = vmatpush1.bf16.msra.mxu0 %v24179_v14  ;;  %16708 = vmatprep.subr.bf16.mxu1 %v24184_v37  ;;  %v24263_v14 = vld [vmem:[%s24682_s12 + $0x4840] ss:$24 sps:$4 sm:$0xff]   ;;  %v24268_v37 = vld [vmem:[%s24682_s12 + $0x4874] ss:$24 sps:$4 sm:$0xff]  }
 0x967   : > { %17717 = vmatprep.subr.bf16.mxu0 %v24187_v4  ;;  %v24266_v4 = vld [vmem:[%s24682_s12 + $0x4870] ss:$24 sps:$4 sm:$0xff]  }
 0x969   : > { %16709 = vmatpush1.bf16.msra.mxu1 %v24182_v22  ;;  %v24271_v22 = vld [vmem:[%s24682_s12 + $0x48a4] ss:$24 sps:$4 sm:$0xff]  }
 0x96a   : > { %17718 = vmatpush1.bf16.msra.mxu0 %v24185_v11  ;;  %16710 = vmatprep.subr.bf16.mxu1 %v24190_v25  ;;  %v24269_v11 = vld [vmem:[%s24682_s12 + $0x48a0] ss:$24 sps:$4 sm:$0xff]   ;;  %v24272_v25 = vld [vmem:[%s24682_s12 + $0x48d0] ss:$24 sps:$4 sm:$0xff]  }
 0x96b   : > { %17719 = vmatprep.subr.bf16.mxu0 %v24193_v15  ;;  %v24277_v15 = vld [vmem:[%s24682_s12 + $0x4904] ss:$24 sps:$4 sm:$0xff]  }
 0x96d   : > { %16711 = vmatpush1.bf16.msra.mxu1 %v24188_v23  ;;  %v24280_v23 = vld [vmem:[%s24682_s12 + $0x4934] ss:$24 sps:$4 sm:$0xff]  }
 0x96e   : > { %17720 = vmatpush1.bf16.msra.mxu0 %v24191_v62  ;;  %16712 = vmatprep.subr.bf16.mxu1 %v24196_v63  ;;  %v24278_v62 = vld [vmem:[%s24682_s12 + $0x4930] ss:$24 sps:$4 sm:$0xff]   ;;  %v24283_v63 = vld [vmem:[%s24682_s12 + $0x4964] ss:$24 sps:$4 sm:$0xff]  }
 0x96f   : > { %17721 = vmatprep.subr.bf16.mxu0 %v24199_v8  ;;  %v24281_v8 = vld [vmem:[%s24682_s12 + $0x4960] ss:$24 sps:$4 sm:$0xff]  }
 0x971   : > { %16713 = vmatpush1.bf16.msra.mxu1 %v24194_v16 }
 0x972   : > { %17722 = vmatpush1.bf16.msra.mxu0 %v24197_v60  ;;  %16714 = vmatprep.subr.bf16.mxu1 %v24202_v47 }
 0x973   : > { %17723 = vmatprep.subr.bf16.mxu0 %v24205_v18 }
 0x975   : > { %16715 = vmatpush1.bf16.msra.mxu1 %v24200_v41 }
 0x976   : > { %17724 = vmatpush1.bf16.msra.mxu0 %v24203_v12  ;;  %16716 = vmatprep.subr.bf16.mxu1 %v24208_v43  ;;  %v17807_v12 = vrot.slane %v17799_v34, %v24740_v50  ;;  %v17844_v34 = vsub.s32 (!%p20363_p9), 1, %v24732_v44 }
 0x977   : > { %17725 = vmatprep.subr.bf16.mxu0 %v24211_v57  ;;  %v2621_v57 = vld [vmem:[#allocation2] sm:$0xff] }
 0x979   : > { %16717 = vmatpush1.bf16.msra.mxu1 %v24206_v27 }
 0x97a   : > { %17726 = vmatpush1.bf16.msra.mxu0 %v24209_v46  ;;  %16727 = vmatprep.subr.bf16.mxu1 %v24214_v32 }
 0x97b   : > { %17727 = vmatprep.subr.bf16.mxu0 %v24217_v53 }
 0x97c   : > { %16719 = vmatmul.mubr.bf16.vlgmr.msra.gmra.mrb[4].mxu1 %v25826_v3 }
 0x97d   : > { %16728 = vmatpush1.bf16.msra.mxu1 %v24212_v17  ;;  %16759 = vmatprep.mubr.bf16.mxu1 %v24469_v45 }
 0x97e   : > { %17728 = vmatpush1.bf16.msra.mxu0 %v24215_v59  ;;  %16729 = vmatprep.subr.bf16.mxu1 %v24220_v5  ;;  %v2622_v59 = vld [vmem:[#allocation2 + $0x8] sm:$0xf] }
 0x97f   : > { %17729 = vmatprep.subr.bf16.mxu0 %v24223_v10 }
 0x981   : > { %16730 = vmatpush1.bf16.msra.mxu1 %v24218_v42 }
 0x982   : > { %17730 = vmatpush1.bf16.msra.mxu0 %v24221_v39  ;;  %16731 = vmatprep.subr.bf16.mxu1 %v24226_v35  ;;  %v17848_v39 = vsub.s32 (!%p20363_p9), 2, %v24732_v44  ;;  %v17852_v35 = vsub.s32 (!%p20363_p9), 3, %v24732_v44 }
 0x983   : > { %17731 = vmatprep.subr.bf16.mxu0 %v24229_v49  ;;  %v17856_v49 = vsub.s32 (!%p20363_p9), 4, %v24732_v44 }
 0x985   : > { %16732 = vmatpush1.bf16.msra.mxu1 %v24224_v19  ;;  %v17860_v19 = vsub.s32 (!%p20363_p9), 5, %v24732_v44 }
 0x986   : > { %17732 = vmatpush1.bf16.msra.mxu0 %v24227_v38  ;;  %16733 = vmatprep.subr.bf16.mxu1 %v24232_v56  ;;  %v17841_v38 = vrot.slane (!%p20363_p9), %v17836_v54, %v17840_v29  ;;  %v17845_v56 = vrot.slane (!%p20363_p9), %v17836_v54, %v17844_v34 }
 0x987   : > { %17733 = vmatprep.subr.bf16.mxu0 %v24235_v36  ;;  %v17849_v36 = vrot.slane (!%p20363_p9), %v17836_v54, %v17848_v39 }
 0x989   : > { %16734 = vmatpush1.bf16.msra.mxu1 %v24230_v33  ;;  %v17853_v33 = vrot.slane (!%p20363_p9), %v17836_v54, %v17852_v35 }
 0x98a   : > { %17734 = vmatpush1.bf16.msra.mxu0 %v24233_v51  ;;  %16735 = vmatprep.subr.bf16.mxu1 %v24238_v20  ;;  %v17857_v51 = vrot.slane (!%p20363_p9), %v17836_v54, %v17856_v49  ;;  %v17861_v20 = vrot.slane (!%p20363_p9), %v17836_v54, %v17860_v19 }
 0x98b   : > { %17735 = vmatprep.subr.bf16.mxu0 %v24241_v31  ;;  %v17862_v31 = vcombine.low (!%p20363_p9), %v17841_v38, %v17845_v56 }
 0x98d   : > { %16736 = vmatpush1.bf16.msra.mxu1 %v24236_v28  ;;  %v17863_v28 = vcombine.low (!%p20363_p9), %v17849_v36, %v17853_v33 }
 0x98e   : > { %17736 = vmatpush1.bf16.msra.mxu0 %v24239_v7  ;;  %16737 = vmatprep.subr.bf16.mxu1 %v24244_v40  ;;  %v17879_v7 = vcombine.low (!%p20363_p9), %v17857_v51, %v17861_v20  ;;  %v17870_v40 = vrot.slane (!%p20363_p9), %v17862_v31, %v24740_v50 }
 0x98f   : > { %17737 = vmatprep.subr.bf16.mxu0 %v24247_v24 }
 0x991   : > { %16738 = vmatpush1.bf16.msra.mxu1 %v24242_v9  ;;  %v17877_v9 = vrot.slane (!%p20363_p9), %v17863_v28, %v24740_v50 }
 0x992   : > { %17738 = vmatpush1.bf16.msra.mxu0 %v24245_v6  ;;  %16739 = vmatprep.subr.bf16.mxu1 %v24250_v48  ;;  %v17886_v6 = vrot.slane (!%p20363_p9), %v17879_v7, %v24740_v50 }
 0x993   : > { %17739 = vmatprep.subr.bf16.mxu0 %v24253_v58  ;;  %v17878_v58 = vcombine.low (!%p20363_p9), %v17870_v40, %v17877_v9 }
 0x995   : > { %16740 = vmatpush1.bf16.msra.mxu1 %v24248_v21 }
 0x996   : > { %17740 = vmatpush1.bf16.msra.mxu0 %v24251_v61  ;;  %16741 = vmatprep.subr.bf16.mxu1 %v24256_v26 }
 0x997   : > { %17741 = vmatprep.subr.bf16.mxu0 %v24259_v30 }
 0x999   : > { %16742 = vmatpush1.bf16.msra.mxu1 %v24254_v1 }
 0x99a   : > { %17742 = vmatpush1.bf16.msra.mxu0 %v24257_v2 }
 0x99b   : > { %17752 = vmatprep.subr.bf16.mxu0 %v24262_v13 }
 0x99c   : > { %16760 = vmatmul.mubr.bf16.vlgmr.msra.gmra.mrb[4].mxu1 %v25865_v55 }
 0x99d   : > { %17744 = vmatmul.mubr.bf16.vlgmr.msra.gmra.mrb[4].mxu0 %v25826_v3  ;;  %v24274_v3 = vld [vmem:[%s24682_s12 + $0x48d4] ss:$24 sps:$4 sm:$0xff]  }
 0x99e   : > { %17753 = vmatpush1.bf16.msra.mxu0 %v24260_v52  ;;  %17784 = vmatprep.mubr.bf16.mxu0 %v24469_v45  ;;  %v24275_v45 = vld [vmem:[%s24682_s12 + $0x4900] ss:$24 sps:$4 sm:$0xff]  }
 0x99f   : > { %17754 = vmatprep.subr.bf16.mxu0 %v24265_v0 }
 0x9a2   : > { %17755 = vmatpush1.bf16.msra.mxu0 %v24263_v14 }
 0x9a3   : > { %17756 = vmatprep.subr.bf16.mxu0 %v24268_v37 }
 0x9a6   : > { %17757 = vmatpush1.bf16.msra.mxu0 %v24266_v4 }
 0x9a7   : > { %17758 = vmatprep.subr.bf16.mxu0 %v24271_v22 }
 0x9aa   : > { %17759 = vmatpush1.bf16.msra.mxu0 %v24269_v11 }
 0x9ab   : > { %17760 = vmatprep.subr.bf16.mxu0 %v24274_v3 }
 0x9ae   : > { %17761 = vmatpush1.bf16.msra.mxu0 %v24272_v25 }
 0x9af   : > { %17762 = vmatprep.subr.bf16.mxu0 %v24277_v15 }
 0x9b2   : > { %17763 = vmatpush1.bf16.msra.mxu0 %v24275_v45 }
 0x9b3   : > { %17764 = vmatprep.subr.bf16.mxu0 %v24280_v23 }
 0x9b6   : > { %17765 = vmatpush1.bf16.msra.mxu0 %v24278_v62 }
 0x9b7   : > { %17766 = vmatprep.subr.bf16.mxu0 %v24283_v63 }
 0x9ba   : > { %17767 = vmatpush1.bf16.msra.mxu0 %v24281_v8 }
 0x9bd   : > { %17785 = vmatmul.mubr.bf16.vlgmr.msra.gmra.mrb[4].mxu0 %v25865_v55 }
 0xa6f   : > { %v16761_v16 = vpop.f32.mrb[4].mxu1 }
 0xa70   : > { %v16763_v60 = vpop.f32.mrb[5].mxu1 }
 0xa71   : > { %v17800_v47 = vcombine.low %v16761_v16, %v16763_v60  ;;  %v16765_v18 = vpop.f32.mrb[6].mxu1 }
 0xa72   : > { %v16766_v41 = vpop.f32.mrb[7].mxu1 }
 0xa73   : > { %v17814_v43 = vrot.slane %v17800_v47, %v24740_v50 }
 0xa75   : > { %v17815_v27 = vcombine.low %v17807_v12, %v17814_v43 }
 0xa77   : > { %v17826_v46 = vadd.f32 %v17815_v27, %v2621_v57 }
 0xa79   : > { %17828 = vst [vmem:[#allocation2] sm:$0xff] %v17826_v46 }
 0xa80   : > { %v17834_v48 = vld [vmem:[#allocation2] sm:$0xff] (!%p20363_p9) }
 0xa81   : > { %v17889_v44 = vadd.f32 (!%p20363_p9), %v17878_v58, %v17834_v48 }
 0xa83   : > { %17891 = vst [vmem:[#allocation9] sm:$0xff] (!%p20363_p9), %v17889_v44 }
 0xa90   : > { %v17786_v32 = vpop.f32.mrb[4].mxu0 }
 0xa91   : > { %v17788_v53 = vpop.f32.mrb[5].mxu0 }
 0xa92   : > { %v17816_v17 = vcombine.low %v17786_v32, %v17788_v53  ;;  %v17790_v55 = vpop.f32.mrb[6].mxu0  ;;  %17833 = sbr.rel (%p20363_p9) target bundleno = 2723 (0xaa3), region = 52 }
 0xa93   : > { %v17791_v5 = vpop.f32.mrb[7].mxu0 }
 0xa94   : > { %v17823_v10 = vrot.slane %v17816_v17, %v24740_v50 }
 0xa96   : > { %v17827_v42 = vadd.f32 %v17823_v10, %v2622_v59 }
 0xa98   : > { %17829 = vst [vmem:[#allocation2 + $0x8] sm:$0xf] %v17827_v42 }
 0xa9f   : > { %v17835_v24 = vld [vmem:[#allocation2 + $0x8] sm:$0xf] }
 0xaa0   : > { %v17890_v21 = vadd.f32 %v17886_v6, %v17835_v24 }
 0xaa2   : > { %17892 = vst [vmem:[#allocation9 + $0x8] sm:$0xf] %v17890_v21 }
 0xaa3 PF: > { %p20687_p11 = scmp.eq.s32.totalorder %s24520_s18, 3  ;;  %s24470_s15 = smov [#allocation9]  }
 0xaa4   : > { %s17903_s20 = sshll.u32 %s24470_s15, 4  ;;  %s17904_s20 = int_to_ptr.vmem [resolvable:$true] %s17903_s20 }
 0xaa5   : > { %s24372_s21 = scalar_lea.vmem %s17904_s20, 192  ;;  %p24379_p1 = scmp.lt.s32.totalorder %s17904_s20, %s17904_s20 }
 0xaa6   : > { %p24373_p13 = scmp.ne.s32.totalorder %s17904_s20, %s24372_s21  ;;  %p24380_p0 = scmp.lt.s32.totalorder %s24372_s21, %s24372_s21 }
 0xaa8   : > { %p24374_p3 = pnand %p24373_p13, %p20687_p11  ;;  %p24381_p8 = por %p24380_p0, %p24379_p1 }
 0xaaa   : > { %p24375_p4 = pneg %p24374_p3 }
 0xaac   : > { %p24382_p2 = pnand %p24381_p8, %p24375_p4 }
 0xaae   : > { %24385 = shalt.err (!%p24382_p2)
}
 0xaaf   : > { %s24386_s27 = scalar_lea.hbm %s27589_s3, 192 }
 0xab0   : > { %p24387_p12 = scmp.ne.s32.totalorder %s27589_s3, %s24386_s27  ;;  %p24392_p5 = scmp.lt.u32.totalorder %s24386_s27, %s27589_s3 }
 0xab2   : > { %p24388_p7 = pnand %p24387_p12, %p20687_p11 }
 0xab4   : > { %p24389_p10 = pneg %p24388_p7 }
 0xab6   : > { %p24394_p6 = pnand %p24392_p5, %p24389_p10 }
 0xab8   : > { %24397 = shalt.err (!%p24394_p6)
}
 0xab9   : > { %20669 = dma.vmem_to_hbm [thread:$0]  (%p20687_p11), %s17904_s20, 192, %s27589_s3, [#allocation5]  }
 0xaba   : > { %24435 = dma.done.wait (%p20687_p11), [#allocation5], 192  }
 0xabb   : > { %24437 = vsyncadd (%p20687_p11), [#allocation5], 4294967104 }
 0xabc PF: > { %s20_s17 = sadd.s32 1, %s24460_s17   ;;  %s27606_s12 = smov %s24444_s13 }
 0xabd   : > { %p17_p9 = scmp.ge.s32.totalorder %s20_s17, 6   ;;  %s27607_s13 = smov %s24448_s14 }
 0xabe   : > { %s27608_s14 = smov %s24604_s26  ;;  %s27609_s15 = smov %s24456_s16 }
 0xabf   : > { %s27610_s16 = smov %s27612_s25  ;;  %19 = sbr.rel (!%p17_p9) target bundleno = 7 (0x7), region = 96 }
 0xac6   :  { %17916 = vsyncpa [#allocation4], 1 }
 0xac7   :  { %17918 = vsyncpa [#allocation4 + $0x1], 1 }
 0xac8   :  { %17919 = vsyncpa [#allocation7], 1 }
 0xac9   :  { %17921 = vsyncpa [#allocation7 + $0x1], 1 }
 0xaca   :  { %17922 = vsyncpa [#allocation5], 1 }
 0xacb   :  { %17924 = vsyncpa [#allocation5 + $0x1], 1 }

</bundles_post_ra>
